<compile_context>
chip_gen: v7x
topology: tpu7x:2x2x1
jax: 0.10.0
libtpu: 0.0.40
codegen_flags: <defaults>
</compile_context>

<pallas_src>
import functools

import numpy as np
import jax
import jax.numpy as jnp
from jax import lax
from jax.experimental import pallas as pl
from jax.experimental.pallas import tpu as pltpu


def _round_up(x, m):
    return (x + m - 1) // m * m


# ------------------------------- Pallas kernel -------------------------------

def fused_net_kernel(x_ref, w1_ref, b1_ref, w2_ref, b2_ref, f1_ref, bf1_ref,
                     wf2_ref, bf2_ref, o_ref, y1_ref):
    """Whole-network forward for one batch tile of TB images.

    x_ref:   (2, 14*TB, 32) bf16  -- input rows split by parity: row r*TB+b of
             parity e is image-row 2*r+e of image b (width zero-padded 28->32).
    w1_ref:  (5, 32, 768) bf16    -- conv1 width-structured weights, one matrix
             per kernel row ki; columns = (dx, pooled_col, cout).
    b1_ref:  (1, 768) f32
    w2_ref:  (5, 384, 512) bf16   -- conv2 width-structured weights; rows =
             (col, cin), columns = (dx2, pooled_col, cout).
    b2_ref:  (1, 512) f32
    f1_ref:  (4, 256, 256) bf16   -- fc1 weights, one block per pooled row PH,
             with the PyTorch NCHW flatten permutation folded in.
    bf1_ref: (1, 256) f32
    wf2_ref: (256, 128) f32       -- fc2 weights, class dim zero-padded to 128.
    bf2_ref: (1, 128) f32         -- fc2 bias, padded classes set to -1e30.
    o_ref:   (TB, 128) f32        -- log-probs (cols >= 10 are padding).
    y1_ref:  (2, 6*TB, 384) bf16 scratch -- pooled conv1 activations, split by
             pooled-row parity; rows = (pooled_row, image), lanes = (col, cin).
    """
    TB = x_ref.shape[1] // 14
    f32 = jnp.float32

    # ---- conv1 + bias + ReLU with the 2x2 maxpool fused ---------------------
    # Row pooling  = elementwise max of the two dy accumulators.
    # Col pooling  = elementwise max of the two 384-lane halves (dx = 0, 1).
    z_dy = []
    for dy in range(2):
        acc = None
        for ki in range(5):
            s = dy + ki                                        # input-row offset
            lhs = x_ref[s % 2, pl.ds((s // 2) * TB, 12 * TB)]  # (12*TB, 32) bf16
            t = jnp.dot(lhs, w1_ref[ki], preferred_element_type=f32)
            acc = t if acc is None else acc + t
        z_dy.append(jnp.maximum(acc + b1_ref[...], 0.0))       # (12*TB, 768) f32
    z = jnp.maximum(z_dy[0], z_dy[1])                          # pool over dy
    y1 = jnp.maximum(z[:, :384], z[:, 384:])                   # pool over dx
    y1 = y1.astype(jnp.bfloat16)                               # rows = (ph, b)
    for ph in range(12):                                       # parity-split store
        y1_ref[ph % 2, pl.ds((ph // 2) * TB, TB)] = y1[ph * TB:(ph + 1) * TB]

    # ---- conv2 + bias + ReLU with the 2x2 maxpool fused ---------------------
    z2_dy = []
    for dy2 in range(2):
        acc = None
        for ki in range(5):
            s2 = dy2 + ki
            lhs = y1_ref[s2 % 2, pl.ds((s2 // 2) * TB, 4 * TB)]  # (4*TB, 384) bf16
            t = jnp.dot(lhs, w2_ref[ki], preferred_element_type=f32)
            acc = t if acc is None else acc + t
        z2_dy.append(jnp.maximum(acc + b2_ref[...], 0.0))      # (4*TB, 512) f32
    z2 = jnp.maximum(z2_dy[0], z2_dy[1])                       # pool over dy2
    y2 = jnp.maximum(z2[:, :256], z2[:, 256:])                 # (4*TB, 256) f32
    y2 = y2.astype(jnp.bfloat16)                               # rows = (PH, b)

    # ---- fc1 + ReLU ----------------------------------------------------------
    h = None
    for PH in range(4):
        t = jnp.dot(y2[PH * TB:(PH + 1) * TB], f1_ref[PH],
                    preferred_element_type=f32)                # (TB, 256) f32
        h = t if h is None else h + t
    h = jnp.maximum(h + bf1_ref[...], 0.0)
    # Dropout(p=0.5) is identity in eval/inference mode.
    # TODO(synk): training-mode dropout would use pltpu.prng_seed/prng_random_bits.

    # ---- fc2 + log_softmax (class dim padded to 128 lanes, lane-dense store) -
    logits = jnp.dot(h, wf2_ref[...], preferred_element_type=f32) + bf2_ref[...]
    m = jnp.max(logits, axis=-1, keepdims=True)
    s = logits - m
    lse = jnp.log(jnp.sum(jnp.exp(s), axis=-1, keepdims=True))
    o_ref[...] = s - lse


# ------------------------------ pallas wrapper --------------------------------

def _fused_net_call(x_eo, prepped, tb):
    (w1m, b1t, w2m, b2t, f1m, bf1t, wf2p, bf2p) = prepped
    nb = x_eo.shape[0]
    return pl.pallas_call(
        fused_net_kernel,
        out_shape=jax.ShapeDtypeStruct((nb * tb, 128), jnp.float32),
        grid_spec=pltpu.PrefetchScalarGridSpec(
            num_scalar_prefetch=0,
            grid=(nb,),
            in_specs=[
                pl.BlockSpec((None, 2, 14 * tb, 32), lambda n: (n, 0, 0, 0)),
                pl.BlockSpec((5, 32, 768), lambda n: (0, 0, 0)),
                pl.BlockSpec((1, 768), lambda n: (0, 0)),
                pl.BlockSpec((5, 384, 512), lambda n: (0, 0, 0)),
                pl.BlockSpec((1, 512), lambda n: (0, 0)),
                pl.BlockSpec((4, 256, 256), lambda n: (0, 0, 0)),
                pl.BlockSpec((1, 256), lambda n: (0, 0)),
                pl.BlockSpec((256, 128), lambda n: (0, 0)),
                pl.BlockSpec((1, 128), lambda n: (0, 0)),
            ],
            out_specs=pl.BlockSpec((tb, 128), lambda n: (n, 0)),
            scratch_shapes=[pltpu.VMEM((2, 6 * tb, 384), jnp.bfloat16)],
        ),
        compiler_params=pltpu.CompilerParams(dimension_semantics=("parallel",)),
    )(x_eo, w1m, b1t, w2m, b2t, f1m, bf1t, wf2p, bf2p)


# --------------------------- one-time weight prep -----------------------------

def prepare_params(params):
    """Host-side, one-time layout prep: structured conv weight matrices that
    fold the width-im2col and the 2x2-maxpool column grouping, fc1 weights with
    the PyTorch NCHW flatten folded in, bf16 MXU operands, lane-padded fc2."""
    (w1, b1, w2, b2, wf1, bf1, wf2, bf2) = [np.asarray(p) for p in params]
    bf16 = jnp.bfloat16

    # conv1: W1[ki, k, dx*384 + pw*32 + co] = w1[co, 0, ki, k - (2*pw + dx)]
    W1 = np.zeros((5, 32, 2, 12, 32), np.float32)
    for ki in range(5):
        for kj in range(5):
            for dx in range(2):
                for pw in range(12):
                    W1[ki, 2 * pw + dx + kj, dx, pw, :] = w1[:, 0, ki, kj]
    W1 = W1.reshape(5, 32, 768)
    b1t = np.broadcast_to(b1, (24, 32)).reshape(1, 768)

    # conv2: V2[ki, w*32 + ci, dx2*256 + PW*64 + co2] = w2[co2, ci, ki, w-(2*PW+dx2)]
    V2 = np.zeros((5, 12, 32, 2, 4, 64), np.float32)
    for ki in range(5):
        for kj in range(5):
            for dx2 in range(2):
                for PW in range(4):
                    V2[ki, 2 * PW + dx2 + kj, :, dx2, PW, :] = w2[:, :, ki, kj].T
    V2 = V2.reshape(5, 384, 512)
    b2t = np.broadcast_to(b2, (8, 64)).reshape(1, 512)

    # fc1: F1[PH, PW*64 + co2, n] = wf1[n, co2*16 + PH*4 + PW]  (NCHW flatten)
    F1 = wf1.reshape(256, 64, 4, 4).transpose(2, 3, 1, 0).reshape(4, 256, 256)
    bf1t = bf1.reshape(1, 256)

    # fc2: class dim padded to 128 lanes; padded logits pushed to -1e30.
    Wf2p = np.zeros((256, 128), np.float32)
    Wf2p[:, :10] = wf2.T
    bf2p = np.full((1, 128), -1e30, np.float32)
    bf2p[0, :10] = bf2

    return (jnp.asarray(W1, bf16), jnp.asarray(b1t, jnp.float32),
            jnp.asarray(V2, bf16), jnp.asarray(b2t, jnp.float32),
            jnp.asarray(F1, bf16), jnp.asarray(bf1t, jnp.float32),
            jnp.asarray(Wf2p, jnp.float32), jnp.asarray(bf2p, jnp.float32))


# --------------------------------- forward ------------------------------------

@functools.partial(jax.jit, static_argnames=("tb",))
def net_forward(x_nchw, prepped, tb=64):
    """Forward pass matching PyTorch Net.forward (eval mode). x: (B, 1, 28, 28)."""
    B = x_nchw.shape[0]
    assert x_nchw.shape[1:] == (1, 28, 28)
    TB = min(tb, _round_up(B, 8))          # batch tile (multiple of 8)
    Bp = _round_up(B, TB)
    nb = Bp // TB

    # Cheap XLA-side relayout of the raw input (no im2col blow-up):
    # (B,1,28,28) -> parity-split, batch-tiled (nb, 2, 14*TB, 32) bf16.
    x = x_nchw.reshape(B, 28, 28)
    x = jnp.pad(x, ((0, Bp - B), (0, 0), (0, 4)))              # (Bp, 28, 32)
    x = jnp.transpose(x, (1, 0, 2))                            # (28, Bp, 32)
    x = x.reshape(14, 2, nb, TB, 32).transpose(2, 1, 0, 3, 4)  # (nb,2,14,TB,32)
    x_eo = x.reshape(nb, 2, 14 * TB, 32).astype(jnp.bfloat16)

    out = _fused_net_call(x_eo, prepped, TB)                   # (Bp, 128)
    return out[:B, :10]


# ------------------------------ JAX references ---------------------------------

def net_forward_ref_f32(x_nchw, params):
    (w1c, b1c, w2c, b2c, wf1, bf1, wf2, bf2) = params
    y = lax.conv_general_dilated(x_nchw, w1c, (1, 1), 'VALID',
                                 dimension_numbers=('NCHW', 'OIHW', 'NCHW'))
    y = jax.nn.relu(y + b1c[None, :, None, None])
    y = lax.reduce_window(y, -jnp.inf, lax.max, (1, 1, 2, 2), (1, 1, 2, 2), 'VALID')
    y = lax.conv_general_dilated(y, w2c, (1, 1), 'VALID',
                                 dimension_numbers=('NCHW', 'OIHW', 'NCHW'))
    y = jax.nn.relu(y + b2c[None, :, None, None])
    y = lax.reduce_window(y, -jnp.inf, lax.max, (1, 1, 2, 2), (1, 1, 2, 2), 'VALID')
    y = y.reshape(y.shape[0], -1)
    y = jax.nn.relu(y @ wf1.T + bf1)
    y = y @ wf2.T + bf2
    return jax.nn.log_softmax(y, axis=1)


def net_forward_ref_bf16(x_nchw, params):
    """Numerics-matched reference: bf16 MXU operands, f32 accumulation,
    bf16 inter-stage activations, f32 last layer."""
    (w1c, b1c, w2c, b2c, wf1, bf1, wf2, bf2) = params
    bf = jnp.bfloat16
    y = lax.conv_general_dilated(x_nchw.astype(bf), w1c.astype(bf), (1, 1), 'VALID',
                                 dimension_numbers=('NCHW', 'OIHW', 'NCHW'),
                                 preferred_element_type=jnp.float32)
    y = jax.nn.relu(y + b1c[None, :, None, None])
    y = lax.reduce_window(y, -jnp.inf, lax.max, (1, 1, 2, 2), (1, 1, 2, 2), 'VALID')
    y = y.astype(bf)
    y = lax.conv_general_dilated(y, w2c.astype(bf), (1, 1), 'VALID',
                                 dimension_numbers=('NCHW', 'OIHW', 'NCHW'),
                                 preferred_element_type=jnp.float32)
    y = jax.nn.relu(y + b2c[None, :, None, None])
    y = lax.reduce_window(y, -jnp.inf, lax.max, (1, 1, 2, 2), (1, 1, 2, 2), 'VALID')
    flat = y.reshape(y.shape[0], -1).astype(bf)
    h = jax.nn.relu(jnp.dot(flat, wf1.T.astype(bf),
                            preferred_element_type=jnp.float32) + bf1)
    logits = h @ wf2.T + bf2
    return jax.nn.log_softmax(logits, axis=1)


# ----------------------------------- main --------------------------------------

if __name__ == "__main__":
    key = jax.random.PRNGKey(0)
    keys = jax.random.split(key, 9)

    def u(k, shape, fan_in):
        bound = 1.0 / (fan_in ** 0.5)
        return jax.random.uniform(k, shape, jnp.float32, -bound, bound)

    # Same parameter shapes as the PyTorch module __init__.
    params = (
        u(keys[0], (32, 1, 5, 5), 25),     u(keys[1], (32,), 25),      # conv1
        u(keys[2], (64, 32, 5, 5), 800),   u(keys[3], (64,), 800),     # conv2
        u(keys[4], (256, 1024), 1024),     u(keys[5], (256,), 1024),   # fc1
        u(keys[6], (10, 256), 256),        u(keys[7], (10,), 256),     # fc2
    )

    # MNIST-style input implied by the layer sizes: (N, 1, 28, 28) NCHW.
    x = jax.random.normal(keys[8], (2, 1, 28, 28), jnp.float32)

    prepped = prepare_params(params)               # one-time layout prep (host)

    out = jax.block_until_ready(net_forward(x, prepped))
    ref_bf16 = net_forward_ref_bf16(x, params)     # numerics-matched reference
    ref_f32 = net_forward_ref_f32(x, params)       # exact PyTorch-semantics ref

    assert out.shape == (2, 10)
    assert bool(jnp.allclose(out, ref_bf16, atol=5e-3, rtol=5e-3)), \
        "Pallas output does not match the bf16-matched JAX reference"
    assert bool(jnp.allclose(out, ref_f32, atol=6e-2, rtol=6e-2)), \
        "Pallas output drifted too far from the f32 reference"

    # Also exercise the batch-blocked multi-step ("parallel") grid path.
    xb = jax.random.normal(jax.random.PRNGKey(1), (24, 1, 28, 28), jnp.float32)
    outb = jax.block_until_ready(net_forward(xb, prepped, tb=8))   # grid = (3,)
    refb = net_forward_ref_bf16(xb, params)
    assert outb.shape == (24, 10)
    assert bool(jnp.allclose(outb, refb, atol=5e-3, rtol=5e-3)), \
        "Batch-blocked Pallas output does not match the bf16 reference"

    print("KERNEL_OK")
</pallas_src>

<mosaic_0001>
module attributes {stable_mosaic.version = 11 : i64} {
  func.func @fused_net_kernel(%arg0: i32, %arg1: memref<1x2x112x32xbf16, #tpu.memory_space<vmem>>, %arg2: memref<5x32x768xbf16, #tpu.memory_space<vmem>>, %arg3: memref<1x768xf32, #tpu.memory_space<vmem>>, %arg4: memref<5x384x512xbf16, #tpu.memory_space<vmem>>, %arg5: memref<1x512xf32, #tpu.memory_space<vmem>>, %arg6: memref<4x256x256xbf16, #tpu.memory_space<vmem>>, %arg7: memref<1x256xf32, #tpu.memory_space<vmem>>, %arg8: memref<256x128xf32, #tpu.memory_space<vmem>>, %arg9: memref<1x128xf32, #tpu.memory_space<vmem>>, %arg10: memref<8x128xf32, #tpu.memory_space<vmem>>, %arg11: memref<2x48x384xbf16, #tpu.memory_space<vmem>>) attributes {dimension_semantics = [#tpu.dimension_semantics<parallel>], iteration_bounds = array<i64: 1>, scalar_prefetch = 0 : i64, scratch_operands = 1 : i64, tpu.core_type = #tpu.core_type<tc>, window_params = [{transform_indices = @transform_0, window_bounds = array<i64: 1, 2, 112, 32>}, {pipeline_mode = #tpu.pipeline_mode<synchronous>, transform_indices = @transform_1, window_bounds = array<i64: 5, 32, 768>}, {pipeline_mode = #tpu.pipeline_mode<synchronous>, transform_indices = @transform_2, window_bounds = array<i64: 1, 768>}, {pipeline_mode = #tpu.pipeline_mode<synchronous>, transform_indices = @transform_3, window_bounds = array<i64: 5, 384, 512>}, {pipeline_mode = #tpu.pipeline_mode<synchronous>, transform_indices = @transform_4, window_bounds = array<i64: 1, 512>}, {pipeline_mode = #tpu.pipeline_mode<synchronous>, transform_indices = @transform_5, window_bounds = array<i64: 4, 256, 256>}, {pipeline_mode = #tpu.pipeline_mode<synchronous>, transform_indices = @transform_6, window_bounds = array<i64: 1, 256>}, {pipeline_mode = #tpu.pipeline_mode<synchronous>, transform_indices = @transform_7, window_bounds = array<i64: 256, 128>}, {pipeline_mode = #tpu.pipeline_mode<synchronous>, transform_indices = @transform_8, window_bounds = array<i64: 1, 128>}, {transform_indices = @transform_9, window_bounds = array<i64: 8, 128>}]} {
    %c0 = arith.constant 0 : index
    %c0_0 = arith.constant 0 : index
    %c0_1 = arith.constant 0 : index
    %c0_2 = arith.constant 0 : index
    %0 = vector.load %arg1[%c0, %c0_0, %c0_1, %c0_2] : memref<1x2x112x32xbf16, #tpu.memory_space<vmem>>, vector<1x1x96x32xbf16>
    %1 = vector.shape_cast %0 : vector<1x1x96x32xbf16> to vector<96x32xbf16>
    %c0_3 = arith.constant 0 : index
    %c0_4 = arith.constant 0 : index
    %c0_5 = arith.constant 0 : index
    %2 = vector.load %arg2[%c0_3, %c0_4, %c0_5] : memref<5x32x768xbf16, #tpu.memory_space<vmem>>, vector<1x32x768xbf16>
    %3 = vector.shape_cast %2 : vector<1x32x768xbf16> to vector<32x768xbf16>
    %cst = arith.constant dense<0.000000e+00> : vector<96x768xf32>
    %4 = tpu.matmul %1, %3, %cst {dimension_numbers = #tpu.dot_dimension_numbers<[1], [0], [0], [1], [0, 0, 1, 1], [], []>} : vector<96x32xbf16>, vector<32x768xbf16>, vector<96x768xf32> -> vector<96x768xf32>
    %c0_6 = arith.constant 0 : index
    %c1 = arith.constant 1 : index
    %c0_7 = arith.constant 0 : index
    %c0_8 = arith.constant 0 : index
    %5 = vector.load %arg1[%c0_6, %c1, %c0_7, %c0_8] : memref<1x2x112x32xbf16, #tpu.memory_space<vmem>>, vector<1x1x96x32xbf16>
    %6 = vector.shape_cast %5 : vector<1x1x96x32xbf16> to vector<96x32xbf16>
    %c1_9 = arith.constant 1 : index
    %c0_10 = arith.constant 0 : index
    %c0_11 = arith.constant 0 : index
    %7 = vector.load %arg2[%c1_9, %c0_10, %c0_11] : memref<5x32x768xbf16, #tpu.memory_space<vmem>>, vector<1x32x768xbf16>
    %8 = vector.shape_cast %7 : vector<1x32x768xbf16> to vector<32x768xbf16>
    %cst_12 = arith.constant dense<0.000000e+00> : vector<96x768xf32>
    %9 = tpu.matmul %6, %8, %cst_12 {dimension_numbers = #tpu.dot_dimension_numbers<[1], [0], [0], [1], [0, 0, 1, 1], [], []>} : vector<96x32xbf16>, vector<32x768xbf16>, vector<96x768xf32> -> vector<96x768xf32>
    %10 = arith.addf %4, %9 : vector<96x768xf32>
    %c0_13 = arith.constant 0 : index
    %c0_14 = arith.constant 0 : index
    %c8 = arith.constant 8 : index
    %c0_15 = arith.constant 0 : index
    %11 = vector.load %arg1[%c0_13, %c0_14, %c8, %c0_15] : memref<1x2x112x32xbf16, #tpu.memory_space<vmem>>, vector<1x1x96x32xbf16>
    %12 = vector.shape_cast %11 : vector<1x1x96x32xbf16> to vector<96x32xbf16>
    %c2 = arith.constant 2 : index
    %c0_16 = arith.constant 0 : index
    %c0_17 = arith.constant 0 : index
    %13 = vector.load %arg2[%c2, %c0_16, %c0_17] : memref<5x32x768xbf16, #tpu.memory_space<vmem>>, vector<1x32x768xbf16>
    %14 = vector.shape_cast %13 : vector<1x32x768xbf16> to vector<32x768xbf16>
    %cst_18 = arith.constant dense<0.000000e+00> : vector<96x768xf32>
    %15 = tpu.matmul %12, %14, %cst_18 {dimension_numbers = #tpu.dot_dimension_numbers<[1], [0], [0], [1], [0, 0, 1, 1], [], []>} : vector<96x32xbf16>, vector<32x768xbf16>, vector<96x768xf32> -> vector<96x768xf32>
    %16 = arith.addf %10, %15 : vector<96x768xf32>
    %c0_19 = arith.constant 0 : index
    %c1_20 = arith.constant 1 : index
    %c8_21 = arith.constant 8 : index
    %c0_22 = arith.constant 0 : index
    %17 = vector.load %arg1[%c0_19, %c1_20, %c8_21, %c0_22] : memref<1x2x112x32xbf16, #tpu.memory_space<vmem>>, vector<1x1x96x32xbf16>
    %18 = vector.shape_cast %17 : vector<1x1x96x32xbf16> to vector<96x32xbf16>
    %c3 = arith.constant 3 : index
    %c0_23 = arith.constant 0 : index
    %c0_24 = arith.constant 0 : index
    %19 = vector.load %arg2[%c3, %c0_23, %c0_24] : memref<5x32x768xbf16, #tpu.memory_space<vmem>>, vector<1x32x768xbf16>
    %20 = vector.shape_cast %19 : vector<1x32x768xbf16> to vector<32x768xbf16>
    %cst_25 = arith.constant dense<0.000000e+00> : vector<96x768xf32>
    %21 = tpu.matmul %18, %20, %cst_25 {dimension_numbers = #tpu.dot_dimension_numbers<[1], [0], [0], [1], [0, 0, 1, 1], [], []>} : vector<96x32xbf16>, vector<32x768xbf16>, vector<96x768xf32> -> vector<96x768xf32>
    %22 = arith.addf %16, %21 : vector<96x768xf32>
    %c0_26 = arith.constant 0 : index
    %c0_27 = arith.constant 0 : index
    %c16 = arith.constant 16 : index
    %c0_28 = arith.constant 0 : index
    %23 = vector.load %arg1[%c0_26, %c0_27, %c16, %c0_28] : memref<1x2x112x32xbf16, #tpu.memory_space<vmem>>, vector<1x1x96x32xbf16>
    %24 = vector.shape_cast %23 : vector<1x1x96x32xbf16> to vector<96x32xbf16>
    %c4 = arith.constant 4 : index
    %c0_29 = arith.constant 0 : index
    %c0_30 = arith.constant 0 : index
    %25 = vector.load %arg2[%c4, %c0_29, %c0_30] : memref<5x32x768xbf16, #tpu.memory_space<vmem>>, vector<1x32x768xbf16>
    %26 = vector.shape_cast %25 : vector<1x32x768xbf16> to vector<32x768xbf16>
    %cst_31 = arith.constant dense<0.000000e+00> : vector<96x768xf32>
    %27 = tpu.matmul %24, %26, %cst_31 {dimension_numbers = #tpu.dot_dimension_numbers<[1], [0], [0], [1], [0, 0, 1, 1], [], []>} : vector<96x32xbf16>, vector<32x768xbf16>, vector<96x768xf32> -> vector<96x768xf32>
    %28 = arith.addf %22, %27 : vector<96x768xf32>
    %c0_32 = arith.constant 0 : index
    %c0_33 = arith.constant 0 : index
    %29 = vector.load %arg3[%c0_32, %c0_33] : memref<1x768xf32, #tpu.memory_space<vmem>>, vector<1x768xf32>
    %30 = vector.broadcast %29 : vector<1x768xf32> to vector<96x768xf32>
    %31 = arith.addf %28, %30 : vector<96x768xf32>
    %cst_34 = arith.constant 0.000000e+00 : f32
    %32 = vector.broadcast %cst_34 : f32 to vector<96x768xf32>
    %33 = arith.maximumf %31, %32 : vector<96x768xf32>
    %c0_35 = arith.constant 0 : index
    %c1_36 = arith.constant 1 : index
    %c0_37 = arith.constant 0 : index
    %c0_38 = arith.constant 0 : index
    %34 = vector.load %arg1[%c0_35, %c1_36, %c0_37, %c0_38] : memref<1x2x112x32xbf16, #tpu.memory_space<vmem>>, vector<1x1x96x32xbf16>
    %35 = vector.shape_cast %34 : vector<1x1x96x32xbf16> to vector<96x32xbf16>
    %c0_39 = arith.constant 0 : index
    %c0_40 = arith.constant 0 : index
    %c0_41 = arith.constant 0 : index
    %36 = vector.load %arg2[%c0_39, %c0_40, %c0_41] : memref<5x32x768xbf16, #tpu.memory_space<vmem>>, vector<1x32x768xbf16>
    %37 = vector.shape_cast %36 : vector<1x32x768xbf16> to vector<32x768xbf16>
    %cst_42 = arith.constant dense<0.000000e+00> : vector<96x768xf32>
    %38 = tpu.matmul %35, %37, %cst_42 {dimension_numbers = #tpu.dot_dimension_numbers<[1], [0], [0], [1], [0, 0, 1, 1], [], []>} : vector<96x32xbf16>, vector<32x768xbf16>, vector<96x768xf32> -> vector<96x768xf32>
    %c0_43 = arith.constant 0 : index
    %c0_44 = arith.constant 0 : index
    %c8_45 = arith.constant 8 : index
    %c0_46 = arith.constant 0 : index
    %39 = vector.load %arg1[%c0_43, %c0_44, %c8_45, %c0_46] : memref<1x2x112x32xbf16, #tpu.memory_space<vmem>>, vector<1x1x96x32xbf16>
    %40 = vector.shape_cast %39 : vector<1x1x96x32xbf16> to vector<96x32xbf16>
    %c1_47 = arith.constant 1 : index
    %c0_48 = arith.constant 0 : index
    %c0_49 = arith.constant 0 : index
    %41 = vector.load %arg2[%c1_47, %c0_48, %c0_49] : memref<5x32x768xbf16, #tpu.memory_space<vmem>>, vector<1x32x768xbf16>
    %42 = vector.shape_cast %41 : vector<1x32x768xbf16> to vector<32x768xbf16>
    %cst_50 = arith.constant dense<0.000000e+00> : vector<96x768xf32>
    %43 = tpu.matmul %40, %42, %cst_50 {dimension_numbers = #tpu.dot_dimension_numbers<[1], [0], [0], [1], [0, 0, 1, 1], [], []>} : vector<96x32xbf16>, vector<32x768xbf16>, vector<96x768xf32> -> vector<96x768xf32>
    %44 = arith.addf %38, %43 : vector<96x768xf32>
    %c0_51 = arith.constant 0 : index
    %c1_52 = arith.constant 1 : index
    %c8_53 = arith.constant 8 : index
    %c0_54 = arith.constant 0 : index
    %45 = vector.load %arg1[%c0_51, %c1_52, %c8_53, %c0_54] : memref<1x2x112x32xbf16, #tpu.memory_space<vmem>>, vector<1x1x96x32xbf16>
    %46 = vector.shape_cast %45 : vector<1x1x96x32xbf16> to vector<96x32xbf16>
    %c2_55 = arith.constant 2 : index
    %c0_56 = arith.constant 0 : index
    %c0_57 = arith.constant 0 : index
    %47 = vector.load %arg2[%c2_55, %c0_56, %c0_57] : memref<5x32x768xbf16, #tpu.memory_space<vmem>>, vector<1x32x768xbf16>
    %48 = vector.shape_cast %47 : vector<1x32x768xbf16> to vector<32x768xbf16>
    %cst_58 = arith.constant dense<0.000000e+00> : vector<96x768xf32>
    %49 = tpu.matmul %46, %48, %cst_58 {dimension_numbers = #tpu.dot_dimension_numbers<[1], [0], [0], [1], [0, 0, 1, 1], [], []>} : vector<96x32xbf16>, vector<32x768xbf16>, vector<96x768xf32> -> vector<96x768xf32>
    %50 = arith.addf %44, %49 : vector<96x768xf32>
    %c0_59 = arith.constant 0 : index
    %c0_60 = arith.constant 0 : index
    %c16_61 = arith.constant 16 : index
    %c0_62 = arith.constant 0 : index
    %51 = vector.load %arg1[%c0_59, %c0_60, %c16_61, %c0_62] : memref<1x2x112x32xbf16, #tpu.memory_space<vmem>>, vector<1x1x96x32xbf16>
    %52 = vector.shape_cast %51 : vector<1x1x96x32xbf16> to vector<96x32xbf16>
    %c3_63 = arith.constant 3 : index
    %c0_64 = arith.constant 0 : index
    %c0_65 = arith.constant 0 : index
    %53 = vector.load %arg2[%c3_63, %c0_64, %c0_65] : memref<5x32x768xbf16, #tpu.memory_space<vmem>>, vector<1x32x768xbf16>
    %54 = vector.shape_cast %53 : vector<1x32x768xbf16> to vector<32x768xbf16>
    %cst_66 = arith.constant dense<0.000000e+00> : vector<96x768xf32>
    %55 = tpu.matmul %52, %54, %cst_66 {dimension_numbers = #tpu.dot_dimension_numbers<[1], [0], [0], [1], [0, 0, 1, 1], [], []>} : vector<96x32xbf16>, vector<32x768xbf16>, vector<96x768xf32> -> vector<96x768xf32>
    %56 = arith.addf %50, %55 : vector<96x768xf32>
    %c0_67 = arith.constant 0 : index
    %c1_68 = arith.constant 1 : index
    %c16_69 = arith.constant 16 : index
    %c0_70 = arith.constant 0 : index
    %57 = vector.load %arg1[%c0_67, %c1_68, %c16_69, %c0_70] : memref<1x2x112x32xbf16, #tpu.memory_space<vmem>>, vector<1x1x96x32xbf16>
    %58 = vector.shape_cast %57 : vector<1x1x96x32xbf16> to vector<96x32xbf16>
    %c4_71 = arith.constant 4 : index
    %c0_72 = arith.constant 0 : index
    %c0_73 = arith.constant 0 : index
    %59 = vector.load %arg2[%c4_71, %c0_72, %c0_73] : memref<5x32x768xbf16, #tpu.memory_space<vmem>>, vector<1x32x768xbf16>
    %60 = vector.shape_cast %59 : vector<1x32x768xbf16> to vector<32x768xbf16>
    %cst_74 = arith.constant dense<0.000000e+00> : vector<96x768xf32>
    %61 = tpu.matmul %58, %60, %cst_74 {dimension_numbers = #tpu.dot_dimension_numbers<[1], [0], [0], [1], [0, 0, 1, 1], [], []>} : vector<96x32xbf16>, vector<32x768xbf16>, vector<96x768xf32> -> vector<96x768xf32>
    %62 = arith.addf %56, %61 : vector<96x768xf32>
    %c0_75 = arith.constant 0 : index
    %c0_76 = arith.constant 0 : index
    %63 = vector.load %arg3[%c0_75, %c0_76] : memref<1x768xf32, #tpu.memory_space<vmem>>, vector<1x768xf32>
    %64 = vector.broadcast %63 : vector<1x768xf32> to vector<96x768xf32>
    %65 = arith.addf %62, %64 : vector<96x768xf32>
    %cst_77 = arith.constant 0.000000e+00 : f32
    %66 = vector.broadcast %cst_77 : f32 to vector<96x768xf32>
    %67 = arith.maximumf %65, %66 : vector<96x768xf32>
    %68 = arith.maximumf %33, %67 : vector<96x768xf32>
    %69 = vector.extract_strided_slice %68 {offsets = [0, 0], sizes = [96, 384], strides = [1, 1]} : vector<96x768xf32> to vector<96x384xf32>
    %70 = vector.extract_strided_slice %68 {offsets = [0, 384], sizes = [96, 384], strides = [1, 1]} : vector<96x768xf32> to vector<96x384xf32>
    %71 = arith.maximumf %69, %70 : vector<96x384xf32>
    %72 = arith.truncf %71 : vector<96x384xf32> to vector<96x384xbf16>
    %73 = vector.extract_strided_slice %72 {offsets = [0, 0], sizes = [8, 384], strides = [1, 1]} : vector<96x384xbf16> to vector<8x384xbf16>
    %c0_78 = arith.constant 0 : index
    %c0_79 = arith.constant 0 : index
    %c0_80 = arith.constant 0 : index
    %74 = vector.load %arg11[%c0_78, %c0_79, %c0_80] : memref<2x48x384xbf16, #tpu.memory_space<vmem>>, vector<1x8x384xbf16>
    %75 = vector.shape_cast %74 : vector<1x8x384xbf16> to vector<8x384xbf16>
    %76 = vector.shape_cast %73 : vector<8x384xbf16> to vector<1x8x384xbf16>
    tpu.vector_store %arg11[%c0_78, %c0_79, %c0_80], %76 {strides = array<i32>} : memref<2x48x384xbf16, #tpu.memory_space<vmem>>, vector<1x8x384xbf16>,
    %77 = vector.extract_strided_slice %72 {offsets = [8, 0], sizes = [8, 384], strides = [1, 1]} : vector<96x384xbf16> to vector<8x384xbf16>
    %c1_81 = arith.constant 1 : index
    %c0_82 = arith.constant 0 : index
    %c0_83 = arith.constant 0 : index
    %78 = vector.load %arg11[%c1_81, %c0_82, %c0_83] : memref<2x48x384xbf16, #tpu.memory_space<vmem>>, vector<1x8x384xbf16>
    %79 = vector.shape_cast %78 : vector<1x8x384xbf16> to vector<8x384xbf16>
    %80 = vector.shape_cast %77 : vector<8x384xbf16> to vector<1x8x384xbf16>
    tpu.vector_store %arg11[%c1_81, %c0_82, %c0_83], %80 {strides = array<i32>} : memref<2x48x384xbf16, #tpu.memory_space<vmem>>, vector<1x8x384xbf16>,
    %81 = vector.extract_strided_slice %72 {offsets = [16, 0], sizes = [8, 384], strides = [1, 1]} : vector<96x384xbf16> to vector<8x384xbf16>
    %c0_84 = arith.constant 0 : index
    %c8_85 = arith.constant 8 : index
    %c0_86 = arith.constant 0 : index
    %82 = vector.load %arg11[%c0_84, %c8_85, %c0_86] : memref<2x48x384xbf16, #tpu.memory_space<vmem>>, vector<1x8x384xbf16>
    %83 = vector.shape_cast %82 : vector<1x8x384xbf16> to vector<8x384xbf16>
    %84 = vector.shape_cast %81 : vector<8x384xbf16> to vector<1x8x384xbf16>
    tpu.vector_store %arg11[%c0_84, %c8_85, %c0_86], %84 {strides = array<i32>} : memref<2x48x384xbf16, #tpu.memory_space<vmem>>, vector<1x8x384xbf16>,
    %85 = vector.extract_strided_slice %72 {offsets = [24, 0], sizes = [8, 384], strides = [1, 1]} : vector<96x384xbf16> to vector<8x384xbf16>
    %c1_87 = arith.constant 1 : index
    %c8_88 = arith.constant 8 : index
    %c0_89 = arith.constant 0 : index
    %86 = vector.load %arg11[%c1_87, %c8_88, %c0_89] : memref<2x48x384xbf16, #tpu.memory_space<vmem>>, vector<1x8x384xbf16>
    %87 = vector.shape_cast %86 : vector<1x8x384xbf16> to vector<8x384xbf16>
    %88 = vector.shape_cast %85 : vector<8x384xbf16> to vector<1x8x384xbf16>
    tpu.vector_store %arg11[%c1_87, %c8_88, %c0_89], %88 {strides = array<i32>} : memref<2x48x384xbf16, #tpu.memory_space<vmem>>, vector<1x8x384xbf16>,
    %89 = vector.extract_strided_slice %72 {offsets = [32, 0], sizes = [8, 384], strides = [1, 1]} : vector<96x384xbf16> to vector<8x384xbf16>
    %c0_90 = arith.constant 0 : index
    %c16_91 = arith.constant 16 : index
    %c0_92 = arith.constant 0 : index
    %90 = vector.load %arg11[%c0_90, %c16_91, %c0_92] : memref<2x48x384xbf16, #tpu.memory_space<vmem>>, vector<1x8x384xbf16>
    %91 = vector.shape_cast %90 : vector<1x8x384xbf16> to vector<8x384xbf16>
    %92 = vector.shape_cast %89 : vector<8x384xbf16> to vector<1x8x384xbf16>
    tpu.vector_store %arg11[%c0_90, %c16_91, %c0_92], %92 {strides = array<i32>} : memref<2x48x384xbf16, #tpu.memory_space<vmem>>, vector<1x8x384xbf16>,
    %93 = vector.extract_strided_slice %72 {offsets = [40, 0], sizes = [8, 384], strides = [1, 1]} : vector<96x384xbf16> to vector<8x384xbf16>
    %c1_93 = arith.constant 1 : index
    %c16_94 = arith.constant 16 : index
    %c0_95 = arith.constant 0 : index
    %94 = vector.load %arg11[%c1_93, %c16_94, %c0_95] : memref<2x48x384xbf16, #tpu.memory_space<vmem>>, vector<1x8x384xbf16>
    %95 = vector.shape_cast %94 : vector<1x8x384xbf16> to vector<8x384xbf16>
    %96 = vector.shape_cast %93 : vector<8x384xbf16> to vector<1x8x384xbf16>
    tpu.vector_store %arg11[%c1_93, %c16_94, %c0_95], %96 {strides = array<i32>} : memref<2x48x384xbf16, #tpu.memory_space<vmem>>, vector<1x8x384xbf16>,
    %97 = vector.extract_strided_slice %72 {offsets = [48, 0], sizes = [8, 384], strides = [1, 1]} : vector<96x384xbf16> to vector<8x384xbf16>
    %c0_96 = arith.constant 0 : index
    %c24 = arith.constant 24 : index
    %c0_97 = arith.constant 0 : index
    %98 = vector.load %arg11[%c0_96, %c24, %c0_97] : memref<2x48x384xbf16, #tpu.memory_space<vmem>>, vector<1x8x384xbf16>
    %99 = vector.shape_cast %98 : vector<1x8x384xbf16> to vector<8x384xbf16>
    %100 = vector.shape_cast %97 : vector<8x384xbf16> to vector<1x8x384xbf16>
    tpu.vector_store %arg11[%c0_96, %c24, %c0_97], %100 {strides = array<i32>} : memref<2x48x384xbf16, #tpu.memory_space<vmem>>, vector<1x8x384xbf16>,
    %101 = vector.extract_strided_slice %72 {offsets = [56, 0], sizes = [8, 384], strides = [1, 1]} : vector<96x384xbf16> to vector<8x384xbf16>
    %c1_98 = arith.constant 1 : index
    %c24_99 = arith.constant 24 : index
    %c0_100 = arith.constant 0 : index
    %102 = vector.load %arg11[%c1_98, %c24_99, %c0_100] : memref<2x48x384xbf16, #tpu.memory_space<vmem>>, vector<1x8x384xbf16>
    %103 = vector.shape_cast %102 : vector<1x8x384xbf16> to vector<8x384xbf16>
    %104 = vector.shape_cast %101 : vector<8x384xbf16> to vector<1x8x384xbf16>
    tpu.vector_store %arg11[%c1_98, %c24_99, %c0_100], %104 {strides = array<i32>} : memref<2x48x384xbf16, #tpu.memory_space<vmem>>, vector<1x8x384xbf16>,
    %105 = vector.extract_strided_slice %72 {offsets = [64, 0], sizes = [8, 384], strides = [1, 1]} : vector<96x384xbf16> to vector<8x384xbf16>
    %c0_101 = arith.constant 0 : index
    %c32 = arith.constant 32 : index
    %c0_102 = arith.constant 0 : index
    %106 = vector.load %arg11[%c0_101, %c32, %c0_102] : memref<2x48x384xbf16, #tpu.memory_space<vmem>>, vector<1x8x384xbf16>
    %107 = vector.shape_cast %106 : vector<1x8x384xbf16> to vector<8x384xbf16>
    %108 = vector.shape_cast %105 : vector<8x384xbf16> to vector<1x8x384xbf16>
    tpu.vector_store %arg11[%c0_101, %c32, %c0_102], %108 {strides = array<i32>} : memref<2x48x384xbf16, #tpu.memory_space<vmem>>, vector<1x8x384xbf16>,
    %109 = vector.extract_strided_slice %72 {offsets = [72, 0], sizes = [8, 384], strides = [1, 1]} : vector<96x384xbf16> to vector<8x384xbf16>
    %c1_103 = arith.constant 1 : index
    %c32_104 = arith.constant 32 : index
    %c0_105 = arith.constant 0 : index
    %110 = vector.load %arg11[%c1_103, %c32_104, %c0_105] : memref<2x48x384xbf16, #tpu.memory_space<vmem>>, vector<1x8x384xbf16>
    %111 = vector.shape_cast %110 : vector<1x8x384xbf16> to vector<8x384xbf16>
    %112 = vector.shape_cast %109 : vector<8x384xbf16> to vector<1x8x384xbf16>
    tpu.vector_store %arg11[%c1_103, %c32_104, %c0_105], %112 {strides = array<i32>} : memref<2x48x384xbf16, #tpu.memory_space<vmem>>, vector<1x8x384xbf16>,
    %113 = vector.extract_strided_slice %72 {offsets = [80, 0], sizes = [8, 384], strides = [1, 1]} : vector<96x384xbf16> to vector<8x384xbf16>
    %c0_106 = arith.constant 0 : index
    %c40 = arith.constant 40 : index
    %c0_107 = arith.constant 0 : index
    %114 = vector.load %arg11[%c0_106, %c40, %c0_107] : memref<2x48x384xbf16, #tpu.memory_space<vmem>>, vector<1x8x384xbf16>
    %115 = vector.shape_cast %114 : vector<1x8x384xbf16> to vector<8x384xbf16>
    %116 = vector.shape_cast %113 : vector<8x384xbf16> to vector<1x8x384xbf16>
    tpu.vector_store %arg11[%c0_106, %c40, %c0_107], %116 {strides = array<i32>} : memref<2x48x384xbf16, #tpu.memory_space<vmem>>, vector<1x8x384xbf16>,
    %117 = vector.extract_strided_slice %72 {offsets = [88, 0], sizes = [8, 384], strides = [1, 1]} : vector<96x384xbf16> to vector<8x384xbf16>
    %c1_108 = arith.constant 1 : index
    %c40_109 = arith.constant 40 : index
    %c0_110 = arith.constant 0 : index
    %118 = vector.load %arg11[%c1_108, %c40_109, %c0_110] : memref<2x48x384xbf16, #tpu.memory_space<vmem>>, vector<1x8x384xbf16>
    %119 = vector.shape_cast %118 : vector<1x8x384xbf16> to vector<8x384xbf16>
    %120 = vector.shape_cast %117 : vector<8x384xbf16> to vector<1x8x384xbf16>
    tpu.vector_store %arg11[%c1_108, %c40_109, %c0_110], %120 {strides = array<i32>} : memref<2x48x384xbf16, #tpu.memory_space<vmem>>, vector<1x8x384xbf16>,
    %c0_111 = arith.constant 0 : index
    %c0_112 = arith.constant 0 : index
    %c0_113 = arith.constant 0 : index
    %121 = vector.load %arg11[%c0_111, %c0_112, %c0_113] : memref<2x48x384xbf16, #tpu.memory_space<vmem>>, vector<1x32x384xbf16>
    %122 = vector.shape_cast %121 : vector<1x32x384xbf16> to vector<32x384xbf16>
    %c0_114 = arith.constant 0 : index
    %c0_115 = arith.constant 0 : index
    %c0_116 = arith.constant 0 : index
    %123 = vector.load %arg4[%c0_114, %c0_115, %c0_116] : memref<5x384x512xbf16, #tpu.memory_space<vmem>>, vector<1x384x512xbf16>
    %124 = vector.shape_cast %123 : vector<1x384x512xbf16> to vector<384x512xbf16>
    %cst_117 = arith.constant dense<0.000000e+00> : vector<32x512xf32>
    %125 = tpu.matmul %122, %124, %cst_117 {dimension_numbers = #tpu.dot_dimension_numbers<[1], [0], [0], [1], [0, 0, 1, 1], [], []>} : vector<32x384xbf16>, vector<384x512xbf16>, vector<32x512xf32> -> vector<32x512xf32>
    %c1_118 = arith.constant 1 : index
    %c0_119 = arith.constant 0 : index
    %c0_120 = arith.constant 0 : index
    %126 = vector.load %arg11[%c1_118, %c0_119, %c0_120] : memref<2x48x384xbf16, #tpu.memory_space<vmem>>, vector<1x32x384xbf16>
    %127 = vector.shape_cast %126 : vector<1x32x384xbf16> to vector<32x384xbf16>
    %c1_121 = arith.constant 1 : index
    %c0_122 = arith.constant 0 : index
    %c0_123 = arith.constant 0 : index
    %128 = vector.load %arg4[%c1_121, %c0_122, %c0_123] : memref<5x384x512xbf16, #tpu.memory_space<vmem>>, vector<1x384x512xbf16>
    %129 = vector.shape_cast %128 : vector<1x384x512xbf16> to vector<384x512xbf16>
    %cst_124 = arith.constant dense<0.000000e+00> : vector<32x512xf32>
    %130 = tpu.matmul %127, %129, %cst_124 {dimension_numbers = #tpu.dot_dimension_numbers<[1], [0], [0], [1], [0, 0, 1, 1], [], []>} : vector<32x384xbf16>, vector<384x512xbf16>, vector<32x512xf32> -> vector<32x512xf32>
    %131 = arith.addf %125, %130 : vector<32x512xf32>
    %c0_125 = arith.constant 0 : index
    %c8_126 = arith.constant 8 : index
    %c0_127 = arith.constant 0 : index
    %132 = vector.load %arg11[%c0_125, %c8_126, %c0_127] : memref<2x48x384xbf16, #tpu.memory_space<vmem>>, vector<1x32x384xbf16>
    %133 = vector.shape_cast %132 : vector<1x32x384xbf16> to vector<32x384xbf16>
    %c2_128 = arith.constant 2 : index
    %c0_129 = arith.constant 0 : index
    %c0_130 = arith.constant 0 : index
    %134 = vector.load %arg4[%c2_128, %c0_129, %c0_130] : memref<5x384x512xbf16, #tpu.memory_space<vmem>>, vector<1x384x512xbf16>
    %135 = vector.shape_cast %134 : vector<1x384x512xbf16> to vector<384x512xbf16>
    %cst_131 = arith.constant dense<0.000000e+00> : vector<32x512xf32>
    %136 = tpu.matmul %133, %135, %cst_131 {dimension_numbers = #tpu.dot_dimension_numbers<[1], [0], [0], [1], [0, 0, 1, 1], [], []>} : vector<32x384xbf16>, vector<384x512xbf16>, vector<32x512xf32> -> vector<32x512xf32>
    %137 = arith.addf %131, %136 : vector<32x512xf32>
    %c1_132 = arith.constant 1 : index
    %c8_133 = arith.constant 8 : index
    %c0_134 = arith.constant 0 : index
    %138 = vector.load %arg11[%c1_132, %c8_133, %c0_134] : memref<2x48x384xbf16, #tpu.memory_space<vmem>>, vector<1x32x384xbf16>
    %139 = vector.shape_cast %138 : vector<1x32x384xbf16> to vector<32x384xbf16>
    %c3_135 = arith.constant 3 : index
    %c0_136 = arith.constant 0 : index
    %c0_137 = arith.constant 0 : index
    %140 = vector.load %arg4[%c3_135, %c0_136, %c0_137] : memref<5x384x512xbf16, #tpu.memory_space<vmem>>, vector<1x384x512xbf16>
    %141 = vector.shape_cast %140 : vector<1x384x512xbf16> to vector<384x512xbf16>
    %cst_138 = arith.constant dense<0.000000e+00> : vector<32x512xf32>
    %142 = tpu.matmul %139, %141, %cst_138 {dimension_numbers = #tpu.dot_dimension_numbers<[1], [0], [0], [1], [0, 0, 1, 1], [], []>} : vector<32x384xbf16>, vector<384x512xbf16>, vector<32x512xf32> -> vector<32x512xf32>
    %143 = arith.addf %137, %142 : vector<32x512xf32>
    %c0_139 = arith.constant 0 : index
    %c16_140 = arith.constant 16 : index
    %c0_141 = arith.constant 0 : index
    %144 = vector.load %arg11[%c0_139, %c16_140, %c0_141] : memref<2x48x384xbf16, #tpu.memory_space<vmem>>, vector<1x32x384xbf16>
    %145 = vector.shape_cast %144 : vector<1x32x384xbf16> to vector<32x384xbf16>
    %c4_142 = arith.constant 4 : index
    %c0_143 = arith.constant 0 : index
    %c0_144 = arith.constant 0 : index
    %146 = vector.load %arg4[%c4_142, %c0_143, %c0_144] : memref<5x384x512xbf16, #tpu.memory_space<vmem>>, vector<1x384x512xbf16>
    %147 = vector.shape_cast %146 : vector<1x384x512xbf16> to vector<384x512xbf16>
    %cst_145 = arith.constant dense<0.000000e+00> : vector<32x512xf32>
    %148 = tpu.matmul %145, %147, %cst_145 {dimension_numbers = #tpu.dot_dimension_numbers<[1], [0], [0], [1], [0, 0, 1, 1], [], []>} : vector<32x384xbf16>, vector<384x512xbf16>, vector<32x512xf32> -> vector<32x512xf32>
    %149 = arith.addf %143, %148 : vector<32x512xf32>
    %c0_146 = arith.constant 0 : index
    %c0_147 = arith.constant 0 : index
    %150 = vector.load %arg5[%c0_146, %c0_147] : memref<1x512xf32, #tpu.memory_space<vmem>>, vector<1x512xf32>
    %151 = vector.broadcast %150 : vector<1x512xf32> to vector<32x512xf32>
    %152 = arith.addf %149, %151 : vector<32x512xf32>
    %cst_148 = arith.constant 0.000000e+00 : f32
    %153 = vector.broadcast %cst_148 : f32 to vector<32x512xf32>
    %154 = arith.maximumf %152, %153 : vector<32x512xf32>
    %c1_149 = arith.constant 1 : index
    %c0_150 = arith.constant 0 : index
    %c0_151 = arith.constant 0 : index
    %155 = vector.load %arg11[%c1_149, %c0_150, %c0_151] : memref<2x48x384xbf16, #tpu.memory_space<vmem>>, vector<1x32x384xbf16>
    %156 = vector.shape_cast %155 : vector<1x32x384xbf16> to vector<32x384xbf16>
    %c0_152 = arith.constant 0 : index
    %c0_153 = arith.constant 0 : index
    %c0_154 = arith.constant 0 : index
    %157 = vector.load %arg4[%c0_152, %c0_153, %c0_154] : memref<5x384x512xbf16, #tpu.memory_space<vmem>>, vector<1x384x512xbf16>
    %158 = vector.shape_cast %157 : vector<1x384x512xbf16> to vector<384x512xbf16>
    %cst_155 = arith.constant dense<0.000000e+00> : vector<32x512xf32>
    %159 = tpu.matmul %156, %158, %cst_155 {dimension_numbers = #tpu.dot_dimension_numbers<[1], [0], [0], [1], [0, 0, 1, 1], [], []>} : vector<32x384xbf16>, vector<384x512xbf16>, vector<32x512xf32> -> vector<32x512xf32>
    %c0_156 = arith.constant 0 : index
    %c8_157 = arith.constant 8 : index
    %c0_158 = arith.constant 0 : index
    %160 = vector.load %arg11[%c0_156, %c8_157, %c0_158] : memref<2x48x384xbf16, #tpu.memory_space<vmem>>, vector<1x32x384xbf16>
    %161 = vector.shape_cast %160 : vector<1x32x384xbf16> to vector<32x384xbf16>
    %c1_159 = arith.constant 1 : index
    %c0_160 = arith.constant 0 : index
    %c0_161 = arith.constant 0 : index
    %162 = vector.load %arg4[%c1_159, %c0_160, %c0_161] : memref<5x384x512xbf16, #tpu.memory_space<vmem>>, vector<1x384x512xbf16>
    %163 = vector.shape_cast %162 : vector<1x384x512xbf16> to vector<384x512xbf16>
    %cst_162 = arith.constant dense<0.000000e+00> : vector<32x512xf32>
    %164 = tpu.matmul %161, %163, %cst_162 {dimension_numbers = #tpu.dot_dimension_numbers<[1], [0], [0], [1], [0, 0, 1, 1], [], []>} : vector<32x384xbf16>, vector<384x512xbf16>, vector<32x512xf32> -> vector<32x512xf32>
    %165 = arith.addf %159, %164 : vector<32x512xf32>
    %c1_163 = arith.constant 1 : index
    %c8_164 = arith.constant 8 : index
    %c0_165 = arith.constant 0 : index
    %166 = vector.load %arg11[%c1_163, %c8_164, %c0_165] : memref<2x48x384xbf16, #tpu.memory_space<vmem>>, vector<1x32x384xbf16>
    %167 = vector.shape_cast %166 : vector<1x32x384xbf16> to vector<32x384xbf16>
    %c2_166 = arith.constant 2 : index
    %c0_167 = arith.constant 0 : index
    %c0_168 = arith.constant 0 : index
    %168 = vector.load %arg4[%c2_166, %c0_167, %c0_168] : memref<5x384x512xbf16, #tpu.memory_space<vmem>>, vector<1x384x512xbf16>
    %169 = vector.shape_cast %168 : vector<1x384x512xbf16> to vector<384x512xbf16>
    %cst_169 = arith.constant dense<0.000000e+00> : vector<32x512xf32>
    %170 = tpu.matmul %167, %169, %cst_169 {dimension_numbers = #tpu.dot_dimension_numbers<[1], [0], [0], [1], [0, 0, 1, 1], [], []>} : vector<32x384xbf16>, vector<384x512xbf16>, vector<32x512xf32> -> vector<32x512xf32>
    %171 = arith.addf %165, %170 : vector<32x512xf32>
    %c0_170 = arith.constant 0 : index
    %c16_171 = arith.constant 16 : index
    %c0_172 = arith.constant 0 : index
    %172 = vector.load %arg11[%c0_170, %c16_171, %c0_172] : memref<2x48x384xbf16, #tpu.memory_space<vmem>>, vector<1x32x384xbf16>
    %173 = vector.shape_cast %172 : vector<1x32x384xbf16> to vector<32x384xbf16>
    %c3_173 = arith.constant 3 : index
    %c0_174 = arith.constant 0 : index
    %c0_175 = arith.constant 0 : index
    %174 = vector.load %arg4[%c3_173, %c0_174, %c0_175] : memref<5x384x512xbf16, #tpu.memory_space<vmem>>, vector<1x384x512xbf16>
    %175 = vector.shape_cast %174 : vector<1x384x512xbf16> to vector<384x512xbf16>
    %cst_176 = arith.constant dense<0.000000e+00> : vector<32x512xf32>
    %176 = tpu.matmul %173, %175, %cst_176 {dimension_numbers = #tpu.dot_dimension_numbers<[1], [0], [0], [1], [0, 0, 1, 1], [], []>} : vector<32x384xbf16>, vector<384x512xbf16>, vector<32x512xf32> -> vector<32x512xf32>
    %177 = arith.addf %171, %176 : vector<32x512xf32>
    %c1_177 = arith.constant 1 : index
    %c16_178 = arith.constant 16 : index
    %c0_179 = arith.constant 0 : index
    %178 = vector.load %arg11[%c1_177, %c16_178, %c0_179] : memref<2x48x384xbf16, #tpu.memory_space<vmem>>, vector<1x32x384xbf16>
    %179 = vector.shape_cast %178 : vector<1x32x384xbf16> to vector<32x384xbf16>
    %c4_180 = arith.constant 4 : index
    %c0_181 = arith.constant 0 : index
    %c0_182 = arith.constant 0 : index
    %180 = vector.load %arg4[%c4_180, %c0_181, %c0_182] : memref<5x384x512xbf16, #tpu.memory_space<vmem>>, vector<1x384x512xbf16>
    %181 = vector.shape_cast %180 : vector<1x384x512xbf16> to vector<384x512xbf16>
    %cst_183 = arith.constant dense<0.000000e+00> : vector<32x512xf32>
    %182 = tpu.matmul %179, %181, %cst_183 {dimension_numbers = #tpu.dot_dimension_numbers<[1], [0], [0], [1], [0, 0, 1, 1], [], []>} : vector<32x384xbf16>, vector<384x512xbf16>, vector<32x512xf32> -> vector<32x512xf32>
    %183 = arith.addf %177, %182 : vector<32x512xf32>
    %c0_184 = arith.constant 0 : index
    %c0_185 = arith.constant 0 : index
    %184 = vector.load %arg5[%c0_184, %c0_185] : memref<1x512xf32, #tpu.memory_space<vmem>>, vector<1x512xf32>
    %185 = vector.broadcast %184 : vector<1x512xf32> to vector<32x512xf32>
    %186 = arith.addf %183, %185 : vector<32x512xf32>
    %cst_186 = arith.constant 0.000000e+00 : f32
    %187 = vector.broadcast %cst_186 : f32 to vector<32x512xf32>
    %188 = arith.maximumf %186, %187 : vector<32x512xf32>
    %189 = arith.maximumf %154, %188 : vector<32x512xf32>
    %190 = vector.extract_strided_slice %189 {offsets = [0, 0], sizes = [32, 256], strides = [1, 1]} : vector<32x512xf32> to vector<32x256xf32>
    %191 = vector.extract_strided_slice %189 {offsets = [0, 256], sizes = [32, 256], strides = [1, 1]} : vector<32x512xf32> to vector<32x256xf32>
    %192 = arith.maximumf %190, %191 : vector<32x256xf32>
    %193 = arith.truncf %192 : vector<32x256xf32> to vector<32x256xbf16>
    %194 = vector.extract_strided_slice %193 {offsets = [0, 0], sizes = [8, 256], strides = [1, 1]} : vector<32x256xbf16> to vector<8x256xbf16>
    %c0_187 = arith.constant 0 : index
    %c0_188 = arith.constant 0 : index
    %c0_189 = arith.constant 0 : index
    %195 = vector.load %arg6[%c0_187, %c0_188, %c0_189] : memref<4x256x256xbf16, #tpu.memory_space<vmem>>, vector<1x256x256xbf16>
    %196 = vector.shape_cast %195 : vector<1x256x256xbf16> to vector<256x256xbf16>
    %cst_190 = arith.constant dense<0.000000e+00> : vector<8x256xf32>
    %197 = tpu.matmul %194, %196, %cst_190 {dimension_numbers = #tpu.dot_dimension_numbers<[1], [0], [0], [1], [0, 0, 1, 1], [], []>} : vector<8x256xbf16>, vector<256x256xbf16>, vector<8x256xf32> -> vector<8x256xf32>
    %198 = vector.extract_strided_slice %193 {offsets = [8, 0], sizes = [8, 256], strides = [1, 1]} : vector<32x256xbf16> to vector<8x256xbf16>
    %c1_191 = arith.constant 1 : index
    %c0_192 = arith.constant 0 : index
    %c0_193 = arith.constant 0 : index
    %199 = vector.load %arg6[%c1_191, %c0_192, %c0_193] : memref<4x256x256xbf16, #tpu.memory_space<vmem>>, vector<1x256x256xbf16>
    %200 = vector.shape_cast %199 : vector<1x256x256xbf16> to vector<256x256xbf16>
    %cst_194 = arith.constant dense<0.000000e+00> : vector<8x256xf32>
    %201 = tpu.matmul %198, %200, %cst_194 {dimension_numbers = #tpu.dot_dimension_numbers<[1], [0], [0], [1], [0, 0, 1, 1], [], []>} : vector<8x256xbf16>, vector<256x256xbf16>, vector<8x256xf32> -> vector<8x256xf32>
    %202 = arith.addf %197, %201 : vector<8x256xf32>
    %203 = vector.extract_strided_slice %193 {offsets = [16, 0], sizes = [8, 256], strides = [1, 1]} : vector<32x256xbf16> to vector<8x256xbf16>
    %c2_195 = arith.constant 2 : index
    %c0_196 = arith.constant 0 : index
    %c0_197 = arith.constant 0 : index
    %204 = vector.load %arg6[%c2_195, %c0_196, %c0_197] : memref<4x256x256xbf16, #tpu.memory_space<vmem>>, vector<1x256x256xbf16>
    %205 = vector.shape_cast %204 : vector<1x256x256xbf16> to vector<256x256xbf16>
    %cst_198 = arith.constant dense<0.000000e+00> : vector<8x256xf32>
    %206 = tpu.matmul %203, %205, %cst_198 {dimension_numbers = #tpu.dot_dimension_numbers<[1], [0], [0], [1], [0, 0, 1, 1], [], []>} : vector<8x256xbf16>, vector<256x256xbf16>, vector<8x256xf32> -> vector<8x256xf32>
    %207 = arith.addf %202, %206 : vector<8x256xf32>
    %208 = vector.extract_strided_slice %193 {offsets = [24, 0], sizes = [8, 256], strides = [1, 1]} : vector<32x256xbf16> to vector<8x256xbf16>
    %c3_199 = arith.constant 3 : index
    %c0_200 = arith.constant 0 : index
    %c0_201 = arith.constant 0 : index
    %209 = vector.load %arg6[%c3_199, %c0_200, %c0_201] : memref<4x256x256xbf16, #tpu.memory_space<vmem>>, vector<1x256x256xbf16>
    %210 = vector.shape_cast %209 : vector<1x256x256xbf16> to vector<256x256xbf16>
    %cst_202 = arith.constant dense<0.000000e+00> : vector<8x256xf32>
    %211 = tpu.matmul %208, %210, %cst_202 {dimension_numbers = #tpu.dot_dimension_numbers<[1], [0], [0], [1], [0, 0, 1, 1], [], []>} : vector<8x256xbf16>, vector<256x256xbf16>, vector<8x256xf32> -> vector<8x256xf32>
    %212 = arith.addf %207, %211 : vector<8x256xf32>
    %c0_203 = arith.constant 0 : index
    %c0_204 = arith.constant 0 : index
    %213 = vector.load %arg7[%c0_203, %c0_204] : memref<1x256xf32, #tpu.memory_space<vmem>>, vector<1x256xf32>
    %214 = vector.broadcast %213 : vector<1x256xf32> to vector<8x256xf32>
    %215 = arith.addf %212, %214 : vector<8x256xf32>
    %cst_205 = arith.constant 0.000000e+00 : f32
    %216 = vector.broadcast %cst_205 : f32 to vector<8x256xf32>
    %217 = arith.maximumf %215, %216 : vector<8x256xf32>
    %c0_206 = arith.constant 0 : index
    %c0_207 = arith.constant 0 : index
    %218 = vector.load %arg8[%c0_206, %c0_207] : memref<256x128xf32, #tpu.memory_space<vmem>>, vector<256x128xf32>
    %cst_208 = arith.constant dense<0.000000e+00> : vector<8x128xf32>
    %219 = tpu.matmul %217, %218, %cst_208 {dimension_numbers = #tpu.dot_dimension_numbers<[1], [0], [0], [1], [0, 0, 1, 1], [], []>} : vector<8x256xf32>, vector<256x128xf32>, vector<8x128xf32> -> vector<8x128xf32>
    %c0_209 = arith.constant 0 : index
    %c0_210 = arith.constant 0 : index
    %220 = vector.load %arg9[%c0_209, %c0_210] : memref<1x128xf32, #tpu.memory_space<vmem>>, vector<1x128xf32>
    %221 = vector.broadcast %220 : vector<1x128xf32> to vector<8x128xf32>
    %222 = arith.addf %219, %221 : vector<8x128xf32>
    %cst_211 = arith.constant dense<0xFF800000> : vector<8xf32>
    %223 = vector.multi_reduction <maximumf>, %222, %cst_211 [1] : vector<8x128xf32> to vector<8xf32>
    %224 = vector.shape_cast %223 : vector<8xf32> to vector<8x1xf32>
    %225 = vector.broadcast %224 : vector<8x1xf32> to vector<8x128xf32>
    %226 = arith.subf %222, %225 : vector<8x128xf32>
    %227 = math.exp %226 : vector<8x128xf32>
    %cst_212 = arith.constant dense<0.000000e+00> : vector<8xf32>
    %228 = vector.multi_reduction <add>, %227, %cst_212 [1] : vector<8x128xf32> to vector<8xf32>
    %229 = vector.shape_cast %228 : vector<8xf32> to vector<8x1xf32>
    %230 = math.log %229 : vector<8x1xf32>
    %231 = vector.broadcast %230 : vector<8x1xf32> to vector<8x128xf32>
    %232 = arith.subf %226, %231 : vector<8x128xf32>
    %c0_213 = arith.constant 0 : index
    %c0_214 = arith.constant 0 : index
    %233 = vector.load %arg10[%c0_213, %c0_214] : memref<8x128xf32, #tpu.memory_space<vmem>>, vector<8x128xf32>
    tpu.vector_store %arg10[%c0_213, %c0_214], %232 {strides = array<i32>} : memref<8x128xf32, #tpu.memory_space<vmem>>, vector<8x128xf32>,
    return
  }
  func.func @transform_0(%arg0: i32) -> (i32, i32, i32, i32) {
    %c0_i32 = arith.constant 0 : i32
    %c0_i32_0 = arith.constant 0 : i32
    %c0_i32_1 = arith.constant 0 : i32
    %c0_i32_2 = arith.constant 0 : i32
    return %arg0, %c0_i32, %c0_i32_0, %c0_i32_1 : i32, i32, i32, i32
  }
  func.func @transform_1(%arg0: i32) -> (i32, i32, i32) {
    %c0_i32 = arith.constant 0 : i32
    %c0_i32_0 = arith.constant 0 : i32
    %c0_i32_1 = arith.constant 0 : i32
    %c0_i32_2 = arith.constant 0 : i32
    return %c0_i32, %c0_i32_0, %c0_i32_1 : i32, i32, i32
  }
  func.func @transform_2(%arg0: i32) -> (i32, i32) {
    %c0_i32 = arith.constant 0 : i32
    %c0_i32_0 = arith.constant 0 : i32
    %c0_i32_1 = arith.constant 0 : i32
    return %c0_i32, %c0_i32_0 : i32, i32
  }
  func.func @transform_3(%arg0: i32) -> (i32, i32, i32) {
    %c0_i32 = arith.constant 0 : i32
    %c0_i32_0 = arith.constant 0 : i32
    %c0_i32_1 = arith.constant 0 : i32
    %c0_i32_2 = arith.constant 0 : i32
    return %c0_i32, %c0_i32_0, %c0_i32_1 : i32, i32, i32
  }
  func.func @transform_4(%arg0: i32) -> (i32, i32) {
    %c0_i32 = arith.constant 0 : i32
    %c0_i32_0 = arith.constant 0 : i32
    %c0_i32_1 = arith.constant 0 : i32
    return %c0_i32, %c0_i32_0 : i32, i32
  }
  func.func @transform_5(%arg0: i32) -> (i32, i32, i32) {
    %c0_i32 = arith.constant 0 : i32
    %c0_i32_0 = arith.constant 0 : i32
    %c0_i32_1 = arith.constant 0 : i32
    %c0_i32_2 = arith.constant 0 : i32
    return %c0_i32, %c0_i32_0, %c0_i32_1 : i32, i32, i32
  }
  func.func @transform_6(%arg0: i32) -> (i32, i32) {
    %c0_i32 = arith.constant 0 : i32
    %c0_i32_0 = arith.constant 0 : i32
    %c0_i32_1 = arith.constant 0 : i32
    return %c0_i32, %c0_i32_0 : i32, i32
  }
  func.func @transform_7(%arg0: i32) -> (i32, i32) {
    %c0_i32 = arith.constant 0 : i32
    %c0_i32_0 = arith.constant 0 : i32
    %c0_i32_1 = arith.constant 0 : i32
    return %c0_i32, %c0_i32_0 : i32, i32
  }
  func.func @transform_8(%arg0: i32) -> (i32, i32) {
    %c0_i32 = arith.constant 0 : i32
    %c0_i32_0 = arith.constant 0 : i32
    %c0_i32_1 = arith.constant 0 : i32
    return %c0_i32, %c0_i32_0 : i32, i32
  }
  func.func @transform_9(%arg0: i32) -> (i32, i32) {
    %c0_i32 = arith.constant 0 : i32
    %c0_i32_0 = arith.constant 0 : i32
    return %arg0, %c0_i32 : i32, i32
  }
}

</mosaic_0001>

<bundles_post_ra>
// kernel: net_forward.1
= control target key start
LH: loop header
LB: loop body
LE: loop exit
PB: predicated region body
PF: predicated region fallthrough
CT: control target
= control target key end

     0   :  { %14 = vsyncpa [#allocation4], 0  ;;  %s17752_s0 = inlined_call_operand.vmem [shape: bf16[1,2,112,32], index: 0, kind: input, shape index: {}]   ;;  %s17753_s1 = inlined_call_operand.hbm [shape: bf16[5,32,768], index: 1, kind: input, shape index: {}]   ;;  %s17754_s2 = inlined_call_operand.hbm [shape: f32[1,768], index: 2, kind: input, shape index: {}]   ;;  %s17755_s3 = inlined_call_operand.hbm [shape: bf16[5,384,512], index: 3, kind: input, shape index: {}]   ;;  %s17756_s4 = inlined_call_operand.hbm [shape: f32[1,512], index: 4, kind: input, shape index: {}]   ;;  %s17757_s5 = inlined_call_operand.hbm [shape: bf16[4,256,256], index: 5, kind: input, shape index: {}]   ;;  %s17758_s6 = inlined_call_operand.hbm [shape: f32[1,256], index: 6, kind: input, shape index: {}]   ;;  %s17759_s7 = inlined_call_operand.hbm [shape: f32[256,128], index: 7, kind: input, shape index: {}]   ;;  %s17760_s8 = inlined_call_operand.hbm [shape: f32[1,128], index: 8, kind: input, shape index: {}]   ;;  %s17761_s9 = inlined_call_operand.vmem [shape: f32[8,128], index: 9, kind: output, shape index: {}]  }
   0x1   :  { %15 = vsyncpa [#allocation6], 0 }
   0x2   :  { %16 = vsyncpa [#allocation9], 0 }
   0x3   :  { %17 = vsyncpa [#allocation12], 0 }
   0x4   :  { %18 = vsyncpa [#allocation15], 0  ;;  %s14235_s30 = smov [#allocation5]   ;;  %s14236_s11 = smov [#allocation8]  }
   0x5   :  { %s39_s10 = sshll.u32 %s14235_s30, 4  ;;  %s61_s12 = sshll.u32 %s14236_s11, 4  ;;  %s40_s10 = int_to_ptr.vmem [resolvable:$true] %s39_s10  ;;  %s62_s12 = int_to_ptr.vmem [resolvable:$true] %s61_s12 }
   0x6   :  { %s14049_s15 = scalar_lea.hbm %s17754_s2, 96 }
   0x7   :  { %p14050_p0 = scmp.ne.s32.totalorder %s17754_s2, %s14049_s15  ;;  %p14053_p1 = scmp.lt.u32.totalorder %s14049_s15, %s17754_s2 }
   0x9   :  { %p14055_p2 = pnand %p14053_p1, %p14050_p0 }
   0xb   :  { %14058 = shalt.err (!%p14055_p2)
}
   0xc   :  { %s14059_s20 = scalar_lea.vmem %s40_s10, 96  ;;  %p14064_p4 = scmp.lt.s32.totalorder %s40_s10, %s40_s10 }
   0xd   :  { %p14060_p3 = scmp.ne.s32.totalorder %s40_s10, %s14059_s20  ;;  %p14065_p5 = scmp.lt.s32.totalorder %s14059_s20, %s14059_s20 }
   0xf   :  { %p14066_p6 = por %p14065_p5, %p14064_p4 }
  0x11   :  { %p14067_p7 = pnand %p14066_p6, %p14060_p3 }
  0x13   :  { %14070 = shalt.err (!%p14067_p7)
}
  0x14   :  { %42 = dma.hbm_to_vmem [thread:$0]  %s17754_s2, 96, %s40_s10, [#allocation6]  }
  0x15   :  { %s14071_s25 = scalar_lea.hbm %s17756_s4, 64 }
  0x16   :  { %p14072_p8 = scmp.ne.s32.totalorder %s17756_s4, %s14071_s25  ;;  %p14075_p9 = scmp.lt.u32.totalorder %s14071_s25, %s17756_s4 }
  0x18   :  { %p14077_p10 = pnand %p14075_p9, %p14072_p8 }
  0x1a   :  { %14080 = shalt.err (!%p14077_p10)
}
  0x1b   :  { %s14081_s30 = scalar_lea.vmem %s62_s12, 64  ;;  %p14086_p12 = scmp.lt.s32.totalorder %s62_s12, %s62_s12 }
  0x1c   :  { %p14082_p11 = scmp.ne.s32.totalorder %s62_s12, %s14081_s30  ;;  %p14087_p13 = scmp.lt.s32.totalorder %s14081_s30, %s14081_s30 }
  0x1e   :  { %p14088_p0 = por %p14087_p13, %p14086_p12 }
  0x20   :  { %p14089_p1 = pnand %p14088_p0, %p14082_p11 }
  0x22   :  { %14092 = shalt.err (!%p14089_p1)
}
  0x23   :  { %64 = dma.hbm_to_vmem [thread:$0]  %s17756_s4, 64, %s62_s12, [#allocation9]  }
  0x24   :  { %s14237_s11 = smov [#allocation11]   ;;  %s14238_s14 = smov [#allocation3]  }
  0x25   :  { %s83_s13 = sshll.u32 %s14237_s11, 4  ;;  %s26_s15 = sshll.u32 %s14238_s14, 4  ;;  %s84_s13 = int_to_ptr.vmem [resolvable:$true] %s83_s13  ;;  %s14324_s15 = int_to_ptr.vmem [resolvable:$true] %s26_s15 }
  0x26   :  { %s14093_s18 = scalar_lea.hbm %s17758_s6, 32 }
  0x27   :  { %p14094_p2 = scmp.ne.s32.totalorder %s17758_s6, %s14093_s18  ;;  %p14097_p3 = scmp.lt.u32.totalorder %s14093_s18, %s17758_s6 }
  0x29   :  { %p14099_p4 = pnand %p14097_p3, %p14094_p2 }
  0x2b   :  { %14102 = shalt.err (!%p14099_p4)
}
  0x2c   :  { %s14103_s4 = scalar_lea.vmem %s84_s13, 32  ;;  %p14108_p6 = scmp.lt.s32.totalorder %s84_s13, %s84_s13 }
  0x2d   :  { %p14104_p5 = scmp.ne.s32.totalorder %s84_s13, %s14103_s4  ;;  %p14109_p7 = scmp.lt.s32.totalorder %s14103_s4, %s14103_s4 }
  0x2f   :  { %p14110_p8 = por %p14109_p7, %p14108_p6 }
  0x31   :  { %p14111_p9 = pnand %p14110_p8, %p14104_p5 }
  0x33   :  { %14114 = shalt.err (!%p14111_p9)
}
  0x34   :  { %86 = dma.hbm_to_vmem [thread:$0]  %s17758_s6, 32, %s84_s13, [#allocation12]  }
  0x35   :  { %s14115_s26 = scalar_lea.hbm %s17753_s1, 7680 }
  0x36   :  { %p14116_p10 = scmp.ne.s32.totalorder %s17753_s1, %s14115_s26  ;;  %p14119_p11 = scmp.lt.u32.totalorder %s14115_s26, %s17753_s1 }
  0x38   :  { %p14121_p12 = pnand %p14119_p11, %p14116_p10 }
  0x3a   :  { %14124 = shalt.err (!%p14121_p12)
}
  0x3b   :  { %s14125_s2 = scalar_lea.vmem %s14324_s15, 7680  ;;  %p14130_p0 = scmp.lt.s32.totalorder %s14324_s15, %s14324_s15 }
  0x3c   :  { %p14126_p13 = scmp.ne.s32.totalorder %s14324_s15, %s14125_s2  ;;  %p14131_p1 = scmp.lt.s32.totalorder %s14125_s2, %s14125_s2 }
  0x3e   :  { %p14132_p2 = por %p14131_p1, %p14130_p0 }
  0x40   :  { %p14133_p3 = pnand %p14132_p2, %p14126_p13 }
  0x42   :  { %14136 = shalt.err (!%p14133_p3)
}
  0x43   :  { %s14239_s6 = smov 384   ;;  %s14240_s10 = smov 24  }
  0x44   :  { %32 = dma.hbm_to_vmem [thread:$0]  %s17753_s1, 7680, %s14324_s15, [#allocation4], %s14239_s6, %s14239_s6, %s14240_s10  }
  0x45   :  { %s14241_s14 = smov [#allocation7]   ;;  %s14137_s19 = scalar_lea.hbm %s17755_s3, 61440 }
  0x46   :  { %s48_s16 = sshll.u32 %s14241_s14, 4  ;;  %p14138_p4 = scmp.ne.s32.totalorder %s17755_s3, %s14137_s19  ;;  %s49_s16 = int_to_ptr.vmem [resolvable:$true] %s48_s16 }
  0x47   :  { %p14141_p5 = scmp.lt.u32.totalorder %s14137_s19, %s17755_s3 }
  0x49   :  { %p14143_p6 = pnand %p14141_p5, %p14138_p4 }
  0x4b   :  { %14146 = shalt.err (!%p14143_p6)
}
  0x4c   :  { %s14147_s12 = scalar_lea.vmem %s49_s16, 61440  ;;  %p14152_p8 = scmp.lt.s32.totalorder %s49_s16, %s49_s16 }
  0x4d   :  { %p14148_p7 = scmp.ne.s32.totalorder %s49_s16, %s14147_s12  ;;  %p14153_p9 = scmp.lt.s32.totalorder %s14147_s12, %s14147_s12 }
  0x4f   :  { %p14154_p10 = por %p14153_p9, %p14152_p8 }
  0x51   :  { %p14155_p11 = pnand %p14154_p10, %p14148_p7 }
  0x53   :  { %14158 = shalt.err (!%p14155_p11)
}
  0x54   :  { %s14242_s1 = smov 256   ;;  %s14243_s15 = smov 16  }
  0x55   :  { %54 = dma.hbm_to_vmem [thread:$0]  %s17755_s3, 61440, %s49_s16, [#allocation6], %s14242_s1, %s14242_s1, %s14243_s15  }
  0x56   :  { %s14244_s25 = smov [#allocation10]   ;;  %s14159_s29 = scalar_lea.hbm %s17757_s5, 16384 }
  0x57   :  { %s70_s26 = sshll.u32 %s14244_s25, 4  ;;  %p14160_p12 = scmp.ne.s32.totalorder %s17757_s5, %s14159_s29  ;;  %s71_s26 = int_to_ptr.vmem [resolvable:$true] %s70_s26 }
  0x58   :  { %p14163_p13 = scmp.lt.u32.totalorder %s14159_s29, %s17757_s5 }
  0x5a   :  { %p14165_p0 = pnand %p14163_p13, %p14160_p12 }
  0x5c   :  { %14168 = shalt.err (!%p14165_p0)
}
  0x5d   :  { %s14169_s11 = scalar_lea.vmem %s71_s26, 16384  ;;  %p14174_p2 = scmp.lt.s32.totalorder %s71_s26, %s71_s26 }
  0x5e   :  { %p14170_p1 = scmp.ne.s32.totalorder %s71_s26, %s14169_s11  ;;  %p14175_p3 = scmp.lt.s32.totalorder %s14169_s11, %s14169_s11 }
  0x60   :  { %p14176_p4 = por %p14175_p3, %p14174_p2 }
  0x62   :  { %p14177_p5 = pnand %p14176_p4, %p14170_p1 }
  0x64   :  { %14180 = shalt.err (!%p14177_p5)
}
  0x65   :  { %s14245_s3 = smov 128   ;;  %s14246_s13 = smov 8  }
  0x66   :  { %76 = dma.hbm_to_vmem [thread:$0]  %s17757_s5, 16384, %s71_s26, [#allocation9], %s14245_s3, %s14245_s3, %s14246_s13  }
  0x67   :  { %s14247_s17 = smov [#allocation13]   ;;  %s14248_s19 = smov [#allocation14]  }
  0x68   :  { %s92_s18 = sshll.u32 %s14247_s17, 4  ;;  %s105_s20 = sshll.u32 %s14248_s19, 4  ;;  %s93_s18 = int_to_ptr.vmem [resolvable:$true] %s92_s18  ;;  %s106_s20 = int_to_ptr.vmem [resolvable:$true] %s105_s20 }
  0x69   :  { %s14181_s4 = scalar_lea.hbm %s17759_s7, 4096 }
  0x6a   :  { %p14182_p6 = scmp.ne.s32.totalorder %s17759_s7, %s14181_s4  ;;  %p14185_p7 = scmp.lt.u32.totalorder %s14181_s4, %s17759_s7 }
  0x6c   :  { %p14187_p8 = pnand %p14185_p7, %p14182_p6 }
  0x6e   :  { %14190 = shalt.err (!%p14187_p8)
}
  0x6f   :  { %s14191_s5 = scalar_lea.vmem %s93_s18, 4096  ;;  %p14196_p10 = scmp.lt.s32.totalorder %s93_s18, %s93_s18 }
  0x70   :  { %p14192_p9 = scmp.ne.s32.totalorder %s93_s18, %s14191_s5  ;;  %p14197_p11 = scmp.lt.s32.totalorder %s14191_s5, %s14191_s5 }
  0x72   :  { %p14198_p12 = por %p14197_p11, %p14196_p10 }
  0x74   :  { %p14199_p13 = pnand %p14198_p12, %p14192_p9 }
  0x76   :  { %14202 = shalt.err (!%p14199_p13)
}
  0x77   :  { %98 = dma.hbm_to_vmem [thread:$0]  %s17759_s7, 4096, %s93_s18, [#allocation12], %s14245_s3, %s14245_s3, %s14246_s13  }
  0x78   :  { %s14203_s28 = scalar_lea.hbm %s17760_s8, 16 }
  0x79   :  { %p14204_p0 = scmp.ne.s32.totalorder %s17760_s8, %s14203_s28  ;;  %p14207_p1 = scmp.lt.u32.totalorder %s14203_s28, %s17760_s8 }
  0x7b   :  { %p14209_p2 = pnand %p14207_p1, %p14204_p0 }
  0x7d   :  { %14212 = shalt.err (!%p14209_p2)
}
  0x7e   :  { %s14213_s10 = scalar_lea.vmem %s106_s20, 16  ;;  %s14217_s11 = scalar_lea.vmem %s106_s20, 32 }
  0x7f   :  { %p14214_p3 = scmp.ne.s32.totalorder %s106_s20, %s14213_s10  ;;  %p14218_p4 = scmp.lt.s32.totalorder %s106_s20, %s106_s20 }
  0x80   :  { %p14219_p5 = scmp.lt.s32.totalorder %s14217_s11, %s14213_s10 }
  0x82   :  { %p14220_p6 = por %p14219_p5, %p14218_p4 }
  0x84   :  { %p14221_p7 = pnand %p14220_p6, %p14214_p3 }
  0x86   :  { %14224 = shalt.err (!%p14221_p7)
}
  0x87   :  { %108 = dma.hbm_to_vmem [thread:$0]  %s17760_s8, 16, %s106_s20, [#allocation15]  }
  0x88   :  { %14225 = dma.done.wait [#allocation4], 7680  }
  0x89   :  { %14226 = vsyncadd [#allocation4], 4294959616 }
  0x8a   :  { %14227 = dma.done.wait [#allocation6], 61536  }
  0x8b   :  { %14228 = vsyncadd [#allocation6], 4294905760 }
  0x8c   :  { %14229 = dma.done.wait [#allocation9], 16448  }
  0x8d   :  { %14230 = vsyncadd [#allocation9], 4294950848 }
  0x8e   :  { %14231 = dma.done.wait [#allocation12], 4128  }
  0x8f   :  { %14232 = vsyncadd [#allocation12], 4294963168 }
  0x90   :  { %14233 = dma.done.wait [#allocation15], 16  }
  0x91   :  { %14234 = vsyncadd [#allocation15], 4294967280  ;;  %v17762_v0 = vmov 0   ;;  %v14405_v1 = vld [vmem:[#allocation3 + $0x64] ss:$24 sps:$4 sm:$0xff]   ;;  %v14411_v9 = vld [vmem:[%s17752_s0 + $0x38] sm:$0xff]  }
  0x92   :  { %325 = vmatprep.mubr.bf16.mxu0 %v17762_v0  ;;  %468 = vmatprep.mubr.bf16.mxu1 %v17762_v0  ;;  %v12899_v2 = vld [vmem:[#allocation3 + $0x6c] ss:$24 sps:$4 sm:$0xff]   ;;  %v12901_v3 = vld [vmem:[#allocation3 + $0x60] ss:$24 sps:$4 sm:$0xff]   ;;  %v12905_v6 = vld [vmem:[#allocation3 + $0x9c] ss:$24 sps:$4 sm:$0xff]  }
  0x93   :  { %293 = vmatprep.subr.bf16.mxu0 %v14405_v1  ;;  %v12902_v4 = vld [vmem:[#allocation3 + $0x68] ss:$24 sps:$4 sm:$0xff]   ;;  %12014 = vmatprep.subr.bf16.mxu1 %v12899_v2  ;;  %v12903_v5 = vld [vmem:[#allocation3 + $0x94] ss:$24 sps:$4 sm:$0xff]   ;;  %v12908_v8 = vld [vmem:[#allocation3 + $0x98] ss:$24 sps:$4 sm:$0xff]  }
  0x94   :  { %294 = vmatpush1.bf16.msra.mxu0 %v12901_v3  ;;  %12016 = vmatpush1.bf16.msra.mxu1 %v12902_v4  ;;  %v12907_v7 = vld [vmem:[#allocation3 + $0x90] ss:$24 sps:$4 sm:$0xff]   ;;  %vm274_vm0 = vcmask 261120   ;;  %v12913_v12 = vld [vmem:[#allocation3 + $0xc] ss:$24 sps:$4 sm:$0xff]   ;;  %v14443_v21 = vld [vmem:[%s17752_s0 + $0x48] sm:$0xff]  }
  0x95   :  { %295 = vmatprep.subr.bf16.mxu0 %v12903_v5  ;;  %12015 = vmatprep.subr.bf16.mxu1 %v12905_v6  ;;  %v14416_v10 = vld [vmem:[%s17752_s0 + $0x60] sm:$0xff]   ;;  %v12911_v11 = vld [vmem:[#allocation3 + $0x8] ss:$24 sps:$4 sm:$0xff]   ;;  %v12921_v15 = vld [vmem:[#allocation3 + $0xcc] ss:$24 sps:$4 sm:$0xff]   ;;  %vm6323_vm1 = vcmask 1043456  }
  0x96   :  { %v12916_v13 = vld [vmem:[#allocation3 + $0x3c] ss:$24 sps:$4 sm:$0xff]   ;;  %v12914_v14 = vld [vmem:[#allocation3 + $0x38] ss:$24 sps:$4 sm:$0xff]   ;;  %v12919_v18 = vld [vmem:[#allocation3 + $0xc8] ss:$24 sps:$4 sm:$0xff]  }
  0x97   :  { %v14427_v16 = vld [vmem:[%s17752_s0 + $0x40] sm:$0xff]   ;;  %v14448_v22 = vld [vmem:[%s17752_s0 + $0x8] sm:$0xff]   ;;  %v12936_v23 = vld [vmem:[#allocation3 + $0x12c] ss:$24 sps:$4 sm:$0xff]  }
  0x98   :  { %296 = vmatpush1.bf16.msra.mxu0 %v12907_v7  ;;  %12017 = vmatpush1.bf16.msra.mxu1 %v12908_v8  ;;  %v14432_v17 = vld [vmem:[%s17752_s0] sm:$0xff]   ;;  %v14459_v25 = vld [vmem:[%s17752_s0 + $0x50] sm:$0xff]   ;;  %v14475_v27 = vld [vmem:[%s17752_s0 + $0x58] sm:$0xff]  }
  0x99   :  { %386 = vmatprep.subr.bf16.mxu0 %v12899_v2  ;;  %773 = vmatprep.subr.bf16.mxu1 %v12913_v12  ;;  %v12928_v19 = vld [vmem:[#allocation3 + $0xf8] ss:$24 sps:$4 sm:$0xff]   ;;  %v12930_v20 = vld [vmem:[#allocation3 + $0xfc] ss:$24 sps:$4 sm:$0xff]   ;;  %v14464_v26 = vld [vmem:[%s17752_s0 + $0x10] sm:$0xff]  }
  0x9a   :  { %v12941_v24 = vld [vmem:[#allocation3 + $0x74] ss:$24 sps:$4 sm:$0xff]   ;;  %v14502_v30 = vld [vmem:[%s17752_s0 + $0x28] sm:$0xff]   ;;  %v12939_v31 = vld [vmem:[#allocation3 + $0x70] ss:$24 sps:$4 sm:$0xff]  }
  0x9b   :  { %11056 = vmatmul.mubr.msk.bf16.vlgmr.msra.gmra.mrb[0].mxu0 %vm274_vm0, %v14411_v9  ;;  %11067 = vmatmul.mubr.msk.bf16.vlgmr.msra.gmra.mrb[0].mxu1 %vm274_vm0, %v14416_v10  ;;  %v14480_v28 = vld [vmem:[%s17752_s0 + $0x18] sm:$0xff]   ;;  %v14491_v29 = vld [vmem:[%s17752_s0 + $0x20] sm:$0xff]   ;;  %v12948_v32 = vld [vmem:[#allocation3 + $0xa4] ss:$24 sps:$4 sm:$0xff]  }
  0x9c   :  { %774 = vmatpush1.bf16.msra.mxu1 %v12911_v11  ;;  %335 = vmatprep.mubr.bf16.mxu0 %v17762_v0  ;;  %v12946_v33 = vld [vmem:[#allocation3 + $0xa0] ss:$24 sps:$4 sm:$0xff]   ;;  %v12959_v34 = vld [vmem:[#allocation3 + $0x4] ss:$24 sps:$4 sm:$0xff]   ;;  %v12942_v42 = vld [vmem:[%s17752_s0 + $0x1c] sm:$0xff]  }
  0x9d   :  { %775 = vmatprep.subr.bf16.mxu1 %v12916_v13  ;;  %805 = vmatprep.mubr.bf16.mxu1 %v17762_v0  ;;  %v12933_v35 = vld [vmem:[%s17752_s0 + $0x4] sm:$0xff]   ;;  %v12934_v36 = vld [vmem:[#allocation3 + $0x128] ss:$24 sps:$4 sm:$0xff]   ;;  %v12954_v39 = vld [vmem:[#allocation3 + $0x18c] ss:$24 sps:$4 sm:$0xff]  }
  0x9e   :  { %387 = vmatpush1.bf16.msra.mxu0 %v12902_v4  ;;  %v12945_v37 = vld [vmem:[#allocation3 + $0x15c] ss:$24 sps:$4 sm:$0xff]   ;;  %v12943_v38 = vld [vmem:[#allocation3 + $0x158] ss:$24 sps:$4 sm:$0xff]   ;;  %v12938_v41 = vld [vmem:[%s17752_s0 + $0x14] sm:$0xff]  }
  0x9f   :  { %388 = vmatprep.subr.bf16.mxu0 %v12905_v6  ;;  %v12937_v40 = vld [vmem:[%s17752_s0 + $0xc] sm:$0xff]   ;;  %v12949_v43 = vld [vmem:[%s17752_s0 + $0x24] sm:$0xff]   ;;  %v12964_v46 = vld [vmem:[#allocation3 + $0x30] ss:$24 sps:$4 sm:$0xff]  }
  0xa0   :  { %776 = vmatpush1.bf16.msra.mxu1 %v12914_v14  ;;  %v12957_v44 = vld [vmem:[#allocation3] ss:$24 sps:$4 sm:$0xff]   ;;  %v12966_v45 = vld [vmem:[#allocation3 + $0x34] ss:$24 sps:$4 sm:$0xff]   ;;  %v12960_v55 = vld [vmem:[%s17752_s0 + $0x54] sm:$0xff]  }
  0xa1   :  { %1185 = vmatprep.subr.bf16.mxu1 %v12921_v15  ;;  %v12974_v47 = vld [vmem:[#allocation3 + $0x14] ss:$24 sps:$4 sm:$0xff]   ;;  %v12950_v48 = vld [vmem:[%s17752_s0 + $0x2c] sm:$0xff]   ;;  %v12961_v52 = vld [vmem:[#allocation3 + $0x1b8] ss:$24 sps:$4 sm:$0xff]  }
  0xa2   :  { %389 = vmatpush1.bf16.msra.mxu0 %v12908_v8  ;;  %v12951_v49 = vld [vmem:[%s17752_s0 + $0x3c] sm:$0xff]   ;;  %v12952_v50 = vld [vmem:[#allocation3 + $0x188] ss:$24 sps:$4 sm:$0xff]   ;;  %v12963_v51 = vld [vmem:[#allocation3 + $0x1bc] ss:$24 sps:$4 sm:$0xff]  }
  0xa3   :  { %11057 = vmatmul.mubr.msk.bf16.gmra.mrb[4].mxu0 %vm274_vm0, %v14427_v16  ;;  %11098 = vmatmul.mubr.msk.bf16.vlgmr.msra.gmra.mrb[4].mxu1 %vm274_vm0, %v14432_v17  ;;  %v12955_v53 = vld [vmem:[%s17752_s0 + $0x44] sm:$0xff]   ;;  %v12956_v54 = vld [vmem:[%s17752_s0 + $0x4c] sm:$0xff]   ;;  %v12967_v56 = vld [vmem:[%s17752_s0 + $0x5c] sm:$0xff]  }
  0xa4   :  { %1186 = vmatpush1.bf16.msra.mxu1 %v12919_v18  ;;  %345 = vmatprep.mubr.bf16.mxu0 %v17762_v0  ;;  %v12972_v57 = vld [vmem:[#allocation3 + $0x10] ss:$24 sps:$4 sm:$0xff]   ;;  %v12978_v58 = vld [vmem:[#allocation3 + $0x44] ss:$24 sps:$4 sm:$0xff]   ;;  %v12976_v59 = vld [vmem:[#allocation3 + $0x40] ss:$24 sps:$4 sm:$0xff]  }
  0xa5   :  { %815 = vmatprep.mubr.bf16.mxu1 %v17762_v0  ;;  %1187 = vmatprep.subr.bf16.mxu1 %v12930_v20  ;;  %v12983_v60 = vld [vmem:[#allocation3 + $0xc4] ss:$24 sps:$4 sm:$0xff]   ;;  %v12968_v61 = vld [vmem:[%s17752_s0 + $0x64] sm:$0xff]   ;;  %v13941_v3 = vld [vmem:[#allocation3 + $0x90] ss:$24 sps:$4 sm:$0xff]  }
  0xa6   :  { %479 = vmatprep.subr.bf16.mxu0 %v12941_v24  ;;  %v12969_v62 = vld [vmem:[%s17752_s0 + $0x8] sm:$0xff]   ;;  %v13940_v2 = vld [vmem:[#allocation3 + $0x94] ss:$24 sps:$4 sm:$0xff]   ;;  %v14651_v11 = vld [vmem:[#allocation3 + $0xf0] ss:$24 sps:$4 sm:$0xff]  }
  0xa7   :  { %v13939_v63 = vld [vmem:[#allocation3 + $0x60] ss:$24 sps:$4 sm:$0xff]   ;;  %v13942_v4 = vld [vmem:[#allocation3 + $0x6c] ss:$24 sps:$4 sm:$0xff]   ;;  %v12975_v6 = vld [vmem:[%s17752_s0 + $0x20] sm:$0xff]  }
  0xa8   :  { %1188 = vmatpush1.bf16.msra.mxu1 %v12928_v19  ;;  %v12971_v5 = vld [vmem:[%s17752_s0 + $0x18] sm:$0xff]   ;;  %v12979_v7 = vld [vmem:[%s17752_s0 + $0x28] sm:$0xff]   ;;  %v14658_v13 = vld [vmem:[%s17752_s0 + $0x30] sm:$0xff]  }
  0xa9   :  { %1669 = vmatprep.subr.bf16.mxu1 %v12936_v23  ;;  %v14642_v8 = vld [vmem:[#allocation3 + $0xc0] ss:$24 sps:$4 sm:$0xff]   ;;  %v12989_v12 = vld [vmem:[#allocation3 + $0xd4] ss:$24 sps:$4 sm:$0xff]   ;;  %v14704_v24 = vld [vmem:[%s17752_s0 + $0x14] sm:$0xff]  }
  0xaa   :  { %v13944_v14 = vld [vmem:[%s17752_s0 + $0x8] sm:$0xff]   ;;  %v13945_v15 = vld [vmem:[%s17752_s0 + $0x10] sm:$0xff]   ;;  %v13950_v20 = vld [vmem:[#allocation3 + $0x74] ss:$24 sps:$4 sm:$0xff]  }
  0xab   :  { %11058 = vmatmul.mubr.msk.bf16.gmra.mrb[8].mxu0 %vm274_vm0, %v14443_v21  ;;  %11099 = vmatmul.mubr.msk.bf16.gmra.mrb[8].mxu1 %vm274_vm0, %v14448_v22  ;;  %v13948_v18 = vld [vmem:[#allocation3 + $0x9c] ss:$24 sps:$4 sm:$0xff]   ;;  %v13949_v19 = vld [vmem:[#allocation3 + $0x98] ss:$24 sps:$4 sm:$0xff]  }
  0xac   :  { %355 = vmatprep.mubr.bf16.mxu0 %v17762_v0  ;;  %825 = vmatprep.mubr.bf16.mxu1 %v17762_v0  ;;  %v13953_v23 = vld [vmem:[%s17752_s0 + $0x20] sm:$0xff]  }
  0xb3   :  { %11059 = vmatmul.mubr.msk.bf16.gmra.mrb[12].mxu0 %vm274_vm0, %v14459_v25  ;;  %11100 = vmatmul.mubr.msk.bf16.gmra.mrb[12].mxu1 %vm274_vm0, %v14464_v26 }
  0xb4   :  { %365 = vmatprep.mubr.bf16.mxu0 %v17762_v0  ;;  %835 = vmatprep.mubr.bf16.mxu1 %v17762_v0 }
  0xbb   :  { %11060 = vmatmul.mubr.msk.bf16.gmra.mrb[16].mxu0 %vm274_vm0, %v14475_v27  ;;  %11101 = vmatmul.mubr.msk.bf16.gmra.mrb[16].mxu1 %vm274_vm0, %v14480_v28 }
  0xbc   :  { %375 = vmatprep.mubr.bf16.mxu0 %v17762_v0  ;;  %845 = vmatprep.mubr.bf16.mxu1 %v17762_v0 }
  0xc3   :  { %11061 = vmatmul.mubr.msk.bf16.gmra.mrb[20].mxu0 %vm274_vm0, %v14416_v10  ;;  %11102 = vmatmul.mubr.msk.bf16.gmra.mrb[20].mxu1 %vm274_vm0, %v14491_v29 }
  0xc4   :  { %418 = vmatprep.mubr.bf16.mxu0 %v17762_v0  ;;  %855 = vmatprep.mubr.bf16.mxu1 %v17762_v0 }
  0xcb   :  { %11062 = vmatmul.mubr.msk.bf16.vlgmr.msra.gmra.mrb[24].mxu0 %vm274_vm0, %v14411_v9  ;;  %11103 = vmatmul.mubr.msk.bf16.gmra.mrb[0].mxu1 %vm274_vm0, %v14502_v30 }
  0xcc   :  { %428 = vmatprep.mubr.bf16.mxu0 %v17762_v0  ;;  %1217 = vmatprep.mubr.bf16.mxu1 %v17762_v0 }
  0xcd   :  { %480 = vmatpush1.bf16.msra.mxu0 %v12939_v31  ;;  %v14742_v31 = vld [vmem:[#allocation3 + $0x124] ss:$24 sps:$4 sm:$0xff]  }
  0xce   :  { %481 = vmatprep.subr.bf16.mxu0 %v12948_v32  ;;  %v14751_v32 = vld [vmem:[%s17752_s0 + $0x2c] sm:$0xff]  }
  0xd1   :  { %482 = vmatpush1.bf16.msra.mxu0 %v12946_v33  ;;  %v13959_v33 = vld [vmem:[#allocation3 + $0x70] ss:$24 sps:$4 sm:$0xff]  }
  0xd2   :  { %680 = vmatprep.subr.bf16.mxu0 %v12959_v34  ;;  %v13960_v34 = vld [vmem:[#allocation3 + $0xa4] ss:$24 sps:$4 sm:$0xff]  }
  0xd3   :  { %11063 = vmatmul.mubr.msk.bf16.gmra.mrb[28].mxu0 %vm274_vm0, %v14427_v16  ;;  %11134 = vmatmul.mubr.msk.bf16.vlgmr.msra.gmra.mrb[4].mxu1 %vm274_vm0, %v12933_v35  ;;  %v13961_v35 = vld [vmem:[#allocation3 + $0xa0] ss:$24 sps:$4 sm:$0xff]  }
  0xd4   :  { %1670 = vmatpush1.bf16.msra.mxu1 %v12934_v36  ;;  %438 = vmatprep.mubr.bf16.mxu0 %v17762_v0  ;;  %v13962_v36 = vld [vmem:[#allocation3 + $0x4] ss:$24 sps:$4 sm:$0xff]  }
  0xd5   :  { %1227 = vmatprep.mubr.bf16.mxu1 %v17762_v0  ;;  %1671 = vmatprep.subr.bf16.mxu1 %v12945_v37 }
  0xd8   :  { %1672 = vmatpush1.bf16.msra.mxu1 %v12943_v38 }
  0xd9   :  { %2153 = vmatprep.subr.bf16.mxu1 %v12954_v39 }
  0xdb   :  { %11064 = vmatmul.mubr.msk.bf16.gmra.mrb[32].mxu0 %vm274_vm0, %v14443_v21  ;;  %11135 = vmatmul.mubr.msk.bf16.gmra.mrb[8].mxu1 %vm274_vm0, %v12937_v40 }
  0xdc   :  { %448 = vmatprep.mubr.bf16.mxu0 %v17762_v0  ;;  %1237 = vmatprep.mubr.bf16.mxu1 %v17762_v0 }
  0xe3   :  { %11065 = vmatmul.mubr.msk.bf16.gmra.mrb[36].mxu0 %vm274_vm0, %v14459_v25  ;;  %11136 = vmatmul.mubr.msk.bf16.gmra.mrb[12].mxu1 %vm274_vm0, %v12938_v41 }
  0xe4   :  { %458 = vmatprep.mubr.bf16.mxu0 %v17762_v0  ;;  %1247 = vmatprep.mubr.bf16.mxu1 %v17762_v0 }
  0xeb   :  { %11066 = vmatmul.mubr.msk.bf16.gmra.mrb[40].mxu0 %vm274_vm0, %v14475_v27  ;;  %11137 = vmatmul.mubr.msk.bf16.gmra.mrb[16].mxu1 %vm274_vm0, %v12942_v42 }
  0xec   :  { %511 = vmatprep.mubr.bf16.mxu0 %v17762_v0  ;;  %1257 = vmatprep.mubr.bf16.mxu1 %v17762_v0 }
  0xf3   :  { %11068 = vmatmul.mubr.msk.bf16.vlgmr.msra.gmra.mrb[44].mxu0 %vm274_vm0, %v14411_v9  ;;  %11138 = vmatmul.mubr.msk.bf16.gmra.mrb[20].mxu1 %vm274_vm0, %v12949_v43  ;;  %v14644_v9 = vld [vmem:[#allocation3 + $0xf4] ss:$24 sps:$4 sm:$0xff]  }
  0xf4   :  { %521 = vmatprep.mubr.bf16.mxu0 %v17762_v0  ;;  %1267 = vmatprep.mubr.bf16.mxu1 %v17762_v0 }
  0xf5   :  { %681 = vmatpush1.bf16.msra.mxu0 %v12957_v44 }
  0xf6   :  { %682 = vmatprep.subr.bf16.mxu0 %v12966_v45 }
  0xf9   :  { %683 = vmatpush1.bf16.msra.mxu0 %v12964_v46 }
  0xfa   :  { %866 = vmatprep.subr.bf16.mxu0 %v12974_v47 }
  0xfb   :  { %11069 = vmatmul.mubr.msk.bf16.gmra.mrb[48].mxu0 %vm274_vm0, %v14427_v16  ;;  %11139 = vmatmul.mubr.msk.bf16.gmra.mrb[0].mxu1 %vm274_vm0, %v12950_v48  ;;  %v14678_v16 = vld [vmem:[%s17752_s0 + $0x4] sm:$0xff]  }
  0xfc   :  { %531 = vmatprep.mubr.bf16.mxu0 %v17762_v0  ;;  %1701 = vmatprep.mubr.bf16.mxu1 %v17762_v0  ;;  %v14803_v48 = vld [vmem:[#allocation3 + $0x120] ss:$24 sps:$4 sm:$0xff]  }
 0x103   :  { %11070 = vmatmul.mubr.msk.bf16.gmra.mrb[52].mxu0 %vm274_vm0, %v14443_v21  ;;  %11182 = vmatmul.mubr.msk.bf16.vlgmr.msra.gmra.mrb[4].mxu1 %vm274_vm0, %v12951_v49  ;;  %v13951_v21 = vld [vmem:[%s17752_s0 + $0x18] sm:$0xff]  }
 0x104   :  { %2154 = vmatpush1.bf16.msra.mxu1 %v12952_v50  ;;  %541 = vmatprep.mubr.bf16.mxu0 %v17762_v0  ;;  %v14807_v50 = vld [vmem:[#allocation3 + $0x154] ss:$24 sps:$4 sm:$0xff]  }
 0x105   :  { %1711 = vmatprep.mubr.bf16.mxu1 %v17762_v0  ;;  %2155 = vmatprep.subr.bf16.mxu1 %v12963_v51  ;;  %v14816_v51 = vld [vmem:[#allocation3 + $0x150] ss:$24 sps:$4 sm:$0xff]  }
 0x108   :  { %2156 = vmatpush1.bf16.msra.mxu1 %v12961_v52  ;;  %v14819_v52 = vld [vmem:[#allocation3 + $0x134] ss:$24 sps:$4 sm:$0xff]  }
 0x109   :  { %2587 = vmatprep.subr.bf16.mxu1 %v14405_v1  ;;  %v12970_v1 = vld [vmem:[%s17752_s0 + $0x10] sm:$0xff]  }
 0x10b   :  { %11071 = vmatmul.mubr.msk.bf16.gmra.mrb[56].mxu0 %vm274_vm0, %v14459_v25  ;;  %11183 = vmatmul.mubr.msk.bf16.gmra.mrb[8].mxu1 %vm274_vm0, %v12955_v53  ;;  %v13955_v25 = vld [vmem:[%s17752_s0 + $0x28] sm:$0xff]  }
 0x10c   :  { %551 = vmatprep.mubr.bf16.mxu0 %v17762_v0  ;;  %1721 = vmatprep.mubr.bf16.mxu1 %v17762_v0 }
 0x113   :  { %11072 = vmatmul.mubr.msk.bf16.gmra.mrb[60].mxu0 %vm274_vm0, %v14475_v27  ;;  %11184 = vmatmul.mubr.msk.bf16.gmra.mrb[12].mxu1 %vm274_vm0, %v12956_v54  ;;  %v14723_v27 = vld [vmem:[#allocation3 + $0xd0] ss:$24 sps:$4 sm:$0xff]  }
 0x114   :  { %561 = vmatprep.mubr.bf16.mxu0 %v17762_v0  ;;  %1731 = vmatprep.mubr.bf16.mxu1 %v17762_v0 }
 0x11b   :  { %11073 = vmatmul.mubr.msk.bf16.gmra.mrb[64].mxu0 %vm274_vm0, %v14416_v10  ;;  %11185 = vmatmul.mubr.msk.bf16.gmra.mrb[16].mxu1 %vm274_vm0, %v12960_v55  ;;  %v13943_v10 = vld [vmem:[%s17752_s0] sm:$0xff]  }
 0x11c   :  { %712 = vmatprep.mubr.bf16.mxu0 %v17762_v0  ;;  %1741 = vmatprep.mubr.bf16.mxu1 %v17762_v0 }
 0x123   :  { %11092 = vmatmul.mubr.msk.bf16.vlgmr.msra.gmra.mrb[0].mxu0 %vm274_vm0, %v14432_v17  ;;  %11186 = vmatmul.mubr.msk.bf16.gmra.mrb[20].mxu1 %vm274_vm0, %v12967_v56  ;;  %v13947_v17 = vld [vmem:[#allocation3 + $0x68] ss:$24 sps:$4 sm:$0xff]  }
 0x124   :  { %722 = vmatprep.mubr.bf16.mxu0 %v17762_v0  ;;  %1751 = vmatprep.mubr.bf16.mxu1 %v17762_v0 }
 0x125   :  { %867 = vmatpush1.bf16.msra.mxu0 %v12972_v57 }
 0x126   :  { %868 = vmatprep.subr.bf16.mxu0 %v12978_v58 }
 0x129   :  { %869 = vmatpush1.bf16.msra.mxu0 %v12976_v59 }
 0x12a   :  { %1092 = vmatprep.subr.bf16.mxu0 %v12983_v60 }
 0x12b   :  { %11093 = vmatmul.mubr.msk.bf16.gmra.mrb[4].mxu0 %vm274_vm0, %v14448_v22  ;;  %11187 = vmatmul.mubr.msk.bf16.gmra.mrb[0].mxu1 %vm274_vm0, %v12968_v61  ;;  %v14691_v22 = vld [vmem:[%s17752_s0 + $0xc] sm:$0xff]  }
 0x12c   :  { %732 = vmatprep.mubr.bf16.mxu0 %v17762_v0  ;;  %2185 = vmatprep.mubr.bf16.mxu1 %v17762_v0  ;;  %v13963_v61 = vld [vmem:[#allocation3] ss:$24 sps:$4 sm:$0xff]  }
 0x133   :  { %11094 = vmatmul.mubr.msk.bf16.gmra.mrb[8].mxu0 %vm274_vm0, %v14464_v26  ;;  %11218 = vmatmul.mubr.msk.bf16.vlgmr.msra.gmra.mrb[4].mxu1 %vm274_vm0, %v12969_v62  ;;  %v14717_v26 = vld [vmem:[%s17752_s0 + $0x1c] sm:$0xff]  }
 0x134   :  { %2588 = vmatpush1.bf16.msra.mxu1 %v13939_v63  ;;  %742 = vmatprep.mubr.bf16.mxu0 %v17762_v0  ;;  %v13964_v62 = vld [vmem:[#allocation3 + $0x34] ss:$24 sps:$4 sm:$0xff]   ;;  %v13965_v63 = vld [vmem:[#allocation3 + $0x30] ss:$24 sps:$4 sm:$0xff]  }
 0x135   :  { %2195 = vmatprep.mubr.bf16.mxu1 %v17762_v0  ;;  %2589 = vmatprep.subr.bf16.mxu1 %v13940_v2  ;;  %v14869_v2 = vld [vmem:[#allocation3 + $0x130] ss:$24 sps:$4 sm:$0xff]  }
 0x138   :  { %2590 = vmatpush1.bf16.msra.mxu1 %v13941_v3  ;;  %v14871_v3 = vld [vmem:[#allocation3 + $0x164] ss:$24 sps:$4 sm:$0xff]  }
 0x139   :  { %2680 = vmatprep.subr.bf16.mxu1 %v13942_v4  ;;  %v14876_v4 = vld [vmem:[%s17752_s0 + $0x3c] sm:$0xff]  }
 0x13b   :  { %11095 = vmatmul.mubr.msk.bf16.gmra.mrb[12].mxu0 %vm274_vm0, %v14480_v28  ;;  %11219 = vmatmul.mubr.msk.bf16.gmra.mrb[8].mxu1 %vm274_vm0, %v12970_v1  ;;  %v14725_v28 = vld [vmem:[#allocation3 + $0x104] ss:$24 sps:$4 sm:$0xff]  }
 0x13c   :  { %752 = vmatprep.mubr.bf16.mxu0 %v17762_v0  ;;  %2205 = vmatprep.mubr.bf16.mxu1 %v17762_v0  ;;  %v13966_v1 = vld [vmem:[#allocation3 + $0xc] ss:$24 sps:$4 sm:$0xff]  }
 0x143   :  { %11096 = vmatmul.mubr.msk.bf16.gmra.mrb[16].mxu0 %vm274_vm0, %v14491_v29  ;;  %11220 = vmatmul.mubr.msk.bf16.gmra.mrb[12].mxu1 %vm274_vm0, %v12971_v5  ;;  %v14732_v29 = vld [vmem:[%s17752_s0 + $0x24] sm:$0xff]  }
 0x144   :  { %762 = vmatprep.mubr.bf16.mxu0 %v17762_v0  ;;  %2215 = vmatprep.mubr.bf16.mxu1 %v17762_v0  ;;  %v14885_v5 = vld [vmem:[#allocation3 + $0x160] ss:$24 sps:$4 sm:$0xff]  }
 0x14b   :  { %11097 = vmatmul.mubr.msk.bf16.gmra.mrb[20].mxu0 %vm274_vm0, %v14502_v30  ;;  %11221 = vmatmul.mubr.msk.bf16.gmra.mrb[16].mxu1 %vm274_vm0, %v12975_v6  ;;  %v14736_v30 = vld [vmem:[#allocation3 + $0x100] ss:$24 sps:$4 sm:$0xff]   ;;  %v14888_v6 = vld [vmem:[#allocation3 + $0x184] ss:$24 sps:$4 sm:$0xff]  }
 0x14c   :  { %898 = vmatprep.mubr.bf16.mxu0 %v17762_v0  ;;  %2225 = vmatprep.mubr.bf16.mxu1 %v17762_v0 }
 0x153   :  { %11104 = vmatmul.mubr.msk.bf16.vlgmr.msra.gmra.mrb[44].mxu0 %vm274_vm0, %v13943_v10  ;;  %11222 = vmatmul.mubr.msk.bf16.gmra.mrb[20].mxu1 %vm274_vm0, %v12979_v7  ;;  %v14895_v7 = vld [vmem:[%s17752_s0 + $0x44] sm:$0xff]   ;;  %v14906_v10 = vld [vmem:[%s17752_s0 + $0x4c] sm:$0xff]  }
 0x154   :  { %908 = vmatprep.mubr.bf16.mxu0 %v17762_v0  ;;  %2235 = vmatprep.mubr.bf16.mxu1 %v17762_v0 }
 0x155   :  { %1093 = vmatpush1.bf16.msra.mxu0 %v14642_v8 }
 0x156   :  { %1094 = vmatprep.subr.bf16.mxu0 %v14644_v9 }
 0x159   :  { %1095 = vmatpush1.bf16.msra.mxu0 %v14651_v11 }
 0x15a   :  { %1278 = vmatprep.subr.bf16.mxu0 %v12989_v12  ;;  %v14913_v12 = vld [vmem:[%s17752_s0 + $0x38] sm:$0xff]  }
 0x15b   :  { %11105 = vmatmul.mubr.msk.bf16.gmra.mrb[48].mxu0 %vm274_vm0, %v13944_v14  ;;  %11223 = vmatmul.mubr.msk.bf16.gmra.mrb[0].mxu1 %vm274_vm0, %v14658_v13  ;;  %v13971_v14 = vld [vmem:[#allocation3 + $0x8] ss:$24 sps:$4 sm:$0xff]  }
 0x15c   :  { %918 = vmatprep.mubr.bf16.mxu0 %v17762_v0  ;;  %2619 = vmatprep.mubr.bf16.mxu1 %v17762_v0 }
 0x163   :  { %11106 = vmatmul.mubr.msk.bf16.gmra.mrb[52].mxu0 %vm274_vm0, %v13945_v15  ;;  %11230 = vmatmul.mubr.msk.bf16.vlgmr.msra.gmra.mrb[24].mxu1 %vm274_vm0, %v14678_v16  ;;  %v13972_v15 = vld [vmem:[#allocation3 + $0x3c] ss:$24 sps:$4 sm:$0xff]  }
 0x164   :  { %2681 = vmatpush1.bf16.msra.mxu1 %v13947_v17  ;;  %928 = vmatprep.mubr.bf16.mxu0 %v17762_v0  ;;  %v13974_v17 = vld [vmem:[#allocation3 + $0x14] ss:$24 sps:$4 sm:$0xff]  }
 0x165   :  { %2629 = vmatprep.mubr.bf16.mxu1 %v17762_v0  ;;  %2682 = vmatprep.subr.bf16.mxu1 %v13948_v18  ;;  %v14922_v18 = vld [vmem:[%s17752_s0 + $0x54] sm:$0xff]  }
 0x168   :  { %2683 = vmatpush1.bf16.msra.mxu1 %v13949_v19  ;;  %v14929_v19 = vld [vmem:[%s17752_s0 + $0x40] sm:$0xff]  }
 0x169   :  { %2773 = vmatprep.subr.bf16.mxu1 %v13950_v20  ;;  %v14938_v20 = vld [vmem:[%s17752_s0 + $0x5c] sm:$0xff]  }
 0x16b   :  { %11107 = vmatmul.mubr.msk.bf16.gmra.mrb[56].mxu0 %vm274_vm0, %v13951_v21  ;;  %11231 = vmatmul.mubr.msk.bf16.gmra.mrb[28].mxu1 %vm274_vm0, %v14691_v22  ;;  %v14945_v21 = vld [vmem:[%s17752_s0 + $0x48] sm:$0xff]  }
 0x16c   :  { %938 = vmatprep.mubr.bf16.mxu0 %v17762_v0  ;;  %2639 = vmatprep.mubr.bf16.mxu1 %v17762_v0 }
 0x173   :  { %11108 = vmatmul.mubr.msk.bf16.gmra.mrb[60].mxu0 %vm274_vm0, %v13953_v23  ;;  %11232 = vmatmul.mubr.msk.bf16.gmra.mrb[32].mxu1 %vm274_vm0, %v14704_v24 }
 0x174   :  { %948 = vmatprep.mubr.bf16.mxu0 %v17762_v0  ;;  %2649 = vmatprep.mubr.bf16.mxu1 %v17762_v0 }
 0x17b   :  { %11109 = vmatmul.mubr.msk.bf16.gmra.mrb[64].mxu0 %vm274_vm0, %v13955_v25  ;;  %11233 = vmatmul.mubr.msk.bf16.gmra.mrb[36].mxu1 %vm274_vm0, %v14717_v26 }
 0x17c   :  { %1124 = vmatprep.mubr.bf16.mxu0 %v17762_v0  ;;  %2659 = vmatprep.mubr.bf16.mxu1 %v17762_v0 }
 0x183   :  { %11128 = vmatmul.mubr.msk.bf16.vlgmr.msra.gmra.mrb[0].mxu0 %vm274_vm0, %v14678_v16  ;;  %11234 = vmatmul.mubr.msk.bf16.gmra.mrb[40].mxu1 %vm274_vm0, %v14732_v29 }
 0x184   :  { %1134 = vmatprep.mubr.bf16.mxu0 %v17762_v0  ;;  %2669 = vmatprep.mubr.bf16.mxu1 %v17762_v0 }
 0x185   :  { %1279 = vmatpush1.bf16.msra.mxu0 %v14723_v27 }
 0x186   :  { %1280 = vmatprep.subr.bf16.mxu0 %v14725_v28 }
 0x189   :  { %1281 = vmatpush1.bf16.msra.mxu0 %v14736_v30 }
 0x18a   :  { %1576 = vmatprep.subr.bf16.mxu0 %v14742_v31 }
 0x18b   :  { %11129 = vmatmul.mubr.msk.bf16.gmra.mrb[4].mxu0 %vm274_vm0, %v14691_v22  ;;  %11235 = vmatmul.mubr.msk.bf16.gmra.mrb[44].mxu1 %vm274_vm0, %v14751_v32 }
 0x18c   :  { %1144 = vmatprep.mubr.bf16.mxu0 %v17762_v0  ;;  %2712 = vmatprep.mubr.bf16.mxu1 %v17762_v0 }
 0x193   :  { %11130 = vmatmul.mubr.msk.bf16.gmra.mrb[8].mxu0 %vm274_vm0, %v14704_v24  ;;  %11236 = vmatmul.mubr.msk.bf16.vlgmr.msra.gmra.mrb[48].mxu1 %vm274_vm0, %v14678_v16 }
 0x194   :  { %2774 = vmatpush1.bf16.msra.mxu1 %v13959_v33  ;;  %1154 = vmatprep.mubr.bf16.mxu0 %v17762_v0 }
 0x195   :  { %2722 = vmatprep.mubr.bf16.mxu1 %v17762_v0  ;;  %2775 = vmatprep.subr.bf16.mxu1 %v13960_v34  ;;  %v14966_v34 = vld [vmem:[%s17752_s0 + $0x64] sm:$0xff]  }
 0x198   :  { %2776 = vmatpush1.bf16.msra.mxu1 %v13961_v35  ;;  %v14973_v35 = vld [vmem:[%s17752_s0 + $0x50] sm:$0xff]  }
 0x199   :  { %2866 = vmatprep.subr.bf16.mxu1 %v13962_v36 }
 0x19b   :  { %11131 = vmatmul.mubr.msk.bf16.gmra.mrb[12].mxu0 %vm274_vm0, %v14717_v26  ;;  %11237 = vmatmul.mubr.msk.bf16.gmra.mrb[52].mxu1 %vm274_vm0, %v14691_v22 }
 0x19c   :  { %1164 = vmatprep.mubr.bf16.mxu0 %v17762_v0  ;;  %2732 = vmatprep.mubr.bf16.mxu1 %v17762_v0 }
 0x19e   :  { %v14769_v37 = vpop.f32.mrb[24].mxu0 }
 0x19f   :  { %v14771_v38 = vpop.f32.mrb[25].mxu0 }
 0x1a0   :  { %v14773_v39 = vpop.f32.mrb[26].mxu0 }
 0x1a1   :  { %v14775_v40 = vpop.f32.mrb[27].mxu0 }
 0x1a3   :  { %11132 = vmatmul.mubr.msk.bf16.gmra.mrb[16].mxu0 %vm274_vm0, %v14732_v29  ;;  %11238 = vmatmul.mubr.msk.bf16.gmra.mrb[56].mxu1 %vm274_vm0, %v14704_v24 }
 0x1a4   :  { %1174 = vmatprep.mubr.bf16.mxu0 %v17762_v0  ;;  %2742 = vmatprep.mubr.bf16.mxu1 %v17762_v0 }
 0x1a6   :  { %v14783_v41 = vpop.f32.mrb[28].mxu0 }
 0x1a7   :  { %v14785_v42 = vpop.f32.mrb[29].mxu0 }
 0x1a8   :  { %v14787_v43 = vpop.f32.mrb[30].mxu0 }
 0x1a9   :  { %v14789_v44 = vpop.f32.mrb[31].mxu0 }
 0x1ab   :  { %11133 = vmatmul.mubr.msk.bf16.gmra.mrb[20].mxu0 %vm274_vm0, %v14751_v32  ;;  %11239 = vmatmul.mubr.msk.bf16.gmra.mrb[60].mxu1 %vm274_vm0, %v14717_v26 }
 0x1ac   :  { %1310 = vmatprep.mubr.bf16.mxu0 %v17762_v0  ;;  %2752 = vmatprep.mubr.bf16.mxu1 %v17762_v0 }
 0x1ae   :  { %v14797_v45 = vpop.f32.mrb[32].mxu0 }
 0x1af   :  { %v14799_v46 = vpop.f32.mrb[33].mxu0 }
 0x1b0   :  { %v14801_v47 = vpop.f32.mrb[34].mxu0 }
 0x1b1   :  { %v14805_v49 = vpop.f32.mrb[35].mxu0 }
 0x1b3   :  { %11140 = vmatmul.mubr.msk.bf16.vlgmr.msra.gmra.mrb[44].mxu0 %vm274_vm0, %v14678_v16  ;;  %11240 = vmatmul.mubr.msk.bf16.gmra.mrb[64].mxu1 %vm274_vm0, %v14732_v29 }
 0x1b4   :  { %1320 = vmatprep.mubr.bf16.mxu0 %v17762_v0  ;;  %2762 = vmatprep.mubr.bf16.mxu1 %v17762_v0 }
 0x1b5   :  { %1577 = vmatpush1.bf16.msra.mxu0 %v14803_v48 }
 0x1b6   :  { %1578 = vmatprep.subr.bf16.mxu0 %v14807_v50  ;;  %v14821_v53 = vpop.f32.mrb[36].mxu0 }
 0x1b7   :  { %v14823_v54 = vpop.f32.mrb[37].mxu0 }
 0x1b8   :  { %v14825_v55 = vpop.f32.mrb[38].mxu0 }
 0x1b9   :  { %1579 = vmatpush1.bf16.msra.mxu0 %v14816_v51  ;;  %v14828_v56 = vpop.f32.mrb[39].mxu0 }
 0x1ba   :  { %1762 = vmatprep.subr.bf16.mxu0 %v14819_v52 }
 0x1bb   :  { %11141 = vmatmul.mubr.msk.bf16.gmra.mrb[48].mxu0 %vm274_vm0, %v14691_v22  ;;  %11241 = vmatmul.mubr.msk.bf16.gmra.mrb[68].mxu1 %vm274_vm0, %v14751_v32 }
 0x1bc   :  { %1330 = vmatprep.mubr.bf16.mxu0 %v17762_v0  ;;  %2805 = vmatprep.mubr.bf16.mxu1 %v17762_v0 }
 0x1be   :  { %v14837_v57 = vpop.f32.mrb[40].mxu0 }
 0x1bf   :  { %v14839_v58 = vpop.f32.mrb[41].mxu0 }
 0x1c0   :  { %v14841_v59 = vpop.f32.mrb[42].mxu0 }
 0x1c1   :  { %v14843_v60 = vpop.f32.mrb[43].mxu0 }
 0x1c3   :  { %11142 = vmatmul.mubr.msk.bf16.gmra.mrb[52].mxu0 %vm274_vm0, %v14704_v24  ;;  %11242 = vmatmul.mubr.msk.bf16.vlgmr.msra.gmra.mrb[72].mxu1 %vm274_vm0, %v14678_v16  ;;  %v13973_v16 = vld [vmem:[#allocation3 + $0x38] ss:$24 sps:$4 sm:$0xff]  }
 0x1c4   :  { %2867 = vmatpush1.bf16.msra.mxu1 %v13963_v61  ;;  %1340 = vmatprep.mubr.bf16.mxu0 %v17762_v0 }
 0x1c5   :  { %2815 = vmatprep.mubr.bf16.mxu1 %v17762_v0  ;;  %2868 = vmatprep.subr.bf16.mxu1 %v13964_v62 }
 0x1c8   :  { %2869 = vmatpush1.bf16.msra.mxu1 %v13965_v63  ;;  %v14988_v63 = vld [vmem:[#allocation3 + $0x180] ss:$24 sps:$4 sm:$0xff]  }
 0x1c9   :  { %2959 = vmatprep.subr.bf16.mxu1 %v13966_v1 }
 0x1cb   :  { %11143 = vmatmul.mubr.msk.bf16.gmra.mrb[56].mxu0 %vm274_vm0, %v14717_v26  ;;  %11243 = vmatmul.mubr.msk.bf16.gmra.mrb[76].mxu1 %vm274_vm0, %v14691_v22 }
 0x1cc   :  { %1350 = vmatprep.mubr.bf16.mxu0 %v17762_v0  ;;  %2825 = vmatprep.mubr.bf16.mxu1 %v17762_v0 }
 0x1d3   :  { %11144 = vmatmul.mubr.msk.bf16.gmra.mrb[60].mxu0 %vm274_vm0, %v14732_v29  ;;  %11244 = vmatmul.mubr.msk.bf16.gmra.mrb[80].mxu1 %vm274_vm0, %v14704_v24 }
 0x1d4   :  { %1360 = vmatprep.mubr.bf16.mxu0 %v17762_v0  ;;  %2835 = vmatprep.mubr.bf16.mxu1 %v17762_v0 }
 0x1db   :  { %11145 = vmatmul.mubr.msk.bf16.gmra.mrb[64].mxu0 %vm274_vm0, %v14751_v32  ;;  %11245 = vmatmul.mubr.msk.bf16.gmra.mrb[84].mxu1 %vm274_vm0, %v14717_v26 }
 0x1dc   :  { %1608 = vmatprep.mubr.bf16.mxu0 %v17762_v0  ;;  %2845 = vmatprep.mubr.bf16.mxu1 %v17762_v0 }
 0x1e3   :  { %11176 = vmatmul.mubr.msk.bf16.vlgmr.msra.gmra.mrb[0].mxu0 %vm274_vm0, %v14876_v4  ;;  %11246 = vmatmul.mubr.msk.bf16.gmra.mrb[88].mxu1 %vm274_vm0, %v14732_v29 }
 0x1e4   :  { %1618 = vmatprep.mubr.bf16.mxu0 %v17762_v0  ;;  %2855 = vmatprep.mubr.bf16.mxu1 %v17762_v0 }
 0x1e5   :  { %1763 = vmatpush1.bf16.msra.mxu0 %v14869_v2 }
 0x1e6   :  { %1764 = vmatprep.subr.bf16.mxu0 %v14871_v3 }
 0x1e9   :  { %1765 = vmatpush1.bf16.msra.mxu0 %v14885_v5 }
 0x1ea   :  { %2060 = vmatprep.subr.bf16.mxu0 %v14888_v6 }
 0x1eb   :  { %11177 = vmatmul.mubr.msk.bf16.gmra.mrb[4].mxu0 %vm274_vm0, %v14895_v7  ;;  %11247 = vmatmul.mubr.msk.bf16.gmra.mrb[92].mxu1 %vm274_vm0, %v14751_v32 }
 0x1ec   :  { %1628 = vmatprep.mubr.bf16.mxu0 %v17762_v0  ;;  %2898 = vmatprep.mubr.bf16.mxu1 %v17762_v0 }
 0x1f3   :  { %11178 = vmatmul.mubr.msk.bf16.gmra.mrb[8].mxu0 %vm274_vm0, %v14906_v10  ;;  %11248 = vmatmul.mubr.msk.bf16.vlgmr.msra.gmra.mrb[24].mxu1 %vm274_vm0, %v14913_v12 }
 0x1f4   :  { %2960 = vmatpush1.bf16.msra.mxu1 %v13971_v14  ;;  %1638 = vmatprep.mubr.bf16.mxu0 %v17762_v0  ;;  %v14993_v14 = vld [vmem:[#allocation3 + $0x1b4] ss:$24 sps:$4 sm:$0xff]  }
 0x1f5   :  { %2908 = vmatprep.mubr.bf16.mxu1 %v17762_v0  ;;  %2961 = vmatprep.subr.bf16.mxu1 %v13972_v15 }
 0x1f8   :  { %2962 = vmatpush1.bf16.msra.mxu1 %v13973_v16 }
 0x1f9   :  { %3052 = vmatprep.subr.bf16.mxu1 %v13974_v17 }
 0x1fb   :  { %11179 = vmatmul.mubr.msk.bf16.gmra.mrb[12].mxu0 %vm274_vm0, %v14922_v18  ;;  %11249 = vmatmul.mubr.msk.bf16.gmra.mrb[28].mxu1 %vm274_vm0, %v14929_v19 }
 0x1fc   :  { %1648 = vmatprep.mubr.bf16.mxu0 %v17762_v0  ;;  %2918 = vmatprep.mubr.bf16.mxu1 %v17762_v0 }
 0x203   :  { %11180 = vmatmul.mubr.msk.bf16.gmra.mrb[16].mxu0 %vm274_vm0, %v14938_v20  ;;  %11250 = vmatmul.mubr.msk.bf16.gmra.mrb[32].mxu1 %vm274_vm0, %v14945_v21 }
 0x204   :  { %1658 = vmatprep.mubr.bf16.mxu0 %v17762_v0  ;;  %2928 = vmatprep.mubr.bf16.mxu1 %v17762_v0 }
 0x206   :  { %v2187_v22 = vpop.f32.mrb[4].mxu1 }
 0x207   :  { %v14952_v23 = vadd.f32 %v2187_v22, %v14769_v37  ;;  %v2189_v24 = vpop.f32.mrb[5].mxu1 }
 0x208   :  { %v14955_v25 = vadd.f32 %v2189_v24, %v14771_v38  ;;  %v2191_v26 = vpop.f32.mrb[6].mxu1 }
 0x209   :  { %v14958_v29 = vadd.f32 %v2191_v26, %v14773_v39  ;;  %v2193_v32 = vpop.f32.mrb[7].mxu1 }
 0x20a   :  { %v14961_v33 = vadd.f32 %v2193_v32, %v14775_v40 }
 0x20b   :  { %11181 = vmatmul.mubr.msk.bf16.gmra.mrb[20].mxu0 %vm274_vm0, %v14966_v34  ;;  %11251 = vmatmul.mubr.msk.bf16.gmra.mrb[36].mxu1 %vm274_vm0, %v14973_v35 }
 0x20c   :  { %1794 = vmatprep.mubr.bf16.mxu0 %v17762_v0  ;;  %2938 = vmatprep.mubr.bf16.mxu1 %v17762_v0 }
 0x20e   :  { %v2197_v36 = vpop.f32.mrb[8].mxu1 }
 0x20f   :  { %v14980_v37 = vadd.f32 %v2197_v36, %v14783_v41  ;;  %v2199_v38 = vpop.f32.mrb[9].mxu1  ;;  %v15000_v41 = vld [vmem:[%s17752_s0 + $0x58] sm:$0xff]  }
 0x210   :  { %v14983_v39 = vadd.f32 %v2199_v38, %v14785_v42  ;;  %v2201_v40 = vpop.f32.mrb[10].mxu1  ;;  %v15007_v42 = vld [vmem:[#allocation3 + $0x1b0] ss:$24 sps:$4 sm:$0xff]  }
 0x211   :  { %v14986_v61 = vadd.f32 %v2201_v40, %v14787_v43  ;;  %v2203_v62 = vpop.f32.mrb[11].mxu1 }
 0x212   :  { %v14991_v1 = vadd.f32 %v2203_v62, %v14789_v44  ;;  %v15010_v44 = vld [vmem:[#allocation3 + $0x194] ss:$24 sps:$4 sm:$0xff]  }
 0x213   :  { %11188 = vmatmul.mubr.msk.bf16.vlgmr.msra.gmra.mrb[44].mxu0 %vm274_vm0, %v14876_v4  ;;  %11252 = vmatmul.mubr.msk.bf16.gmra.mrb[40].mxu1 %vm274_vm0, %v15000_v41 }
 0x214   :  { %1804 = vmatprep.mubr.bf16.mxu0 %v17762_v0  ;;  %2948 = vmatprep.mubr.bf16.mxu1 %v17762_v0 }
 0x215   :  { %2061 = vmatpush1.bf16.msra.mxu0 %v14988_v63 }
 0x216   :  { %v2207_v43 = vpop.f32.mrb[12].mxu1  ;;  %2062 = vmatprep.subr.bf16.mxu0 %v14993_v14 }
 0x217   :  { %v15013_v15 = vadd.f32 %v2207_v43, %v14797_v45  ;;  %v2209_v16 = vpop.f32.mrb[13].mxu1  ;;  %v15031_v45 = vld [vmem:[%s17752_s0 + $0x60] sm:$0xff]  }
 0x218   :  { %v15016_v17 = vadd.f32 %v2209_v16, %v14799_v46  ;;  %v2211_v22 = vpop.f32.mrb[14].mxu1 }
 0x219   :  { %v15019_v24 = vadd.f32 %v2211_v22, %v14801_v47  ;;  %v2213_v26 = vpop.f32.mrb[15].mxu1  ;;  %2063 = vmatpush1.bf16.msra.mxu0 %v15007_v42 }
 0x21a   :  { %v15023_v32 = vadd.f32 %v2213_v26, %v14805_v49  ;;  %2246 = vmatprep.subr.bf16.mxu0 %v15010_v44 }
 0x21b   :  { %11189 = vmatmul.mubr.msk.bf16.gmra.mrb[48].mxu0 %vm274_vm0, %v14895_v7  ;;  %11253 = vmatmul.mubr.msk.bf16.gmra.mrb[44].mxu1 %vm274_vm0, %v15031_v45 }
 0x21c   :  { %1814 = vmatprep.mubr.bf16.mxu0 %v17762_v0  ;;  %2991 = vmatprep.mubr.bf16.mxu1 %v17762_v0 }
 0x21e   :  { %v2217_v46 = vpop.f32.mrb[16].mxu1 }
 0x21f   :  { %v15038_v47 = vadd.f32 %v2217_v46, %v14821_v53  ;;  %v2219_v49 = vpop.f32.mrb[17].mxu1  ;;  %v13983_v53 = vld [vmem:[#allocation3 + $0x10] ss:$24 sps:$4 sm:$0xff]   ;;  %v13985_v46 = vld [vmem:[#allocation3 + $0x40] ss:$24 sps:$4 sm:$0xff]  }
 0x220   :  { %v15041_v36 = vadd.f32 %v2219_v49, %v14823_v54  ;;  %v2221_v38 = vpop.f32.mrb[18].mxu1  ;;  %v13984_v54 = vld [vmem:[#allocation3 + $0x44] ss:$24 sps:$4 sm:$0xff]  }
 0x221   :  { %v15044_v40 = vadd.f32 %v2221_v38, %v14825_v55  ;;  %v2223_v62 = vpop.f32.mrb[19].mxu1 }
 0x222   :  { %v15047_v43 = vadd.f32 %v2223_v62, %v14828_v56  ;;  %v13986_v62 = vld [vmem:[#allocation3 + $0xc4] ss:$24 sps:$4 sm:$0xff]  }
 0x223   :  { %11190 = vmatmul.mubr.msk.bf16.gmra.mrb[52].mxu0 %vm274_vm0, %v14906_v10  ;;  %11254 = vmatmul.mubr.msk.bf16.vlgmr.msra.gmra.mrb[48].mxu1 %vm274_vm0, %v14913_v12 }
 0x224   :  { %3053 = vmatpush1.bf16.msra.mxu1 %v13983_v53  ;;  %1824 = vmatprep.mubr.bf16.mxu0 %v17762_v0 }
 0x225   :  { %3001 = vmatprep.mubr.bf16.mxu1 %v17762_v0  ;;  %3054 = vmatprep.subr.bf16.mxu1 %v13984_v54 }
 0x226   :  { %v2227_v55 = vpop.f32.mrb[20].mxu1 }
 0x227   :  { %v15056_v16 = vadd.f32 %v2227_v55, %v14837_v57  ;;  %v2229_v56 = vpop.f32.mrb[21].mxu1  ;;  %v15095_v55 = vld [vmem:[#allocation3 + $0x1c4] ss:$24 sps:$4 sm:$0xff]  }
 0x228   :  { %v15059_v22 = vadd.f32 %v2229_v56, %v14839_v58  ;;  %v2231_v26 = vpop.f32.mrb[22].mxu1  ;;  %3055 = vmatpush1.bf16.msra.mxu1 %v13985_v46  ;;  %v15100_v56 = vld [vmem:[%s17752_s0 + $0x8] sm:$0xff]   ;;  %v15116_v46 = vld [vmem:[%s17752_s0 + $0x10] sm:$0xff]  }
 0x229   :  { %v15062_v49 = vadd.f32 %v2231_v26, %v14841_v59  ;;  %v2233_v38 = vpop.f32.mrb[23].mxu1  ;;  %3145 = vmatprep.subr.bf16.mxu1 %v13986_v62  ;;  %v15109_v26 = vld [vmem:[#allocation3 + $0x1c0] ss:$24 sps:$4 sm:$0xff]   ;;  %v13990_v62 = vld [vmem:[#allocation3 + $0xcc] ss:$24 sps:$4 sm:$0xff]  }
 0x22a   :  { %v15065_v53 = vadd.f32 %v2233_v38, %v14843_v60  ;;  %v15093_v60 = vld [vmem:[#allocation3 + $0x190] ss:$24 sps:$4 sm:$0xff]  }
 0x22b   :  { %17770 = vst [vmem:[#allocation21_spill] sm:$0xff] %v15062_v49  ;;  %11191 = vmatmul.mubr.msk.bf16.gmra.mrb[56].mxu0 %vm274_vm0, %v14922_v18  ;;  %11255 = vmatmul.mubr.msk.bf16.gmra.mrb[52].mxu1 %vm274_vm0, %v14929_v19  ;;  %v15127_v38 = vld [vmem:[%s17752_s0 + $0x18] sm:$0xff]  }
 0x22c   :  { %17771 = vst [vmem:[#allocation22_spill] sm:$0xff] %v15065_v53  ;;  %1834 = vmatprep.mubr.bf16.mxu0 %v17762_v0  ;;  %3011 = vmatprep.mubr.bf16.mxu1 %v17762_v0 }
 0x22e   :  { %v15073_v57 = vpop.f32.mrb[0].mxu1 }
 0x22f   :  { %17772 = vst [vmem:[#allocation23_spill] sm:$0xff] %v15073_v57  ;;  %v15075_v58 = vpop.f32.mrb[1].mxu1 }
 0x230   :  { %17773 = vst [vmem:[#allocation24_spill] sm:$0xff] %v15075_v58  ;;  %v15077_v59 = vpop.f32.mrb[2].mxu1 }
 0x231   :  { %17774 = vst [vmem:[#allocation25_spill] sm:$0xff] %v15077_v59  ;;  %v15079_v54 = vpop.f32.mrb[3].mxu1 }
 0x232   :  { %17775 = vst [vmem:[#allocation26_spill] sm:$0xff] %v15079_v54  ;;  %v15141_v54 = vld [vmem:[%s17752_s0 + $0x20] sm:$0xff]  }
 0x233   :  { %11192 = vmatmul.mubr.msk.bf16.gmra.mrb[60].mxu0 %vm274_vm0, %v14938_v20  ;;  %11256 = vmatmul.mubr.msk.bf16.gmra.mrb[56].mxu1 %vm274_vm0, %v14945_v21 }
 0x234   :  { %1844 = vmatprep.mubr.bf16.mxu0 %v17762_v0  ;;  %3021 = vmatprep.mubr.bf16.mxu1 %v17762_v0 }
 0x23b   :  { %11193 = vmatmul.mubr.msk.bf16.gmra.mrb[64].mxu0 %vm274_vm0, %v14966_v34  ;;  %11257 = vmatmul.mubr.msk.bf16.gmra.mrb[60].mxu1 %vm274_vm0, %v14973_v35 }
 0x23c   :  { %2092 = vmatprep.mubr.bf16.mxu0 %v17762_v0  ;;  %3031 = vmatprep.mubr.bf16.mxu1 %v17762_v0 }
 0x243   :  { %11212 = vmatmul.mubr.msk.bf16.vlgmr.msra.gmra.mrb[0].mxu0 %vm274_vm0, %v15100_v56  ;;  %11258 = vmatmul.mubr.msk.bf16.gmra.mrb[64].mxu1 %vm274_vm0, %v15000_v41 }
 0x244   :  { %2102 = vmatprep.mubr.bf16.mxu0 %v17762_v0  ;;  %3041 = vmatprep.mubr.bf16.mxu1 %v17762_v0 }
 0x245   :  { %2247 = vmatpush1.bf16.msra.mxu0 %v15093_v60 }
 0x246   :  { %2248 = vmatprep.subr.bf16.mxu0 %v15095_v55 }
 0x249   :  { %2249 = vmatpush1.bf16.msra.mxu0 %v15109_v26 }
 0x24b   :  { %11213 = vmatmul.mubr.msk.bf16.gmra.mrb[4].mxu0 %vm274_vm0, %v15116_v46  ;;  %11259 = vmatmul.mubr.msk.bf16.gmra.mrb[68].mxu1 %vm274_vm0, %v15031_v45 }
 0x24c   :  { %2112 = vmatprep.mubr.bf16.mxu0 %v17762_v0  ;;  %3084 = vmatprep.mubr.bf16.mxu1 %v17762_v0 }
 0x253   :  { %11214 = vmatmul.mubr.msk.bf16.gmra.mrb[8].mxu0 %vm274_vm0, %v15127_v38  ;;  %11260 = vmatmul.mubr.msk.bf16.vlgmr.msra.gmra.mrb[72].mxu1 %vm274_vm0, %v14913_v12  ;;  %v13996_v12 = vld [vmem:[#allocation3 + $0xd4] ss:$24 sps:$4 sm:$0xff]  }
 0x254   :  { %3146 = vmatpush1.bf16.msra.mxu1 %v14642_v8  ;;  %2122 = vmatprep.mubr.bf16.mxu0 %v17762_v0  ;;  %v15152_v8 = vld [vmem:[%s17752_s0 + $0x28] sm:$0xff]  }
 0x255   :  { %3094 = vmatprep.mubr.bf16.mxu1 %v17762_v0  ;;  %3147 = vmatprep.subr.bf16.mxu1 %v14644_v9  ;;  %v13993_v9 = vld [vmem:[#allocation3 + $0xc8] ss:$24 sps:$4 sm:$0xff]  }
 0x258   :  { %3148 = vmatpush1.bf16.msra.mxu1 %v14651_v11  ;;  %v13994_v11 = vld [vmem:[#allocation3 + $0xfc] ss:$24 sps:$4 sm:$0xff]  }
 0x259   :  { %3238 = vmatprep.subr.bf16.mxu1 %v13990_v62 }
 0x25b   :  { %11215 = vmatmul.mubr.msk.bf16.gmra.mrb[12].mxu0 %vm274_vm0, %v15141_v54  ;;  %11261 = vmatmul.mubr.msk.bf16.gmra.mrb[76].mxu1 %vm274_vm0, %v14929_v19  ;;  %v15201_v19 = vld [vmem:[%s17752_s0 + $0x30] sm:$0xff]  }
 0x25c   :  { %2132 = vmatprep.mubr.bf16.mxu0 %v17762_v0  ;;  %3104 = vmatprep.mubr.bf16.mxu1 %v17762_v0 }
 0x263   :  { %11216 = vmatmul.mubr.msk.bf16.gmra.mrb[16].mxu0 %vm274_vm0, %v15152_v8  ;;  %11262 = vmatmul.mubr.msk.bf16.gmra.mrb[80].mxu1 %vm274_vm0, %v14945_v21 }
 0x264   :  { %2142 = vmatprep.mubr.bf16.mxu0 %v17762_v0  ;;  %3114 = vmatprep.mubr.bf16.mxu1 %v17762_v0 }
 0x26b   :  { %11217 = vmatmul.mubr.msk.bf16.gmra.mrb[20].mxu0 %vm274_vm0, %v14658_v13  ;;  %11263 = vmatmul.mubr.msk.bf16.gmra.mrb[84].mxu1 %vm274_vm0, %v14973_v35  ;;  %v13995_v13 = vld [vmem:[#allocation3 + $0xf8] ss:$24 sps:$4 sm:$0xff]  }
 0x26c   :  { %3124 = vmatprep.mubr.bf16.mxu1 %v17762_v0  ;;  %2278 = vmatprep.mubr.bf16.mxu0 %v17762_v0 }
 0x273   :  { %11264 = vmatmul.mubr.msk.bf16.gmra.mrb[88].mxu1 %vm274_vm0, %v15000_v41  ;;  %11224 = vmatmul.mubr.msk.bf16.vlgmr.msra.gmra.mrb[44].mxu0 %vm274_vm0, %v15100_v56 }
 0x274   :  { %3134 = vmatprep.mubr.bf16.mxu1 %v17762_v0  ;;  %2288 = vmatprep.mubr.bf16.mxu0 %v17762_v0 }
 0x27b   :  { %11265 = vmatmul.mubr.msk.bf16.gmra.mrb[92].mxu1 %vm274_vm0, %v15031_v45  ;;  %11225 = vmatmul.mubr.msk.bf16.gmra.mrb[48].mxu0 %vm274_vm0, %v15116_v46 }
 0x27c   :  { %3177 = vmatprep.mubr.bf16.mxu1 %v17762_v0  ;;  %2298 = vmatprep.mubr.bf16.mxu0 %v17762_v0 }
 0x283   :  { %11266 = vmatmul.mubr.msk.bf16.vlgmr.msra.gmra.mrb[24].mxu1 %vm274_vm0, %v14876_v4  ;;  %11226 = vmatmul.mubr.msk.bf16.gmra.mrb[52].mxu0 %vm274_vm0, %v15127_v38 }
 0x284   :  { %3239 = vmatpush1.bf16.msra.mxu1 %v13993_v9  ;;  %3187 = vmatprep.mubr.bf16.mxu1 %v17762_v0 }
 0x285   :  { %2308 = vmatprep.mubr.bf16.mxu0 %v17762_v0  ;;  %3240 = vmatprep.subr.bf16.mxu1 %v13994_v11 }
 0x288   :  { %3241 = vmatpush1.bf16.msra.mxu1 %v13995_v13 }
 0x289   :  { %3331 = vmatprep.subr.bf16.mxu1 %v13996_v12 }
 0x28b   :  { %11267 = vmatmul.mubr.msk.bf16.gmra.mrb[28].mxu1 %vm274_vm0, %v14895_v7  ;;  %11227 = vmatmul.mubr.msk.bf16.gmra.mrb[56].mxu0 %vm274_vm0, %v15141_v54 }
 0x28c   :  { %3197 = vmatprep.mubr.bf16.mxu1 %v17762_v0  ;;  %2318 = vmatprep.mubr.bf16.mxu0 %v17762_v0 }
 0x293   :  { %11268 = vmatmul.mubr.msk.bf16.gmra.mrb[32].mxu1 %vm274_vm0, %v14906_v10  ;;  %11228 = vmatmul.mubr.msk.bf16.gmra.mrb[60].mxu0 %vm274_vm0, %v15152_v8 }
 0x294   :  { %3207 = vmatprep.mubr.bf16.mxu1 %v17762_v0  ;;  %2328 = vmatprep.mubr.bf16.mxu0 %v17762_v0 }
 0x29b   :  { %11269 = vmatmul.mubr.msk.bf16.gmra.mrb[36].mxu1 %vm274_vm0, %v14922_v18  ;;  %11229 = vmatmul.mubr.msk.bf16.gmra.mrb[64].mxu0 %vm274_vm0, %v15201_v19 }
 0x29c   :  { %3217 = vmatprep.mubr.bf16.mxu1 %v17762_v0 }
 0x2a3   :  { %11270 = vmatmul.mubr.msk.bf16.gmra.mrb[40].mxu1 %vm274_vm0, %v14938_v20 }
 0x2a4   :  { %3227 = vmatprep.mubr.bf16.mxu1 %v17762_v0 }
 0x2ab   :  { %11271 = vmatmul.mubr.msk.bf16.gmra.mrb[44].mxu1 %vm274_vm0, %v14966_v34 }
 0x2ac   :  { %3270 = vmatprep.mubr.bf16.mxu1 %v17762_v0 }
 0x2b3   :  { %11272 = vmatmul.mubr.msk.bf16.vlgmr.msra.gmra.mrb[48].mxu1 %vm274_vm0, %v14876_v4 }
 0x2b4   :  { %3332 = vmatpush1.bf16.msra.mxu1 %v14723_v27  ;;  %3280 = vmatprep.mubr.bf16.mxu1 %v17762_v0  ;;  %v13998_v27 = vld [vmem:[#allocation3 + $0x12c] ss:$24 sps:$4 sm:$0xff]  }
 0x2b5   :  { %3333 = vmatprep.subr.bf16.mxu1 %v14725_v28  ;;  %v13999_v28 = vld [vmem:[#allocation3 + $0x128] ss:$24 sps:$4 sm:$0xff]  }
 0x2b8   :  { %3334 = vmatpush1.bf16.msra.mxu1 %v14736_v30  ;;  %v14000_v30 = vld [vmem:[#allocation3 + $0x15c] ss:$24 sps:$4 sm:$0xff]  }
 0x2b9   :  { %3496 = vmatprep.subr.bf16.mxu1 %v14742_v31 }
 0x2bb   :  { %11273 = vmatmul.mubr.msk.bf16.gmra.mrb[52].mxu1 %vm274_vm0, %v14895_v7 }
 0x2bc   :  { %3290 = vmatprep.mubr.bf16.mxu1 %v17762_v0 }
 0x2c3   :  { %11274 = vmatmul.mubr.msk.bf16.gmra.mrb[56].mxu1 %vm274_vm0, %v14906_v10 }
 0x2c4   :  { %3300 = vmatprep.mubr.bf16.mxu1 %v17762_v0 }
 0x2cb   :  { %11275 = vmatmul.mubr.msk.bf16.gmra.mrb[60].mxu1 %vm274_vm0, %v14922_v18 }
 0x2cc   :  { %3310 = vmatprep.mubr.bf16.mxu1 %v17762_v0 }
 0x2d3   :  { %11276 = vmatmul.mubr.msk.bf16.gmra.mrb[64].mxu1 %vm274_vm0, %v14938_v20 }
 0x2d4   :  { %3320 = vmatprep.mubr.bf16.mxu1 %v17762_v0 }
 0x2db   :  { %11277 = vmatmul.mubr.msk.bf16.gmra.mrb[68].mxu1 %vm274_vm0, %v14966_v34 }
 0x2dc   :  { %3363 = vmatprep.mubr.bf16.mxu1 %v17762_v0 }
 0x2e3   :  { %11278 = vmatmul.mubr.msk.bf16.vlgmr.msra.gmra.mrb[72].mxu1 %vm274_vm0, %v14876_v4 }
 0x2e4   :  { %3497 = vmatpush1.bf16.msra.mxu1 %v14803_v48  ;;  %3373 = vmatprep.mubr.bf16.mxu1 %v17762_v0 }
 0x2e5   :  { %3498 = vmatprep.subr.bf16.mxu1 %v14807_v50 }
 0x2e8   :  { %3499 = vmatpush1.bf16.msra.mxu1 %v14816_v51  ;;  %v14001_v51 = vld [vmem:[#allocation3 + $0x158] ss:$24 sps:$4 sm:$0xff]  }
 0x2e9   :  { %3589 = vmatprep.subr.bf16.mxu1 %v13998_v27 }
 0x2eb   :  { %11279 = vmatmul.mubr.msk.bf16.gmra.mrb[76].mxu1 %vm274_vm0, %v14895_v7 }
 0x2ec   :  { %3383 = vmatprep.mubr.bf16.mxu1 %v17762_v0 }
 0x2f3   :  { %11280 = vmatmul.mubr.msk.bf16.gmra.mrb[80].mxu1 %vm274_vm0, %v14906_v10 }
 0x2f4   :  { %3393 = vmatprep.mubr.bf16.mxu1 %v17762_v0 }
 0x2fb   :  { %11281 = vmatmul.mubr.msk.bf16.gmra.mrb[84].mxu1 %vm274_vm0, %v14922_v18 }
 0x2fc   :  { %3403 = vmatprep.mubr.bf16.mxu1 %v17762_v0 }
 0x303   :  { %11282 = vmatmul.mubr.msk.bf16.gmra.mrb[88].mxu1 %vm274_vm0, %v14938_v20 }
 0x304   :  { %3413 = vmatprep.mubr.bf16.mxu1 %v17762_v0 }
 0x30b   :  { %11283 = vmatmul.mubr.msk.bf16.gmra.mrb[92].mxu1 %vm274_vm0, %v14966_v34 }
 0x30c   :  { %3528 = vmatprep.mubr.bf16.mxu1 %v17762_v0 }
 0x313   :  { %11284 = vmatmul.mubr.msk.bf16.vlgmr.msra.gmra.mrb[24].mxu1 %vm274_vm0, %v15100_v56 }
 0x314   :  { %3590 = vmatpush1.bf16.msra.mxu1 %v13999_v28  ;;  %3538 = vmatprep.mubr.bf16.mxu1 %v17762_v0 }
 0x315   :  { %3591 = vmatprep.subr.bf16.mxu1 %v14000_v30 }
 0x316   :  { %v15258_v31 = vpop.f32.mrb[0].mxu0 }
 0x317   :  { %v15260_v48 = vpop.f32.mrb[1].mxu0 }
 0x318   :  { %v15262_v50 = vpop.f32.mrb[2].mxu0  ;;  %3592 = vmatpush1.bf16.msra.mxu1 %v14001_v51 }
 0x319   :  { %v15264_v4 = vpop.f32.mrb[3].mxu0  ;;  %3682 = vmatprep.subr.bf16.mxu1 %v14819_v52 }
 0x31b   :  { %11285 = vmatmul.mubr.msk.bf16.gmra.mrb[28].mxu1 %vm274_vm0, %v15116_v46 }
 0x31c   :  { %3548 = vmatprep.mubr.bf16.mxu1 %v17762_v0 }
 0x31e   :  { %v15270_v7 = vpop.f32.mrb[4].mxu0 }
 0x31f   :  { %v15272_v10 = vpop.f32.mrb[5].mxu0 }
 0x320   :  { %v15274_v18 = vpop.f32.mrb[6].mxu0 }
 0x321   :  { %v15276_v20 = vpop.f32.mrb[7].mxu0 }
 0x323   :  { %11286 = vmatmul.mubr.msk.bf16.gmra.mrb[32].mxu1 %vm274_vm0, %v15127_v38 }
 0x324   :  { %3558 = vmatprep.mubr.bf16.mxu1 %v17762_v0 }
 0x326   :  { %v15281_v21 = vpop.f32.mrb[8].mxu0 }
 0x327   :  { %v15283_v52 = vpop.f32.mrb[9].mxu0 }
 0x328   :  { %v15285_v34 = vpop.f32.mrb[10].mxu0 }
 0x329   :  { %v15287_v35 = vpop.f32.mrb[11].mxu0 }
 0x32b   :  { %11287 = vmatmul.mubr.msk.bf16.gmra.mrb[36].mxu1 %vm274_vm0, %v15141_v54 }
 0x32c   :  { %3568 = vmatprep.mubr.bf16.mxu1 %v17762_v0 }
 0x32e   :  { %v15292_v41 = vpop.f32.mrb[12].mxu0 }
 0x32f   :  { %v15294_v45 = vpop.f32.mrb[13].mxu0 }
 0x330   :  { %v15296_v62 = vpop.f32.mrb[14].mxu0 }
 0x331   :  { %v15298_v9 = vpop.f32.mrb[15].mxu0 }
 0x333   :  { %11288 = vmatmul.mubr.msk.bf16.gmra.mrb[40].mxu1 %vm274_vm0, %v15152_v8 }
 0x334   :  { %3578 = vmatprep.mubr.bf16.mxu1 %v17762_v0 }
 0x336   :  { %v15303_v11 = vpop.f32.mrb[16].mxu0 }
 0x337   :  { %v15305_v13 = vpop.f32.mrb[17].mxu0 }
 0x338   :  { %v15307_v12 = vpop.f32.mrb[18].mxu0 }
 0x339   :  { %v15309_v27 = vpop.f32.mrb[19].mxu0 }
 0x33b   :  { %11289 = vmatmul.mubr.msk.bf16.gmra.mrb[44].mxu1 %vm274_vm0, %v15201_v19 }
 0x33c   :  { %3621 = vmatprep.mubr.bf16.mxu1 %v17762_v0 }
 0x33e   :  { %v15314_v28 = vpop.f32.mrb[20].mxu0 }
 0x33f   :  { %v15316_v30 = vpop.f32.mrb[21].mxu0 }
 0x340   :  { %v15318_v51 = vpop.f32.mrb[22].mxu0 }
 0x341   :  { %v15320_v59 = vpop.f32.mrb[23].mxu0 }
 0x343   :  { %11290 = vmatmul.mubr.msk.bf16.vlgmr.msra.gmra.mrb[48].mxu1 %vm274_vm0, %v15100_v56 }
 0x344   :  { %3683 = vmatpush1.bf16.msra.mxu1 %v14869_v2  ;;  %3631 = vmatprep.mubr.bf16.mxu1 %v17762_v0 }
 0x345   :  { %3684 = vmatprep.subr.bf16.mxu1 %v14871_v3 }
 0x346   :  { %v15327_v58 = vpop.f32.mrb[44].mxu0 }
 0x347   :  { %17776 = vst [vmem:[#allocation27_spill] sm:$0xff] %v15327_v58  ;;  %v15329_v57 = vpop.f32.mrb[45].mxu0 }
 0x348   :  { %17777 = vst [vmem:[#allocation28_spill] sm:$0xff] %v15329_v57  ;;  %v15331_v53 = vpop.f32.mrb[46].mxu0  ;;  %3685 = vmatpush1.bf16.msra.mxu1 %v14885_v5 }
 0x349   :  { %17778 = vst [vmem:[#allocation29_spill] sm:$0xff] %v15331_v53  ;;  %v15334_v49 = vpop.f32.mrb[47].mxu0  ;;  %3907 = vmatprep.subr.bf16.mxu1 %v14888_v6 }
 0x34a   :  { %17779 = vst [vmem:[#allocation30_spill] sm:$0xff] %v15334_v49 }
 0x34b   :  { %11291 = vmatmul.mubr.msk.bf16.gmra.mrb[52].mxu1 %vm274_vm0, %v15116_v46 }
 0x34c   :  { %3641 = vmatprep.mubr.bf16.mxu1 %v17762_v0 }
 0x34e   :  { %v15340_v2 = vpop.f32.mrb[48].mxu0 }
 0x34f   :  { %17780 = vst [vmem:[#allocation31_spill] sm:$0xff] %v15340_v2  ;;  %v15342_v3 = vpop.f32.mrb[49].mxu0 }
 0x350   :  { %17781 = vst [vmem:[#allocation32_spill] sm:$0xff] %v15342_v3  ;;  %v15344_v58 = vpop.f32.mrb[50].mxu0 }
 0x351   :  { %17782 = vst [vmem:[#allocation33_spill] sm:$0xff] %v15344_v58  ;;  %v15346_v57 = vpop.f32.mrb[51].mxu0 }
 0x352   :  { %17783 = vst [vmem:[#allocation34_spill] sm:$0xff] %v15346_v57 }
 0x353   :  { %11292 = vmatmul.mubr.msk.bf16.gmra.mrb[56].mxu1 %vm274_vm0, %v15127_v38 }
 0x354   :  { %3651 = vmatprep.mubr.bf16.mxu1 %v17762_v0 }
 0x356   :  { %v15351_v5 = vpop.f32.mrb[52].mxu0 }
 0x357   :  { %17784 = vst [vmem:[#allocation35_spill] sm:$0xff] %v15351_v5  ;;  %v15353_v6 = vpop.f32.mrb[53].mxu0 }
 0x358   :  { %17785 = vst [vmem:[#allocation36_spill] sm:$0xff] %v15353_v6  ;;  %v15355_v49 = vpop.f32.mrb[54].mxu0 }
 0x359   :  { %17786 = vst [vmem:[#allocation37_spill] sm:$0xff] %v15355_v49  ;;  %v15357_v53 = vpop.f32.mrb[55].mxu0 }
 0x35a   :  { %17787 = vst [vmem:[#allocation38_spill] sm:$0xff] %v15357_v53 }
 0x35b   :  { %11293 = vmatmul.mubr.msk.bf16.gmra.mrb[60].mxu1 %vm274_vm0, %v15141_v54 }
 0x35c   :  { %3661 = vmatprep.mubr.bf16.mxu1 %v17762_v0 }
 0x35e   :  { %v15362_v58 = vpop.f32.mrb[56].mxu0 }
 0x35f   :  { %17788 = vst [vmem:[#allocation39_spill] sm:$0xff] %v15362_v58  ;;  %v15364_v57 = vpop.f32.mrb[57].mxu0 }
 0x360   :  { %17789 = vst [vmem:[#allocation40_spill] sm:$0xff] %v15364_v57  ;;  %v15366_v3 = vpop.f32.mrb[58].mxu0 }
 0x361   :  { %17790 = vst [vmem:[#allocation41_spill] sm:$0xff] %v15366_v3  ;;  %v15368_v2 = vpop.f32.mrb[59].mxu0 }
 0x362   :  { %17791 = vst [vmem:[#allocation42_spill] sm:$0xff] %v15368_v2 }
 0x363   :  { %11294 = vmatmul.mubr.msk.bf16.gmra.mrb[64].mxu1 %vm274_vm0, %v15152_v8 }
 0x364   :  { %3671 = vmatprep.mubr.bf16.mxu1 %v17762_v0 }
 0x366   :  { %v15373_v49 = vpop.f32.mrb[60].mxu0 }
 0x367   :  { %v15375_v53 = vpop.f32.mrb[61].mxu0 }
 0x368   :  { %17792 = vst [vmem:[#allocation43_spill] sm:$0xff] %v15375_v53  ;;  %v15377_v6 = vpop.f32.mrb[62].mxu0 }
 0x369   :  { %17793 = vst [vmem:[#allocation44_spill] sm:$0xff] %v15377_v6  ;;  %v15379_v5 = vpop.f32.mrb[63].mxu0 }
 0x36a   :  { %17794 = vst [vmem:[#allocation45_spill] sm:$0xff] %v15379_v5  ;;  %v14002_v5 = vld [vmem:[#allocation3 + $0x18c] ss:$24 sps:$4 sm:$0xff]  }
 0x36b   :  { %11295 = vmatmul.mubr.msk.bf16.gmra.mrb[68].mxu1 %vm274_vm0, %v15201_v19 }
 0x36c   :  { %3714 = vmatprep.mubr.bf16.mxu1 %v17762_v0 }
 0x36e   :  { %v15384_v3 = vpop.f32.mrb[64].mxu0 }
 0x36f   :  { %17795 = vst [vmem:[#allocation46_spill] sm:$0xff] %v15384_v3  ;;  %v15386_v2 = vpop.f32.mrb[65].mxu0 }
 0x370   :  { %17796 = vst [vmem:[#allocation47_spill] sm:$0xff] %v15386_v2  ;;  %v15388_v57 = vpop.f32.mrb[66].mxu0 }
 0x371   :  { %17797 = vst [vmem:[#allocation48_spill] sm:$0xff] %v15388_v57  ;;  %v15390_v58 = vpop.f32.mrb[67].mxu0 }
 0x372   :  { %17798 = vst [vmem:[#allocation49_spill] sm:$0xff] %v15390_v58 }
 0x373   :  { %11296 = vmatmul.mubr.msk.bf16.vlgmr.msra.gmra.mrb[72].mxu1 %vm274_vm0, %v15100_v56  ;;  %v14005_v56 = vld [vmem:[#allocation3 + $0x1b8] ss:$24 sps:$4 sm:$0xff]  }
 0x374   :  { %3908 = vmatpush1.bf16.msra.mxu1 %v14988_v63  ;;  %3724 = vmatprep.mubr.bf16.mxu1 %v17762_v0  ;;  %v13017_v63 = vld [vmem:[%s17752_s0 + $0x40] sm:$0xff]  }
 0x375   :  { %3909 = vmatprep.subr.bf16.mxu1 %v14993_v14  ;;  %v14003_v14 = vld [vmem:[#allocation3 + $0x188] ss:$24 sps:$4 sm:$0xff]  }
 0x378   :  { %3910 = vmatpush1.bf16.msra.mxu1 %v15007_v42  ;;  %v14004_v42 = vld [vmem:[#allocation3 + $0x1bc] ss:$24 sps:$4 sm:$0xff]  }
 0x379   :  { %4000 = vmatprep.subr.bf16.mxu1 %v14002_v5  ;;  %v13031_v5 = vld [vmem:[#allocation7 + $0x344] ss:$16 sps:$4 sm:$0xff]  }
 0x37b   :  { %11297 = vmatmul.mubr.msk.bf16.gmra.mrb[76].mxu1 %vm274_vm0, %v15116_v46  ;;  %v13019_v46 = vld [vmem:[%s17752_s0 + $0x50] sm:$0xff]  }
 0x37c   :  { %3734 = vmatprep.mubr.bf16.mxu1 %v17762_v0 }
 0x383   :  { %11298 = vmatmul.mubr.msk.bf16.gmra.mrb[80].mxu1 %vm274_vm0, %v15127_v38  ;;  %v13020_v38 = vld [vmem:[%s17752_s0 + $0x58] sm:$0xff]  }
 0x384   :  { %3744 = vmatprep.mubr.bf16.mxu1 %v17762_v0 }
 0x38b   :  { %11299 = vmatmul.mubr.msk.bf16.gmra.mrb[84].mxu1 %vm274_vm0, %v15141_v54  ;;  %v13018_v54 = vld [vmem:[%s17752_s0 + $0x48] sm:$0xff]  }
 0x38c   :  { %3754 = vmatprep.mubr.bf16.mxu1 %v17762_v0 }
 0x393   :  { %11300 = vmatmul.mubr.msk.bf16.gmra.mrb[88].mxu1 %vm274_vm0, %v15152_v8  ;;  %v13022_v8 = vld [vmem:[%s17752_s0 + $0x68] sm:$0xff]  }
 0x394   :  { %3764 = vmatprep.mubr.bf16.mxu1 %v17762_v0 }
 0x39b   :  { %11301 = vmatmul.mubr.msk.bf16.gmra.mrb[92].mxu1 %vm274_vm0, %v15201_v19  ;;  %v13026_v19 = vld [vmem:[#allocation7 + $0x320] ss:$16 sps:$4 sm:$0xff]  }
 0x39c   :  { %3939 = vmatprep.mubr.bf16.mxu1 %v17762_v0 }
 0x3a3   :  { %11320 = vmatmul.mubr.msk.bf16.vlgmr.msra.gmra.mrb[24].mxu1 %vm274_vm0, %v13017_v63 }
 0x3a4   :  { %4001 = vmatpush1.bf16.msra.mxu1 %v14003_v14  ;;  %3949 = vmatprep.mubr.bf16.mxu1 %v17762_v0  ;;  %v13034_v14 = vld [vmem:[#allocation7 + $0x364] ss:$16 sps:$4 sm:$0xff]  }
 0x3a5   :  { %4002 = vmatprep.subr.bf16.mxu1 %v14004_v42  ;;  %v13032_v42 = vld [vmem:[#allocation7 + $0x360] ss:$16 sps:$4 sm:$0xff]  }
 0x3a8   :  { %4003 = vmatpush1.bf16.msra.mxu1 %v14005_v56  ;;  %v13035_v56 = vld [vmem:[#allocation7 + $0x380] ss:$16 sps:$4 sm:$0xff]  }
 0x3a9   :  { %4093 = vmatprep.subr.bf16.mxu1 %v15010_v44  ;;  %v13021_v44 = vld [vmem:[%s17752_s0 + $0x60] sm:$0xff]  }
 0x3ab   :  { %11321 = vmatmul.mubr.msk.bf16.gmra.mrb[28].mxu1 %vm274_vm0, %v13018_v54 }
 0x3ac   :  { %3959 = vmatprep.mubr.bf16.mxu1 %v17762_v0 }
 0x3b3   :  { %11322 = vmatmul.mubr.msk.bf16.gmra.mrb[32].mxu1 %vm274_vm0, %v13019_v46 }
 0x3b4   :  { %3969 = vmatprep.mubr.bf16.mxu1 %v17762_v0 }
 0x3bb   :  { %11323 = vmatmul.mubr.msk.bf16.gmra.mrb[36].mxu1 %vm274_vm0, %v13020_v38 }
 0x3bc   :  { %3979 = vmatprep.mubr.bf16.mxu1 %v17762_v0 }
 0x3c3   :  { %11324 = vmatmul.mubr.msk.bf16.gmra.mrb[40].mxu1 %vm274_vm0, %v13021_v44 }
 0x3c4   :  { %3989 = vmatprep.mubr.bf16.mxu1 %v17762_v0 }
 0x3cb   :  { %11325 = vmatmul.mubr.msk.bf16.gmra.mrb[44].mxu1 %vm274_vm0, %v13022_v8 }
 0x3cc   :  { %4032 = vmatprep.mubr.bf16.mxu1 %v17762_v0 }
 0x3d3   :  { %11326 = vmatmul.mubr.msk.bf16.vlgmr.msra.gmra.mrb[48].mxu1 %vm274_vm0, %v13017_v63 }
 0x3d4   :  { %4094 = vmatpush1.bf16.msra.mxu1 %v15093_v60  ;;  %4042 = vmatprep.mubr.bf16.mxu1 %v17762_v0  ;;  %v13025_v60 = vld [vmem:[#allocation7 + $0x304] ss:$16 sps:$4 sm:$0xff]  }
 0x3d5   :  { %4095 = vmatprep.subr.bf16.mxu1 %v15095_v55  ;;  %v13023_v55 = vld [vmem:[#allocation7 + $0x300] ss:$16 sps:$4 sm:$0xff]   ;;  %5304 = vmatprep.subr.bf16.mxu0 %v13025_v60 }
 0x3d6   :  { %5305 = vmatpush1.bf16.msra.mxu0 %v13023_v55 }
 0x3d8   :  { %4096 = vmatpush1.bf16.msra.mxu1 %v15109_v26  ;;  %v13028_v26 = vld [vmem:[#allocation7 + $0x324] ss:$16 sps:$4 sm:$0xff]  }
 0x3d9   :  { %8759 = vmatprep.subr.bf16.mxu1 %v13025_v60  ;;  %5306 = vmatprep.subr.bf16.mxu0 %v13028_v26  ;;  %v13046_v60 = vld [vmem:[#allocation7 + $0x3e4] ss:$16 sps:$4 sm:$0xff]  }
 0x3da   :  { %5307 = vmatpush1.bf16.msra.mxu0 %v13026_v19 }
 0x3db   :  { %11327 = vmatmul.mubr.msk.bf16.gmra.mrb[52].mxu1 %vm274_vm0, %v13018_v54  ;;  %5308 = vmatprep.subr.bf16.mxu0 %v13031_v5 }
 0x3dc   :  { %4052 = vmatprep.mubr.bf16.mxu1 %v17762_v0 }
 0x3e3   :  { %11328 = vmatmul.mubr.msk.bf16.gmra.mrb[56].mxu1 %vm274_vm0, %v13019_v46 }
 0x3e4   :  { %4062 = vmatprep.mubr.bf16.mxu1 %v17762_v0 }
 0x3eb   :  { %11329 = vmatmul.mubr.msk.bf16.gmra.mrb[60].mxu1 %vm274_vm0, %v13020_v38 }
 0x3ec   :  { %4072 = vmatprep.mubr.bf16.mxu1 %v17762_v0 }
 0x3f3   :  { %11330 = vmatmul.mubr.msk.bf16.gmra.mrb[64].mxu1 %vm274_vm0, %v13021_v44 }
 0x3f4   :  { %4082 = vmatprep.mubr.bf16.mxu1 %v17762_v0 }
 0x3fb   :  { %11331 = vmatmul.mubr.msk.bf16.gmra.mrb[68].mxu1 %vm274_vm0, %v13022_v8 }
 0x3fc   :  { %4125 = vmatprep.mubr.bf16.mxu1 %v17762_v0 }
 0x403   :  { %11332 = vmatmul.mubr.msk.bf16.vlgmr.msra.gmra.mrb[72].mxu1 %vm274_vm0, %v13017_v63  ;;  %v13029_v63 = vld [vmem:[#allocation7 + $0x340] ss:$16 sps:$4 sm:$0xff]  }
 0x404   :  { %4135 = vmatprep.mubr.bf16.mxu1 %v17762_v0  ;;  %8760 = vmatpush1.bf16.msra.mxu1 %v13023_v55  ;;  %v13044_v55 = vld [vmem:[#allocation7 + $0x3e0] ss:$16 sps:$4 sm:$0xff]  }
 0x405   :  { %8761 = vmatprep.subr.bf16.mxu1 %v13028_v26  ;;  %5309 = vmatpush1.bf16.msra.mxu0 %v13029_v63  ;;  %v13049_v26 = vld [vmem:[#allocation7 + $0x404] ss:$16 sps:$4 sm:$0xff]  }
 0x406   :  { %5310 = vmatprep.subr.bf16.mxu0 %v13034_v14 }
 0x408   :  { %8762 = vmatpush1.bf16.msra.mxu1 %v13026_v19  ;;  %v13047_v19 = vld [vmem:[#allocation7 + $0x400] ss:$16 sps:$4 sm:$0xff]  }
 0x409   :  { %8763 = vmatprep.subr.bf16.mxu1 %v13031_v5  ;;  %5311 = vmatpush1.bf16.msra.mxu0 %v13032_v42  ;;  %v13052_v5 = vld [vmem:[#allocation7 + $0x424] ss:$16 sps:$4 sm:$0xff]  }
 0x40b   :  { %11333 = vmatmul.mubr.msk.bf16.gmra.mrb[76].mxu1 %vm274_vm0, %v13018_v54  ;;  %v13037_v54 = vld [vmem:[#allocation7 + $0x384] ss:$16 sps:$4 sm:$0xff]  }
 0x40c   :  { %4145 = vmatprep.mubr.bf16.mxu1 %v17762_v0  ;;  %8764 = vmatpush1.bf16.msra.mxu1 %v13029_v63  ;;  %v13050_v63 = vld [vmem:[#allocation7 + $0x420] ss:$16 sps:$4 sm:$0xff]  }
 0x40d   :  { %8765 = vmatprep.subr.bf16.mxu1 %v13034_v14  ;;  %5312 = vmatprep.subr.bf16.mxu0 %v13037_v54  ;;  %v13055_v14 = vld [vmem:[#allocation7 + $0x444] ss:$16 sps:$4 sm:$0xff]  }
 0x40e   :  { %5313 = vmatpush1.bf16.msra.mxu0 %v13035_v56 }
 0x410   :  { %8766 = vmatpush1.bf16.msra.mxu1 %v13032_v42  ;;  %v13053_v42 = vld [vmem:[#allocation7 + $0x440] ss:$16 sps:$4 sm:$0xff]  }
 0x411   :  { %8767 = vmatprep.subr.bf16.mxu1 %v13037_v54  ;;  %v13058_v54 = vld [vmem:[#allocation7 + $0x464] ss:$16 sps:$4 sm:$0xff]  }
 0x413   :  { %11334 = vmatmul.mubr.msk.bf16.gmra.mrb[80].mxu1 %vm274_vm0, %v13019_v46  ;;  %v13040_v46 = vld [vmem:[#allocation7 + $0x3a4] ss:$16 sps:$4 sm:$0xff]  }
 0x414   :  { %4155 = vmatprep.mubr.bf16.mxu1 %v17762_v0  ;;  %8768 = vmatpush1.bf16.msra.mxu1 %v13035_v56  ;;  %v13056_v56 = vld [vmem:[#allocation7 + $0x460] ss:$16 sps:$4 sm:$0xff]  }
 0x415   :  { %5314 = vmatprep.subr.bf16.mxu0 %v13040_v46  ;;  %8769 = vmatprep.subr.bf16.mxu1 %v13040_v46  ;;  %v13061_v46 = vld [vmem:[#allocation7 + $0x484] ss:$16 sps:$4 sm:$0xff]  }
 0x41b   :  { %11335 = vmatmul.mubr.msk.bf16.gmra.mrb[84].mxu1 %vm274_vm0, %v13020_v38  ;;  %v13038_v38 = vld [vmem:[#allocation7 + $0x3a0] ss:$16 sps:$4 sm:$0xff]  }
 0x41c   :  { %4165 = vmatprep.mubr.bf16.mxu1 %v17762_v0  ;;  %5315 = vmatpush1.bf16.msra.mxu0 %v13038_v38 }
 0x41d   :  { %8770 = vmatpush1.bf16.msra.mxu1 %v13038_v38  ;;  %v13059_v38 = vld [vmem:[#allocation7 + $0x480] ss:$16 sps:$4 sm:$0xff]  }
 0x423   :  { %11336 = vmatmul.mubr.msk.bf16.gmra.mrb[88].mxu1 %vm274_vm0, %v13021_v44  ;;  %v13043_v44 = vld [vmem:[#allocation7 + $0x3c4] ss:$16 sps:$4 sm:$0xff]  }
 0x424   :  { %4175 = vmatprep.mubr.bf16.mxu1 %v17762_v0  ;;  %5316 = vmatprep.subr.bf16.mxu0 %v13043_v44 }
 0x425   :  { %8771 = vmatprep.subr.bf16.mxu1 %v13043_v44  ;;  %v13064_v44 = vld [vmem:[#allocation7 + $0x4a4] ss:$16 sps:$4 sm:$0xff]  }
 0x42b   :  { %11337 = vmatmul.mubr.msk.bf16.gmra.mrb[92].mxu1 %vm274_vm0, %v13022_v8  ;;  %v13041_v8 = vld [vmem:[#allocation7 + $0x3c0] ss:$16 sps:$4 sm:$0xff]  }
 0x42c   :  { %5317 = vmatpush1.bf16.msra.mxu0 %v13041_v8  ;;  %8772 = vmatpush1.bf16.msra.mxu1 %v13041_v8  ;;  %v13062_v8 = vld [vmem:[#allocation7 + $0x4a0] ss:$16 sps:$4 sm:$0xff]  }
 0x42d   :  { %5318 = vmatprep.subr.bf16.mxu0 %v13046_v60  ;;  %8773 = vmatprep.subr.bf16.mxu1 %v13046_v60  ;;  %v2413_v60 = vlaneseq }
 0x430   :  { %5319 = vmatpush1.bf16.msra.mxu0 %v13044_v55  ;;  %8774 = vmatpush1.bf16.msra.mxu1 %v13044_v55  ;;  %v13067_v55 = vld [vmem:[#allocation7 + $0x4c4] ss:$16 sps:$4 sm:$0xff]  }
 0x431   :  { %5320 = vmatprep.subr.bf16.mxu0 %v13049_v26  ;;  %8775 = vmatprep.subr.bf16.mxu1 %v13049_v26  ;;  %v13065_v26 = vld [vmem:[#allocation7 + $0x4c0] ss:$16 sps:$4 sm:$0xff]  }
 0x434   :  { %5321 = vmatpush1.bf16.msra.mxu0 %v13047_v19  ;;  %8776 = vmatpush1.bf16.msra.mxu1 %v13047_v19  ;;  %v15470_v19 = vshrl.u32 %v2413_v60, 7 }
 0x435   :  { %5322 = vmatprep.subr.bf16.mxu0 %v13052_v5  ;;  %8777 = vmatprep.subr.bf16.mxu1 %v13052_v5 }
 0x436   :  { %v15473_v5 = vsub.s32 0, %v15470_v19 }
 0x438   :  { %5323 = vmatpush1.bf16.msra.mxu0 %v13050_v63  ;;  %8778 = vmatpush1.bf16.msra.mxu1 %v13050_v63  ;;  %17799 = vst [vmem:[#allocation50_spill] sm:$0xff] %v15473_v5  ;;  %v13070_v63 = vld [vmem:[#allocation7 + $0x4e4] ss:$16 sps:$4 sm:$0xff]  }
 0x439   :  { %5324 = vmatprep.subr.bf16.mxu0 %v13055_v14  ;;  %8779 = vmatprep.subr.bf16.mxu1 %v13055_v14  ;;  %v15476_v14 = vsub.s32 1, %v15470_v19 }
 0x43b   :  { %17800 = vst [vmem:[#allocation51_spill] sm:$0xff] %v15476_v14 }
 0x43c   :  { %5325 = vmatpush1.bf16.msra.mxu0 %v13053_v42  ;;  %8780 = vmatpush1.bf16.msra.mxu1 %v13053_v42  ;;  %v13068_v42 = vld [vmem:[#allocation7 + $0x4e0] ss:$16 sps:$4 sm:$0xff]  }
 0x43d   :  { %5326 = vmatprep.subr.bf16.mxu0 %v13058_v54  ;;  %8781 = vmatprep.subr.bf16.mxu1 %v13058_v54  ;;  %v15478_v54 = vld [vmem:[#allocation5] sm:$0x3f] }
 0x440   :  { %5327 = vmatpush1.bf16.msra.mxu0 %v13056_v56  ;;  %8782 = vmatpush1.bf16.msra.mxu1 %v13056_v56  ;;  %v15482_v56 = vrot.slane %v15478_v54, %v15473_v5 }
 0x441   :  { %5328 = vmatprep.subr.bf16.mxu0 %v13061_v46  ;;  %8783 = vmatprep.subr.bf16.mxu1 %v13061_v46  ;;  %v13073_v46 = vld [vmem:[#allocation7 + $0x504] ss:$16 sps:$4 sm:$0xff]  }
 0x444   :  { %5329 = vmatpush1.bf16.msra.mxu0 %v13059_v38  ;;  %8784 = vmatpush1.bf16.msra.mxu1 %v13059_v38  ;;  %v15486_v38 = vrot.slane %v15478_v54, %v15476_v14 }
 0x445   :  { %5330 = vmatprep.subr.bf16.mxu0 %v13064_v44  ;;  %8785 = vmatprep.subr.bf16.mxu1 %v13064_v44  ;;  %v2443_v44 = vadd.f32 %v15482_v56, %v15258_v31 }
 0x448   :  { %5331 = vmatpush1.bf16.msra.mxu0 %v13062_v8  ;;  %8786 = vmatpush1.bf16.msra.mxu1 %v13062_v8  ;;  %v2444_v8 = vadd.f32 %v15486_v38, %v15260_v48 }
 0x449   :  { %5332 = vmatprep.subr.bf16.mxu0 %v13067_v55  ;;  %8787 = vmatprep.subr.bf16.mxu1 %v13067_v55  ;;  %v2449_v55 = vadd.f32 %v15482_v56, %v15262_v50 }
 0x44a   :  { %v2516_v57 = vmax.f32 %v2444_v8, 0.0 }
 0x44b   :  { %v2521_v3 = vmax.f32 %v2449_v55, 0.0 }
 0x44c   :  { %5333 = vmatpush1.bf16.msra.mxu0 %v13065_v26  ;;  %8788 = vmatpush1.bf16.msra.mxu1 %v13065_v26 }
 0x44d   :  { %5334 = vmatprep.subr.bf16.mxu0 %v13070_v63  ;;  %8789 = vmatprep.subr.bf16.mxu1 %v13070_v63 }
 0x450   :  { %5335 = vmatpush1.bf16.msra.mxu0 %v13068_v42  ;;  %8790 = vmatpush1.bf16.msra.mxu1 %v13068_v42  ;;  %v2450_v42 = vadd.f32 %v15486_v38, %v15264_v4 }
 0x451   :  { %5357 = vmatprep.subr.bf16.mxu0 %v13073_v46  ;;  %8812 = vmatprep.subr.bf16.mxu1 %v13073_v46  ;;  %v2515_v46 = vmax.f32 %v2443_v44, 0.0 }
 0x452   :  { %v2522_v6 = vmax.f32 %v2450_v42, 0.0 }
 0x476   :  { %v3941_v60 = vpop.f32.mrb[24].mxu1 }
 0x477   :  { %v4258_v26 = vadd.f32 %v3941_v60, %v15482_v56  ;;  %v3943_v63 = vpop.f32.mrb[25].mxu1 }
 0x478   :  { %v4259_v0 = vadd.f32 %v3943_v63, %v15486_v38  ;;  %v3945_v14 = vpop.f32.mrb[26].mxu1  ;;  %v2455_v63 = vadd.f32 %v15482_v56, %v15270_v7 }
 0x479   :  { %v4330_v5 = vmax.f32 %v4258_v26, 0.0  ;;  %v4264_v31 = vadd.f32 %v3945_v14, %v15482_v56  ;;  %v3947_v58 = vpop.f32.mrb[27].mxu1  ;;  %v2456_v14 = vadd.f32 %v15486_v38, %v15272_v10 }
 0x47a   :  { %v4331_v48 = vmax.f32 %v4259_v0, 0.0  ;;  %v4265_v2 = vadd.f32 %v3947_v58, %v15486_v38  ;;  %v2461_v58 = vadd.f32 %v15482_v56, %v15274_v18 }
 0x47b   :  { %v15500_v50 = vmax.f32 %v2515_v46, %v4330_v5  ;;  %v4336_v60 = vmax.f32 %v4264_v31, 0.0 }
 0x47c   :  { %v15502_v53 = vmax.f32 %v2516_v57, %v4331_v48  ;;  %v4337_v4 = vmax.f32 %v4265_v2, 0.0  ;;  %v2462_v57 = vadd.f32 %v15486_v38, %v15276_v20  ;;  %v2533_v48 = vmax.f32 %v2461_v58, 0.0 }
 0x47d   :  { %v15506_v44 = vmax.f32 %v2521_v3, %v4336_v60  ;;  %v2527_v3 = vmax.f32 %v2455_v63, 0.0  ;;  %v2473_v58 = vadd.f32 %v15482_v56, %v15285_v34 }
 0x47e   :  { %v15510_v8 = vmax.f32 %v2522_v6, %v4337_v4  ;;  %v3951_v0 = vpop.f32.mrb[28].mxu1  ;;  %v2528_v6 = vmax.f32 %v2456_v14, 0.0  ;;  %v2534_v4 = vmax.f32 %v2462_v57, 0.0 }
 0x47f   :  { %v4270_v5 = vadd.f32 %v3951_v0, %v15482_v56  ;;  %v3953_v55 = vpop.f32.mrb[29].mxu1 }
 0x480   :  { %v4271_v2 = vadd.f32 %v3953_v55, %v15486_v38  ;;  %v3955_v7 = vpop.f32.mrb[30].mxu1  ;;  %v2467_v55 = vadd.f32 %v15482_v56, %v15281_v21 }
 0x481   :  { %v4342_v26 = vmax.f32 %v4270_v5, 0.0  ;;  %v4276_v42 = vadd.f32 %v3955_v7, %v15482_v56  ;;  %v3957_v10 = vpop.f32.mrb[31].mxu1  ;;  %v2468_v5 = vadd.f32 %v15486_v38, %v15283_v52 }
 0x482   :  { %v4343_v46 = vmax.f32 %v4271_v2, 0.0  ;;  %v4277_v31 = vadd.f32 %v3957_v10, %v15486_v38 }
 0x483   :  { %v15520_v18 = vmax.f32 %v2527_v3, %v4342_v26  ;;  %v4348_v60 = vmax.f32 %v4276_v42, 0.0  ;;  %v2474_v3 = vadd.f32 %v15486_v38, %v15287_v35  ;;  %v2539_v42 = vmax.f32 %v2467_v55, 0.0 }
 0x484   :  { %v15522_v0 = vmax.f32 %v2528_v6, %v4343_v46  ;;  %v4349_v20 = vmax.f32 %v4277_v31, 0.0  ;;  %v2540_v46 = vmax.f32 %v2468_v5, 0.0 }
 0x485   :  { %v15526_v63 = vmax.f32 %v2533_v48, %v4348_v60  ;;  %v2545_v60 = vmax.f32 %v2473_v58, 0.0  ;;  %v2485_v58 = vadd.f32 %v15482_v56, %v15296_v62 }
 0x486   :  { %v15530_v14 = vmax.f32 %v2534_v4, %v4349_v20  ;;  %v3961_v2 = vpop.f32.mrb[32].mxu1  ;;  %v2546_v20 = vmax.f32 %v2474_v3, 0.0 }
 0x487   :  { %v4282_v7 = vadd.f32 %v3961_v2, %v15482_v56  ;;  %v3963_v57 = vpop.f32.mrb[33].mxu1 }
 0x488   :  { %v4283_v26 = vadd.f32 %v3963_v57, %v15486_v38  ;;  %v3965_v21 = vpop.f32.mrb[34].mxu1  ;;  %v2479_v57 = vadd.f32 %v15482_v56, %v15292_v41 }
 0x489   :  { %v4354_v10 = vmax.f32 %v4282_v7, 0.0  ;;  %v4288_v6 = vadd.f32 %v3965_v21, %v15482_v56  ;;  %v3967_v52 = vpop.f32.mrb[35].mxu1  ;;  %v2480_v7 = vadd.f32 %v15486_v38, %v15294_v45 }
 0x48a   :  { %v4355_v31 = vmax.f32 %v4283_v26, 0.0  ;;  %v4289_v48 = vadd.f32 %v3967_v52, %v15486_v38 }
 0x48b   :  { %v15540_v34 = vmax.f32 %v2539_v42, %v4354_v10  ;;  %v4360_v4 = vmax.f32 %v4288_v6, 0.0  ;;  %v2486_v42 = vadd.f32 %v15486_v38, %v15298_v9  ;;  %v2551_v6 = vmax.f32 %v2479_v57, 0.0 }
 0x48c   :  { %v15542_v2 = vmax.f32 %v2540_v46, %v4355_v31  ;;  %v4361_v35 = vmax.f32 %v4289_v48, 0.0  ;;  %v2552_v31 = vmax.f32 %v2480_v7, 0.0 }
 0x48d   :  { %v15546_v55 = vmax.f32 %v2545_v60, %v4360_v4  ;;  %v2557_v4 = vmax.f32 %v2485_v58, 0.0  ;;  %v2497_v58 = vadd.f32 %v15482_v56, %v15307_v12 }
 0x48e   :  { %v15550_v5 = vmax.f32 %v2546_v20, %v4361_v35  ;;  %v3971_v26 = vpop.f32.mrb[36].mxu1  ;;  %v2558_v35 = vmax.f32 %v2486_v42, 0.0 }
 0x48f   :  { %v4294_v21 = vadd.f32 %v3971_v26, %v15482_v56  ;;  %v3973_v3 = vpop.f32.mrb[37].mxu1 }
 0x490   :  { %v4295_v10 = vadd.f32 %v3973_v3, %v15486_v38  ;;  %v3975_v41 = vpop.f32.mrb[38].mxu1  ;;  %v2491_v3 = vadd.f32 %v15482_v56, %v15303_v11 }
 0x491   :  { %v4366_v52 = vmax.f32 %v4294_v21, 0.0  ;;  %v4300_v46 = vadd.f32 %v3975_v41, %v15482_v56  ;;  %v3977_v45 = vpop.f32.mrb[39].mxu1  ;;  %v2492_v21 = vadd.f32 %v15486_v38, %v15305_v13 }
 0x492   :  { %v4367_v48 = vmax.f32 %v4295_v10, 0.0  ;;  %v4301_v60 = vadd.f32 %v3977_v45, %v15486_v38 }
 0x493   :  { %v15560_v62 = vmax.f32 %v2551_v6, %v4366_v52  ;;  %v4372_v20 = vmax.f32 %v4300_v46, 0.0  ;;  %v2498_v6 = vadd.f32 %v15486_v38, %v15309_v27  ;;  %v2563_v46 = vmax.f32 %v2491_v3, 0.0 }
 0x494   :  { %v15562_v26 = vmax.f32 %v2552_v31, %v4367_v48  ;;  %v4373_v9 = vmax.f32 %v4301_v60, 0.0  ;;  %v2564_v48 = vmax.f32 %v2492_v21, 0.0  ;;  %v2503_v3 = vadd.f32 %v15482_v56, %v15314_v28 }
 0x495   :  { %v15566_v57 = vmax.f32 %v2557_v4, %v4372_v20  ;;  %v2569_v20 = vmax.f32 %v2497_v58, 0.0  ;;  %v17769_v21 = vsub.s32 3, %v15470_v19 }
 0x496   :  { %v15570_v7 = vmax.f32 %v2558_v35, %v4373_v9  ;;  %v3981_v10 = vpop.f32.mrb[40].mxu1  ;;  %v2570_v9 = vmax.f32 %v2498_v6, 0.0  ;;  %v2509_v6 = vadd.f32 %v15482_v56, %v15318_v51 }
 0x497   :  { %v4306_v41 = vadd.f32 %v3981_v10, %v15482_v56  ;;  %v3983_v42 = vpop.f32.mrb[41].mxu1  ;;  %v15609_v51 = vrot.slane %v15478_v54, %v17769_v21 }
 0x498   :  { %v4307_v52 = vadd.f32 %v3983_v42, %v15486_v38  ;;  %v3985_v11 = vpop.f32.mrb[42].mxu1  ;;  %v17768_v42 = vsub.s32 2, %v15470_v19 }
 0x499   :  { %v4378_v45 = vmax.f32 %v4306_v41, 0.0  ;;  %v4312_v31 = vadd.f32 %v3985_v11, %v15482_v56  ;;  %v3987_v13 = vpop.f32.mrb[43].mxu1 }
 0x49a   :  { %v4379_v60 = vmax.f32 %v4307_v52, 0.0  ;;  %v4313_v4 = vadd.f32 %v3987_v13, %v15486_v38  ;;  %v2504_v52 = vadd.f32 %v15486_v38, %v15316_v30  ;;  %v2575_v30 = vmax.f32 %v2503_v3, 0.0 }
 0x49b   :  { %v15580_v12 = vmax.f32 %v2563_v46, %v4378_v45  ;;  %v4384_v35 = vmax.f32 %v4312_v31, 0.0  ;;  %v2510_v31 = vadd.f32 %v15486_v38, %v15320_v59 }
 0x49c   :  { %v15582_v10 = vmax.f32 %v2564_v48, %v4379_v60  ;;  %v4385_v27 = vmax.f32 %v4313_v4, 0.0  ;;  %v15603_v48 = vrot.slane %v15478_v54, %v17768_v42 }
 0x49d   :  { %v15587_v41 = vmax.f32 %v2569_v20, %v4384_v35  ;;  %v2576_v35 = vmax.f32 %v2504_v52, 0.0  ;;  %v2582_v42 = vmax.f32 %v2510_v31, 0.0 }
 0x49e   :  { %v15592_v58 = vmax.f32 %v2570_v9, %v4385_v27  ;;  %v3991_v11 = vpop.f32.mrb[44].mxu1  ;;  %v2581_v27 = vmax.f32 %v2509_v6, 0.0 }
 0x49f   :  { %v4318_v46 = vadd.f32 %v3991_v11, %v15482_v56  ;;  %v3993_v45 = vpop.f32.mrb[45].mxu1 }
 0x4a0   :  { %17801 = vst [vmem:[#allocation52_spill] sm:$0xff] %v15592_v58  ;;  %v4319_v28 = vadd.f32 %v3993_v45, %v15486_v38  ;;  %v3995_v13 = vpop.f32.mrb[46].mxu1 }
 0x4a1   :  { %v4390_v60 = vmax.f32 %v4318_v46, 0.0  ;;  %v4324_v4 = vadd.f32 %v3995_v13, %v15482_v56  ;;  %v3997_v20 = vpop.f32.mrb[47].mxu1  ;;  %v2445_v56 = vadd.f32 %v14952_v23, %v15603_v48  ;;  %v2446_v13 = vadd.f32 %v14955_v25, %v15609_v51 }
 0x4a2   :  { %v4391_v59 = vmax.f32 %v4319_v28, 0.0  ;;  %v4325_v9 = vadd.f32 %v3997_v20, %v15486_v38  ;;  %v2451_v38 = vadd.f32 %v14958_v29, %v15603_v48 }
 0x4a3   :  { %v15612_v11 = vmax.f32 %v2575_v30, %v4390_v60  ;;  %v4396_v45 = vmax.f32 %v4324_v4, 0.0  ;;  %v2452_v30 = vadd.f32 %v14961_v33, %v15609_v51  ;;  %v2517_v4 = vmax.f32 %v2445_v56, 0.0 }
 0x4a4   :  { %v15614_v58 = vmax.f32 %v2576_v35, %v4391_v59  ;;  %v4397_v3 = vmax.f32 %v4325_v9, 0.0  ;;  %v2457_v33 = vadd.f32 %v14980_v37, %v15603_v48  ;;  %v2458_v56 = vadd.f32 %v14983_v39, %v15609_v51 }
 0x4a5   :  { %v15618_v46 = vmax.f32 %v2581_v27, %v4396_v45  ;;  %v2523_v27 = vmax.f32 %v2451_v38, 0.0  ;;  %v2463_v38 = vadd.f32 %v14986_v61, %v15603_v48 }
 0x4a6   :  { %v15622_v52 = vmax.f32 %v2582_v42, %v4397_v3  ;;  %v4034_v28 = vpop.f32.mrb[48].mxu1  ;;  %v2518_v42 = vmax.f32 %v2446_v13, 0.0  ;;  %v2524_v3 = vmax.f32 %v2452_v30, 0.0 }
 0x4a7   :  { %v4260_v6 = vadd.f32 %v4034_v28, %v15603_v48  ;;  %v4036_v31 = vpop.f32.mrb[49].mxu1 }
 0x4a8   :  { %v4261_v60 = vadd.f32 %v4036_v31, %v15609_v51  ;;  %v4038_v23 = vpop.f32.mrb[50].mxu1 }
 0x4a9   :  { %v4332_v20 = vmax.f32 %v4260_v6, 0.0  ;;  %v4266_v35 = vadd.f32 %v4038_v23, %v15603_v48  ;;  %v4040_v25 = vpop.f32.mrb[51].mxu1 }
 0x4aa   :  { %v4333_v59 = vmax.f32 %v4261_v60, 0.0  ;;  %v4267_v9 = vadd.f32 %v4040_v25, %v15609_v51  ;;  %v2529_v25 = vmax.f32 %v2457_v33, 0.0  ;;  %v2469_v33 = vadd.f32 %v15013_v15, %v15603_v48 }
 0x4ab   :  { %v15632_v29 = vmax.f32 %v2517_v4, %v4332_v20  ;;  %v4338_v45 = vmax.f32 %v4266_v35, 0.0  ;;  %v2464_v4 = vadd.f32 %v14991_v1, %v15609_v51 }
 0x4ac   :  { %v4405_v28 = vmax.f32 %v2518_v42, %v4333_v59  ;;  %v4339_v21 = vmax.f32 %v4267_v9, 0.0  ;;  %v2530_v42 = vmax.f32 %v2458_v56, 0.0  ;;  %v2470_v56 = vadd.f32 %v15016_v17, %v15609_v51 }
 0x4ad   :  { %v15636_v31 = vmax.f32 %v2523_v27, %v4338_v45  ;;  %v2535_v27 = vmax.f32 %v2463_v38, 0.0  ;;  %v2536_v1 = vmax.f32 %v2464_v4, 0.0  ;;  %v2541_v17 = vmax.f32 %v2469_v33, 0.0 }
 0x4ae   :  { %v4474_v13 = vmax.f32 %v15500_v50, %v4405_v28  ;;  %v4411_v6 = vmax.f32 %v2524_v3, %v4339_v21  ;;  %v4044_v60 = vpop.f32.mrb[52].mxu1 }
 0x4af   :  { %v4272_v23 = vadd.f32 %v4044_v60, %v15603_v48  ;;  %v4046_v30 = vpop.f32.mrb[53].mxu1 }
 0x4b0   :  { %v4477_v37 = vmax.f32 %v15506_v44, %v4411_v6  ;;  %v4273_v20 = vadd.f32 %v4046_v30, %v15609_v51  ;;  %v4048_v35 = vpop.f32.mrb[54].mxu1  ;;  %v2475_v30 = vadd.f32 %v15019_v24, %v15603_v48 }
 0x4b1   :  { %v4344_v39 = vmax.f32 %v4272_v23, 0.0  ;;  %v4278_v50 = vadd.f32 %v4048_v35, %v15603_v48  ;;  %v4050_v21 = vpop.f32.mrb[55].mxu1 }
 0x4b2   :  { %v4510_v59 = vpack.c.bf16 %v4477_v37, %v4474_v13  ;;  %v4345_v9 = vmax.f32 %v4273_v20, 0.0  ;;  %v4279_v61 = vadd.f32 %v4050_v21, %v15609_v51  ;;  %v2476_v20 = vadd.f32 %v15023_v32, %v15609_v51 }
 0x4b3   :  { %v15650_v45 = vmax.f32 %v2529_v25, %v4344_v39  ;;  %v4350_v3 = vmax.f32 %v4278_v50, 0.0  ;;  %v2542_v21 = vmax.f32 %v2470_v56, 0.0 }
 0x4b4   :  { %4528 = vst [vmem:[#allocation2] sm:$0xf] %v4510_v59  ;;  %v4534_v44 = vrot.slane %v4510_v59, 4  ;;  %v4417_v28 = vmax.f32 %v2530_v42, %v4345_v9  ;;  %v4351_v6 = vmax.f32 %v4279_v61, 0.0  ;;  %v2547_v9 = vmax.f32 %v2475_v30, 0.0 }
 0x4b5   :  { %v15654_v60 = vmax.f32 %v2535_v27, %v4350_v3  ;;  %v2548_v32 = vmax.f32 %v2476_v20, 0.0 }
 0x4b6   :  { %4541 = vst [vmem:[#allocation2 + $0x48] sm:$0xf] %v4534_v44  ;;  %v4480_v13 = vmax.f32 %v15520_v18, %v4417_v28  ;;  %v4423_v38 = vmax.f32 %v2536_v1, %v4351_v6  ;;  %v4054_v23 = vpop.f32.mrb[56].mxu1  ;;  %v2481_v44 = vadd.f32 %v15038_v47, %v15603_v48  ;;  %v2482_v6 = vadd.f32 %v15041_v36, %v15609_v51 }
 0x4b7   :  { %v4284_v4 = vadd.f32 %v4054_v23, %v15603_v48  ;;  %v4056_v37 = vpop.f32.mrb[57].mxu1 }
 0x4b8   :  { %v4483_v15 = vmax.f32 %v15526_v63, %v4423_v38  ;;  %v4285_v35 = vadd.f32 %v4056_v37, %v15609_v51  ;;  %v4058_v25 = vpop.f32.mrb[58].mxu1  ;;  %v2487_v38 = vadd.f32 %v15044_v40, %v15603_v48  ;;  %v2553_v36 = vmax.f32 %v2481_v44, 0.0 }
 0x4b9   :  { %v4356_v39 = vmax.f32 %v4284_v4, 0.0  ;;  %v4290_v18 = vadd.f32 %v4058_v25, %v15603_v48  ;;  %v4060_v50 = vpop.f32.mrb[59].mxu1  ;;  %v2488_v4 = vadd.f32 %v15047_v43, %v15609_v51  ;;  %v2554_v25 = vmax.f32 %v2482_v6, 0.0  ;;  %v17803_v6 = vld [vmem:[#allocation22_spill] sm:$0xff] }
 0x4ba   :  { %v4513_v42 = vpack.c.bf16 %v4483_v15, %v4480_v13  ;;  %v4357_v59 = vmax.f32 %v4285_v35, 0.0  ;;  %v4291_v24 = vadd.f32 %v4060_v50, %v15609_v51 }
 0x4bb   :  { %v15668_v61 = vmax.f32 %v2541_v17, %v4356_v39  ;;  %v4362_v27 = vmax.f32 %v4290_v18, 0.0  ;;  %v2559_v18 = vmax.f32 %v2487_v38, 0.0  ;;  %v2560_v43 = vmax.f32 %v2488_v4, 0.0 }
 0x4bc   :  { %v4547_v3 = vrot.slane %v4513_v42, 4  ;;  %4556 = vst [vmem:[#allocation2 + $0x48] sm:$0xf0] %v4513_v42  ;;  %v4429_v63 = vmax.f32 %v2542_v21, %v4357_v59  ;;  %v4363_v1 = vmax.f32 %v4291_v24, 0.0  ;;  %v2493_v24 = vadd.f32 %v15056_v16, %v15603_v48 }
 0x4bd   :  { %v15672_v28 = vmax.f32 %v2547_v9, %v4362_v27  ;;  %v2494_v27 = vadd.f32 %v15059_v22, %v15609_v51 }
 0x4be   :  { %4553 = vst [vmem:[#allocation2] sm:$0xf0] %v4547_v3  ;;  %v4486_v33 = vmax.f32 %v15540_v34, %v4429_v63  ;;  %v4435_v56 = vmax.f32 %v2548_v32, %v4363_v1  ;;  %v4064_v13 = vpop.f32.mrb[60].mxu1  ;;  %v17802_v1 = vld [vmem:[#allocation21_spill] sm:$0xff]  ;;  %v2565_v22 = vmax.f32 %v2493_v24, 0.0 }
 0x4bf   :  { %v4296_v23 = vadd.f32 %v4064_v13, %v15603_v48  ;;  %v4066_v30 = vpop.f32.mrb[61].mxu1  ;;  %v2499_v44 = vadd.f32 %v17802_v1, %v15603_v48 }
 0x4c0   :  { %v4489_v47 = vmax.f32 %v15546_v55, %v4435_v56  ;;  %v4297_v37 = vadd.f32 %v4066_v30, %v15609_v51  ;;  %v4068_v20 = vpop.f32.mrb[62].mxu1 }
 0x4c1   :  { %v4368_v15 = vmax.f32 %v4296_v23, 0.0  ;;  %v4302_v34 = vadd.f32 %v4068_v20, %v15603_v48  ;;  %v4070_v35 = vpop.f32.mrb[63].mxu1 }
 0x4c2   :  { %v4516_v17 = vpack.c.bf16 %v4489_v47, %v4486_v33  ;;  %v4369_v39 = vmax.f32 %v4297_v37, 0.0  ;;  %v4303_v40 = vadd.f32 %v4070_v35, %v15609_v51  ;;  %v2500_v33 = vadd.f32 %v17803_v6, %v15609_v51 }
 0x4c3   :  { %v15686_v50 = vmax.f32 %v2553_v36, %v4368_v15  ;;  %v4374_v21 = vmax.f32 %v4302_v34, 0.0  ;;  %v2566_v47 = vmax.f32 %v2494_v27, 0.0  ;;  %v2571_v15 = vmax.f32 %v2499_v44, 0.0 }
 0x4c4   :  { %4559 = vst [vmem:[#allocation2 + $0x18] sm:$0xf] %v4516_v17  ;;  %v4565_v55 = vrot.slane %v4516_v17, 4  ;;  %v4441_v42 = vmax.f32 %v2554_v25, %v4369_v39  ;;  %v4375_v59 = vmax.f32 %v4303_v40, 0.0  ;;  %v2572_v34 = vmax.f32 %v2500_v33, 0.0  ;;  %v17804_v17 = vld [vmem:[#allocation23_spill] sm:$0xff] }
 0x4c5   :  { %v15690_v9 = vmax.f32 %v2559_v18, %v4374_v21  ;;  %v2431_v21 = vsub.s32 4, %v15470_v19  ;;  %v17807_v33 = vld [vmem:[#allocation26_spill] sm:$0xff] }
 0x4c6   :  { %4571 = vst [vmem:[#allocation2 + $0x60] sm:$0xf] %v4565_v55  ;;  %v4492_v32 = vmax.f32 %v15560_v62, %v4441_v42  ;;  %v4447_v3 = vmax.f32 %v2560_v43, %v4375_v59  ;;  %v4074_v63 = vpop.f32.mrb[64].mxu1  ;;  %v2435_v43 = vsub.s32 5, %v15470_v19  ;;  %v17805_v42 = vld [vmem:[#allocation24_spill] sm:$0xff] }
 0x4c7   :  { %v4308_v56 = vadd.f32 %v4074_v63, %v15603_v48  ;;  %v4076_v13 = vpop.f32.mrb[65].mxu1  ;;  %v2506_v59 = vadd.f32 %v15609_v51, %v17805_v42 }
 0x4c8   :  { %v4495_v16 = vmax.f32 %v15566_v57, %v4447_v3  ;;  %v4309_v38 = vadd.f32 %v4076_v13, %v15609_v51  ;;  %v4078_v23 = vpop.f32.mrb[66].mxu1  ;;  %v2505_v57 = vadd.f32 %v15603_v48, %v17804_v17  ;;  %v17806_v3 = vld [vmem:[#allocation25_spill] sm:$0xff] }
 0x4c9   :  { %v4380_v30 = vmax.f32 %v4308_v56, 0.0  ;;  %v4314_v62 = vadd.f32 %v4078_v23, %v15603_v48  ;;  %v4080_v4 = vpop.f32.mrb[67].mxu1  ;;  %v2511_v63 = vadd.f32 %v15603_v48, %v17806_v3  ;;  %v2512_v56 = vadd.f32 %v15609_v51, %v17807_v33 }
 0x4ca   :  { %v4519_v37 = vpack.c.bf16 %v4495_v16, %v4492_v32  ;;  %v4381_v20 = vmax.f32 %v4309_v38, 0.0  ;;  %v4315_v36 = vadd.f32 %v4080_v4, %v15609_v51  ;;  %v2577_v6 = vmax.f32 %v2505_v57, 0.0 }
 0x4cb   :  { %v15704_v35 = vmax.f32 %v2565_v22, %v4380_v30  ;;  %v4386_v25 = vmax.f32 %v4314_v62, 0.0  ;;  %v15723_v23 = vrot.slane %v15478_v54, %v2431_v21  ;;  %v2578_v4 = vmax.f32 %v2506_v59, 0.0  ;;  %v17810_v21 = vld [vmem:[#allocation29_spill] sm:$0xff] }
 0x4cc   :  { %v4577_v39 = vrot.slane %v4519_v37, 4  ;;  %4586 = vst [vmem:[#allocation2 + $0x60] sm:$0xf0] %v4519_v37  ;;  %v4453_v40 = vmax.f32 %v2566_v47, %v4381_v20  ;;  %v4387_v18 = vmax.f32 %v4315_v36, 0.0  ;;  %v2583_v36 = vmax.f32 %v2511_v63, 0.0 }
 0x4cd   :  { %v15710_v55 = vmax.f32 %v2571_v15, %v4386_v25 }
 0x4ce   :  { %4583 = vst [vmem:[#allocation2 + $0x18] sm:$0xf0] %v4577_v39  ;;  %v4498_v24 = vmax.f32 %v15580_v12, %v4453_v40  ;;  %v4459_v27 = vmax.f32 %v2572_v34, %v4387_v18  ;;  %v4084_v32 = vpop.f32.mrb[68].mxu1  ;;  %v15726_v12 = vrot.slane %v15478_v54, %v2435_v43  ;;  %v2584_v34 = vmax.f32 %v2512_v56, 0.0  ;;  %v17808_v54 = vld [vmem:[#allocation27_spill] sm:$0xff]  ;;  %v17809_v40 = vld [vmem:[#allocation28_spill] sm:$0xff] }
 0x4cf   :  { %v4320_v1 = vadd.f32 %v4084_v32, %v15603_v48  ;;  %v4086_v44 = vpop.f32.mrb[69].mxu1  ;;  %v2447_v39 = vadd.f32 %v15723_v23, %v17808_v54 }
 0x4d0   :  { %v4501_v13 = vmax.f32 %v15587_v41, %v4459_v27  ;;  %v4321_v16 = vadd.f32 %v4086_v44, %v15609_v51  ;;  %v4088_v38 = vpop.f32.mrb[70].mxu1 }
 0x4d1   :  { %v4392_v22 = vmax.f32 %v4320_v1, 0.0  ;;  %v4326_v30 = vadd.f32 %v4088_v38, %v15603_v48  ;;  %v4090_v62 = vpop.f32.mrb[71].mxu1  ;;  %v2448_v48 = vadd.f32 %v15726_v12, %v17809_v40  ;;  %v17815_v40 = vld [vmem:[#allocation34_spill] sm:$0xff] }
 0x4d2   :  { %v4522_v47 = vpack.c.bf16 %v4501_v13, %v4498_v24  ;;  %v4393_v37 = vmax.f32 %v4321_v16, 0.0  ;;  %v4327_v20 = vadd.f32 %v4090_v62, %v15609_v51  ;;  %v2453_v51 = vadd.f32 %v15723_v23, %v17810_v21  ;;  %v17811_v24 = vld [vmem:[#allocation30_spill] sm:$0xff] }
 0x4d3   :  { %v15730_v41 = vmax.f32 %v2577_v6, %v4392_v22  ;;  %v4398_v15 = vmax.f32 %v4326_v30, 0.0  ;;  %v2454_v27 = vadd.f32 %v15726_v12, %v17811_v24  ;;  %v2519_v6 = vmax.f32 %v2447_v39, 0.0 }
 0x4d4   :  { %4589 = vst [vmem:[#allocation2 + $0x30] sm:$0xf] %v4522_v47  ;;  %v4595_v25 = vrot.slane %v4522_v47, 4  ;;  %v4465_v17 = vmax.f32 %v2578_v4, %v4393_v37  ;;  %v4399_v57 = vmax.f32 %v4327_v20, 0.0  ;;  %v2520_v33 = vmax.f32 %v2448_v48, 0.0  ;;  %v17812_v4 = vld [vmem:[#allocation31_spill] sm:$0xff] }
 0x4d5   :  { %v15736_v18 = vmax.f32 %v2583_v36, %v4398_v15  ;;  %v2526_v62 = vmax.f32 %v2454_v27, 0.0  ;;  %v2459_v47 = vadd.f32 %v15723_v23, %v17812_v4  ;;  %v17813_v20 = vld [vmem:[#allocation32_spill] sm:$0xff]  ;;  %v2466_v48 = vadd.f32 %v15726_v12, %v17815_v40 }
 0x4d6   :  { %4601 = vst [vmem:[#allocation2 + $0x78] sm:$0xf] %v4595_v25  ;;  %v4504_v43 = vmax.f32 %v15612_v11, %v4465_v17  ;;  %v4471_v42 = vmax.f32 %v2584_v34, %v4399_v57  ;;  %v4127_v59 = vpop.f32.mrb[72].mxu1  ;;  %v2525_v11 = vmax.f32 %v2453_v51, 0.0  ;;  %v2460_v36 = vadd.f32 %v15726_v12, %v17813_v20  ;;  %v17814_v17 = vld [vmem:[#allocation33_spill] sm:$0xff] }
 0x4d7   :  { %v4262_v32 = vadd.f32 %v4127_v59, %v15723_v23  ;;  %v4129_v3 = vpop.f32.mrb[73].mxu1  ;;  %v2465_v57 = vadd.f32 %v15723_v23, %v17814_v17  ;;  %v2531_v27 = vmax.f32 %v2459_v47, 0.0  ;;  %v17818_v20 = vld [vmem:[#allocation37_spill] sm:$0xff] }
 0x4d8   :  { %v4507_v63 = vmax.f32 %v15618_v46, %v4471_v42  ;;  %v4263_v1 = vadd.f32 %v4129_v3, %v15726_v12  ;;  %v4131_v44 = vpop.f32.mrb[74].mxu1 }
 0x4d9   :  { %v4334_v56 = vmax.f32 %v4262_v32, 0.0  ;;  %v4268_v13 = vadd.f32 %v4131_v44, %v15723_v23  ;;  %v4133_v16 = vpop.f32.mrb[75].mxu1  ;;  %v2532_v32 = vmax.f32 %v2460_v36, 0.0  ;;  %v2477_v36 = vadd.f32 %v15723_v23, %v17818_v20 }
 0x4da   :  { %v4525_v38 = vpack.c.bf16 %v4507_v63, %v4504_v43  ;;  %v4335_v22 = vmax.f32 %v4263_v1, 0.0  ;;  %v4269_v30 = vadd.f32 %v4133_v16, %v15726_v12  ;;  %v2537_v1 = vmax.f32 %v2465_v57, 0.0 }
 0x4db   :  { %v4406_v37 = vmax.f32 %v2519_v6, %v4334_v56  ;;  %v4340_v46 = vmax.f32 %v4268_v13, 0.0  ;;  %v2538_v56 = vmax.f32 %v2466_v48, 0.0 }
 0x4dc   :  { %v4607_v15 = vrot.slane %v4525_v38, 4  ;;  %4616 = vst [vmem:[#allocation2 + $0x78] sm:$0xf0] %v4525_v38  ;;  %v4407_v34 = vmax.f32 %v2520_v33, %v4335_v22  ;;  %v4341_v25 = vmax.f32 %v4269_v30, 0.0 }
 0x4dd   :  { %v4475_v54 = vmax.f32 %v15502_v53, %v4406_v37  ;;  %v4412_v39 = vmax.f32 %v2525_v11, %v4340_v46  ;;  %v17816_v11 = vld [vmem:[#allocation35_spill] sm:$0xff] }
 0x4de   :  { %4613 = vst [vmem:[#allocation2 + $0x30] sm:$0xf0] %v4607_v15  ;;  %v4476_v21 = vmax.f32 %v15632_v29, %v4407_v34  ;;  %v4413_v51 = vmax.f32 %v2526_v62, %v4341_v25  ;;  %v4137_v43 = vpop.f32.mrb[76].mxu1  ;;  %v2471_v38 = vadd.f32 %v15723_v23, %v17816_v11  ;;  %v17817_v62 = vld [vmem:[#allocation36_spill] sm:$0xff]  ;;  %v17819_v25 = vld [vmem:[#allocation38_spill] sm:$0xff] }
 0x4df   :  { %v4478_v42 = vmax.f32 %v15510_v8, %v4412_v39  ;;  %v4274_v59 = vadd.f32 %v4137_v43, %v15723_v23  ;;  %v4139_v24 = vpop.f32.mrb[77].mxu1  ;;  %v2472_v4 = vadd.f32 %v15726_v12, %v17817_v62  ;;  %v2478_v17 = vadd.f32 %v15726_v12, %v17819_v25  ;;  %v17823_v62 = vld [vmem:[#allocation42_spill] sm:$0xff] }
 0x4e0   :  { %v4479_v3 = vmax.f32 %v15636_v31, %v4413_v51  ;;  %v4275_v53 = vadd.f32 %v4139_v24, %v15726_v12  ;;  %v4141_v63 = vpop.f32.mrb[78].mxu1  ;;  %v2543_v51 = vmax.f32 %v2471_v38, 0.0  ;;  %v2549_v24 = vmax.f32 %v2477_v36, 0.0  ;;  %v17822_v38 = vld [vmem:[#allocation41_spill] sm:$0xff] }
 0x4e1   :  { %v4511_v44 = vpack.c.bf16 %v4478_v42, %v4475_v54  ;;  %v4346_v6 = vmax.f32 %v4274_v59, 0.0  ;;  %v4280_v33 = vadd.f32 %v4141_v63, %v15723_v23  ;;  %v4143_v29 = vpop.f32.mrb[79].mxu1  ;;  %v2544_v43 = vmax.f32 %v2472_v4, 0.0 }
 0x4e2   :  { %v4512_v13 = vpack.c.bf16 %v4479_v3, %v4476_v21  ;;  %v4347_v16 = vmax.f32 %v4275_v53, 0.0  ;;  %v4281_v8 = vadd.f32 %v4143_v29, %v15726_v12  ;;  %v2550_v53 = vmax.f32 %v2478_v17, 0.0 }
 0x4e3   :  { %4529 = vst [vmem:[#allocation2 + $0x8] sm:$0xf] %v4511_v44  ;;  %v4535_v22 = vrot.slane %v4511_v44, 4  ;;  %v4418_v31 = vmax.f32 %v2531_v27, %v4346_v6  ;;  %v4352_v30 = vmax.f32 %v4280_v33, 0.0  ;;  %v17820_v44 = vld [vmem:[#allocation39_spill] sm:$0xff]  ;;  %v2490_v4 = vadd.f32 %v15726_v12, %v17823_v62 }
 0x4e4   :  { %4530 = vst [vmem:[#allocation2 + $0x10] sm:$0xf] %v4512_v13  ;;  %v4536_v47 = vrot.slane %v4512_v13, 4  ;;  %v4419_v37 = vmax.f32 %v2532_v32, %v4347_v16  ;;  %v4353_v46 = vmax.f32 %v4281_v8, 0.0  ;;  %v2483_v6 = vadd.f32 %v15723_v23, %v17820_v44  ;;  %v17825_v44 = vld [vmem:[#allocation44_spill] sm:$0xff] }
 0x4e5   :  { %4542 = vst [vmem:[#allocation2 + $0x50] sm:$0xf] %v4535_v22  ;;  %v4481_v15 = vmax.f32 %v15522_v0, %v4418_v31  ;;  %v4424_v34 = vmax.f32 %v2537_v1, %v4352_v30  ;;  %v2489_v22 = vadd.f32 %v15723_v23, %v17822_v38 }
 0x4e6   :  { %4543 = vst [vmem:[#allocation2 + $0x58] sm:$0xf] %v4536_v47  ;;  %v4482_v57 = vmax.f32 %v15650_v45, %v4419_v37  ;;  %v4425_v54 = vmax.f32 %v2538_v56, %v4353_v46  ;;  %v4147_v39 = vpop.f32.mrb[80].mxu1  ;;  %v17821_v56 = vld [vmem:[#allocation40_spill] sm:$0xff] }
 0x4e7   :  { %v4484_v40 = vmax.f32 %v15530_v14, %v4424_v34  ;;  %v4286_v48 = vadd.f32 %v4147_v39, %v15723_v23  ;;  %v4149_v21 = vpop.f32.mrb[81].mxu1  ;;  %v2484_v13 = vadd.f32 %v15726_v12, %v17821_v56  ;;  %v2555_v34 = vmax.f32 %v2483_v6, 0.0 }
 0x4e8   :  { %v4485_v42 = vmax.f32 %v15654_v60, %v4425_v54  ;;  %v4287_v0 = vadd.f32 %v4149_v21, %v15726_v12  ;;  %v4151_v59 = vpop.f32.mrb[82].mxu1  ;;  %v2561_v54 = vmax.f32 %v2489_v22, 0.0  ;;  %v15795_v21 = vld [vmem:[#allocation7 + $0x500] ss:$16 sps:$4 sm:$0xff]  }
 0x4e9   :  { %v4514_v27 = vpack.c.bf16 %v4484_v40, %v4481_v15  ;;  %v4358_v32 = vmax.f32 %v4286_v48, 0.0  ;;  %v4292_v3 = vadd.f32 %v4151_v59, %v15723_v23  ;;  %v4153_v45 = vpop.f32.mrb[83].mxu1  ;;  %v2556_v25 = vmax.f32 %v2484_v13, 0.0  ;;  %v15800_v59 = vld [vmem:[#allocation7 + $0x524] ss:$16 sps:$4 sm:$0xff]  }
 0x4ea   :  { %v4515_v63 = vpack.c.bf16 %v4485_v42, %v4482_v57  ;;  %v4359_v1 = vmax.f32 %v4287_v0, 0.0  ;;  %v4293_v14 = vadd.f32 %v4153_v45, %v15726_v12  ;;  %v17824_v45 = vld [vmem:[#allocation43_spill] sm:$0xff] }
 0x4eb   :  { %v4548_v33 = vrot.slane %v4514_v27, 4  ;;  %4557 = vst [vmem:[#allocation2 + $0x50] sm:$0xf0] %v4514_v27  ;;  %v4430_v60 = vmax.f32 %v2543_v51, %v4358_v32  ;;  %v4364_v29 = vmax.f32 %v4292_v3, 0.0  ;;  %v2562_v51 = vmax.f32 %v2490_v4, 0.0  ;;  %v15805_v3 = vld [vmem:[#allocation2 + $0x48] sm:$0xff] }
 0x4ec   :  { %v4549_v16 = vrot.slane %v4515_v63, 4  ;;  %4558 = vst [vmem:[#allocation2 + $0x58] sm:$0xf0] %v4515_v63  ;;  %v4431_v8 = vmax.f32 %v2544_v43, %v4359_v1  ;;  %v4365_v11 = vmax.f32 %v4293_v14, 0.0 }
 0x4ed   :  { %4554 = vst [vmem:[#allocation2 + $0x8] sm:$0xf0] %v4548_v33  ;;  %v4487_v31 = vmax.f32 %v15542_v2, %v4430_v60  ;;  %v4436_v30 = vmax.f32 %v2549_v24, %v4364_v29  ;;  %v15814_v60 = vld [vmem:[#allocation7 + $0x520] ss:$16 sps:$4 sm:$0xff]   ;;  %v17826_v29 = vld [vmem:[#allocation45_spill] sm:$0xff] }
 0x4ee   :  { %4555 = vst [vmem:[#allocation2 + $0x10] sm:$0xf0] %v4549_v16  ;;  %v4488_v47 = vmax.f32 %v15668_v61, %v4431_v8  ;;  %v4437_v37 = vmax.f32 %v2550_v53, %v4365_v11  ;;  %v4157_v46 = vpop.f32.mrb[84].mxu1  ;;  %v2496_v53 = vadd.f32 %v15726_v12, %v17824_v45  ;;  %v2502_v56 = vadd.f32 %v15726_v12, %v17826_v29  ;;  %v15820_v11 = vld [vmem:[#allocation7 + $0x544] ss:$16 sps:$4 sm:$0xff]  }
 0x4ef   :  { %v4490_v20 = vmax.f32 %v15550_v5, %v4436_v30  ;;  %v4298_v36 = vadd.f32 %v4157_v46, %v15723_v23  ;;  %v4159_v15 = vpop.f32.mrb[85].mxu1 }
 0x4f0   :  { %v4491_v17 = vmax.f32 %v15672_v28, %v4437_v37  ;;  %v4299_v2 = vadd.f32 %v4159_v15, %v15726_v12  ;;  %v4161_v57 = vpop.f32.mrb[86].mxu1  ;;  %v2495_v28 = vadd.f32 %v15723_v23, %v15373_v49  ;;  %v2501_v49 = vadd.f32 %v15723_v23, %v17825_v44  ;;  %v15828_v15 = vld [vmem:[#allocation7 + $0x540] ss:$16 sps:$4 sm:$0xff]  }
 0x4f1   :  { %v4517_v39 = vpack.c.bf16 %v4490_v20, %v4487_v31  ;;  %v4370_v40 = vmax.f32 %v4298_v36, 0.0  ;;  %v4304_v48 = vadd.f32 %v4161_v57, %v15723_v23  ;;  %v4163_v61 = vpop.f32.mrb[87].mxu1  ;;  %v2568_v30 = vmax.f32 %v2496_v53, 0.0 }
 0x4f2   :  { %v4518_v5 = vpack.c.bf16 %v4491_v17, %v4488_v47  ;;  %v4371_v43 = vmax.f32 %v4299_v2, 0.0  ;;  %v4305_v42 = vadd.f32 %v4163_v61, %v15726_v12  ;;  %v15798_v0 = vld [vmem:[#allocation2 + $0x50] sm:$0xff]  ;;  %v2567_v31 = vmax.f32 %v2495_v28, 0.0  ;;  %v17827_v2 = vld [vmem:[#allocation46_spill] sm:$0xff] }
 0x4f3   :  { %4560 = vst [vmem:[#allocation2 + $0x20] sm:$0xf] %v4517_v39  ;;  %v4566_v24 = vrot.slane %v4517_v39, 4  ;;  %v4442_v27 = vmax.f32 %v2555_v34, %v4370_v40  ;;  %v4376_v32 = vmax.f32 %v4304_v48, 0.0  ;;  %5336 = vmatprep.mubr.bf16.mxu0 %v15798_v0  ;;  %v2573_v37 = vmax.f32 %v2501_v49, 0.0  ;;  %v17828_v48 = vld [vmem:[#allocation47_spill] sm:$0xff] }
 0x4f4   :  { %4561 = vst [vmem:[#allocation2 + $0x28] sm:$0xf] %v4518_v5  ;;  %v4567_v63 = vrot.slane %v4518_v5, 4  ;;  %v4443_v1 = vmax.f32 %v2556_v25, %v4371_v43  ;;  %v4377_v14 = vmax.f32 %v4305_v42, 0.0  ;;  %5337 = vmatmul.mubr.bf16.vlgmr.msra.gmra.mrb[68].mxu0 %v15805_v3  ;;  %v2507_v57 = vadd.f32 %v15723_v23, %v17827_v2  ;;  %v17829_v42 = vld [vmem:[#allocation48_spill] sm:$0xff] }
 0x4f5   :  { %4572 = vst [vmem:[#allocation2 + $0x68] sm:$0xf] %v4566_v24  ;;  %v4493_v6 = vmax.f32 %v15562_v26, %v4442_v27  ;;  %v4448_v33 = vmax.f32 %v2561_v54, %v4376_v32  ;;  %5358 = vmatpush1.bf16.msra.mxu0 %v15795_v21  ;;  %v2508_v61 = vadd.f32 %v15726_v12, %v17828_v48  ;;  %v15842_v32 = vld [vmem:[#allocation7 + $0x560] ss:$16 sps:$4 sm:$0xff]  }
 0x4f6   :  { %4573 = vst [vmem:[#allocation2 + $0x70] sm:$0xf] %v4567_v63  ;;  %v4494_v13 = vmax.f32 %v15686_v50, %v4443_v1  ;;  %v4449_v16 = vmax.f32 %v2562_v51, %v4377_v14  ;;  %v4167_v8 = vpop.f32.mrb[88].mxu1  ;;  %5359 = vmatprep.subr.bf16.mxu0 %v15800_v59  ;;  %v2513_v28 = vadd.f32 %v15723_v23, %v17829_v42  ;;  %v15846_v1 = vld [vmem:[#allocation7 + $0x584] ss:$16 sps:$4 sm:$0xff]   ;;  %v17830_v14 = vld [vmem:[#allocation49_spill] sm:$0xff] }
 0x4f7   :  { %v4496_v38 = vmax.f32 %v15570_v7, %v4448_v33  ;;  %v4310_v26 = vadd.f32 %v4167_v8, %v15723_v23  ;;  %v4169_v22 = vpop.f32.mrb[89].mxu1  ;;  %v2574_v7 = vmax.f32 %v2502_v56, 0.0  ;;  %v2514_v44 = vadd.f32 %v15726_v12, %v17830_v14  ;;  %v17831_v49 = vld [vmem:[#allocation52_spill] sm:$0xff]  ;;  %v6214_v14 = vld [vmem:[#allocation2 + $0x30] sm:$0xf] }
 0x4f8   :  { %v4497_v62 = vmax.f32 %v15690_v9, %v4449_v16  ;;  %v4311_v4 = vadd.f32 %v4169_v22, %v15726_v12  ;;  %v4171_v47 = vpop.f32.mrb[90].mxu1  ;;  %v15832_v9 = vld [vmem:[#allocation7 + $0x564] ss:$16 sps:$4 sm:$0xff]   ;;  %v2579_v29 = vmax.f32 %v2507_v57, 0.0  ;;  %v2580_v56 = vmax.f32 %v2508_v61, 0.0 }
 0x4f9   :  { %v4520_v50 = vpack.c.bf16 %v4496_v38, %v4493_v6  ;;  %v4382_v46 = vmax.f32 %v4310_v26, 0.0  ;;  %v4316_v20 = vadd.f32 %v4171_v47, %v15723_v23  ;;  %5360 = vmatpush1.bf16.msra.mxu0 %v15814_v60  ;;  %v4173_v36 = vpop.f32.mrb[91].mxu1  ;;  %v2585_v8 = vmax.f32 %v2513_v28, 0.0  ;;  %v15875_v48 = vld [vmem:[#allocation7 + $0x5a0] ss:$16 sps:$4 sm:$0xff]  }
 0x4fa   :  { %v4521_v34 = vpack.c.bf16 %v4497_v62, %v4494_v13  ;;  %v4383_v25 = vmax.f32 %v4311_v4, 0.0  ;;  %v4317_v17 = vadd.f32 %v4173_v36, %v15726_v12  ;;  %5361 = vmatprep.subr.bf16.mxu0 %v15820_v11  ;;  %v15858_v62 = vld [vmem:[#allocation2 + $0x18] sm:$0xff] }
 0x4fb   :  { %v4578_v54 = vrot.slane %v4520_v50, 4  ;;  %4587 = vst [vmem:[#allocation2 + $0x68] sm:$0xf0] %v4520_v50  ;;  %v4454_v39 = vmax.f32 %v2567_v31, %v4382_v46  ;;  %v4388_v40 = vmax.f32 %v4316_v20, 0.0  ;;  %v15864_v50 = vld [vmem:[#allocation7 + $0x5a4] ss:$16 sps:$4 sm:$0xff]  }
 0x4fc   :  { %v4579_v51 = vrot.slane %v4521_v34, 4  ;;  %4588 = vst [vmem:[#allocation2 + $0x70] sm:$0xf0] %v4521_v34  ;;  %v4455_v5 = vmax.f32 %v2568_v30, %v4383_v25  ;;  %v4389_v43 = vmax.f32 %v4317_v17, 0.0  ;;  %v15856_v30 = vld [vmem:[#allocation7 + $0x580] ss:$16 sps:$4 sm:$0xff]  }
 0x4fd   :  { %4584 = vst [vmem:[#allocation2 + $0x20] sm:$0xf0] %v4578_v54  ;;  %v4499_v24 = vmax.f32 %v15582_v10, %v4454_v39  ;;  %v4460_v27 = vmax.f32 %v2573_v37, %v4388_v40  ;;  %5362 = vmatpush1.bf16.msra.mxu0 %v15828_v15  ;;  %v6209_v46 = vld [vmem:[#allocation2 + $0x8] sm:$0xf0]  ;;  %v2586_v20 = vmax.f32 %v2514_v44, 0.0  ;;  %v15867_v34 = vld [vmem:[#allocation2 + $0x60] sm:$0xff] }
 0x4fe   :  { %4585 = vst [vmem:[#allocation2 + $0x28] sm:$0xf0] %v4579_v51  ;;  %v4500_v45 = vmax.f32 %v15704_v35, %v4455_v5  ;;  %v4461_v53 = vmax.f32 %v2574_v7, %v4389_v43  ;;  %v4177_v63 = vpop.f32.mrb[92].mxu1  ;;  %5363 = vmatprep.subr.bf16.mxu0 %v15832_v9  ;;  %v6208_v25 = vld [vmem:[#allocation2] sm:$0xf0]  ;;  %v6325_v54 = vrot.slane %v15858_v62, 4 }
 0x4ff   :  { %v4502_v6 = vmax.f32 %v17831_v49, %v4460_v27  ;;  %v4322_v10 = vadd.f32 %v4177_v63, %v15723_v23  ;;  %v4179_v33 = vpop.f32.mrb[93].mxu1  ;;  %v6327_v61 = vrot.slane %v6209_v46, 4  ;;  %v17832_v5 = vmov 0   ;;  %v13089_v63 = vld [vmem:[#allocation7 + $0x5c0] ss:$16 sps:$4 sm:$0xff]  }
 0x500   :  { %v4503_v13 = vmax.f32 %v15710_v55, %v4461_v53  ;;  %v4323_v35 = vadd.f32 %v4179_v33, %v15726_v12  ;;  %v4181_v16 = vpop.f32.mrb[94].mxu1  ;;  %v6324_v28 = vrot.slane %v6208_v25, 4  ;;  %v6333_v33 = vrot.slane %v6214_v14, 4  ;;  %v13118_v46 = vld [vmem:[#allocation7 + $0x3cc] ss:$16 sps:$4 sm:$0xff]  }
 0x501   :  { %v4523_v38 = vpack.c.bf16 %v4502_v6, %v4499_v24  ;;  %v4394_v26 = vmax.f32 %v4322_v10, 0.0  ;;  %v4328_v22 = vadd.f32 %v4181_v16, %v15723_v23  ;;  %5364 = vmatpush1.bf16.msra.mxu0 %v15842_v32  ;;  %v4183_v31 = vpop.f32.mrb[95].mxu1  ;;  %v15881_v24 = vld [vmem:[#allocation7 + $0x5c4] ss:$16 sps:$4 sm:$0xff]   ;;  %v15939_v25 = vld [vmem:[#allocation7 + $0x528] ss:$16 sps:$4 sm:$0xff]  }
 0x502   :  { %v4524_v4 = vpack.c.bf16 %v4503_v13, %v4500_v45  ;;  %v4395_v47 = vmax.f32 %v4323_v35, 0.0  ;;  %v4329_v37 = vadd.f32 %v4183_v31, %v15726_v12  ;;  %v15861_v55 = vld [vmem:[#allocation2 + $0x68] sm:$0xff]  ;;  %5365 = vmatprep.subr.bf16.mxu0 %v15846_v1  ;;  %v15890_v53 = vsel %vm6323_vm1, %v6324_v28, %v6325_v54  ;;  %v13100_v35 = vld [vmem:[#allocation7 + $0x32c] ss:$16 sps:$4 sm:$0xff]   ;;  %v15908_v16 = vld [vmem:[#allocation2 + $0x58] sm:$0xff] }
 0x503   :  { %4590 = vst [vmem:[#allocation2 + $0x38] sm:$0xf] %v4523_v38  ;;  %v4596_v23 = vrot.slane %v4523_v38, 4  ;;  %v4466_v36 = vmax.f32 %v2579_v29, %v4394_v26  ;;  %v4400_v7 = vmax.f32 %v4328_v22, 0.0  ;;  %5346 = vmatprep.mubr.bf16.mxu0 %v15861_v55  ;;  %v13094_v6 = vld [vmem:[#allocation7 + $0x5e4] ss:$16 sps:$4 sm:$0xff]  }
 0x504   :  { %4591 = vst [vmem:[#allocation2 + $0x40] sm:$0xf] %v4524_v4  ;;  %v4597_v17 = vrot.slane %v4524_v4, 4  ;;  %v4467_v12 = vmax.f32 %v2580_v56, %v4395_v47  ;;  %v4401_v2 = vmax.f32 %v4329_v37, 0.0  ;;  %5347 = vmatmul.mubr.bf16.gmra.mrb[72].mxu0 %v15867_v34  ;;  %v15870_v57 = vld [vmem:[#allocation2 + $0x20] sm:$0xff] }
 0x505   :  { %4602 = vst [vmem:[#allocation2 + $0x80] sm:$0xf] %v4596_v23  ;;  %v4505_v39 = vmax.f32 %v15614_v58, %v4466_v36  ;;  %v4472_v40 = vmax.f32 %v2585_v8, %v4400_v7  ;;  %5366 = vmatpush1.bf16.msra.mxu0 %v15856_v30  ;;  %v6328_v51 = vrot.slane %v15870_v57, 4  ;;  %5389 = vmatprep.mubr.bf16.mxu0 %v17832_v5  ;;  %v13092_v56 = vld [vmem:[#allocation7 + $0x5e0] ss:$16 sps:$4 sm:$0xff]  }
 0x506   :  { %4603 = vst [vmem:[#allocation2 + $0x88] sm:$0xf] %v4597_v17  ;;  %v4506_v43 = vmax.f32 %v15730_v41, %v4467_v12  ;;  %v4473_v42 = vmax.f32 %v2586_v20, %v4401_v2  ;;  %5367 = vmatprep.subr.bf16.mxu0 %v15864_v50  ;;  %v13095_v13 = vld [vmem:[#allocation7 + $0x308] ss:$16 sps:$4 sm:$0xff]   ;;  %v13112_v22 = vld [vmem:[#allocation7 + $0x3ac] ss:$16 sps:$4 sm:$0xff]  }
 0x507   :  { %v4508_v58 = vmax.f32 %v15622_v52, %v4472_v40  ;;  %v15885_v27 = vsel %vm6323_vm1, %v6327_v61, %v6328_v51  ;;  %v15917_v8 = vld [vmem:[#allocation2 + $0x70] sm:$0xff]  ;;  %v15924_v26 = vld [vmem:[#allocation2 + $0x28] sm:$0xff] }
 0x508   :  { %v4509_v45 = vmax.f32 %v15736_v18, %v4473_v42  ;;  %8791 = vmatprep.mubr.bf16.mxu1 %v15885_v27  ;;  %v13107_v38 = vld [vmem:[#allocation7 + $0x388] ss:$16 sps:$4 sm:$0xff]   ;;  %v6210_v31 = vld [vmem:[#allocation2 + $0x10] sm:$0xf0]  ;;  %v6331_v4 = vrot.slane %v15924_v26, 4 }
 0x509   :  { %v4526_v41 = vpack.c.bf16 %v4508_v58, %v4505_v39  ;;  %5368 = vmatpush1.bf16.msra.mxu0 %v15875_v48  ;;  %8792 = vmatmul.mubr.bf16.vlgmr.msra.gmra.mrb[96].mxu1 %v15890_v53  ;;  %v13110_v47 = vld [vmem:[#allocation7 + $0x3a8] ss:$16 sps:$4 sm:$0xff]   ;;  %v6330_v37 = vrot.slane %v6210_v31, 4  ;;  %v15932_v20 = vld [vmem:[#allocation7 + $0x52c] ss:$16 sps:$4 sm:$0xff]  }
 0x50a   :  { %v4527_v44 = vpack.c.bf16 %v4509_v45, %v4506_v43  ;;  %8813 = vmatpush1.bf16.msra.mxu1 %v15795_v21  ;;  %5369 = vmatprep.subr.bf16.mxu0 %v15881_v24  ;;  %v6215_v52 = vld [vmem:[#allocation2 + $0x38] sm:$0xf]  ;;  %v13097_v21 = vld [vmem:[#allocation7 + $0x30c] ss:$16 sps:$4 sm:$0xff]   ;;  %v13116_v36 = vld [vmem:[#allocation7 + $0x3c8] ss:$16 sps:$4 sm:$0xff]  }
 0x50b   :  { %v4608_v49 = vrot.slane %v4526_v41, 4  ;;  %4617 = vst [vmem:[#allocation2 + $0x80] sm:$0xf0] %v4526_v41  ;;  %8814 = vmatprep.subr.bf16.mxu1 %v15800_v59  ;;  %v6335_v18 = vrot.slane %v6215_v52, 4  ;;  %v15904_v59 = vsel %vm6323_vm1, %v6325_v54, %v6333_v33  ;;  %v15935_v23 = vsel %vm6323_vm1, %v6330_v37, %v6331_v4  ;;  %v6216_v7 = vld [vmem:[#allocation2 + $0x40] sm:$0xf] }
 0x50c   :  { %v4609_v10 = vrot.slane %v4527_v44, 4  ;;  %4618 = vst [vmem:[#allocation2 + $0x88] sm:$0xf0] %v4527_v44  ;;  %v13124_v17 = vld [vmem:[#allocation7 + $0x3ec] ss:$16 sps:$4 sm:$0xff]   ;;  %v6337_v2 = vrot.slane %v6216_v7, 4 }
 0x50d   :  { %4614 = vst [vmem:[#allocation2 + $0x38] sm:$0xf0] %v4608_v49  ;;  %5370 = vmatpush1.bf16.msra.mxu0 %v13089_v63  ;;  %v15898_v29 = vsel %vm6323_vm1, %v6328_v51, %v6335_v18  ;;  %v15943_v12 = vld [vmem:[#allocation7 + $0x54c] ss:$16 sps:$4 sm:$0xff]   ;;  %v13122_v54 = vld [vmem:[#allocation7 + $0x3e8] ss:$16 sps:$4 sm:$0xff]  }
 0x50e   :  { %4615 = vst [vmem:[#allocation2 + $0x40] sm:$0xf0] %v4609_v10  ;;  %8815 = vmatpush1.bf16.msra.mxu1 %v15814_v60  ;;  %8801 = vmatprep.mubr.bf16.mxu1 %v15898_v29  ;;  %v13098_v60 = vld [vmem:[#allocation7 + $0x328] ss:$16 sps:$4 sm:$0xff]   ;;  %v13130_v40 = vld [vmem:[#allocation7 + $0x40c] ss:$16 sps:$4 sm:$0xff]   ;;  %v15952_v61 = vsel %vm6323_vm1, %v6331_v4, %v6337_v2 }
 0x50f   :  { %5371 = vmatprep.subr.bf16.mxu0 %v13094_v6  ;;  %8816 = vmatprep.subr.bf16.mxu1 %v15820_v11  ;;  %v13103_v11 = vld [vmem:[#allocation7 + $0x34c] ss:$16 sps:$4 sm:$0xff]   ;;  %v15946_v39 = vld [vmem:[#allocation7 + $0x548] ss:$16 sps:$4 sm:$0xff]   ;;  %v16001_v31 = vld [vmem:[#allocation7 + $0x40] ss:$16 sps:$4 sm:$0xff]  }
 0x510   :  { %v13128_v51 = vld [vmem:[#allocation7 + $0x408] ss:$16 sps:$4 sm:$0xff]   ;;  %v13136_v42 = vld [vmem:[#allocation7 + $0x42c] ss:$16 sps:$4 sm:$0xff]   ;;  %v16004_v4 = vld [vmem:[#allocation7 + $0x64] ss:$16 sps:$4 sm:$0xff]  }
 0x511   :  { %5372 = vmatpush1.bf16.msra.mxu0 %v13092_v56  ;;  %8802 = vmatmul.mubr.bf16.gmra.mrb[100].mxu1 %v15904_v59  ;;  %v15956_v43 = vld [vmem:[#allocation7 + $0x568] ss:$16 sps:$4 sm:$0xff]   ;;  %v15959_v28 = vld [vmem:[#allocation7 + $0x58c] ss:$16 sps:$4 sm:$0xff]   ;;  %v16013_v37 = vld [vmem:[#allocation7 + $0x84] ss:$16 sps:$4 sm:$0xff]  }
 0x512   :  { %8817 = vmatpush1.bf16.msra.mxu1 %v15828_v15  ;;  %5410 = vmatprep.subr.bf16.mxu0 %v13097_v21  ;;  %v13101_v15 = vld [vmem:[#allocation7 + $0x348] ss:$16 sps:$4 sm:$0xff]   ;;  %v13142_v45 = vld [vmem:[#allocation7 + $0x44c] ss:$16 sps:$4 sm:$0xff]   ;;  %v16041_v7 = vld [vmem:[#allocation7 + $0xe4] ss:$16 sps:$4 sm:$0xff]  }
 0x513   :  { %8818 = vmatprep.subr.bf16.mxu1 %v15832_v9  ;;  %8844 = vmatprep.mubr.bf16.mxu1 %v17832_v5  ;;  %v13106_v9 = vld [vmem:[#allocation7 + $0x36c] ss:$16 sps:$4 sm:$0xff]   ;;  %v15963_v58 = vld [vmem:[#allocation7 + $0x588] ss:$16 sps:$4 sm:$0xff]   ;;  %v16057_v2 = vld [vmem:[#allocation7 + $0x124] ss:$16 sps:$4 sm:$0xff]  }
 0x514   :  { %5390 = vmatmul.mubr.bf16.vlgmr.msra.gmra.mrb[68].mxu0 %v15908_v16  ;;  %v15966_v41 = vld [vmem:[#allocation7 + $0x5ac] ss:$16 sps:$4 sm:$0xff]   ;;  %v15969_v14 = vld [vmem:[#allocation7 + $0x5a8] ss:$16 sps:$4 sm:$0xff]  }
 0x515   :  { %5411 = vmatpush1.bf16.msra.mxu0 %v13095_v13  ;;  %5399 = vmatprep.mubr.bf16.mxu0 %v17832_v5  ;;  %v13148_v44 = vld [vmem:[#allocation7 + $0x46c] ss:$16 sps:$4 sm:$0xff]   ;;  %v13146_v49 = vld [vmem:[#allocation7 + $0x468] ss:$16 sps:$4 sm:$0xff]   ;;  %v15984_v13 = vld [vmem:[#allocation7 + $0x4] ss:$16 sps:$4 sm:$0xff]  }
 0x516   :  { %8819 = vmatpush1.bf16.msra.mxu1 %v15842_v32  ;;  %5412 = vmatprep.subr.bf16.mxu0 %v13100_v35  ;;  %v13104_v32 = vld [vmem:[#allocation7 + $0x368] ss:$16 sps:$4 sm:$0xff]   ;;  %v15972_v52 = vld [vmem:[#allocation7 + $0x5cc] ss:$16 sps:$4 sm:$0xff]  }
 0x517   :  { %8820 = vmatprep.subr.bf16.mxu1 %v15846_v1  ;;  %v13109_v1 = vld [vmem:[#allocation7 + $0x38c] ss:$16 sps:$4 sm:$0xff]   ;;  %v15975_v18 = vld [vmem:[#allocation7 + $0x5c8] ss:$16 sps:$4 sm:$0xff]  }
 0x518   :  { %v15978_v10 = vld [vmem:[#allocation7 + $0x5ec] ss:$16 sps:$4 sm:$0xff]   ;;  %v13152_v33 = vld [vmem:[#allocation7 + $0x488] ss:$16 sps:$4 sm:$0xff]  }
 0x519   :  { %5413 = vmatpush1.bf16.msra.mxu0 %v13098_v60  ;;  %v13160_v21 = vld [vmem:[#allocation7 + $0x4ac] ss:$16 sps:$4 sm:$0xff]   ;;  %v13158_v35 = vld [vmem:[#allocation7 + $0x4a8] ss:$16 sps:$4 sm:$0xff]   ;;  %v15987_v60 = vld [vmem:[#allocation7] ss:$16 sps:$4 sm:$0xff]  }
 0x51a   :  { %8821 = vmatpush1.bf16.msra.mxu1 %v15856_v30  ;;  %5414 = vmatprep.subr.bf16.mxu0 %v13103_v11  ;;  %v15926_v30 = vld [vmem:[#allocation7 + $0x50c] ss:$16 sps:$4 sm:$0xff]  }
 0x51b   :  { %8822 = vmatprep.subr.bf16.mxu1 %v15864_v50  ;;  %v15929_v50 = vld [vmem:[#allocation7 + $0x508] ss:$16 sps:$4 sm:$0xff]   ;;  %v13166_v11 = vld [vmem:[#allocation7 + $0x4cc] ss:$16 sps:$4 sm:$0xff]  }
 0x51c   :  { %5400 = vmatmul.mubr.bf16.gmra.mrb[72].mxu0 %v15917_v8 }
 0x51d   :  { %5415 = vmatpush1.bf16.msra.mxu0 %v13101_v15  ;;  %5442 = vmatprep.mubr.bf16.mxu0 %v15798_v0  ;;  %v15990_v15 = vld [vmem:[#allocation7 + $0x24] ss:$16 sps:$4 sm:$0xff]  }
 0x51e   :  { %8823 = vmatpush1.bf16.msra.mxu1 %v15875_v48  ;;  %5416 = vmatprep.subr.bf16.mxu0 %v13106_v9  ;;  %v15949_v48 = vld [vmem:[#allocation7 + $0x56c] ss:$16 sps:$4 sm:$0xff]   ;;  %v13164_v9 = vld [vmem:[#allocation7 + $0x4c8] ss:$16 sps:$4 sm:$0xff]  }
 0x51f   :  { %8824 = vmatprep.subr.bf16.mxu1 %v15881_v24  ;;  %v13134_v24 = vld [vmem:[#allocation7 + $0x428] ss:$16 sps:$4 sm:$0xff]  }
 0x521   :  { %5417 = vmatpush1.bf16.msra.mxu0 %v13104_v32  ;;  %v15994_v32 = vld [vmem:[#allocation7 + $0x20] ss:$16 sps:$4 sm:$0xff]  }
 0x522   :  { %8825 = vmatpush1.bf16.msra.mxu1 %v13089_v63  ;;  %5418 = vmatprep.subr.bf16.mxu0 %v13109_v1  ;;  %v13140_v63 = vld [vmem:[#allocation7 + $0x448] ss:$16 sps:$4 sm:$0xff]   ;;  %v13172_v1 = vld [vmem:[#allocation7 + $0x4ec] ss:$16 sps:$4 sm:$0xff]  }
 0x523   :  { %8826 = vmatprep.subr.bf16.mxu1 %v13094_v6  ;;  %v13154_v6 = vld [vmem:[#allocation7 + $0x48c] ss:$16 sps:$4 sm:$0xff]  }
 0x525   :  { %5419 = vmatpush1.bf16.msra.mxu0 %v13107_v38  ;;  %v15998_v38 = vld [vmem:[#allocation7 + $0x44] ss:$16 sps:$4 sm:$0xff]  }
 0x526   :  { %8827 = vmatpush1.bf16.msra.mxu1 %v13092_v56  ;;  %5420 = vmatprep.subr.bf16.mxu0 %v13112_v22  ;;  %v15981_v56 = vld [vmem:[#allocation7 + $0x5e8] ss:$16 sps:$4 sm:$0xff]  }
 0x527   :  { %8918 = vmatprep.subr.bf16.mxu1 %v15926_v30  ;;  %v13170_v22 = vld [vmem:[#allocation7 + $0x4e8] ss:$16 sps:$4 sm:$0xff]  }
 0x529   :  { %5421 = vmatpush1.bf16.msra.mxu0 %v13110_v47  ;;  %8845 = vmatmul.mubr.bf16.vlgmr.msra.gmra.mrb[96].mxu1 %v15935_v23  ;;  %v16009_v47 = vld [vmem:[#allocation7 + $0x60] ss:$16 sps:$4 sm:$0xff]  }
 0x52a   :  { %8919 = vmatpush1.bf16.msra.mxu1 %v15929_v50  ;;  %5422 = vmatprep.subr.bf16.mxu0 %v13118_v46  ;;  %v16020_v46 = vld [vmem:[#allocation7 + $0x80] ss:$16 sps:$4 sm:$0xff]  }
 0x52b   :  { %8920 = vmatprep.subr.bf16.mxu1 %v15932_v20  ;;  %8854 = vmatprep.mubr.bf16.mxu1 %v17832_v5 }
 0x52d   :  { %5423 = vmatpush1.bf16.msra.mxu0 %v13116_v36  ;;  %v16023_v36 = vld [vmem:[#allocation7 + $0xa4] ss:$16 sps:$4 sm:$0xff]  }
 0x52e   :  { %8921 = vmatpush1.bf16.msra.mxu1 %v15939_v25  ;;  %5424 = vmatprep.subr.bf16.mxu0 %v13124_v17  ;;  %v16049_v17 = vld [vmem:[#allocation7 + $0x104] ss:$16 sps:$4 sm:$0xff]  }
 0x52f   :  { %8922 = vmatprep.subr.bf16.mxu1 %v15943_v12 }
 0x531   :  { %5425 = vmatpush1.bf16.msra.mxu0 %v13122_v54  ;;  %8855 = vmatmul.mubr.bf16.gmra.mrb[100].mxu1 %v15952_v61  ;;  %v16062_v54 = vld [vmem:[#allocation7 + $0x120] ss:$16 sps:$4 sm:$0xff]  }
 0x532   :  { %8923 = vmatpush1.bf16.msra.mxu1 %v15946_v39  ;;  %5426 = vmatprep.subr.bf16.mxu0 %v13130_v40  ;;  %v16070_v40 = vld [vmem:[#allocation7 + $0x140] ss:$16 sps:$4 sm:$0xff]  }
 0x533   :  { %8924 = vmatprep.subr.bf16.mxu1 %v15949_v48  ;;  %8950 = vmatprep.mubr.bf16.mxu1 %v17832_v5 }
 0x535   :  { %5427 = vmatpush1.bf16.msra.mxu0 %v13128_v51  ;;  %v16078_v51 = vld [vmem:[#allocation7 + $0x160] ss:$16 sps:$4 sm:$0xff]  }
 0x536   :  { %8925 = vmatpush1.bf16.msra.mxu1 %v15956_v43  ;;  %5428 = vmatprep.subr.bf16.mxu0 %v13136_v42  ;;  %v16088_v42 = vld [vmem:[#allocation7 + $0x180] ss:$16 sps:$4 sm:$0xff]  }
 0x537   :  { %8926 = vmatprep.subr.bf16.mxu1 %v15959_v28 }
 0x539   :  { %5429 = vmatpush1.bf16.msra.mxu0 %v13134_v24  ;;  %v16096_v24 = vld [vmem:[#allocation7 + $0x1a0] ss:$16 sps:$4 sm:$0xff]  }
 0x53a   :  { %8927 = vmatpush1.bf16.msra.mxu1 %v15963_v58  ;;  %5430 = vmatprep.subr.bf16.mxu0 %v13142_v45  ;;  %v16102_v45 = vld [vmem:[#allocation2 + $0x8] sm:$0xff] }
 0x53b   :  { %8928 = vmatprep.subr.bf16.mxu1 %v15966_v41 }
 0x53d   :  { %5431 = vmatpush1.bf16.msra.mxu0 %v13140_v63  ;;  %v16111_v63 = vld [vmem:[#allocation7 + $0x1e4] ss:$16 sps:$4 sm:$0xff]  }
 0x53e   :  { %8929 = vmatpush1.bf16.msra.mxu1 %v15969_v14  ;;  %5432 = vmatprep.subr.bf16.mxu0 %v13148_v44  ;;  %v16119_v44 = vld [vmem:[#allocation7 + $0x204] ss:$16 sps:$4 sm:$0xff]  }
 0x53f   :  { %8930 = vmatprep.subr.bf16.mxu1 %v15972_v52 }
 0x541   :  { %5433 = vmatpush1.bf16.msra.mxu0 %v13146_v49  ;;  %v16127_v49 = vld [vmem:[#allocation7 + $0x224] ss:$16 sps:$4 sm:$0xff]  }
 0x542   :  { %8931 = vmatpush1.bf16.msra.mxu1 %v15975_v18  ;;  %5434 = vmatprep.subr.bf16.mxu0 %v13154_v6  ;;  %v16137_v6 = vld [vmem:[#allocation7 + $0x244] ss:$16 sps:$4 sm:$0xff]  }
 0x543   :  { %8932 = vmatprep.subr.bf16.mxu1 %v15978_v10 }
 0x545   :  { %5435 = vmatpush1.bf16.msra.mxu0 %v13152_v33  ;;  %v16151_v33 = vld [vmem:[#allocation7 + $0x260] ss:$16 sps:$4 sm:$0xff]  }
 0x546   :  { %8933 = vmatpush1.bf16.msra.mxu1 %v15981_v56  ;;  %5436 = vmatprep.subr.bf16.mxu0 %v13160_v21  ;;  %v16160_v21 = vld [vmem:[#allocation7 + $0x280] ss:$16 sps:$4 sm:$0xff]  }
 0x547   :  { %8971 = vmatprep.subr.bf16.mxu1 %v15984_v13 }
 0x549   :  { %5437 = vmatpush1.bf16.msra.mxu0 %v13158_v35  ;;  %8951 = vmatmul.mubr.bf16.vlgmr.msra.gmra.mrb[104].mxu1 %v15935_v23  ;;  %v16168_v35 = vld [vmem:[#allocation7 + $0x2a0] ss:$16 sps:$4 sm:$0xff]  }
 0x54a   :  { %8972 = vmatpush1.bf16.msra.mxu1 %v15987_v60  ;;  %5438 = vmatprep.subr.bf16.mxu0 %v13166_v11  ;;  %v16176_v11 = vld [vmem:[#allocation7 + $0x2c0] ss:$16 sps:$4 sm:$0xff]  }
 0x54b   :  { %8973 = vmatprep.subr.bf16.mxu1 %v15990_v15  ;;  %8960 = vmatprep.mubr.bf16.mxu1 %v17832_v5 }
 0x54d   :  { %5439 = vmatpush1.bf16.msra.mxu0 %v13164_v9  ;;  %v16184_v9 = vld [vmem:[#allocation7 + $0x2e0] ss:$16 sps:$4 sm:$0xff]  }
 0x54e   :  { %8974 = vmatpush1.bf16.msra.mxu1 %v15994_v32  ;;  %5440 = vmatprep.subr.bf16.mxu0 %v13172_v1  ;;  %v16192_v1 = vld [vmem:[#allocation7 + $0x8] ss:$16 sps:$4 sm:$0xff]  }
 0x54f   :  { %8975 = vmatprep.subr.bf16.mxu1 %v15998_v38 }
 0x551   :  { %5441 = vmatpush1.bf16.msra.mxu0 %v13170_v22  ;;  %8961 = vmatmul.mubr.bf16.gmra.mrb[108].mxu1 %v15952_v61  ;;  %v16201_v22 = vld [vmem:[#allocation7 + $0x28] ss:$16 sps:$4 sm:$0xff]  }
 0x552   :  { %8976 = vmatpush1.bf16.msra.mxu1 %v16001_v31  ;;  %9003 = vmatprep.mubr.bf16.mxu1 %v15798_v0 }
 0x553   :  { %5463 = vmatprep.subr.bf16.mxu0 %v15926_v30  ;;  %8977 = vmatprep.subr.bf16.mxu1 %v16004_v4  ;;  %v16028_v30 = vld [vmem:[#allocation7 + $0xa0] ss:$16 sps:$4 sm:$0xff]  }
 0x554   :  { %5443 = vmatmul.mubr.bf16.vlgmr.msra.gmra.mrb[76].mxu0 %v15805_v3 }
 0x555   :  { %5452 = vmatprep.mubr.bf16.mxu0 %v15861_v55  ;;  %5464 = vmatpush1.bf16.msra.mxu0 %v15929_v50  ;;  %v16031_v50 = vld [vmem:[#allocation7 + $0xc4] ss:$16 sps:$4 sm:$0xff]  }
 0x556   :  { %8978 = vmatpush1.bf16.msra.mxu1 %v16009_v47  ;;  %5465 = vmatprep.subr.bf16.mxu0 %v15932_v20  ;;  %v16038_v20 = vld [vmem:[#allocation7 + $0xc0] ss:$16 sps:$4 sm:$0xff]  }
 0x557   :  { %8979 = vmatprep.subr.bf16.mxu1 %v16013_v37 }
 0x559   :  { %5466 = vmatpush1.bf16.msra.mxu0 %v15939_v25  ;;  %v16046_v25 = vld [vmem:[#allocation7 + $0xe0] ss:$16 sps:$4 sm:$0xff]  }
 0x55a   :  { %8980 = vmatpush1.bf16.msra.mxu1 %v16020_v46  ;;  %5467 = vmatprep.subr.bf16.mxu0 %v15943_v12  ;;  %v16054_v12 = vld [vmem:[#allocation7 + $0x100] ss:$16 sps:$4 sm:$0xff]  }
 0x55b   :  { %8981 = vmatprep.subr.bf16.mxu1 %v16023_v36 }
 0x55c   :  { %5453 = vmatmul.mubr.bf16.gmra.mrb[80].mxu0 %v15867_v34 }
 0x55d   :  { %5468 = vmatpush1.bf16.msra.mxu0 %v15946_v39  ;;  %5495 = vmatprep.mubr.bf16.mxu0 %v17832_v5  ;;  %v16065_v39 = vld [vmem:[#allocation7 + $0x144] ss:$16 sps:$4 sm:$0xff]  }
 0x55e   :  { %8982 = vmatpush1.bf16.msra.mxu1 %v16028_v30  ;;  %5469 = vmatprep.subr.bf16.mxu0 %v15949_v48  ;;  %v16073_v48 = vld [vmem:[#allocation7 + $0x164] ss:$16 sps:$4 sm:$0xff]  }
 0x55f   :  { %8983 = vmatprep.subr.bf16.mxu1 %v16031_v50 }
 0x561   :  { %5470 = vmatpush1.bf16.msra.mxu0 %v15956_v43  ;;  %v16081_v43 = vld [vmem:[#allocation7 + $0x184] ss:$16 sps:$4 sm:$0xff]  }
 0x562   :  { %8984 = vmatpush1.bf16.msra.mxu1 %v16038_v20  ;;  %5471 = vmatprep.subr.bf16.mxu0 %v15959_v28  ;;  %v16091_v28 = vld [vmem:[#allocation7 + $0x1a4] ss:$16 sps:$4 sm:$0xff]  }
 0x563   :  { %8985 = vmatprep.subr.bf16.mxu1 %v16041_v7 }
 0x565   :  { %5472 = vmatpush1.bf16.msra.mxu0 %v15963_v58  ;;  %v16099_v58 = vld [vmem:[#allocation7 + $0x1c4] ss:$16 sps:$4 sm:$0xff]  }
 0x566   :  { %8986 = vmatpush1.bf16.msra.mxu1 %v16046_v25  ;;  %5473 = vmatprep.subr.bf16.mxu0 %v15966_v41  ;;  %v16108_v41 = vld [vmem:[#allocation7 + $0x1c0] ss:$16 sps:$4 sm:$0xff]  }
 0x567   :  { %8987 = vmatprep.subr.bf16.mxu1 %v16049_v17 }
 0x569   :  { %5474 = vmatpush1.bf16.msra.mxu0 %v15969_v14  ;;  %v16116_v14 = vld [vmem:[#allocation7 + $0x1e0] ss:$16 sps:$4 sm:$0xff]  }
 0x56a   :  { %8988 = vmatpush1.bf16.msra.mxu1 %v16054_v12  ;;  %5475 = vmatprep.subr.bf16.mxu0 %v15972_v52  ;;  %v16124_v52 = vld [vmem:[#allocation7 + $0x200] ss:$16 sps:$4 sm:$0xff]  }
 0x56b   :  { %8989 = vmatprep.subr.bf16.mxu1 %v16057_v2 }
 0x56d   :  { %5476 = vmatpush1.bf16.msra.mxu0 %v15975_v18  ;;  %v16133_v18 = vld [vmem:[#allocation7 + $0x220] ss:$16 sps:$4 sm:$0xff]  }
 0x56e   :  { %8990 = vmatpush1.bf16.msra.mxu1 %v16062_v54  ;;  %5477 = vmatprep.subr.bf16.mxu0 %v15978_v10  ;;  %v16142_v10 = vld [vmem:[#allocation7 + $0x240] ss:$16 sps:$4 sm:$0xff]  }
 0x56f   :  { %8991 = vmatprep.subr.bf16.mxu1 %v16065_v39 }
 0x571   :  { %5478 = vmatpush1.bf16.msra.mxu0 %v15981_v56  ;;  %v16154_v56 = vld [vmem:[#allocation7 + $0x284] ss:$16 sps:$4 sm:$0xff]  }
 0x572   :  { %8992 = vmatpush1.bf16.msra.mxu1 %v16070_v40  ;;  %5996 = vmatprep.subr.bf16.mxu0 %v15984_v13  ;;  %v16163_v13 = vld [vmem:[#allocation7 + $0x2a4] ss:$16 sps:$4 sm:$0xff]  }
 0x573   :  { %8993 = vmatprep.subr.bf16.mxu1 %v16073_v48 }
 0x574   :  { %5496 = vmatmul.mubr.bf16.vlgmr.msra.gmra.mrb[76].mxu0 %v15908_v16 }
 0x575   :  { %5997 = vmatpush1.bf16.msra.mxu0 %v15987_v60  ;;  %5505 = vmatprep.mubr.bf16.mxu0 %v17832_v5  ;;  %v16171_v60 = vld [vmem:[#allocation7 + $0x2c4] ss:$16 sps:$4 sm:$0xff]  }
 0x576   :  { %8994 = vmatpush1.bf16.msra.mxu1 %v16078_v51  ;;  %5998 = vmatprep.subr.bf16.mxu0 %v15990_v15  ;;  %v16179_v15 = vld [vmem:[#allocation7 + $0x2e4] ss:$16 sps:$4 sm:$0xff]  }
 0x577   :  { %8995 = vmatprep.subr.bf16.mxu1 %v16081_v43 }
 0x579   :  { %5999 = vmatpush1.bf16.msra.mxu0 %v15994_v32  ;;  %v16187_v32 = vld [vmem:[#allocation7 + $0xc] ss:$16 sps:$4 sm:$0xff]  }
 0x57a   :  { %8996 = vmatpush1.bf16.msra.mxu1 %v16088_v42  ;;  %6000 = vmatprep.subr.bf16.mxu0 %v15998_v38  ;;  %v16195_v38 = vld [vmem:[#allocation7 + $0x2c] ss:$16 sps:$4 sm:$0xff]  }
 0x57b   :  { %8997 = vmatprep.subr.bf16.mxu1 %v16091_v28 }
 0x57c   :  { %5506 = vmatmul.mubr.bf16.gmra.mrb[80].mxu0 %v15917_v8 }
 0x57d   :  { %6001 = vmatpush1.bf16.msra.mxu0 %v16001_v31  ;;  %6028 = vmatprep.mubr.bf16.mxu0 %v16102_v45  ;;  %v16205_v31 = vld [vmem:[#allocation7 + $0x4c] ss:$16 sps:$4 sm:$0xff]  }
 0x57e   :  { %8998 = vmatpush1.bf16.msra.mxu1 %v16096_v24  ;;  %6002 = vmatprep.subr.bf16.mxu0 %v16004_v4  ;;  %v16210_v4 = vld [vmem:[#allocation7 + $0x48] ss:$16 sps:$4 sm:$0xff]  }
 0x57f   :  { %8999 = vmatprep.subr.bf16.mxu1 %v16099_v58 }
 0x581   :  { %6003 = vmatpush1.bf16.msra.mxu0 %v16009_v47  ;;  %v16213_v47 = vld [vmem:[#allocation7 + $0x6c] ss:$16 sps:$4 sm:$0xff]  }
 0x582   :  { %9000 = vmatpush1.bf16.msra.mxu1 %v16108_v41  ;;  %6004 = vmatprep.subr.bf16.mxu0 %v16013_v37  ;;  %v16219_v37 = vld [vmem:[#allocation7 + $0x68] ss:$16 sps:$4 sm:$0xff]  }
 0x583   :  { %9001 = vmatprep.subr.bf16.mxu1 %v16111_v63 }
 0x585   :  { %6005 = vmatpush1.bf16.msra.mxu0 %v16020_v46  ;;  %v16221_v46 = vld [vmem:[#allocation2] sm:$0xff] }
 0x586   :  { %9002 = vmatpush1.bf16.msra.mxu1 %v16116_v14  ;;  %6006 = vmatprep.subr.bf16.mxu0 %v16023_v36  ;;  %v16225_v36 = vld [vmem:[#allocation7 + $0x8c] ss:$16 sps:$4 sm:$0xff]  }
 0x587   :  { %9024 = vmatprep.subr.bf16.mxu1 %v16119_v44 }
 0x589   :  { %6007 = vmatpush1.bf16.msra.mxu0 %v16028_v30  ;;  %9004 = vmatmul.mubr.bf16.vlgmr.msra.gmra.mrb[96].mxu1 %v15805_v3  ;;  %v16145_v3 = vld [vmem:[#allocation7 + $0x264] ss:$16 sps:$4 sm:$0xff]   ;;  %v16235_v30 = vld [vmem:[#allocation7 + $0xac] ss:$16 sps:$4 sm:$0xff]  }
 0x58a   :  { %9013 = vmatprep.mubr.bf16.mxu1 %v15861_v55  ;;  %9025 = vmatpush1.bf16.msra.mxu1 %v16124_v52 }
 0x58b   :  { %6008 = vmatprep.subr.bf16.mxu0 %v16031_v50  ;;  %9026 = vmatprep.subr.bf16.mxu1 %v16127_v49  ;;  %v16240_v50 = vld [vmem:[#allocation7 + $0xa8] ss:$16 sps:$4 sm:$0xff]  }
 0x58d   :  { %6009 = vmatpush1.bf16.msra.mxu0 %v16038_v20  ;;  %v16250_v20 = vld [vmem:[#allocation7 + $0xc8] ss:$16 sps:$4 sm:$0xff]  }
 0x58e   :  { %9027 = vmatpush1.bf16.msra.mxu1 %v16133_v18  ;;  %6010 = vmatprep.subr.bf16.mxu0 %v16041_v7  ;;  %v16253_v7 = vld [vmem:[#allocation7 + $0xec] ss:$16 sps:$4 sm:$0xff]  }
 0x58f   :  { %9028 = vmatprep.subr.bf16.mxu1 %v16137_v6 }
 0x591   :  { %6011 = vmatpush1.bf16.msra.mxu0 %v16046_v25  ;;  %9014 = vmatmul.mubr.bf16.gmra.mrb[100].mxu1 %v15867_v34  ;;  %v16261_v25 = vld [vmem:[#allocation7 + $0x10c] ss:$16 sps:$4 sm:$0xff]  }
 0x592   :  { %9029 = vmatpush1.bf16.msra.mxu1 %v16142_v10  ;;  %6012 = vmatprep.subr.bf16.mxu0 %v16049_v17  ;;  %v16266_v17 = vld [vmem:[#allocation7 + $0x108] ss:$16 sps:$4 sm:$0xff]  }
 0x593   :  { %9030 = vmatprep.subr.bf16.mxu1 %v16145_v3  ;;  %9056 = vmatprep.mubr.bf16.mxu1 %v17832_v5 }
 0x595   :  { %6013 = vmatpush1.bf16.msra.mxu0 %v16054_v12  ;;  %v16269_v12 = vld [vmem:[#allocation7 + $0x12c] ss:$16 sps:$4 sm:$0xff]  }
 0x596   :  { %9031 = vmatpush1.bf16.msra.mxu1 %v16151_v33  ;;  %6014 = vmatprep.subr.bf16.mxu0 %v16057_v2  ;;  %v16274_v2 = vld [vmem:[#allocation7 + $0x128] ss:$16 sps:$4 sm:$0xff]  }
 0x597   :  { %9032 = vmatprep.subr.bf16.mxu1 %v16154_v56 }
 0x599   :  { %6015 = vmatpush1.bf16.msra.mxu0 %v16062_v54  ;;  %v16277_v54 = vld [vmem:[#allocation7 + $0x14c] ss:$16 sps:$4 sm:$0xff]  }
 0x59a   :  { %9033 = vmatpush1.bf16.msra.mxu1 %v16160_v21  ;;  %6016 = vmatprep.subr.bf16.mxu0 %v16065_v39  ;;  %v16282_v39 = vld [vmem:[#allocation7 + $0x148] ss:$16 sps:$4 sm:$0xff]  }
 0x59b   :  { %9034 = vmatprep.subr.bf16.mxu1 %v16163_v13 }
 0x59d   :  { %6017 = vmatpush1.bf16.msra.mxu0 %v16070_v40  ;;  %v16285_v40 = vld [vmem:[#allocation7 + $0x16c] ss:$16 sps:$4 sm:$0xff]  }
 0x59e   :  { %9035 = vmatpush1.bf16.msra.mxu1 %v16168_v35  ;;  %6018 = vmatprep.subr.bf16.mxu0 %v16073_v48  ;;  %v16290_v48 = vld [vmem:[#allocation7 + $0x168] ss:$16 sps:$4 sm:$0xff]  }
 0x59f   :  { %9036 = vmatprep.subr.bf16.mxu1 %v16171_v60 }
 0x5a1   :  { %6019 = vmatpush1.bf16.msra.mxu0 %v16078_v51  ;;  %v16292_v51 = vld [vmem:[#allocation2 + $0x10] sm:$0xff] }
 0x5a2   :  { %9037 = vmatpush1.bf16.msra.mxu1 %v16176_v11  ;;  %6020 = vmatprep.subr.bf16.mxu0 %v16081_v43  ;;  %v16295_v43 = vld [vmem:[#allocation7 + $0x18c] ss:$16 sps:$4 sm:$0xff]  }
 0x5a3   :  { %9038 = vmatprep.subr.bf16.mxu1 %v16179_v15 }
 0x5a5   :  { %6021 = vmatpush1.bf16.msra.mxu0 %v16088_v42  ;;  %v16302_v42 = vld [vmem:[#allocation7 + $0x188] ss:$16 sps:$4 sm:$0xff]  }
 0x5a6   :  { %9039 = vmatpush1.bf16.msra.mxu1 %v16184_v9  ;;  %6022 = vmatprep.subr.bf16.mxu0 %v16091_v28  ;;  %v16305_v28 = vld [vmem:[#allocation7 + $0x1ac] ss:$16 sps:$4 sm:$0xff]  }
 0x5a7   :  { %9077 = vmatprep.subr.bf16.mxu1 %v16187_v32 }
 0x5a9   :  { %6023 = vmatpush1.bf16.msra.mxu0 %v16096_v24  ;;  %9057 = vmatmul.mubr.bf16.vlgmr.msra.gmra.mrb[96].mxu1 %v15908_v16  ;;  %v16310_v24 = vld [vmem:[#allocation7 + $0x1a8] ss:$16 sps:$4 sm:$0xff]  }
 0x5aa   :  { %9078 = vmatpush1.bf16.msra.mxu1 %v16192_v1  ;;  %6024 = vmatprep.subr.bf16.mxu0 %v16099_v58  ;;  %v16313_v58 = vld [vmem:[#allocation7 + $0x1cc] ss:$16 sps:$4 sm:$0xff]  }
 0x5ab   :  { %9079 = vmatprep.subr.bf16.mxu1 %v16195_v38  ;;  %9066 = vmatprep.mubr.bf16.mxu1 %v17832_v5 }
 0x5ad   :  { %6025 = vmatpush1.bf16.msra.mxu0 %v16108_v41  ;;  %v16320_v41 = vld [vmem:[#allocation7 + $0x1c8] ss:$16 sps:$4 sm:$0xff]  }
 0x5ae   :  { %9080 = vmatpush1.bf16.msra.mxu1 %v16201_v22  ;;  %6026 = vmatprep.subr.bf16.mxu0 %v16111_v63  ;;  %v16323_v63 = vld [vmem:[#allocation7 + $0x1ec] ss:$16 sps:$4 sm:$0xff]  }
 0x5af   :  { %9081 = vmatprep.subr.bf16.mxu1 %v16205_v31 }
 0x5b1   :  { %6027 = vmatpush1.bf16.msra.mxu0 %v16116_v14  ;;  %9067 = vmatmul.mubr.bf16.gmra.mrb[100].mxu1 %v15917_v8  ;;  %v16328_v14 = vld [vmem:[#allocation7 + $0x1e8] ss:$16 sps:$4 sm:$0xff]  }
 0x5b2   :  { %9082 = vmatpush1.bf16.msra.mxu1 %v16210_v4  ;;  %9109 = vmatprep.mubr.bf16.mxu1 %v15798_v0  ;;  %v16232_v0 = vld [vmem:[#allocation7 + $0x88] ss:$16 sps:$4 sm:$0xff]  }
 0x5b3   :  { %6049 = vmatprep.subr.bf16.mxu0 %v16119_v44  ;;  %9083 = vmatprep.subr.bf16.mxu1 %v16213_v47  ;;  %v16336_v44 = vld [vmem:[#allocation7 + $0x208] ss:$16 sps:$4 sm:$0xff]  }
 0x5b4   :  { %6029 = vmatmul.mubr.bf16.vlgmr.msra.gmra.mrb[68].mxu0 %v16221_v46 }
 0x5b5   :  { %6038 = vmatprep.mubr.bf16.mxu0 %v15870_v57  ;;  %6050 = vmatpush1.bf16.msra.mxu0 %v16124_v52  ;;  %v16243_v57 = vld [vmem:[#allocation7 + $0xcc] ss:$16 sps:$4 sm:$0xff]  }
 0x5b6   :  { %9084 = vmatpush1.bf16.msra.mxu1 %v16219_v37  ;;  %6051 = vmatprep.subr.bf16.mxu0 %v16127_v49  ;;  %v16339_v52 = vld [vmem:[#allocation7 + $0x22c] ss:$16 sps:$4 sm:$0xff]   ;;  %v14006_v49 = vld [vmem:[#allocation2 + $0x48] sm:$0xff] }
 0x5b7   :  { %9085 = vmatprep.subr.bf16.mxu1 %v16225_v36 }
 0x5b9   :  { %6052 = vmatpush1.bf16.msra.mxu0 %v16133_v18  ;;  %v16344_v18 = vld [vmem:[#allocation7 + $0x228] ss:$16 sps:$4 sm:$0xff]  }
 0x5ba   :  { %9086 = vmatpush1.bf16.msra.mxu1 %v16232_v0  ;;  %6053 = vmatprep.subr.bf16.mxu0 %v16137_v6  ;;  %v16348_v6 = vld [vmem:[#allocation7 + $0x24c] ss:$16 sps:$4 sm:$0xff]  }
 0x5bb   :  { %9087 = vmatprep.subr.bf16.mxu1 %v16235_v30 }
 0x5bc   :  { %6039 = vmatmul.mubr.bf16.gmra.mrb[72].mxu0 %v15858_v62  ;;  %v16258_v62 = vld [vmem:[#allocation7 + $0xe8] ss:$16 sps:$4 sm:$0xff]  }
 0x5bd   :  { %6054 = vmatpush1.bf16.msra.mxu0 %v16142_v10  ;;  %6081 = vmatprep.mubr.bf16.mxu0 %v17832_v5  ;;  %v16353_v10 = vld [vmem:[#allocation7 + $0x248] ss:$16 sps:$4 sm:$0xff]  }
 0x5be   :  { %9088 = vmatpush1.bf16.msra.mxu1 %v16240_v50  ;;  %6055 = vmatprep.subr.bf16.mxu0 %v16145_v3  ;;  %v16362_v3 = vld [vmem:[#allocation7 + $0x268] ss:$16 sps:$4 sm:$0xff]  }
 0x5bf   :  { %9089 = vmatprep.subr.bf16.mxu1 %v16243_v57 }
 0x5c1   :  { %6056 = vmatpush1.bf16.msra.mxu0 %v16151_v33  ;;  %v16365_v33 = vld [vmem:[#allocation7 + $0x28c] ss:$16 sps:$4 sm:$0xff]  }
 0x5c2   :  { %9090 = vmatpush1.bf16.msra.mxu1 %v16250_v20  ;;  %6057 = vmatprep.subr.bf16.mxu0 %v16154_v56  ;;  %v16371_v56 = vld [vmem:[#allocation7 + $0x288] ss:$16 sps:$4 sm:$0xff]  }
 0x5c3   :  { %9091 = vmatprep.subr.bf16.mxu1 %v16253_v7 }
 0x5c5   :  { %6058 = vmatpush1.bf16.msra.mxu0 %v16160_v21  ;;  %v16379_v21 = vld [vmem:[#allocation7 + $0x2a8] ss:$16 sps:$4 sm:$0xff]  }
 0x5c6   :  { %9092 = vmatpush1.bf16.msra.mxu1 %v16258_v62  ;;  %6059 = vmatprep.subr.bf16.mxu0 %v16163_v13  ;;  %v16382_v13 = vld [vmem:[#allocation7 + $0x2cc] ss:$16 sps:$4 sm:$0xff]  }
 0x5c7   :  { %9093 = vmatprep.subr.bf16.mxu1 %v16261_v25 }
 0x5c9   :  { %6060 = vmatpush1.bf16.msra.mxu0 %v16168_v35  ;;  %v16387_v35 = vld [vmem:[#allocation7 + $0x2c8] ss:$16 sps:$4 sm:$0xff]  }
 0x5ca   :  { %9094 = vmatpush1.bf16.msra.mxu1 %v16266_v17  ;;  %6061 = vmatprep.subr.bf16.mxu0 %v16171_v60  ;;  %v16390_v60 = vld [vmem:[#allocation7 + $0x2ec] ss:$16 sps:$4 sm:$0xff]  }
 0x5cb   :  { %9095 = vmatprep.subr.bf16.mxu1 %v16269_v12 }
 0x5cd   :  { %6062 = vmatpush1.bf16.msra.mxu0 %v16176_v11  ;;  %v16395_v11 = vld [vmem:[#allocation7 + $0x2e8] ss:$16 sps:$4 sm:$0xff]  }
 0x5ce   :  { %9096 = vmatpush1.bf16.msra.mxu1 %v16274_v2  ;;  %6063 = vmatprep.subr.bf16.mxu0 %v16179_v15  ;;  %v16398_v15 = vld [vmem:[#allocation7 + $0x604] ss:$16 sps:$4 sm:$0xff]  }
 0x5cf   :  { %9097 = vmatprep.subr.bf16.mxu1 %v16277_v54 }
 0x5d1   :  { %6064 = vmatpush1.bf16.msra.mxu0 %v16184_v9  ;;  %v16403_v9 = vld [vmem:[#allocation7 + $0x600] ss:$16 sps:$4 sm:$0xff]  }
 0x5d2   :  { %9098 = vmatpush1.bf16.msra.mxu1 %v16282_v39  ;;  %6102 = vmatprep.subr.bf16.mxu0 %v16187_v32  ;;  %v16406_v32 = vld [vmem:[#allocation7 + $0x624] ss:$16 sps:$4 sm:$0xff]  }
 0x5d3   :  { %9099 = vmatprep.subr.bf16.mxu1 %v16285_v40 }
 0x5d4   :  { %6082 = vmatmul.mubr.bf16.vlgmr.msra.gmra.mrb[68].mxu0 %v16292_v51 }
 0x5d5   :  { %6103 = vmatpush1.bf16.msra.mxu0 %v16192_v1  ;;  %6091 = vmatprep.mubr.bf16.mxu0 %v17832_v5  ;;  %v16412_v1 = vld [vmem:[#allocation7 + $0x620] ss:$16 sps:$4 sm:$0xff]  }
 0x5d6   :  { %9100 = vmatpush1.bf16.msra.mxu1 %v16290_v48  ;;  %6104 = vmatprep.subr.bf16.mxu0 %v16195_v38  ;;  %v16414_v38 = vld [vmem:[#allocation2 + $0x68] sm:$0xff] }
 0x5d7   :  { %9101 = vmatprep.subr.bf16.mxu1 %v16295_v43 }
 0x5d9   :  { %6105 = vmatpush1.bf16.msra.mxu0 %v16201_v22  ;;  %v16418_v22 = vld [vmem:[#allocation7 + $0x644] ss:$16 sps:$4 sm:$0xff]  }
 0x5da   :  { %9102 = vmatpush1.bf16.msra.mxu1 %v16302_v42  ;;  %6106 = vmatprep.subr.bf16.mxu0 %v16205_v31  ;;  %v7054_v31 = vld [vmem:[#allocation2 + $0x50] sm:$0xf0] }
 0x5db   :  { %9103 = vmatprep.subr.bf16.mxu1 %v16305_v28 }
 0x5dc   :  { %6092 = vmatmul.mubr.bf16.gmra.mrb[72].mxu0 %v15924_v26 }
 0x5dd   :  { %6107 = vmatpush1.bf16.msra.mxu0 %v16210_v4  ;;  %6134 = vmatprep.mubr.bf16.mxu0 %v16102_v45  ;;  %v16331_v45 = vld [vmem:[#allocation7 + $0x20c] ss:$16 sps:$4 sm:$0xff]   ;;  %v7172_v4 = vrot.slane %v16414_v38, 4  ;;  %v16605_v38 = vld [vmem:[#allocation7 + $0x8a4] ss:$16 sps:$4 sm:$0xff]  }
 0x5de   :  { %9104 = vmatpush1.bf16.msra.mxu1 %v16310_v24  ;;  %6108 = vmatprep.subr.bf16.mxu0 %v16213_v47  ;;  %v7171_v47 = vrot.slane %v7054_v31, 4  ;;  %v16613_v31 = vld [vmem:[#allocation7 + $0x8c4] ss:$16 sps:$4 sm:$0xff]  }
 0x5df   :  { %9105 = vmatprep.subr.bf16.mxu1 %v16313_v58 }
 0x5e1   :  { %6109 = vmatpush1.bf16.msra.mxu0 %v16219_v37  ;;  %v16427_v37 = vld [vmem:[#allocation7 + $0x664] ss:$16 sps:$4 sm:$0xff]  }
 0x5e2   :  { %9106 = vmatpush1.bf16.msra.mxu1 %v16320_v41  ;;  %6110 = vmatprep.subr.bf16.mxu0 %v16225_v36  ;;  %v16434_v36 = vsel %vm6323_vm1, %v7171_v47, %v7172_v4  ;;  %v7058_v47 = vld [vmem:[#allocation2 + $0x70] sm:$0xff] }
 0x5e3   :  { %9107 = vmatprep.subr.bf16.mxu1 %v16323_v63 }
 0x5e5   :  { %6111 = vmatpush1.bf16.msra.mxu0 %v16232_v0  ;;  %v16438_v0 = vld [vmem:[#allocation7 + $0x660] ss:$16 sps:$4 sm:$0xff]  }
 0x5e6   :  { %9108 = vmatpush1.bf16.msra.mxu1 %v16328_v14  ;;  %6112 = vmatprep.subr.bf16.mxu0 %v16235_v30  ;;  %v16442_v30 = vld [vmem:[#allocation7 + $0x684] ss:$16 sps:$4 sm:$0xff]  }
 0x5e7   :  { %9130 = vmatprep.subr.bf16.mxu1 %v16331_v45 }
 0x5e9   :  { %6113 = vmatpush1.bf16.msra.mxu0 %v16240_v50  ;;  %9110 = vmatmul.mubr.bf16.vlgmr.msra.gmra.mrb[104].mxu1 %v14006_v49  ;;  %v16451_v50 = vld [vmem:[#allocation7 + $0x680] ss:$16 sps:$4 sm:$0xff]   ;;  %v16550_v49 = vld [vmem:[#allocation7 + $0x804] ss:$16 sps:$4 sm:$0xff]  }
 0x5ea   :  { %9119 = vmatprep.mubr.bf16.mxu1 %v15861_v55  ;;  %9131 = vmatpush1.bf16.msra.mxu1 %v16336_v44  ;;  %v16356_v55 = vld [vmem:[#allocation7 + $0x26c] ss:$16 sps:$4 sm:$0xff]  }
 0x5eb   :  { %6114 = vmatprep.subr.bf16.mxu0 %v16243_v57  ;;  %9132 = vmatprep.subr.bf16.mxu1 %v16339_v52  ;;  %v16454_v57 = vld [vmem:[#allocation7 + $0x6a4] ss:$16 sps:$4 sm:$0xff]  }
 0x5ed   :  { %6115 = vmatpush1.bf16.msra.mxu0 %v16250_v20  ;;  %v16462_v20 = vld [vmem:[#allocation7 + $0x6c4] ss:$16 sps:$4 sm:$0xff]  }
 0x5ee   :  { %9133 = vmatpush1.bf16.msra.mxu1 %v16344_v18  ;;  %6116 = vmatprep.subr.bf16.mxu0 %v16253_v7  ;;  %v16464_v7 = vld [vmem:[#allocation2 + $0x18] sm:$0xff] }
 0x5ef   :  { %9134 = vmatprep.subr.bf16.mxu1 %v16348_v6 }
 0x5f1   :  { %6117 = vmatpush1.bf16.msra.mxu0 %v16258_v62  ;;  %9120 = vmatmul.mubr.bf16.gmra.mrb[108].mxu1 %v15867_v34  ;;  %v16374_v34 = vld [vmem:[#allocation7 + $0x2ac] ss:$16 sps:$4 sm:$0xff]   ;;  %v16471_v62 = vld [vmem:[#allocation7 + $0x6c0] ss:$16 sps:$4 sm:$0xff]  }
 0x5f2   :  { %9135 = vmatpush1.bf16.msra.mxu1 %v16353_v10  ;;  %6118 = vmatprep.subr.bf16.mxu0 %v16261_v25  ;;  %v16474_v25 = vld [vmem:[#allocation7 + $0x6e4] ss:$16 sps:$4 sm:$0xff]  }
 0x5f3   :  { %9136 = vmatprep.subr.bf16.mxu1 %v16356_v55  ;;  %9162 = vmatprep.mubr.bf16.mxu1 %v17832_v5 }
 0x5f5   :  { %6119 = vmatpush1.bf16.msra.mxu0 %v16266_v17  ;;  %v16479_v17 = vld [vmem:[#allocation7 + $0x6e0] ss:$16 sps:$4 sm:$0xff]  }
 0x5f6   :  { %9137 = vmatpush1.bf16.msra.mxu1 %v16362_v3  ;;  %6120 = vmatprep.subr.bf16.mxu0 %v16269_v12  ;;  %v16482_v12 = vld [vmem:[#allocation7 + $0x704] ss:$16 sps:$4 sm:$0xff]  }
 0x5f7   :  { %9138 = vmatprep.subr.bf16.mxu1 %v16365_v33 }
 0x5f9   :  { %6121 = vmatpush1.bf16.msra.mxu0 %v16274_v2  ;;  %v16487_v2 = vld [vmem:[#allocation7 + $0x700] ss:$16 sps:$4 sm:$0xff]  }
 0x5fa   :  { %9139 = vmatpush1.bf16.msra.mxu1 %v16371_v56  ;;  %6122 = vmatprep.subr.bf16.mxu0 %v16277_v54  ;;  %v16490_v54 = vld [vmem:[#allocation7 + $0x724] ss:$16 sps:$4 sm:$0xff]  }
 0x5fb   :  { %9140 = vmatprep.subr.bf16.mxu1 %v16374_v34 }
 0x5fd   :  { %6123 = vmatpush1.bf16.msra.mxu0 %v16282_v39  ;;  %v16495_v39 = vld [vmem:[#allocation7 + $0x720] ss:$16 sps:$4 sm:$0xff]  }
 0x5fe   :  { %9141 = vmatpush1.bf16.msra.mxu1 %v16379_v21  ;;  %6124 = vmatprep.subr.bf16.mxu0 %v16285_v40  ;;  %v16498_v40 = vld [vmem:[#allocation7 + $0x744] ss:$16 sps:$4 sm:$0xff]  }
 0x5ff   :  { %9142 = vmatprep.subr.bf16.mxu1 %v16382_v13 }
 0x601   :  { %6125 = vmatpush1.bf16.msra.mxu0 %v16290_v48  ;;  %v16503_v48 = vld [vmem:[#allocation7 + $0x740] ss:$16 sps:$4 sm:$0xff]  }
 0x602   :  { %9143 = vmatpush1.bf16.msra.mxu1 %v16387_v35  ;;  %6126 = vmatprep.subr.bf16.mxu0 %v16295_v43  ;;  %v16506_v43 = vld [vmem:[#allocation7 + $0x764] ss:$16 sps:$4 sm:$0xff]  }
 0x603   :  { %9144 = vmatprep.subr.bf16.mxu1 %v16390_v60 }
 0x605   :  { %6127 = vmatpush1.bf16.msra.mxu0 %v16302_v42  ;;  %v16511_v42 = vld [vmem:[#allocation7 + $0x760] ss:$16 sps:$4 sm:$0xff]  }
 0x606   :  { %9145 = vmatpush1.bf16.msra.mxu1 %v16395_v11  ;;  %6128 = vmatprep.subr.bf16.mxu0 %v16305_v28  ;;  %v16514_v28 = vld [vmem:[#allocation7 + $0x784] ss:$16 sps:$4 sm:$0xff]  }
 0x607   :  { %9183 = vmatprep.subr.bf16.mxu1 %v16398_v15 }
 0x609   :  { %6129 = vmatpush1.bf16.msra.mxu0 %v16310_v24  ;;  %9163 = vmatmul.mubr.bf16.vlgmr.msra.gmra.mrb[104].mxu1 %v15908_v16  ;;  %v16424_v16 = vld [vmem:[#allocation7 + $0x640] ss:$16 sps:$4 sm:$0xff]  }
 0x60a   :  { %9184 = vmatpush1.bf16.msra.mxu1 %v16403_v9  ;;  %6130 = vmatprep.subr.bf16.mxu0 %v16313_v58  ;;  %v16521_v24 = vld [vmem:[#allocation7 + $0x780] ss:$16 sps:$4 sm:$0xff]   ;;  %v16524_v58 = vld [vmem:[#allocation7 + $0x7a4] ss:$16 sps:$4 sm:$0xff]  }
 0x60b   :  { %9185 = vmatprep.subr.bf16.mxu1 %v16406_v32  ;;  %9172 = vmatprep.mubr.bf16.mxu1 %v17832_v5 }
 0x60d   :  { %6131 = vmatpush1.bf16.msra.mxu0 %v16320_v41  ;;  %v16532_v41 = vld [vmem:[#allocation7 + $0x7c4] ss:$16 sps:$4 sm:$0xff]  }
 0x60e   :  { %9186 = vmatpush1.bf16.msra.mxu1 %v16412_v1  ;;  %6132 = vmatprep.subr.bf16.mxu0 %v16323_v63  ;;  %v16539_v63 = vld [vmem:[#allocation7 + $0x7c0] ss:$16 sps:$4 sm:$0xff]  }
 0x60f   :  { %9187 = vmatprep.subr.bf16.mxu1 %v16418_v22 }
 0x611   :  { %6133 = vmatpush1.bf16.msra.mxu0 %v16328_v14  ;;  %9173 = vmatmul.mubr.bf16.gmra.mrb[108].mxu1 %v15917_v8  ;;  %v16445_v8 = vld [vmem:[#allocation2 + $0x20] sm:$0xff]  ;;  %v16542_v14 = vld [vmem:[#allocation7 + $0x7e4] ss:$16 sps:$4 sm:$0xff]  }
 0x612   :  { %9188 = vmatpush1.bf16.msra.mxu1 %v16424_v16  ;;  %9215 = vmatprep.mubr.bf16.mxu1 %v16434_v36 }
 0x613   :  { %6155 = vmatprep.subr.bf16.mxu0 %v16331_v45  ;;  %9189 = vmatprep.subr.bf16.mxu1 %v16427_v37  ;;  %v7056_v45 = vld [vmem:[#allocation2 + $0x60] sm:$0xff] }
 0x614   :  { %6135 = vmatmul.mubr.bf16.vlgmr.msra.gmra.mrb[76].mxu0 %v16221_v46  ;;  %v16459_v46 = vld [vmem:[#allocation7 + $0x6a0] ss:$16 sps:$4 sm:$0xff]  }
 0x615   :  { %6144 = vmatprep.mubr.bf16.mxu0 %v16445_v8  ;;  %6156 = vmatpush1.bf16.msra.mxu0 %v16336_v44  ;;  %v7060_v44 = vld [vmem:[#allocation2 + $0x80] sm:$0xf] }
 0x616   :  { %9190 = vmatpush1.bf16.msra.mxu1 %v16438_v0  ;;  %6157 = vmatprep.subr.bf16.mxu0 %v16339_v52  ;;  %v7053_v52 = vld [vmem:[#allocation2 + $0x48] sm:$0xf0] }
 0x617   :  { %9191 = vmatprep.subr.bf16.mxu1 %v16442_v30 }
 0x619   :  { %6158 = vmatpush1.bf16.msra.mxu0 %v16344_v18  ;;  %v7169_v18 = vrot.slane %v7056_v45, 4  ;;  %v16712_v45 = vld [vmem:[#allocation7 + $0x708] ss:$16 sps:$4 sm:$0xff]  }
 0x61a   :  { %9192 = vmatpush1.bf16.msra.mxu1 %v16451_v50  ;;  %6159 = vmatprep.subr.bf16.mxu0 %v16348_v6  ;;  %v7179_v6 = vrot.slane %v7060_v44, 4  ;;  %v16720_v44 = vld [vmem:[#allocation7 + $0x728] ss:$16 sps:$4 sm:$0xff]  }
 0x61b   :  { %9193 = vmatprep.subr.bf16.mxu1 %v16454_v57 }
 0x61c   :  { %6145 = vmatmul.mubr.bf16.gmra.mrb[80].mxu0 %v16464_v7 }
 0x61d   :  { %6160 = vmatpush1.bf16.msra.mxu0 %v16353_v10  ;;  %6187 = vmatprep.mubr.bf16.mxu0 %v17832_v5  ;;  %v7168_v10 = vrot.slane %v7053_v52, 4  ;;  %v16723_v52 = vld [vmem:[#allocation7 + $0x74c] ss:$16 sps:$4 sm:$0xff]  }
 0x61e   :  { %9194 = vmatpush1.bf16.msra.mxu1 %v16459_v46  ;;  %6161 = vmatprep.subr.bf16.mxu0 %v16356_v55  ;;  %v16555_v55 = vld [vmem:[#allocation7 + $0x800] ss:$16 sps:$4 sm:$0xff]  }
 0x61f   :  { %9195 = vmatprep.subr.bf16.mxu1 %v16462_v20 }
 0x621   :  { %6162 = vmatpush1.bf16.msra.mxu0 %v16362_v3  ;;  %v16558_v3 = vld [vmem:[#allocation7 + $0x824] ss:$16 sps:$4 sm:$0xff]  }
 0x622   :  { %9196 = vmatpush1.bf16.msra.mxu1 %v16471_v62  ;;  %6163 = vmatprep.subr.bf16.mxu0 %v16365_v33  ;;  %v16561_v33 = vsel %vm6323_vm1, %v7168_v10, %v7169_v18  ;;  %v16739_v10 = vld [vmem:[#allocation7 + $0x78c] ss:$16 sps:$4 sm:$0xff]  }
 0x623   :  { %9197 = vmatprep.subr.bf16.mxu1 %v16474_v25 }
 0x625   :  { %6164 = vmatpush1.bf16.msra.mxu0 %v16371_v56  ;;  %v16568_v56 = vsel %vm6323_vm1, %v7172_v4, %v7179_v6  ;;  %v16618_v4 = vld [vmem:[#allocation7 + $0x8c0] ss:$16 sps:$4 sm:$0xff]   ;;  %v16736_v6 = vld [vmem:[#allocation7 + $0x768] ss:$16 sps:$4 sm:$0xff]  }
 0x626   :  { %9198 = vmatpush1.bf16.msra.mxu1 %v16479_v17  ;;  %6165 = vmatprep.subr.bf16.mxu0 %v16374_v34  ;;  %v7059_v34 = vld [vmem:[#allocation2 + $0x78] sm:$0xf] }
 0x627   :  { %9199 = vmatprep.subr.bf16.mxu1 %v16482_v12 }
 0x629   :  { %6166 = vmatpush1.bf16.msra.mxu0 %v16379_v21  ;;  %v16572_v21 = vld [vmem:[#allocation7 + $0x820] ss:$16 sps:$4 sm:$0xff]  }
 0x62a   :  { %9200 = vmatpush1.bf16.msra.mxu1 %v16487_v2  ;;  %6167 = vmatprep.subr.bf16.mxu0 %v16382_v13  ;;  %v16576_v13 = vld [vmem:[#allocation7 + $0x844] ss:$16 sps:$4 sm:$0xff]  }
 0x62b   :  { %9201 = vmatprep.subr.bf16.mxu1 %v16490_v54 }
 0x62d   :  { %6168 = vmatpush1.bf16.msra.mxu0 %v16387_v35  ;;  %v7177_v35 = vrot.slane %v7059_v34, 4  ;;  %v16754_v34 = vld [vmem:[#allocation7 + $0x7a8] ss:$16 sps:$4 sm:$0xff]  }
 0x62e   :  { %9202 = vmatpush1.bf16.msra.mxu1 %v16495_v39  ;;  %6169 = vmatprep.subr.bf16.mxu0 %v16390_v60  ;;  %v16581_v60 = vld [vmem:[#allocation7 + $0x840] ss:$16 sps:$4 sm:$0xff]  }
 0x62f   :  { %9203 = vmatprep.subr.bf16.mxu1 %v16498_v40 }
 0x631   :  { %6170 = vmatpush1.bf16.msra.mxu0 %v16395_v11  ;;  %v16584_v11 = vld [vmem:[#allocation7 + $0x864] ss:$16 sps:$4 sm:$0xff]  }
 0x632   :  { %9204 = vmatpush1.bf16.msra.mxu1 %v16503_v48  ;;  %6825 = vmatprep.subr.bf16.mxu0 %v16398_v15  ;;  %v16587_v15 = vsel %vm6323_vm1, %v7169_v18, %v7177_v35  ;;  %v16731_v18 = vld [vmem:[#allocation7 + $0x76c] ss:$16 sps:$4 sm:$0xff]  }
 0x633   :  { %9205 = vmatprep.subr.bf16.mxu1 %v16506_v43  ;;  %v16767_v35 = vld [vmem:[#allocation7 + $0x7ec] ss:$16 sps:$4 sm:$0xff]  }
 0x634   :  { %6188 = vmatmul.mubr.bf16.vlgmr.msra.gmra.mrb[76].mxu0 %v16292_v51  ;;  %v16529_v51 = vld [vmem:[#allocation7 + $0x7a0] ss:$16 sps:$4 sm:$0xff]  }
 0x635   :  { %6826 = vmatpush1.bf16.msra.mxu0 %v16403_v9  ;;  %6197 = vmatprep.mubr.bf16.mxu0 %v17832_v5  ;;  %v16593_v9 = vld [vmem:[#allocation7 + $0x860] ss:$16 sps:$4 sm:$0xff]  }
 0x636   :  { %9206 = vmatpush1.bf16.msra.mxu1 %v16511_v42  ;;  %6827 = vmatprep.subr.bf16.mxu0 %v16406_v32  ;;  %v16596_v32 = vld [vmem:[#allocation7 + $0x884] ss:$16 sps:$4 sm:$0xff]  }
 0x637   :  { %9207 = vmatprep.subr.bf16.mxu1 %v16514_v28 }
 0x639   :  { %6828 = vmatpush1.bf16.msra.mxu0 %v16412_v1  ;;  %v16602_v1 = vld [vmem:[#allocation7 + $0x880] ss:$16 sps:$4 sm:$0xff]  }
 0x63a   :  { %9208 = vmatpush1.bf16.msra.mxu1 %v16521_v24  ;;  %6829 = vmatprep.subr.bf16.mxu0 %v16418_v22  ;;  %v16610_v22 = vld [vmem:[#allocation7 + $0x8a0] ss:$16 sps:$4 sm:$0xff]  }
 0x63b   :  { %9209 = vmatprep.subr.bf16.mxu1 %v16524_v58 }
 0x63c   :  { %6198 = vmatmul.mubr.bf16.gmra.mrb[80].mxu0 %v15924_v26  ;;  %v16547_v26 = vld [vmem:[#allocation7 + $0x7e0] ss:$16 sps:$4 sm:$0xff]  }
 0x63d   :  { %6830 = vmatpush1.bf16.msra.mxu0 %v16424_v16  ;;  %6857 = vmatprep.mubr.bf16.mxu0 %v15885_v27  ;;  %v16621_v16 = vld [vmem:[#allocation7 + $0x8e4] ss:$16 sps:$4 sm:$0xff]  }
 0x63e   :  { %9210 = vmatpush1.bf16.msra.mxu1 %v16529_v51  ;;  %6831 = vmatprep.subr.bf16.mxu0 %v16427_v37  ;;  %v16626_v37 = vld [vmem:[#allocation7 + $0x8e0] ss:$16 sps:$4 sm:$0xff]  }
 0x63f   :  { %9211 = vmatprep.subr.bf16.mxu1 %v16532_v41 }
 0x641   :  { %6832 = vmatpush1.bf16.msra.mxu0 %v16438_v0  ;;  %v7055_v0 = vld [vmem:[#allocation2 + $0x58] sm:$0xf0] }
 0x642   :  { %9212 = vmatpush1.bf16.msra.mxu1 %v16539_v63  ;;  %6833 = vmatprep.subr.bf16.mxu0 %v16442_v30  ;;  %v16629_v30 = vld [vmem:[#allocation7 + $0x60c] ss:$16 sps:$4 sm:$0xff]  }
 0x643   :  { %9213 = vmatprep.subr.bf16.mxu1 %v16542_v14 }
 0x645   :  { %6834 = vmatpush1.bf16.msra.mxu0 %v16451_v50  ;;  %v7175_v50 = vrot.slane %v7058_v47, 4  ;;  %v16816_v47 = vld [vmem:[#allocation7 + $0x888] ss:$16 sps:$4 sm:$0xff]  }
 0x646   :  { %9214 = vmatpush1.bf16.msra.mxu1 %v16547_v26  ;;  %6835 = vmatprep.subr.bf16.mxu0 %v16454_v57  ;;  %v7174_v57 = vrot.slane %v7055_v0, 4  ;;  %v16824_v0 = vld [vmem:[#allocation7 + $0x8a8] ss:$16 sps:$4 sm:$0xff]  }
 0x647   :  { %9236 = vmatprep.subr.bf16.mxu1 %v16550_v49 }
 0x649   :  { %6836 = vmatpush1.bf16.msra.mxu0 %v16459_v46  ;;  %9216 = vmatmul.mubr.bf16.vlgmr.msra.gmra.mrb[96].mxu1 %v16561_v33  ;;  %v16634_v46 = vld [vmem:[#allocation7 + $0x608] ss:$16 sps:$4 sm:$0xff]  }
 0x64a   :  { %9225 = vmatprep.mubr.bf16.mxu1 %v16568_v56  ;;  %9237 = vmatpush1.bf16.msra.mxu1 %v16555_v55 }
 0x64b   :  { %6837 = vmatprep.subr.bf16.mxu0 %v16462_v20  ;;  %9238 = vmatprep.subr.bf16.mxu1 %v16558_v3  ;;  %v16637_v20 = vld [vmem:[#allocation7 + $0x62c] ss:$16 sps:$4 sm:$0xff]  }
 0x64d   :  { %6838 = vmatpush1.bf16.msra.mxu0 %v16471_v62  ;;  %v16640_v62 = vsel %vm6323_vm1, %v7174_v57, %v7175_v50  ;;  %v16835_v57 = vld [vmem:[#allocation7 + $0x8ec] ss:$16 sps:$4 sm:$0xff]  }
 0x64e   :  { %9239 = vmatpush1.bf16.msra.mxu1 %v16572_v21  ;;  %6839 = vmatprep.subr.bf16.mxu0 %v16474_v25  ;;  %v7061_v25 = vld [vmem:[#allocation2 + $0x88] sm:$0xf] }
 0x64f   :  { %9240 = vmatprep.subr.bf16.mxu1 %v16576_v13 }
 0x651   :  { %6840 = vmatpush1.bf16.msra.mxu0 %v16479_v17  ;;  %9226 = vmatmul.mubr.bf16.gmra.mrb[100].mxu1 %v16587_v15  ;;  %v16646_v17 = vld [vmem:[#allocation7 + $0x628] ss:$16 sps:$4 sm:$0xff]  }
 0x652   :  { %9241 = vmatpush1.bf16.msra.mxu1 %v16581_v60  ;;  %6841 = vmatprep.subr.bf16.mxu0 %v16482_v12  ;;  %v16650_v12 = vld [vmem:[#allocation7 + $0x64c] ss:$16 sps:$4 sm:$0xff]  }
 0x653   :  { %9242 = vmatprep.subr.bf16.mxu1 %v16584_v11  ;;  %9268 = vmatprep.mubr.bf16.mxu1 %v17832_v5 }
 0x655   :  { %6842 = vmatpush1.bf16.msra.mxu0 %v16487_v2  ;;  %v7181_v2 = vrot.slane %v7061_v25, 4  ;;  %v16848_v25 = vld [vmem:[#allocation7 + $0x900] ss:$16 sps:$4 sm:$0xff]  }
 0x656   :  { %9243 = vmatpush1.bf16.msra.mxu1 %v16593_v9  ;;  %6843 = vmatprep.subr.bf16.mxu0 %v16490_v54  ;;  %v16655_v54 = vld [vmem:[#allocation7 + $0x648] ss:$16 sps:$4 sm:$0xff]  }
 0x657   :  { %9244 = vmatprep.subr.bf16.mxu1 %v16596_v32 }
 0x659   :  { %6844 = vmatpush1.bf16.msra.mxu0 %v16495_v39  ;;  %v16658_v39 = vld [vmem:[#allocation7 + $0x66c] ss:$16 sps:$4 sm:$0xff]  }
 0x65a   :  { %9245 = vmatpush1.bf16.msra.mxu1 %v16602_v1  ;;  %6845 = vmatprep.subr.bf16.mxu0 %v16498_v40  ;;  %v16661_v40 = vsel %vm6323_vm1, %v7175_v50, %v7181_v2  ;;  %v16832_v50 = vld [vmem:[#allocation7 + $0x8c8] ss:$16 sps:$4 sm:$0xff]   ;;  %v16861_v2 = vld [vmem:[#allocation7 + $0x944] ss:$16 sps:$4 sm:$0xff]  }
 0x65b   :  { %9246 = vmatprep.subr.bf16.mxu1 %v16605_v38 }
 0x65d   :  { %6846 = vmatpush1.bf16.msra.mxu0 %v16503_v48  ;;  %v16667_v48 = vld [vmem:[#allocation7 + $0x668] ss:$16 sps:$4 sm:$0xff]  }
 0x65e   :  { %9247 = vmatpush1.bf16.msra.mxu1 %v16610_v22  ;;  %6847 = vmatprep.subr.bf16.mxu0 %v16506_v43  ;;  %v16671_v43 = vld [vmem:[#allocation7 + $0x68c] ss:$16 sps:$4 sm:$0xff]  }
 0x65f   :  { %9248 = vmatprep.subr.bf16.mxu1 %v16613_v31 }
 0x661   :  { %6848 = vmatpush1.bf16.msra.mxu0 %v16511_v42  ;;  %v16678_v42 = vld [vmem:[#allocation7 + $0x688] ss:$16 sps:$4 sm:$0xff]  }
 0x662   :  { %9249 = vmatpush1.bf16.msra.mxu1 %v16618_v4  ;;  %6849 = vmatprep.subr.bf16.mxu0 %v16514_v28  ;;  %v16681_v28 = vld [vmem:[#allocation7 + $0x6ac] ss:$16 sps:$4 sm:$0xff]  }
 0x663   :  { %9250 = vmatprep.subr.bf16.mxu1 %v16621_v16 }
 0x665   :  { %6850 = vmatpush1.bf16.msra.mxu0 %v16521_v24  ;;  %v16686_v24 = vld [vmem:[#allocation7 + $0x6a8] ss:$16 sps:$4 sm:$0xff]  }
 0x666   :  { %9251 = vmatpush1.bf16.msra.mxu1 %v16626_v37  ;;  %6851 = vmatprep.subr.bf16.mxu0 %v16524_v58  ;;  %v16689_v58 = vld [vmem:[#allocation7 + $0x6cc] ss:$16 sps:$4 sm:$0xff]  }
 0x667   :  { %9289 = vmatprep.subr.bf16.mxu1 %v16629_v30 }
 0x669   :  { %6852 = vmatpush1.bf16.msra.mxu0 %v16529_v51  ;;  %9269 = vmatmul.mubr.bf16.vlgmr.msra.gmra.mrb[96].mxu1 %v16640_v62  ;;  %v16696_v51 = vld [vmem:[#allocation7 + $0x6c8] ss:$16 sps:$4 sm:$0xff]  }
 0x66a   :  { %9290 = vmatpush1.bf16.msra.mxu1 %v16634_v46  ;;  %6853 = vmatprep.subr.bf16.mxu0 %v16532_v41  ;;  %v16699_v41 = vld [vmem:[#allocation7 + $0x6ec] ss:$16 sps:$4 sm:$0xff]  }
 0x66b   :  { %9291 = vmatprep.subr.bf16.mxu1 %v16637_v20  ;;  %9278 = vmatprep.mubr.bf16.mxu1 %v17832_v5 }
 0x66d   :  { %6854 = vmatpush1.bf16.msra.mxu0 %v16539_v63  ;;  %v16704_v63 = vld [vmem:[#allocation7 + $0x6e8] ss:$16 sps:$4 sm:$0xff]  }
 0x66e   :  { %9292 = vmatpush1.bf16.msra.mxu1 %v16646_v17  ;;  %6855 = vmatprep.subr.bf16.mxu0 %v16542_v14  ;;  %v16707_v14 = vld [vmem:[#allocation7 + $0x70c] ss:$16 sps:$4 sm:$0xff]  }
 0x66f   :  { %9293 = vmatprep.subr.bf16.mxu1 %v16650_v12 }
 0x671   :  { %6856 = vmatpush1.bf16.msra.mxu0 %v16547_v26  ;;  %9279 = vmatmul.mubr.bf16.gmra.mrb[100].mxu1 %v16661_v40  ;;  %v16715_v26 = vld [vmem:[#allocation7 + $0x72c] ss:$16 sps:$4 sm:$0xff]  }
 0x672   :  { %9294 = vmatpush1.bf16.msra.mxu1 %v16655_v54  ;;  %9321 = vmatprep.mubr.bf16.mxu1 %v16434_v36 }
 0x673   :  { %6878 = vmatprep.subr.bf16.mxu0 %v16550_v49  ;;  %9295 = vmatprep.subr.bf16.mxu1 %v16658_v39  ;;  %v16728_v49 = vld [vmem:[#allocation7 + $0x748] ss:$16 sps:$4 sm:$0xff]  }
 0x674   :  { %6858 = vmatmul.mubr.bf16.vlgmr.msra.gmra.mrb[68].mxu0 %v15890_v53 }
 0x675   :  { %6867 = vmatprep.mubr.bf16.mxu0 %v15898_v29  ;;  %6879 = vmatpush1.bf16.msra.mxu0 %v16555_v55  ;;  %v16746_v55 = vld [vmem:[#allocation7 + $0x788] ss:$16 sps:$4 sm:$0xff]  }
 0x676   :  { %9296 = vmatpush1.bf16.msra.mxu1 %v16667_v48  ;;  %6880 = vmatprep.subr.bf16.mxu0 %v16558_v3  ;;  %v16749_v3 = vld [vmem:[#allocation7 + $0x7ac] ss:$16 sps:$4 sm:$0xff]  }
 0x677   :  { %9297 = vmatprep.subr.bf16.mxu1 %v16671_v43 }
 0x679   :  { %6881 = vmatpush1.bf16.msra.mxu0 %v16572_v21  ;;  %v16757_v21 = vld [vmem:[#allocation7 + $0x7cc] ss:$16 sps:$4 sm:$0xff]  }
 0x67a   :  { %9298 = vmatpush1.bf16.msra.mxu1 %v16678_v42  ;;  %6882 = vmatprep.subr.bf16.mxu0 %v16576_v13  ;;  %v16764_v13 = vld [vmem:[#allocation7 + $0x7c8] ss:$16 sps:$4 sm:$0xff]  }
 0x67b   :  { %9299 = vmatprep.subr.bf16.mxu1 %v16681_v28 }
 0x67c   :  { %6868 = vmatmul.mubr.bf16.gmra.mrb[72].mxu0 %v15904_v59 }
 0x67d   :  { %6883 = vmatpush1.bf16.msra.mxu0 %v16581_v60  ;;  %6910 = vmatprep.mubr.bf16.mxu0 %v17832_v5  ;;  %v16772_v60 = vld [vmem:[#allocation7 + $0x7e8] ss:$16 sps:$4 sm:$0xff]  }
 0x67e   :  { %9300 = vmatpush1.bf16.msra.mxu1 %v16686_v24  ;;  %6884 = vmatprep.subr.bf16.mxu0 %v16584_v11  ;;  %v16775_v11 = vld [vmem:[#allocation7 + $0x80c] ss:$16 sps:$4 sm:$0xff]  }
 0x67f   :  { %9301 = vmatprep.subr.bf16.mxu1 %v16689_v58 }
 0x681   :  { %6885 = vmatpush1.bf16.msra.mxu0 %v16593_v9  ;;  %v16780_v9 = vld [vmem:[#allocation7 + $0x808] ss:$16 sps:$4 sm:$0xff]  }
 0x682   :  { %9302 = vmatpush1.bf16.msra.mxu1 %v16696_v51  ;;  %6886 = vmatprep.subr.bf16.mxu0 %v16596_v32  ;;  %v16783_v32 = vld [vmem:[#allocation7 + $0x82c] ss:$16 sps:$4 sm:$0xff]  }
 0x683   :  { %9303 = vmatprep.subr.bf16.mxu1 %v16699_v41 }
 0x685   :  { %6887 = vmatpush1.bf16.msra.mxu0 %v16602_v1  ;;  %v16789_v1 = vld [vmem:[#allocation7 + $0x828] ss:$16 sps:$4 sm:$0xff]  }
 0x686   :  { %9304 = vmatpush1.bf16.msra.mxu1 %v16704_v63  ;;  %6888 = vmatprep.subr.bf16.mxu0 %v16605_v38  ;;  %v16793_v38 = vld [vmem:[#allocation7 + $0x84c] ss:$16 sps:$4 sm:$0xff]  }
 0x687   :  { %9305 = vmatprep.subr.bf16.mxu1 %v16707_v14 }
 0x689   :  { %6889 = vmatpush1.bf16.msra.mxu0 %v16610_v22  ;;  %v16798_v22 = vld [vmem:[#allocation7 + $0x848] ss:$16 sps:$4 sm:$0xff]  }
 0x68a   :  { %9306 = vmatpush1.bf16.msra.mxu1 %v16712_v45  ;;  %6890 = vmatprep.subr.bf16.mxu0 %v16613_v31  ;;  %v16801_v31 = vld [vmem:[#allocation7 + $0x86c] ss:$16 sps:$4 sm:$0xff]  }
 0x68b   :  { %9307 = vmatprep.subr.bf16.mxu1 %v16715_v26 }
 0x68d   :  { %6891 = vmatpush1.bf16.msra.mxu0 %v16618_v4  ;;  %v16807_v4 = vld [vmem:[#allocation7 + $0x868] ss:$16 sps:$4 sm:$0xff]  }
 0x68e   :  { %9308 = vmatpush1.bf16.msra.mxu1 %v16720_v44  ;;  %6892 = vmatprep.subr.bf16.mxu0 %v16621_v16  ;;  %v16810_v16 = vld [vmem:[#allocation7 + $0x88c] ss:$16 sps:$4 sm:$0xff]  }
 0x68f   :  { %9309 = vmatprep.subr.bf16.mxu1 %v16723_v52 }
 0x691   :  { %6893 = vmatpush1.bf16.msra.mxu0 %v16626_v37  ;;  %v16819_v37 = vld [vmem:[#allocation7 + $0x8ac] ss:$16 sps:$4 sm:$0xff]  }
 0x692   :  { %9310 = vmatpush1.bf16.msra.mxu1 %v16728_v49  ;;  %6931 = vmatprep.subr.bf16.mxu0 %v16629_v30  ;;  %v16827_v30 = vld [vmem:[#allocation7 + $0x8cc] ss:$16 sps:$4 sm:$0xff]  }
 0x693   :  { %9311 = vmatprep.subr.bf16.mxu1 %v16731_v18 }
 0x694   :  { %6911 = vmatmul.mubr.bf16.vlgmr.msra.gmra.mrb[68].mxu0 %v15935_v23 }
 0x695   :  { %6932 = vmatpush1.bf16.msra.mxu0 %v16634_v46  ;;  %6920 = vmatprep.mubr.bf16.mxu0 %v17832_v5  ;;  %v16840_v46 = vld [vmem:[#allocation7 + $0x8e8] ss:$16 sps:$4 sm:$0xff]  }
 0x696   :  { %9312 = vmatpush1.bf16.msra.mxu1 %v16736_v6  ;;  %6933 = vmatprep.subr.bf16.mxu0 %v16637_v20  ;;  %v16843_v20 = vld [vmem:[#allocation7 + $0x904] ss:$16 sps:$4 sm:$0xff]  }
 0x697   :  { %9313 = vmatprep.subr.bf16.mxu1 %v16739_v10 }
 0x699   :  { %6934 = vmatpush1.bf16.msra.mxu0 %v16646_v17  ;;  %v16851_v17 = vld [vmem:[#allocation7 + $0x924] ss:$16 sps:$4 sm:$0xff]  }
 0x69a   :  { %9314 = vmatpush1.bf16.msra.mxu1 %v16746_v55  ;;  %6935 = vmatprep.subr.bf16.mxu0 %v16650_v12  ;;  %v16857_v12 = vld [vmem:[#allocation7 + $0x920] ss:$16 sps:$4 sm:$0xff]  }
 0x69b   :  { %9315 = vmatprep.subr.bf16.mxu1 %v16749_v3 }
 0x69c   :  { %6921 = vmatmul.mubr.bf16.gmra.mrb[72].mxu0 %v15952_v61 }
 0x69d   :  { %6936 = vmatpush1.bf16.msra.mxu0 %v16655_v54  ;;  %6963 = vmatprep.mubr.bf16.mxu0 %v15885_v27  ;;  %v16866_v54 = vld [vmem:[#allocation7 + $0x940] ss:$16 sps:$4 sm:$0xff]  }
 0x69e   :  { %9316 = vmatpush1.bf16.msra.mxu1 %v16754_v34  ;;  %6937 = vmatprep.subr.bf16.mxu0 %v16658_v39  ;;  %v16869_v39 = vld [vmem:[#allocation7 + $0x964] ss:$16 sps:$4 sm:$0xff]  }
 0x69f   :  { %9317 = vmatprep.subr.bf16.mxu1 %v16757_v21 }
 0x6a1   :  { %6938 = vmatpush1.bf16.msra.mxu0 %v16667_v48  ;;  %v16875_v48 = vld [vmem:[#allocation7 + $0x960] ss:$16 sps:$4 sm:$0xff]  }
 0x6a2   :  { %9318 = vmatpush1.bf16.msra.mxu1 %v16764_v13  ;;  %6939 = vmatprep.subr.bf16.mxu0 %v16671_v43  ;;  %v16879_v43 = vld [vmem:[#allocation7 + $0x984] ss:$16 sps:$4 sm:$0xff]  }
 0x6a3   :  { %9319 = vmatprep.subr.bf16.mxu1 %v16767_v35 }
 0x6a5   :  { %6940 = vmatpush1.bf16.msra.mxu0 %v16678_v42  ;;  %v16886_v42 = vld [vmem:[#allocation7 + $0x980] ss:$16 sps:$4 sm:$0xff]  }
 0x6a6   :  { %9320 = vmatpush1.bf16.msra.mxu1 %v16772_v60  ;;  %6941 = vmatprep.subr.bf16.mxu0 %v16681_v28  ;;  %v16889_v28 = vld [vmem:[#allocation7 + $0x9a4] ss:$16 sps:$4 sm:$0xff]  }
 0x6a7   :  { %9342 = vmatprep.subr.bf16.mxu1 %v16775_v11 }
 0x6a9   :  { %6942 = vmatpush1.bf16.msra.mxu0 %v16686_v24  ;;  %9322 = vmatmul.mubr.bf16.vlgmr.msra.gmra.mrb[104].mxu1 %v16561_v33  ;;  %v16894_v24 = vld [vmem:[#allocation7 + $0x9a0] ss:$16 sps:$4 sm:$0xff]  }
 0x6aa   :  { %9331 = vmatprep.mubr.bf16.mxu1 %v16568_v56  ;;  %9343 = vmatpush1.bf16.msra.mxu1 %v16780_v9 }
 0x6ab   :  { %6943 = vmatprep.subr.bf16.mxu0 %v16689_v58  ;;  %9344 = vmatprep.subr.bf16.mxu1 %v16783_v32  ;;  %v16897_v58 = vld [vmem:[#allocation7 + $0x9c4] ss:$16 sps:$4 sm:$0xff]  }
 0x6ad   :  { %6944 = vmatpush1.bf16.msra.mxu0 %v16696_v51  ;;  %v16904_v51 = vld [vmem:[#allocation7 + $0x9c0] ss:$16 sps:$4 sm:$0xff]  }
 0x6ae   :  { %9345 = vmatpush1.bf16.msra.mxu1 %v16789_v1  ;;  %6945 = vmatprep.subr.bf16.mxu0 %v16699_v41  ;;  %v16907_v41 = vld [vmem:[#allocation7 + $0x9e4] ss:$16 sps:$4 sm:$0xff]  }
 0x6af   :  { %9346 = vmatprep.subr.bf16.mxu1 %v16793_v38 }
 0x6b1   :  { %6946 = vmatpush1.bf16.msra.mxu0 %v16704_v63  ;;  %9332 = vmatmul.mubr.bf16.gmra.mrb[108].mxu1 %v16587_v15  ;;  %v16912_v63 = vld [vmem:[#allocation7 + $0x9e0] ss:$16 sps:$4 sm:$0xff]  }
 0x6b2   :  { %9347 = vmatpush1.bf16.msra.mxu1 %v16798_v22  ;;  %6947 = vmatprep.subr.bf16.mxu0 %v16707_v14  ;;  %v16915_v14 = vld [vmem:[#allocation7 + $0xa04] ss:$16 sps:$4 sm:$0xff]  }
 0x6b3   :  { %9348 = vmatprep.subr.bf16.mxu1 %v16801_v31  ;;  %9374 = vmatprep.mubr.bf16.mxu1 %v17832_v5 }
 0x6b5   :  { %6948 = vmatpush1.bf16.msra.mxu0 %v16712_v45  ;;  %v16920_v45 = vld [vmem:[#allocation7 + $0xa00] ss:$16 sps:$4 sm:$0xff]  }
 0x6b6   :  { %9349 = vmatpush1.bf16.msra.mxu1 %v16807_v4  ;;  %6949 = vmatprep.subr.bf16.mxu0 %v16715_v26  ;;  %v16923_v26 = vld [vmem:[#allocation7 + $0xa24] ss:$16 sps:$4 sm:$0xff]  }
 0x6b7   :  { %9350 = vmatprep.subr.bf16.mxu1 %v16810_v16 }
 0x6b9   :  { %6950 = vmatpush1.bf16.msra.mxu0 %v16720_v44  ;;  %v16928_v44 = vld [vmem:[#allocation7 + $0xa20] ss:$16 sps:$4 sm:$0xff]  }
 0x6ba   :  { %9351 = vmatpush1.bf16.msra.mxu1 %v16816_v47  ;;  %6951 = vmatprep.subr.bf16.mxu0 %v16723_v52  ;;  %v16931_v52 = vld [vmem:[#allocation7 + $0xa44] ss:$16 sps:$4 sm:$0xff]  }
 0x6bb   :  { %9352 = vmatprep.subr.bf16.mxu1 %v16819_v37 }
 0x6bd   :  { %6952 = vmatpush1.bf16.msra.mxu0 %v16728_v49  ;;  %v16936_v49 = vld [vmem:[#allocation7 + $0xa40] ss:$16 sps:$4 sm:$0xff]  }
 0x6be   :  { %9353 = vmatpush1.bf16.msra.mxu1 %v16824_v0  ;;  %6953 = vmatprep.subr.bf16.mxu0 %v16731_v18  ;;  %v16939_v18 = vld [vmem:[#allocation7 + $0xa64] ss:$16 sps:$4 sm:$0xff]  }
 0x6bf   :  { %9354 = vmatprep.subr.bf16.mxu1 %v16827_v30 }
 0x6c1   :  { %6954 = vmatpush1.bf16.msra.mxu0 %v16736_v6  ;;  %v16944_v6 = vld [vmem:[#allocation7 + $0xa60] ss:$16 sps:$4 sm:$0xff]  }
 0x6c2   :  { %9355 = vmatpush1.bf16.msra.mxu1 %v16832_v50  ;;  %6955 = vmatprep.subr.bf16.mxu0 %v16739_v10  ;;  %v16947_v10 = vld [vmem:[#allocation7 + $0xa84] ss:$16 sps:$4 sm:$0xff]  }
 0x6c3   :  { %9356 = vmatprep.subr.bf16.mxu1 %v16835_v57 }
 0x6c5   :  { %6956 = vmatpush1.bf16.msra.mxu0 %v16746_v55  ;;  %v16954_v55 = vld [vmem:[#allocation7 + $0xa80] ss:$16 sps:$4 sm:$0xff]  }
 0x6c6   :  { %9357 = vmatpush1.bf16.msra.mxu1 %v16840_v46  ;;  %6957 = vmatprep.subr.bf16.mxu0 %v16749_v3  ;;  %v16957_v3 = vld [vmem:[#allocation7 + $0xaa4] ss:$16 sps:$4 sm:$0xff]  }
 0x6c7   :  { %9411 = vmatprep.subr.bf16.mxu1 %v16843_v20 }
 0x6c9   :  { %6958 = vmatpush1.bf16.msra.mxu0 %v16754_v34  ;;  %9375 = vmatmul.mubr.bf16.vlgmr.msra.gmra.mrb[104].mxu1 %v16640_v62  ;;  %v16965_v34 = vld [vmem:[#allocation7 + $0xac4] ss:$16 sps:$4 sm:$0xff]  }
 0x6ca   :  { %9412 = vmatpush1.bf16.msra.mxu1 %v16848_v25  ;;  %6959 = vmatprep.subr.bf16.mxu0 %v16757_v21  ;;  %v16972_v21 = vld [vmem:[#allocation7 + $0xac0] ss:$16 sps:$4 sm:$0xff]  }
 0x6cb   :  { %9413 = vmatprep.subr.bf16.mxu1 %v16851_v17  ;;  %9384 = vmatprep.mubr.bf16.mxu1 %v17832_v5 }
 0x6cd   :  { %6960 = vmatpush1.bf16.msra.mxu0 %v16764_v13  ;;  %v16975_v13 = vld [vmem:[#allocation7 + $0xae4] ss:$16 sps:$4 sm:$0xff]  }
 0x6ce   :  { %9414 = vmatpush1.bf16.msra.mxu1 %v16857_v12  ;;  %6961 = vmatprep.subr.bf16.mxu0 %v16767_v35  ;;  %v16983_v35 = vld [vmem:[#allocation7 + $0xb04] ss:$16 sps:$4 sm:$0xff]  }
 0x6cf   :  { %9415 = vmatprep.subr.bf16.mxu1 %v16861_v2 }
 0x6d1   :  { %6962 = vmatpush1.bf16.msra.mxu0 %v16772_v60  ;;  %9385 = vmatmul.mubr.bf16.gmra.mrb[108].mxu1 %v16661_v40  ;;  %v16988_v60 = vld [vmem:[#allocation7 + $0xb00] ss:$16 sps:$4 sm:$0xff]  }
 0x6d2   :  { %9416 = vmatpush1.bf16.msra.mxu1 %v16866_v54  ;;  %9443 = vmatprep.mubr.bf16.mxu1 %v16445_v8 }
 0x6d3   :  { %6984 = vmatprep.subr.bf16.mxu0 %v16775_v11  ;;  %9417 = vmatprep.subr.bf16.mxu1 %v16869_v39  ;;  %v16991_v11 = vld [vmem:[#allocation7 + $0xb24] ss:$16 sps:$4 sm:$0xff]  }
 0x6d4   :  { %6964 = vmatmul.mubr.bf16.vlgmr.msra.gmra.mrb[76].mxu0 %v15890_v53 }
 0x6d5   :  { %6973 = vmatprep.mubr.bf16.mxu0 %v15898_v29  ;;  %6985 = vmatpush1.bf16.msra.mxu0 %v16780_v9  ;;  %v16995_v9 = vld [vmem:[#allocation2 + $0x38] sm:$0xff] }
 0x6d6   :  { %9418 = vmatpush1.bf16.msra.mxu1 %v16875_v48  ;;  %6986 = vmatprep.subr.bf16.mxu0 %v16783_v32  ;;  %v16999_v32 = vld [vmem:[#allocation7 + $0xb20] ss:$16 sps:$4 sm:$0xff]  }
 0x6d7   :  { %9419 = vmatprep.subr.bf16.mxu1 %v16879_v43 }
 0x6d9   :  { %6987 = vmatpush1.bf16.msra.mxu0 %v16789_v1  ;;  %v17003_v1 = vld [vmem:[#allocation7 + $0xb44] ss:$16 sps:$4 sm:$0xff]  }
 0x6da   :  { %9420 = vmatpush1.bf16.msra.mxu1 %v16886_v42  ;;  %6988 = vmatprep.subr.bf16.mxu0 %v16793_v38  ;;  %v17011_v38 = vld [vmem:[#allocation7 + $0xb64] ss:$16 sps:$4 sm:$0xff]  }
 0x6db   :  { %9421 = vmatprep.subr.bf16.mxu1 %v16889_v28 }
 0x6dc   :  { %6974 = vmatmul.mubr.bf16.gmra.mrb[80].mxu0 %v15904_v59 }
 0x6dd   :  { %6989 = vmatpush1.bf16.msra.mxu0 %v16798_v22  ;;  %7016 = vmatprep.mubr.bf16.mxu0 %v17832_v5  ;;  %v17013_v22 = vld [vmem:[#allocation2 + $0x30] sm:$0xff] }
 0x6de   :  { %9422 = vmatpush1.bf16.msra.mxu1 %v16894_v24  ;;  %6990 = vmatprep.subr.bf16.mxu0 %v16801_v31  ;;  %v17019_v31 = vld [vmem:[#allocation7 + $0xb60] ss:$16 sps:$4 sm:$0xff]  }
 0x6df   :  { %9423 = vmatprep.subr.bf16.mxu1 %v16897_v58 }
 0x6e1   :  { %6991 = vmatpush1.bf16.msra.mxu0 %v16807_v4  ;;  %v17022_v4 = vld [vmem:[#allocation7 + $0xb84] ss:$16 sps:$4 sm:$0xff]  }
 0x6e2   :  { %9424 = vmatpush1.bf16.msra.mxu1 %v16904_v51  ;;  %6992 = vmatprep.subr.bf16.mxu0 %v16810_v16  ;;  %v17028_v16 = vld [vmem:[#allocation7 + $0xb80] ss:$16 sps:$4 sm:$0xff]  }
 0x6e3   :  { %9425 = vmatprep.subr.bf16.mxu1 %v16907_v41 }
 0x6e5   :  { %6993 = vmatpush1.bf16.msra.mxu0 %v16816_v47  ;;  %v17031_v47 = vld [vmem:[#allocation7 + $0xba4] ss:$16 sps:$4 sm:$0xff]  }
 0x6e6   :  { %9426 = vmatpush1.bf16.msra.mxu1 %v16912_v63  ;;  %6994 = vmatprep.subr.bf16.mxu0 %v16819_v37  ;;  %v17036_v37 = vld [vmem:[#allocation7 + $0xba0] ss:$16 sps:$4 sm:$0xff]  }
 0x6e7   :  { %9427 = vmatprep.subr.bf16.mxu1 %v16915_v14 }
 0x6e9   :  { %6995 = vmatpush1.bf16.msra.mxu0 %v16824_v0  ;;  %v17039_v0 = vld [vmem:[#allocation7 + $0xbc4] ss:$16 sps:$4 sm:$0xff]  }
 0x6ea   :  { %9428 = vmatpush1.bf16.msra.mxu1 %v16920_v45  ;;  %6996 = vmatprep.subr.bf16.mxu0 %v16827_v30  ;;  %v17044_v30 = vld [vmem:[#allocation7 + $0xbc0] ss:$16 sps:$4 sm:$0xff]  }
 0x6eb   :  { %9429 = vmatprep.subr.bf16.mxu1 %v16923_v26 }
 0x6ed   :  { %6997 = vmatpush1.bf16.msra.mxu0 %v16832_v50  ;;  %v17047_v50 = vld [vmem:[#allocation7 + $0xbe4] ss:$16 sps:$4 sm:$0xff]  }
 0x6ee   :  { %9430 = vmatpush1.bf16.msra.mxu1 %v16928_v44  ;;  %6998 = vmatprep.subr.bf16.mxu0 %v16835_v57  ;;  %v17052_v57 = vld [vmem:[#allocation7 + $0xbe0] ss:$16 sps:$4 sm:$0xff]  }
 0x6ef   :  { %9431 = vmatprep.subr.bf16.mxu1 %v16931_v52 }
 0x6f1   :  { %6999 = vmatpush1.bf16.msra.mxu0 %v16840_v46  ;;  %v17055_v46 = vld [vmem:[#allocation7 + $0x90c] ss:$16 sps:$4 sm:$0xff]  }
 0x6f2   :  { %9432 = vmatpush1.bf16.msra.mxu1 %v16936_v49  ;;  %7669 = vmatprep.subr.bf16.mxu0 %v16843_v20  ;;  %v17060_v20 = vld [vmem:[#allocation7 + $0x908] ss:$16 sps:$4 sm:$0xff]  }
 0x6f3   :  { %9433 = vmatprep.subr.bf16.mxu1 %v16939_v18 }
 0x6f4   :  { %7017 = vmatmul.mubr.bf16.vlgmr.msra.gmra.mrb[76].mxu0 %v15935_v23  ;;  %v16962_v23 = vld [vmem:[#allocation7 + $0xaa0] ss:$16 sps:$4 sm:$0xff]  }
 0x6f5   :  { %7670 = vmatpush1.bf16.msra.mxu0 %v16848_v25  ;;  %7026 = vmatprep.mubr.bf16.mxu0 %v17832_v5  ;;  %v17063_v25 = vld [vmem:[#allocation7 + $0x92c] ss:$16 sps:$4 sm:$0xff]  }
 0x6f6   :  { %9434 = vmatpush1.bf16.msra.mxu1 %v16944_v6  ;;  %7671 = vmatprep.subr.bf16.mxu0 %v16851_v17  ;;  %v17066_v17 = vld [vmem:[#allocation2 + $0x28] sm:$0xff] }
 0x6f7   :  { %9435 = vmatprep.subr.bf16.mxu1 %v16947_v10 }
 0x6f9   :  { %7672 = vmatpush1.bf16.msra.mxu0 %v16857_v12  ;;  %v17071_v12 = vld [vmem:[#allocation7 + $0x928] ss:$16 sps:$4 sm:$0xff]  }
 0x6fa   :  { %9436 = vmatpush1.bf16.msra.mxu1 %v16954_v55  ;;  %7673 = vmatprep.subr.bf16.mxu0 %v16861_v2  ;;  %v17075_v2 = vld [vmem:[#allocation7 + $0x94c] ss:$16 sps:$4 sm:$0xff]  }
 0x6fb   :  { %9437 = vmatprep.subr.bf16.mxu1 %v16957_v3 }
 0x6fc   :  { %7027 = vmatmul.mubr.bf16.gmra.mrb[80].mxu0 %v15952_v61  ;;  %v16980_v61 = vld [vmem:[#allocation7 + $0xae0] ss:$16 sps:$4 sm:$0xff]  }
 0x6fd   :  { %7674 = vmatpush1.bf16.msra.mxu0 %v16866_v54  ;;  %7701 = vmatprep.mubr.bf16.mxu0 %v16434_v36  ;;  %v17080_v54 = vld [vmem:[#allocation7 + $0x948] ss:$16 sps:$4 sm:$0xff]  }
 0x6fe   :  { %9438 = vmatpush1.bf16.msra.mxu1 %v16962_v23  ;;  %7675 = vmatprep.subr.bf16.mxu0 %v16869_v39  ;;  %v17083_v39 = vld [vmem:[#allocation7 + $0x96c] ss:$16 sps:$4 sm:$0xff]  }
 0x6ff   :  { %9439 = vmatprep.subr.bf16.mxu1 %v16965_v34 }
 0x701   :  { %7676 = vmatpush1.bf16.msra.mxu0 %v16875_v48  ;;  %v17085_v48 = vld [vmem:[#allocation2 + $0x40] sm:$0xff] }
 0x702   :  { %9440 = vmatpush1.bf16.msra.mxu1 %v16972_v21  ;;  %7677 = vmatprep.subr.bf16.mxu0 %v16879_v43  ;;  %v17091_v43 = vld [vmem:[#allocation7 + $0x968] ss:$16 sps:$4 sm:$0xff]  }
 0x703   :  { %9441 = vmatprep.subr.bf16.mxu1 %v16975_v13 }
 0x705   :  { %7678 = vmatpush1.bf16.msra.mxu0 %v16886_v42  ;;  %v17095_v42 = vld [vmem:[#allocation7 + $0x98c] ss:$16 sps:$4 sm:$0xff]  }
 0x706   :  { %9442 = vmatpush1.bf16.msra.mxu1 %v16980_v61  ;;  %7679 = vmatprep.subr.bf16.mxu0 %v16889_v28  ;;  %v17102_v28 = vld [vmem:[#allocation7 + $0x988] ss:$16 sps:$4 sm:$0xff]  }
 0x707   :  { %9464 = vmatprep.subr.bf16.mxu1 %v16983_v35 }
 0x709   :  { %7680 = vmatpush1.bf16.msra.mxu0 %v16894_v24  ;;  %9444 = vmatmul.mubr.bf16.vlgmr.msra.gmra.mrb[96].mxu1 %v16464_v7  ;;  %v17008_v7 = vld [vmem:[#allocation7 + $0xb40] ss:$16 sps:$4 sm:$0xff]   ;;  %v17110_v24 = vld [vmem:[#allocation7 + $0x9a8] ss:$16 sps:$4 sm:$0xff]  }
 0x70a   :  { %9453 = vmatprep.mubr.bf16.mxu1 %v16995_v9  ;;  %9465 = vmatpush1.bf16.msra.mxu1 %v16988_v60 }
 0x70b   :  { %7681 = vmatprep.subr.bf16.mxu0 %v16897_v58  ;;  %9466 = vmatprep.subr.bf16.mxu1 %v16991_v11  ;;  %v17113_v58 = vld [vmem:[#allocation7 + $0x9cc] ss:$16 sps:$4 sm:$0xff]  }
 0x70d   :  { %7682 = vmatpush1.bf16.msra.mxu0 %v16904_v51  ;;  %v17120_v51 = vld [vmem:[#allocation7 + $0x9c8] ss:$16 sps:$4 sm:$0xff]  }
 0x70e   :  { %9467 = vmatpush1.bf16.msra.mxu1 %v16999_v32  ;;  %7683 = vmatprep.subr.bf16.mxu0 %v16907_v41  ;;  %v17123_v41 = vld [vmem:[#allocation7 + $0x9ec] ss:$16 sps:$4 sm:$0xff]  }
 0x70f   :  { %9468 = vmatprep.subr.bf16.mxu1 %v17003_v1 }
 0x711   :  { %7684 = vmatpush1.bf16.msra.mxu0 %v16912_v63  ;;  %9454 = vmatmul.mubr.bf16.gmra.mrb[100].mxu1 %v17013_v22  ;;  %v17128_v63 = vld [vmem:[#allocation7 + $0x9e8] ss:$16 sps:$4 sm:$0xff]  }
 0x712   :  { %9469 = vmatpush1.bf16.msra.mxu1 %v17008_v7  ;;  %7685 = vmatprep.subr.bf16.mxu0 %v16915_v14  ;;  %v17131_v14 = vld [vmem:[#allocation7 + $0xa0c] ss:$16 sps:$4 sm:$0xff]  }
 0x713   :  { %9470 = vmatprep.subr.bf16.mxu1 %v17011_v38  ;;  %9496 = vmatprep.mubr.bf16.mxu1 %v17832_v5 }
 0x715   :  { %7686 = vmatpush1.bf16.msra.mxu0 %v16920_v45  ;;  %v17136_v45 = vld [vmem:[#allocation7 + $0xa08] ss:$16 sps:$4 sm:$0xff]  }
 0x716   :  { %9471 = vmatpush1.bf16.msra.mxu1 %v17019_v31  ;;  %7687 = vmatprep.subr.bf16.mxu0 %v16923_v26  ;;  %v17139_v26 = vld [vmem:[#allocation7 + $0xa2c] ss:$16 sps:$4 sm:$0xff]  }
 0x717   :  { %9472 = vmatprep.subr.bf16.mxu1 %v17022_v4 }
 0x719   :  { %7688 = vmatpush1.bf16.msra.mxu0 %v16928_v44  ;;  %v17144_v44 = vld [vmem:[#allocation7 + $0xa28] ss:$16 sps:$4 sm:$0xff]  }
 0x71a   :  { %9473 = vmatpush1.bf16.msra.mxu1 %v17028_v16  ;;  %7689 = vmatprep.subr.bf16.mxu0 %v16931_v52  ;;  %v17147_v52 = vld [vmem:[#allocation7 + $0xa4c] ss:$16 sps:$4 sm:$0xff]  }
 0x71b   :  { %9474 = vmatprep.subr.bf16.mxu1 %v17031_v47 }
 0x71d   :  { %7690 = vmatpush1.bf16.msra.mxu0 %v16936_v49  ;;  %v17152_v49 = vld [vmem:[#allocation7 + $0xa48] ss:$16 sps:$4 sm:$0xff]  }
 0x71e   :  { %9475 = vmatpush1.bf16.msra.mxu1 %v17036_v37  ;;  %7691 = vmatprep.subr.bf16.mxu0 %v16939_v18  ;;  %v17155_v18 = vld [vmem:[#allocation7 + $0xa6c] ss:$16 sps:$4 sm:$0xff]  }
 0x71f   :  { %9476 = vmatprep.subr.bf16.mxu1 %v17039_v0 }
 0x721   :  { %7692 = vmatpush1.bf16.msra.mxu0 %v16944_v6  ;;  %v17160_v6 = vld [vmem:[#allocation7 + $0xa68] ss:$16 sps:$4 sm:$0xff]  }
 0x722   :  { %9477 = vmatpush1.bf16.msra.mxu1 %v17044_v30  ;;  %7693 = vmatprep.subr.bf16.mxu0 %v16947_v10  ;;  %v17163_v10 = vld [vmem:[#allocation7 + $0xa8c] ss:$16 sps:$4 sm:$0xff]  }
 0x723   :  { %9478 = vmatprep.subr.bf16.mxu1 %v17047_v50 }
 0x725   :  { %7694 = vmatpush1.bf16.msra.mxu0 %v16954_v55  ;;  %v17170_v55 = vld [vmem:[#allocation7 + $0xa88] ss:$16 sps:$4 sm:$0xff]  }
 0x726   :  { %9479 = vmatpush1.bf16.msra.mxu1 %v17052_v57  ;;  %7695 = vmatprep.subr.bf16.mxu0 %v16957_v3  ;;  %v17173_v3 = vld [vmem:[#allocation7 + $0xaac] ss:$16 sps:$4 sm:$0xff]  }
 0x727   :  { %9517 = vmatprep.subr.bf16.mxu1 %v17055_v46 }
 0x729   :  { %7696 = vmatpush1.bf16.msra.mxu0 %v16962_v23  ;;  %9497 = vmatmul.mubr.bf16.vlgmr.msra.gmra.mrb[96].mxu1 %v17066_v17  ;;  %v17178_v23 = vld [vmem:[#allocation7 + $0xaa8] ss:$16 sps:$4 sm:$0xff]  }
 0x72a   :  { %9518 = vmatpush1.bf16.msra.mxu1 %v17060_v20  ;;  %7697 = vmatprep.subr.bf16.mxu0 %v16965_v34  ;;  %v17181_v34 = vld [vmem:[#allocation7 + $0xacc] ss:$16 sps:$4 sm:$0xff]  }
 0x72b   :  { %9519 = vmatprep.subr.bf16.mxu1 %v17063_v25  ;;  %9506 = vmatprep.mubr.bf16.mxu1 %v17832_v5 }
 0x72d   :  { %7698 = vmatpush1.bf16.msra.mxu0 %v16972_v21  ;;  %v17188_v21 = vld [vmem:[#allocation7 + $0xac8] ss:$16 sps:$4 sm:$0xff]  }
 0x72e   :  { %9520 = vmatpush1.bf16.msra.mxu1 %v17071_v12  ;;  %7699 = vmatprep.subr.bf16.mxu0 %v16975_v13  ;;  %v17191_v13 = vld [vmem:[#allocation7 + $0xaec] ss:$16 sps:$4 sm:$0xff]  }
 0x72f   :  { %9521 = vmatprep.subr.bf16.mxu1 %v17075_v2 }
 0x731   :  { %7700 = vmatpush1.bf16.msra.mxu0 %v16980_v61  ;;  %9507 = vmatmul.mubr.bf16.gmra.mrb[100].mxu1 %v17085_v48  ;;  %v17196_v61 = vld [vmem:[#allocation7 + $0xae8] ss:$16 sps:$4 sm:$0xff]  }
 0x732   :  { %9522 = vmatpush1.bf16.msra.mxu1 %v17080_v54  ;;  %9549 = vmatprep.mubr.bf16.mxu1 %v16445_v8  ;;  %v17105_v8 = vld [vmem:[#allocation7 + $0x9ac] ss:$16 sps:$4 sm:$0xff]  }
 0x733   :  { %7722 = vmatprep.subr.bf16.mxu0 %v16983_v35  ;;  %9523 = vmatprep.subr.bf16.mxu1 %v17083_v39  ;;  %v17204_v35 = vld [vmem:[#allocation7 + $0xb08] ss:$16 sps:$4 sm:$0xff]  }
 0x734   :  { %7702 = vmatmul.mubr.bf16.vlgmr.msra.gmra.mrb[68].mxu0 %v16561_v33 }
 0x735   :  { %7711 = vmatprep.mubr.bf16.mxu0 %v16568_v56  ;;  %7723 = vmatpush1.bf16.msra.mxu0 %v16988_v60  ;;  %v17207_v60 = vld [vmem:[#allocation7 + $0xb2c] ss:$16 sps:$4 sm:$0xff]  }
 0x736   :  { %9524 = vmatpush1.bf16.msra.mxu1 %v17091_v43  ;;  %7724 = vmatprep.subr.bf16.mxu0 %v16991_v11  ;;  %v17210_v11 = vld [vmem:[#allocation2 + $0x18] sm:$0xff] }
 0x737   :  { %9525 = vmatprep.subr.bf16.mxu1 %v17095_v42 }
 0x739   :  { %7725 = vmatpush1.bf16.msra.mxu0 %v16999_v32  ;;  %v17215_v32 = vld [vmem:[#allocation7 + $0xb28] ss:$16 sps:$4 sm:$0xff]  }
 0x73a   :  { %9526 = vmatpush1.bf16.msra.mxu1 %v17102_v28  ;;  %7726 = vmatprep.subr.bf16.mxu0 %v17003_v1  ;;  %v17219_v1 = vld [vmem:[#allocation7 + $0xb4c] ss:$16 sps:$4 sm:$0xff]  }
 0x73b   :  { %9527 = vmatprep.subr.bf16.mxu1 %v17105_v8 }
 0x73c   :  { %7712 = vmatmul.mubr.bf16.gmra.mrb[72].mxu0 %v16587_v15 }
 0x73d   :  { %7727 = vmatpush1.bf16.msra.mxu0 %v17008_v7  ;;  %7754 = vmatprep.mubr.bf16.mxu0 %v17832_v5  ;;  %v17224_v7 = vld [vmem:[#allocation7 + $0xb48] ss:$16 sps:$4 sm:$0xff]  }
 0x73e   :  { %9528 = vmatpush1.bf16.msra.mxu1 %v17110_v24  ;;  %7728 = vmatprep.subr.bf16.mxu0 %v17011_v38  ;;  %v17227_v38 = vld [vmem:[#allocation7 + $0xb6c] ss:$16 sps:$4 sm:$0xff]  }
 0x73f   :  { %9529 = vmatprep.subr.bf16.mxu1 %v17113_v58 }
 0x741   :  { %7729 = vmatpush1.bf16.msra.mxu0 %v17019_v31  ;;  %v17233_v31 = vld [vmem:[#allocation7 + $0xb68] ss:$16 sps:$4 sm:$0xff]  }
 0x742   :  { %9530 = vmatpush1.bf16.msra.mxu1 %v17120_v51  ;;  %7730 = vmatprep.subr.bf16.mxu0 %v17022_v4  ;;  %v17236_v4 = vld [vmem:[#allocation7 + $0xb8c] ss:$16 sps:$4 sm:$0xff]  }
 0x743   :  { %9531 = vmatprep.subr.bf16.mxu1 %v17123_v41 }
 0x745   :  { %7731 = vmatpush1.bf16.msra.mxu0 %v17028_v16  ;;  %v17242_v16 = vld [vmem:[#allocation7 + $0xb88] ss:$16 sps:$4 sm:$0xff]  }
 0x746   :  { %9532 = vmatpush1.bf16.msra.mxu1 %v17128_v63  ;;  %7732 = vmatprep.subr.bf16.mxu0 %v17031_v47  ;;  %v17245_v47 = vld [vmem:[#allocation7 + $0xbac] ss:$16 sps:$4 sm:$0xff]  }
 0x747   :  { %9533 = vmatprep.subr.bf16.mxu1 %v17131_v14 }
 0x749   :  { %7733 = vmatpush1.bf16.msra.mxu0 %v17036_v37  ;;  %v17250_v37 = vld [vmem:[#allocation7 + $0xba8] ss:$16 sps:$4 sm:$0xff]  }
 0x74a   :  { %9534 = vmatpush1.bf16.msra.mxu1 %v17136_v45  ;;  %7734 = vmatprep.subr.bf16.mxu0 %v17039_v0  ;;  %v17253_v0 = vld [vmem:[#allocation7 + $0xbcc] ss:$16 sps:$4 sm:$0xff]  }
 0x74b   :  { %9535 = vmatprep.subr.bf16.mxu1 %v17139_v26 }
 0x74d   :  { %7735 = vmatpush1.bf16.msra.mxu0 %v17044_v30  ;;  %v17258_v30 = vld [vmem:[#allocation7 + $0xbc8] ss:$16 sps:$4 sm:$0xff]  }
 0x74e   :  { %9536 = vmatpush1.bf16.msra.mxu1 %v17144_v44  ;;  %7736 = vmatprep.subr.bf16.mxu0 %v17047_v50  ;;  %v17261_v50 = vld [vmem:[#allocation7 + $0xbec] ss:$16 sps:$4 sm:$0xff]  }
 0x74f   :  { %9537 = vmatprep.subr.bf16.mxu1 %v17147_v52 }
 0x751   :  { %7737 = vmatpush1.bf16.msra.mxu0 %v17052_v57  ;;  %v17266_v57 = vld [vmem:[#allocation7 + $0xbe8] ss:$16 sps:$4 sm:$0xff]  }
 0x752   :  { %9538 = vmatpush1.bf16.msra.mxu1 %v17152_v49  ;;  %7775 = vmatprep.subr.bf16.mxu0 %v17055_v46  ;;  %v17269_v46 = vld [vmem:[#allocation7 + $0xc04] ss:$16 sps:$4 sm:$0xff]  }
 0x753   :  { %9539 = vmatprep.subr.bf16.mxu1 %v17155_v18 }
 0x754   :  { %7755 = vmatmul.mubr.bf16.vlgmr.msra.gmra.mrb[68].mxu0 %v16640_v62 }
 0x755   :  { %7776 = vmatpush1.bf16.msra.mxu0 %v17060_v20  ;;  %7764 = vmatprep.mubr.bf16.mxu0 %v17832_v5  ;;  %v17274_v20 = vld [vmem:[#allocation7 + $0xc00] ss:$16 sps:$4 sm:$0xff]  }
 0x756   :  { %9540 = vmatpush1.bf16.msra.mxu1 %v17160_v6  ;;  %7777 = vmatprep.subr.bf16.mxu0 %v17063_v25  ;;  %v17277_v25 = vld [vmem:[#allocation7 + $0xc24] ss:$16 sps:$4 sm:$0xff]  }
 0x757   :  { %9541 = vmatprep.subr.bf16.mxu1 %v17163_v10 }
 0x759   :  { %7778 = vmatpush1.bf16.msra.mxu0 %v17071_v12  ;;  %v17283_v12 = vld [vmem:[#allocation7 + $0xc20] ss:$16 sps:$4 sm:$0xff]  }
 0x75a   :  { %9542 = vmatpush1.bf16.msra.mxu1 %v17170_v55  ;;  %7779 = vmatprep.subr.bf16.mxu0 %v17075_v2  ;;  %v17287_v2 = vld [vmem:[#allocation7 + $0xc44] ss:$16 sps:$4 sm:$0xff]  }
 0x75b   :  { %9543 = vmatprep.subr.bf16.mxu1 %v17173_v3 }
 0x75c   :  { %7765 = vmatmul.mubr.bf16.gmra.mrb[72].mxu0 %v16661_v40 }
 0x75d   :  { %7780 = vmatpush1.bf16.msra.mxu0 %v17080_v54  ;;  %7807 = vmatprep.mubr.bf16.mxu0 %v16434_v36  ;;  %v17199_v36 = vld [vmem:[#allocation7 + $0xb0c] ss:$16 sps:$4 sm:$0xff]   ;;  %v17292_v54 = vld [vmem:[#allocation7 + $0xc40] ss:$16 sps:$4 sm:$0xff]  }
 0x75e   :  { %9544 = vmatpush1.bf16.msra.mxu1 %v17178_v23  ;;  %7781 = vmatprep.subr.bf16.mxu0 %v17083_v39  ;;  %v17295_v39 = vld [vmem:[#allocation7 + $0xc64] ss:$16 sps:$4 sm:$0xff]  }
 0x75f   :  { %9545 = vmatprep.subr.bf16.mxu1 %v17181_v34 }
 0x761   :  { %7782 = vmatpush1.bf16.msra.mxu0 %v17091_v43  ;;  %v17300_v43 = vld [vmem:[#allocation2 + $0x68] sm:$0xff] }
 0x762   :  { %9546 = vmatpush1.bf16.msra.mxu1 %v17188_v21  ;;  %7783 = vmatprep.subr.bf16.mxu0 %v17095_v42  ;;  %v17303_v42 = vld [vmem:[#allocation7 + $0xc60] ss:$16 sps:$4 sm:$0xff]  }
 0x763   :  { %9547 = vmatprep.subr.bf16.mxu1 %v17191_v13 }
 0x765   :  { %7784 = vmatpush1.bf16.msra.mxu0 %v17102_v28  ;;  %v17307_v28 = vld [vmem:[#allocation7 + $0xc84] ss:$16 sps:$4 sm:$0xff]  }
 0x766   :  { %9548 = vmatpush1.bf16.msra.mxu1 %v17196_v61  ;;  %7785 = vmatprep.subr.bf16.mxu0 %v17105_v8  ;;  %v17314_v8 = vld [vmem:[#allocation7 + $0xc80] ss:$16 sps:$4 sm:$0xff]  }
 0x767   :  { %9570 = vmatprep.subr.bf16.mxu1 %v17199_v36 }
 0x769   :  { %7786 = vmatpush1.bf16.msra.mxu0 %v17110_v24  ;;  %9550 = vmatmul.mubr.bf16.vlgmr.msra.gmra.mrb[104].mxu1 %v17210_v11  ;;  %v17317_v24 = vld [vmem:[#allocation7 + $0xca4] ss:$16 sps:$4 sm:$0xff]  }
 0x76a   :  { %9559 = vmatprep.mubr.bf16.mxu1 %v16995_v9  ;;  %9571 = vmatpush1.bf16.msra.mxu1 %v17204_v35 }
 0x76b   :  { %7787 = vmatprep.subr.bf16.mxu0 %v17113_v58  ;;  %9572 = vmatprep.subr.bf16.mxu1 %v17207_v60  ;;  %v17332_v58 = vld [vmem:[#allocation7 + $0xcc0] ss:$16 sps:$4 sm:$0xff]  }
 0x76d   :  { %7788 = vmatpush1.bf16.msra.mxu0 %v17120_v51  ;;  %v17335_v51 = vld [vmem:[#allocation7 + $0xce4] ss:$16 sps:$4 sm:$0xff]  }
 0x76e   :  { %9573 = vmatpush1.bf16.msra.mxu1 %v17215_v32  ;;  %7789 = vmatprep.subr.bf16.mxu0 %v17123_v41  ;;  %v17343_v41 = vld [vmem:[#allocation7 + $0xd04] ss:$16 sps:$4 sm:$0xff]  }
 0x76f   :  { %9574 = vmatprep.subr.bf16.mxu1 %v17219_v1 }
 0x771   :  { %7790 = vmatpush1.bf16.msra.mxu0 %v17128_v63  ;;  %9560 = vmatmul.mubr.bf16.gmra.mrb[108].mxu1 %v17013_v22  ;;  %v17348_v63 = vld [vmem:[#allocation7 + $0xd00] ss:$16 sps:$4 sm:$0xff]  }
 0x772   :  { %9575 = vmatpush1.bf16.msra.mxu1 %v17224_v7  ;;  %7791 = vmatprep.subr.bf16.mxu0 %v17131_v14  ;;  %v17351_v14 = vld [vmem:[#allocation7 + $0xd24] ss:$16 sps:$4 sm:$0xff]  }
 0x773   :  { %9576 = vmatprep.subr.bf16.mxu1 %v17227_v38  ;;  %9602 = vmatprep.mubr.bf16.mxu1 %v17832_v5 }
 0x775   :  { %7792 = vmatpush1.bf16.msra.mxu0 %v17136_v45  ;;  %v17356_v45 = vld [vmem:[#allocation7 + $0xd20] ss:$16 sps:$4 sm:$0xff]  }
 0x776   :  { %9577 = vmatpush1.bf16.msra.mxu1 %v17233_v31  ;;  %7793 = vmatprep.subr.bf16.mxu0 %v17139_v26  ;;  %v17359_v26 = vld [vmem:[#allocation7 + $0xd44] ss:$16 sps:$4 sm:$0xff]  }
 0x777   :  { %9578 = vmatprep.subr.bf16.mxu1 %v17236_v4 }
 0x779   :  { %7794 = vmatpush1.bf16.msra.mxu0 %v17144_v44  ;;  %v17364_v44 = vld [vmem:[#allocation7 + $0xd40] ss:$16 sps:$4 sm:$0xff]  }
 0x77a   :  { %9579 = vmatpush1.bf16.msra.mxu1 %v17242_v16  ;;  %7795 = vmatprep.subr.bf16.mxu0 %v17147_v52  ;;  %v17367_v52 = vld [vmem:[#allocation7 + $0xd64] ss:$16 sps:$4 sm:$0xff]  }
 0x77b   :  { %9580 = vmatprep.subr.bf16.mxu1 %v17245_v47 }
 0x77d   :  { %7796 = vmatpush1.bf16.msra.mxu0 %v17152_v49  ;;  %v17372_v49 = vld [vmem:[#allocation7 + $0xd60] ss:$16 sps:$4 sm:$0xff]  }
 0x77e   :  { %9581 = vmatpush1.bf16.msra.mxu1 %v17250_v37  ;;  %7797 = vmatprep.subr.bf16.mxu0 %v17155_v18  ;;  %v17375_v18 = vld [vmem:[#allocation7 + $0xd84] ss:$16 sps:$4 sm:$0xff]  }
 0x77f   :  { %9582 = vmatprep.subr.bf16.mxu1 %v17253_v0 }
 0x781   :  { %7798 = vmatpush1.bf16.msra.mxu0 %v17160_v6  ;;  %v17382_v6 = vld [vmem:[#allocation7 + $0xd80] ss:$16 sps:$4 sm:$0xff]  }
 0x782   :  { %9583 = vmatpush1.bf16.msra.mxu1 %v17258_v30  ;;  %7799 = vmatprep.subr.bf16.mxu0 %v17163_v10  ;;  %v17385_v10 = vld [vmem:[#allocation7 + $0xda4] ss:$16 sps:$4 sm:$0xff]  }
 0x783   :  { %9584 = vmatprep.subr.bf16.mxu1 %v17261_v50 }
 0x785   :  { %7800 = vmatpush1.bf16.msra.mxu0 %v17170_v55  ;;  %v17393_v55 = vld [vmem:[#allocation7 + $0xdc4] ss:$16 sps:$4 sm:$0xff]  }
 0x786   :  { %9585 = vmatpush1.bf16.msra.mxu1 %v17266_v57  ;;  %7801 = vmatprep.subr.bf16.mxu0 %v17173_v3  ;;  %v17397_v3 = vld [vmem:[#allocation2 + $0x20] sm:$0xff] }
 0x787   :  { %9642 = vmatprep.subr.bf16.mxu1 %v17269_v46 }
 0x789   :  { %7802 = vmatpush1.bf16.msra.mxu0 %v17178_v23  ;;  %9603 = vmatmul.mubr.bf16.vlgmr.msra.gmra.mrb[104].mxu1 %v17066_v17  ;;  %v17402_v23 = vld [vmem:[#allocation7 + $0xdc0] ss:$16 sps:$4 sm:$0xff]  }
 0x78a   :  { %9643 = vmatpush1.bf16.msra.mxu1 %v17274_v20  ;;  %7803 = vmatprep.subr.bf16.mxu0 %v17181_v34  ;;  %v17405_v34 = vld [vmem:[#allocation7 + $0xde4] ss:$16 sps:$4 sm:$0xff]  }
 0x78b   :  { %9644 = vmatprep.subr.bf16.mxu1 %v17277_v25  ;;  %9612 = vmatprep.mubr.bf16.mxu1 %v17832_v5 }
 0x78d   :  { %7804 = vmatpush1.bf16.msra.mxu0 %v17188_v21  ;;  %v17413_v21 = vld [vmem:[#allocation7 + $0xe04] ss:$16 sps:$4 sm:$0xff]  }
 0x78e   :  { %9645 = vmatpush1.bf16.msra.mxu1 %v17283_v12  ;;  %7805 = vmatprep.subr.bf16.mxu0 %v17191_v13  ;;  %v17418_v13 = vld [vmem:[#allocation7 + $0xe00] ss:$16 sps:$4 sm:$0xff]  }
 0x78f   :  { %9646 = vmatprep.subr.bf16.mxu1 %v17287_v2 }
 0x791   :  { %7806 = vmatpush1.bf16.msra.mxu0 %v17196_v61  ;;  %9613 = vmatmul.mubr.bf16.gmra.mrb[108].mxu1 %v17085_v48  ;;  %v17421_v61 = vld [vmem:[#allocation7 + $0xe24] ss:$16 sps:$4 sm:$0xff]  }
 0x792   :  { %9647 = vmatpush1.bf16.msra.mxu1 %v17292_v54  ;;  %9674 = vmatprep.mubr.bf16.mxu1 %v17300_v43 }
 0x793   :  { %7828 = vmatprep.subr.bf16.mxu0 %v17199_v36  ;;  %9648 = vmatprep.subr.bf16.mxu1 %v17295_v39  ;;  %v17424_v36 = vld [vmem:[#allocation2 + $0x60] sm:$0xff] }
 0x794   :  { %7808 = vmatmul.mubr.bf16.vlgmr.msra.gmra.mrb[76].mxu0 %v16561_v33  ;;  %v17322_v33 = vld [vmem:[#allocation7 + $0xca0] ss:$16 sps:$4 sm:$0xff]  }
 0x795   :  { %7817 = vmatprep.mubr.bf16.mxu0 %v16568_v56  ;;  %7829 = vmatpush1.bf16.msra.mxu0 %v17204_v35  ;;  %v17325_v56 = vld [vmem:[#allocation7 + $0xcc4] ss:$16 sps:$4 sm:$0xff]   ;;  %v17427_v35 = vld [vmem:[#allocation2 + $0x80] sm:$0xff] }
 0x796   :  { %9649 = vmatpush1.bf16.msra.mxu1 %v17303_v42  ;;  %7830 = vmatprep.subr.bf16.mxu0 %v17207_v60  ;;  %v17431_v60 = vld [vmem:[#allocation7 + $0xe20] ss:$16 sps:$4 sm:$0xff]  }
 0x797   :  { %9650 = vmatprep.subr.bf16.mxu1 %v17307_v28 }
 0x799   :  { %7831 = vmatpush1.bf16.msra.mxu0 %v17215_v32  ;;  %v17435_v32 = vld [vmem:[#allocation7 + $0xe44] ss:$16 sps:$4 sm:$0xff]  }
 0x79a   :  { %9651 = vmatpush1.bf16.msra.mxu1 %v17314_v8  ;;  %7832 = vmatprep.subr.bf16.mxu0 %v17219_v1  ;;  %v17440_v1 = vld [vmem:[#allocation7 + $0xe40] ss:$16 sps:$4 sm:$0xff]  }
 0x79b   :  { %9652 = vmatprep.subr.bf16.mxu1 %v17317_v24 }
 0x79c   :  { %7818 = vmatmul.mubr.bf16.gmra.mrb[80].mxu0 %v16587_v15  ;;  %v17340_v15 = vld [vmem:[#allocation7 + $0xce0] ss:$16 sps:$4 sm:$0xff]  }
 0x79d   :  { %7833 = vmatpush1.bf16.msra.mxu0 %v17224_v7  ;;  %7860 = vmatprep.mubr.bf16.mxu0 %v17832_v5  ;;  %v17443_v7 = vld [vmem:[#allocation7 + $0xe64] ss:$16 sps:$4 sm:$0xff]  }
 0x79e   :  { %9653 = vmatpush1.bf16.msra.mxu1 %v17322_v33  ;;  %7834 = vmatprep.subr.bf16.mxu0 %v17227_v38  ;;  %v17445_v38 = vld [vmem:[#allocation2 + $0x78] sm:$0xff] }
 0x79f   :  { %9654 = vmatprep.subr.bf16.mxu1 %v17325_v56 }
 0x7a1   :  { %7835 = vmatpush1.bf16.msra.mxu0 %v17233_v31  ;;  %v17451_v31 = vld [vmem:[#allocation7 + $0xe60] ss:$16 sps:$4 sm:$0xff]  }
 0x7a2   :  { %9655 = vmatpush1.bf16.msra.mxu1 %v17332_v58  ;;  %7836 = vmatprep.subr.bf16.mxu0 %v17236_v4  ;;  %v17454_v4 = vld [vmem:[#allocation7 + $0xe84] ss:$16 sps:$4 sm:$0xff]  }
 0x7a3   :  { %9656 = vmatprep.subr.bf16.mxu1 %v17335_v51 }
 0x7a5   :  { %7837 = vmatpush1.bf16.msra.mxu0 %v17242_v16  ;;  %v17460_v16 = vld [vmem:[#allocation7 + $0xe80] ss:$16 sps:$4 sm:$0xff]  }
 0x7a6   :  { %9657 = vmatpush1.bf16.msra.mxu1 %v17340_v15  ;;  %7838 = vmatprep.subr.bf16.mxu0 %v17245_v47  ;;  %v17463_v47 = vld [vmem:[#allocation7 + $0xea4] ss:$16 sps:$4 sm:$0xff]  }
 0x7a7   :  { %9658 = vmatprep.subr.bf16.mxu1 %v17343_v41 }
 0x7a9   :  { %7839 = vmatpush1.bf16.msra.mxu0 %v17250_v37  ;;  %v17468_v37 = vld [vmem:[#allocation7 + $0xea0] ss:$16 sps:$4 sm:$0xff]  }
 0x7aa   :  { %9659 = vmatpush1.bf16.msra.mxu1 %v17348_v63  ;;  %7840 = vmatprep.subr.bf16.mxu0 %v17253_v0  ;;  %v17471_v0 = vld [vmem:[#allocation7 + $0xec4] ss:$16 sps:$4 sm:$0xff]  }
 0x7ab   :  { %9660 = vmatprep.subr.bf16.mxu1 %v17351_v14 }
 0x7ad   :  { %7841 = vmatpush1.bf16.msra.mxu0 %v17258_v30  ;;  %v17476_v30 = vld [vmem:[#allocation7 + $0xec0] ss:$16 sps:$4 sm:$0xff]  }
 0x7ae   :  { %9661 = vmatpush1.bf16.msra.mxu1 %v17356_v45  ;;  %7842 = vmatprep.subr.bf16.mxu0 %v17261_v50  ;;  %v17479_v50 = vld [vmem:[#allocation7 + $0xee4] ss:$16 sps:$4 sm:$0xff]  }
 0x7af   :  { %9662 = vmatprep.subr.bf16.mxu1 %v17359_v26 }
 0x7b1   :  { %7843 = vmatpush1.bf16.msra.mxu0 %v17266_v57  ;;  %v17484_v57 = vld [vmem:[#allocation7 + $0xee0] ss:$16 sps:$4 sm:$0xff]  }
 0x7b2   :  { %9663 = vmatpush1.bf16.msra.mxu1 %v17364_v44  ;;  %8477 = vmatprep.subr.bf16.mxu0 %v17269_v46  ;;  %v17487_v46 = vld [vmem:[#allocation7 + $0xc0c] ss:$16 sps:$4 sm:$0xff]  }
 0x7b3   :  { %9664 = vmatprep.subr.bf16.mxu1 %v17367_v52 }
 0x7b4   :  { %7861 = vmatmul.mubr.bf16.vlgmr.msra.gmra.mrb[76].mxu0 %v16640_v62  ;;  %v17390_v62 = vld [vmem:[#allocation7 + $0xda0] ss:$16 sps:$4 sm:$0xff]  }
 0x7b5   :  { %8478 = vmatpush1.bf16.msra.mxu0 %v17274_v20  ;;  %7870 = vmatprep.mubr.bf16.mxu0 %v17832_v5  ;;  %v17492_v20 = vld [vmem:[#allocation7 + $0xc08] ss:$16 sps:$4 sm:$0xff]  }
 0x7b6   :  { %9665 = vmatpush1.bf16.msra.mxu1 %v17372_v49  ;;  %8479 = vmatprep.subr.bf16.mxu0 %v17277_v25  ;;  %v17495_v25 = vld [vmem:[#allocation7 + $0xc2c] ss:$16 sps:$4 sm:$0xff]  }
 0x7b7   :  { %9666 = vmatprep.subr.bf16.mxu1 %v17375_v18 }
 0x7b9   :  { %8480 = vmatpush1.bf16.msra.mxu0 %v17283_v12  ;;  %v17498_v12 = vld [vmem:[#allocation2 + $0x70] sm:$0xff] }
 0x7ba   :  { %9667 = vmatpush1.bf16.msra.mxu1 %v17382_v6  ;;  %8481 = vmatprep.subr.bf16.mxu0 %v17287_v2  ;;  %v17503_v2 = vld [vmem:[#allocation7 + $0xc28] ss:$16 sps:$4 sm:$0xff]  }
 0x7bb   :  { %9668 = vmatprep.subr.bf16.mxu1 %v17385_v10 }
 0x7bc   :  { %7871 = vmatmul.mubr.bf16.gmra.mrb[80].mxu0 %v16661_v40  ;;  %v17410_v40 = vld [vmem:[#allocation7 + $0xde0] ss:$16 sps:$4 sm:$0xff]  }
 0x7bd   :  { %8482 = vmatpush1.bf16.msra.mxu0 %v17292_v54  ;;  %8509 = vmatprep.mubr.bf16.mxu0 %v17397_v3  ;;  %v17507_v54 = vld [vmem:[#allocation7 + $0xc4c] ss:$16 sps:$4 sm:$0xff]  }
 0x7be   :  { %9669 = vmatpush1.bf16.msra.mxu1 %v17390_v62  ;;  %8483 = vmatprep.subr.bf16.mxu0 %v17295_v39  ;;  %v17512_v39 = vld [vmem:[#allocation7 + $0xc48] ss:$16 sps:$4 sm:$0xff]  }
 0x7bf   :  { %9670 = vmatprep.subr.bf16.mxu1 %v17393_v55 }
 0x7c1   :  { %8484 = vmatpush1.bf16.msra.mxu0 %v17303_v42  ;;  %v17515_v42 = vld [vmem:[#allocation7 + $0xc6c] ss:$16 sps:$4 sm:$0xff]  }
 0x7c2   :  { %9671 = vmatpush1.bf16.msra.mxu1 %v17402_v23  ;;  %8485 = vmatprep.subr.bf16.mxu0 %v17307_v28  ;;  %v17517_v28 = vld [vmem:[#allocation2 + $0x88] sm:$0xff] }
 0x7c3   :  { %9672 = vmatprep.subr.bf16.mxu1 %v17405_v34 }
 0x7c5   :  { %8486 = vmatpush1.bf16.msra.mxu0 %v17314_v8  ;;  %v17523_v8 = vld [vmem:[#allocation7 + $0xc68] ss:$16 sps:$4 sm:$0xff]  }
 0x7c6   :  { %9673 = vmatpush1.bf16.msra.mxu1 %v17410_v40  ;;  %8487 = vmatprep.subr.bf16.mxu0 %v17317_v24  ;;  %v17527_v24 = vld [vmem:[#allocation7 + $0xc8c] ss:$16 sps:$4 sm:$0xff]  }
 0x7c7   :  { %9695 = vmatprep.subr.bf16.mxu1 %v17413_v21 }
 0x7c9   :  { %8488 = vmatpush1.bf16.msra.mxu0 %v17322_v33  ;;  %9675 = vmatmul.mubr.bf16.vlgmr.msra.gmra.mrb[96].mxu1 %v17424_v36  ;;  %v17534_v33 = vld [vmem:[#allocation7 + $0xc88] ss:$16 sps:$4 sm:$0xff]  }
 0x7ca   :  { %9684 = vmatprep.mubr.bf16.mxu1 %v17427_v35  ;;  %9696 = vmatpush1.bf16.msra.mxu1 %v17418_v13 }
 0x7cb   :  { %8489 = vmatprep.subr.bf16.mxu0 %v17325_v56  ;;  %9697 = vmatprep.subr.bf16.mxu1 %v17421_v61  ;;  %v17542_v56 = vld [vmem:[#allocation7 + $0xca8] ss:$16 sps:$4 sm:$0xff]  }
 0x7cd   :  { %8490 = vmatpush1.bf16.msra.mxu0 %v17332_v58  ;;  %v17552_v58 = vld [vmem:[#allocation7 + $0xcc8] ss:$16 sps:$4 sm:$0xff]  }
 0x7ce   :  { %9698 = vmatpush1.bf16.msra.mxu1 %v17431_v60  ;;  %8491 = vmatprep.subr.bf16.mxu0 %v17335_v51  ;;  %v17555_v51 = vld [vmem:[#allocation7 + $0xcec] ss:$16 sps:$4 sm:$0xff]  }
 0x7cf   :  { %9699 = vmatprep.subr.bf16.mxu1 %v17435_v32 }
 0x7d1   :  { %8492 = vmatpush1.bf16.msra.mxu0 %v17340_v15  ;;  %9685 = vmatmul.mubr.bf16.gmra.mrb[100].mxu1 %v17445_v38  ;;  %v17563_v15 = vld [vmem:[#allocation7 + $0xd0c] ss:$16 sps:$4 sm:$0xff]  }
 0x7d2   :  { %9700 = vmatpush1.bf16.msra.mxu1 %v17440_v1  ;;  %8493 = vmatprep.subr.bf16.mxu0 %v17343_v41  ;;  %v17568_v41 = vld [vmem:[#allocation7 + $0xd08] ss:$16 sps:$4 sm:$0xff]  }
 0x7d3   :  { %9701 = vmatprep.subr.bf16.mxu1 %v17443_v7  ;;  %9727 = vmatprep.mubr.bf16.mxu1 %v17832_v5 }
 0x7d5   :  { %8494 = vmatpush1.bf16.msra.mxu0 %v17348_v63  ;;  %v17571_v63 = vld [vmem:[#allocation7 + $0xd2c] ss:$16 sps:$4 sm:$0xff]  }
 0x7d6   :  { %9702 = vmatpush1.bf16.msra.mxu1 %v17451_v31  ;;  %8495 = vmatprep.subr.bf16.mxu0 %v17351_v14  ;;  %v17576_v14 = vld [vmem:[#allocation7 + $0xd28] ss:$16 sps:$4 sm:$0xff]  }
 0x7d7   :  { %9703 = vmatprep.subr.bf16.mxu1 %v17454_v4 }
 0x7d9   :  { %8496 = vmatpush1.bf16.msra.mxu0 %v17356_v45  ;;  %v17579_v45 = vld [vmem:[#allocation7 + $0xd4c] ss:$16 sps:$4 sm:$0xff]  }
 0x7da   :  { %9704 = vmatpush1.bf16.msra.mxu1 %v17460_v16  ;;  %8497 = vmatprep.subr.bf16.mxu0 %v17359_v26  ;;  %v17584_v26 = vld [vmem:[#allocation7 + $0xd48] ss:$16 sps:$4 sm:$0xff]  }
 0x7db   :  { %9705 = vmatprep.subr.bf16.mxu1 %v17463_v47 }
 0x7dd   :  { %8498 = vmatpush1.bf16.msra.mxu0 %v17364_v44  ;;  %v17587_v44 = vld [vmem:[#allocation7 + $0xd6c] ss:$16 sps:$4 sm:$0xff]  }
 0x7de   :  { %9706 = vmatpush1.bf16.msra.mxu1 %v17468_v37  ;;  %8499 = vmatprep.subr.bf16.mxu0 %v17367_v52  ;;  %v17592_v52 = vld [vmem:[#allocation7 + $0xd68] ss:$16 sps:$4 sm:$0xff]  }
 0x7df   :  { %9707 = vmatprep.subr.bf16.mxu1 %v17471_v0 }
 0x7e1   :  { %8500 = vmatpush1.bf16.msra.mxu0 %v17372_v49  ;;  %v17595_v49 = vld [vmem:[#allocation7 + $0xd8c] ss:$16 sps:$4 sm:$0xff]  }
 0x7e2   :  { %9708 = vmatpush1.bf16.msra.mxu1 %v17476_v30  ;;  %8501 = vmatprep.subr.bf16.mxu0 %v17375_v18  ;;  %v17602_v18 = vld [vmem:[#allocation7 + $0xd88] ss:$16 sps:$4 sm:$0xff]  }
 0x7e3   :  { %9709 = vmatprep.subr.bf16.mxu1 %v17479_v50 }
 0x7e5   :  { %8502 = vmatpush1.bf16.msra.mxu0 %v17382_v6  ;;  %v17605_v6 = vld [vmem:[#allocation7 + $0xdac] ss:$16 sps:$4 sm:$0xff]  }
 0x7e6   :  { %9710 = vmatpush1.bf16.msra.mxu1 %v17484_v57  ;;  %8503 = vmatprep.subr.bf16.mxu0 %v17385_v10  ;;  %v17610_v10 = vld [vmem:[#allocation7 + $0xda8] ss:$16 sps:$4 sm:$0xff]  }
 0x7e7   :  { %9748 = vmatprep.subr.bf16.mxu1 %v17487_v46 }
 0x7e9   :  { %8504 = vmatpush1.bf16.msra.mxu0 %v17390_v62  ;;  %9728 = vmatmul.mubr.bf16.vlgmr.msra.gmra.mrb[96].mxu1 %v17498_v12  ;;  %v17613_v62 = vld [vmem:[#allocation7 + $0xdcc] ss:$16 sps:$4 sm:$0xff]  }
 0x7ea   :  { %9749 = vmatpush1.bf16.msra.mxu1 %v17492_v20  ;;  %8505 = vmatprep.subr.bf16.mxu0 %v17393_v55  ;;  %v17620_v55 = vld [vmem:[#allocation7 + $0xdc8] ss:$16 sps:$4 sm:$0xff]  }
 0x7eb   :  { %9750 = vmatprep.subr.bf16.mxu1 %v17495_v25  ;;  %9737 = vmatprep.mubr.bf16.mxu1 %v17832_v5 }
 0x7ed   :  { %8506 = vmatpush1.bf16.msra.mxu0 %v17402_v23  ;;  %v17623_v23 = vld [vmem:[#allocation7 + $0xdec] ss:$16 sps:$4 sm:$0xff]  }
 0x7ee   :  { %9751 = vmatpush1.bf16.msra.mxu1 %v17503_v2  ;;  %8507 = vmatprep.subr.bf16.mxu0 %v17405_v34  ;;  %v13716_v34 = vld [vmem:[#allocation7 + $0xde8] ss:$16 sps:$4 sm:$0xff]  }
 0x7ef   :  { %9752 = vmatprep.subr.bf16.mxu1 %v17507_v54 }
 0x7f1   :  { %8508 = vmatpush1.bf16.msra.mxu0 %v17410_v40  ;;  %9738 = vmatmul.mubr.bf16.gmra.mrb[100].mxu1 %v17517_v28  ;;  %v13719_v40 = vld [vmem:[#allocation7 + $0xe08] ss:$16 sps:$4 sm:$0xff]  }
 0x7f2   :  { %9753 = vmatpush1.bf16.msra.mxu1 %v17512_v39  ;;  %9780 = vmatprep.mubr.bf16.mxu1 %v17300_v43  ;;  %v17537_v43 = vld [vmem:[#allocation7 + $0xcac] ss:$16 sps:$4 sm:$0xff]  }
 0x7f3   :  { %8530 = vmatprep.subr.bf16.mxu0 %v17413_v21  ;;  %9754 = vmatprep.subr.bf16.mxu1 %v17515_v42  ;;  %v13724_v21 = vld [vmem:[#allocation7 + $0xe2c] ss:$16 sps:$4 sm:$0xff]  }
 0x7f4   :  { %8510 = vmatmul.mubr.bf16.vlgmr.msra.gmra.mrb[68].mxu0 %v17210_v11 }
 0x7f5   :  { %8519 = vmatprep.mubr.bf16.mxu0 %v16995_v9  ;;  %8531 = vmatpush1.bf16.msra.mxu0 %v17418_v13  ;;  %v17545_v9 = vld [vmem:[#allocation7 + $0xccc] ss:$16 sps:$4 sm:$0xff]   ;;  %v13722_v13 = vld [vmem:[#allocation7 + $0xe28] ss:$16 sps:$4 sm:$0xff]  }
 0x7f6   :  { %9755 = vmatpush1.bf16.msra.mxu1 %v17523_v8  ;;  %8532 = vmatprep.subr.bf16.mxu0 %v17421_v61  ;;  %v13727_v61 = vld [vmem:[#allocation7 + $0xe4c] ss:$16 sps:$4 sm:$0xff]  }
 0x7f7   :  { %9756 = vmatprep.subr.bf16.mxu1 %v17527_v24 }
 0x7f9   :  { %8533 = vmatpush1.bf16.msra.mxu0 %v17431_v60  ;;  %v13725_v60 = vld [vmem:[#allocation7 + $0xe48] ss:$16 sps:$4 sm:$0xff]  }
 0x7fa   :  { %9757 = vmatpush1.bf16.msra.mxu1 %v17534_v33  ;;  %8534 = vmatprep.subr.bf16.mxu0 %v17435_v32  ;;  %v13730_v32 = vld [vmem:[#allocation7 + $0xe6c] ss:$16 sps:$4 sm:$0xff]  }
 0x7fb   :  { %9758 = vmatprep.subr.bf16.mxu1 %v17537_v43 }
 0x7fc   :  { %8520 = vmatmul.mubr.bf16.gmra.mrb[72].mxu0 %v17013_v22  ;;  %v17560_v22 = vld [vmem:[#allocation7 + $0xce8] ss:$16 sps:$4 sm:$0xff]  }
 0x7fd   :  { %8535 = vmatpush1.bf16.msra.mxu0 %v17440_v1  ;;  %8562 = vmatprep.mubr.bf16.mxu0 %v17832_v5  ;;  %v13731_v1 = vld [vmem:[#allocation7 + $0xe88] ss:$16 sps:$4 sm:$0xff]  }
 0x7fe   :  { %9759 = vmatpush1.bf16.msra.mxu1 %v17542_v56  ;;  %8536 = vmatprep.subr.bf16.mxu0 %v17443_v7  ;;  %v13736_v7 = vld [vmem:[#allocation7 + $0xeac] ss:$16 sps:$4 sm:$0xff]  }
 0x7ff   :  { %9760 = vmatprep.subr.bf16.mxu1 %v17545_v9 }
 0x801   :  { %8537 = vmatpush1.bf16.msra.mxu0 %v17451_v31  ;;  %v13739_v31 = vld [vmem:[#allocation7 + $0xecc] ss:$16 sps:$4 sm:$0xff]  }
 0x802   :  { %9761 = vmatpush1.bf16.msra.mxu1 %v17552_v58  ;;  %8538 = vmatprep.subr.bf16.mxu0 %v17454_v4  ;;  %v13737_v4 = vld [vmem:[#allocation7 + $0xec8] ss:$16 sps:$4 sm:$0xff]  }
 0x803   :  { %9762 = vmatprep.subr.bf16.mxu1 %v17555_v51 }
 0x805   :  { %8539 = vmatpush1.bf16.msra.mxu0 %v17460_v16  ;;  %v13742_v16 = vld [vmem:[#allocation7 + $0xeec] ss:$16 sps:$4 sm:$0xff]  }
 0x806   :  { %9763 = vmatpush1.bf16.msra.mxu1 %v17560_v22  ;;  %8540 = vmatprep.subr.bf16.mxu0 %v17463_v47  ;;  %v13740_v47 = vld [vmem:[#allocation7 + $0xee8] ss:$16 sps:$4 sm:$0xff]  }
 0x807   :  { %9764 = vmatprep.subr.bf16.mxu1 %v17563_v15 }
 0x809   :  { %8541 = vmatpush1.bf16.msra.mxu0 %v17468_v37  ;;  %v14015_v37 = vld [vmem:[#allocation2 + $0x38] sm:$0xff] }
 0x80a   :  { %9765 = vmatpush1.bf16.msra.mxu1 %v17568_v41  ;;  %8542 = vmatprep.subr.bf16.mxu0 %v17471_v0  ;;  %v14016_v0 = vld [vmem:[#allocation2 + $0x30] sm:$0xff] }
 0x80b   :  { %9766 = vmatprep.subr.bf16.mxu1 %v17571_v63 }
 0x80d   :  { %8543 = vmatpush1.bf16.msra.mxu0 %v17476_v30  ;;  %v14018_v30 = vld [vmem:[#allocation7 + $0x308] ss:$16 sps:$4 sm:$0xff]  }
 0x80e   :  { %9767 = vmatpush1.bf16.msra.mxu1 %v17576_v14  ;;  %8544 = vmatprep.subr.bf16.mxu0 %v17479_v50  ;;  %v14019_v50 = vld [vmem:[#allocation7 + $0x32c] ss:$16 sps:$4 sm:$0xff]  }
 0x80f   :  { %9768 = vmatprep.subr.bf16.mxu1 %v17579_v45 }
 0x811   :  { %8545 = vmatpush1.bf16.msra.mxu0 %v17484_v57  ;;  %v14020_v57 = vld [vmem:[#allocation7 + $0x328] ss:$16 sps:$4 sm:$0xff]  }
 0x812   :  { %9769 = vmatpush1.bf16.msra.mxu1 %v17584_v26  ;;  %8583 = vmatprep.subr.bf16.mxu0 %v17487_v46  ;;  %v14021_v46 = vld [vmem:[#allocation7 + $0x34c] ss:$16 sps:$4 sm:$0xff]  }
 0x813   :  { %9770 = vmatprep.subr.bf16.mxu1 %v17587_v44 }
 0x814   :  { %8563 = vmatmul.mubr.bf16.vlgmr.msra.gmra.mrb[68].mxu0 %v17066_v17 }
 0x815   :  { %8584 = vmatpush1.bf16.msra.mxu0 %v17492_v20  ;;  %8572 = vmatprep.mubr.bf16.mxu0 %v17832_v5  ;;  %v14022_v20 = vld [vmem:[#allocation7 + $0x348] ss:$16 sps:$4 sm:$0xff]  }
 0x816   :  { %9771 = vmatpush1.bf16.msra.mxu1 %v17592_v52  ;;  %8585 = vmatprep.subr.bf16.mxu0 %v17495_v25  ;;  %v14023_v25 = vld [vmem:[#allocation7 + $0x36c] ss:$16 sps:$4 sm:$0xff]  }
 0x817   :  { %9772 = vmatprep.subr.bf16.mxu1 %v17595_v49 }
 0x819   :  { %8586 = vmatpush1.bf16.msra.mxu0 %v17503_v2  ;;  %v14026_v2 = vld [vmem:[#allocation7 + $0x388] ss:$16 sps:$4 sm:$0xff]  }
 0x81a   :  { %9773 = vmatpush1.bf16.msra.mxu1 %v17602_v18  ;;  %8587 = vmatprep.subr.bf16.mxu0 %v17507_v54  ;;  %v14028_v54 = vld [vmem:[#allocation7 + $0x3a8] ss:$16 sps:$4 sm:$0xff]  }
 0x81b   :  { %9774 = vmatprep.subr.bf16.mxu1 %v17605_v6 }
 0x81c   :  { %8573 = vmatmul.mubr.bf16.gmra.mrb[72].mxu0 %v17085_v48 }
 0x81d   :  { %8588 = vmatpush1.bf16.msra.mxu0 %v17512_v39  ;;  %8615 = vmatprep.mubr.bf16.mxu0 %v17397_v3  ;;  %v13721_v3 = vld [vmem:[#allocation7 + $0xe0c] ss:$16 sps:$4 sm:$0xff]  }
 0x81e   :  { %9775 = vmatpush1.bf16.msra.mxu1 %v17610_v10  ;;  %8589 = vmatprep.subr.bf16.mxu0 %v17515_v42  ;;  %v14029_v39 = vld [vmem:[#allocation7 + $0x3cc] ss:$16 sps:$4 sm:$0xff]   ;;  %v14030_v42 = vld [vmem:[#allocation7 + $0x3c8] ss:$16 sps:$4 sm:$0xff]  }
 0x81f   :  { %9776 = vmatprep.subr.bf16.mxu1 %v17613_v62 }
 0x821   :  { %8590 = vmatpush1.bf16.msra.mxu0 %v17523_v8  ;;  %v14034_v8 = vld [vmem:[#allocation7 + $0x408] ss:$16 sps:$4 sm:$0xff]  }
 0x822   :  { %9777 = vmatpush1.bf16.msra.mxu1 %v17620_v55  ;;  %8591 = vmatprep.subr.bf16.mxu0 %v17527_v24  ;;  %v14035_v24 = vld [vmem:[#allocation7 + $0x42c] ss:$16 sps:$4 sm:$0xff]  }
 0x823   :  { %9778 = vmatprep.subr.bf16.mxu1 %v17623_v23 }
 0x825   :  { %8592 = vmatpush1.bf16.msra.mxu0 %v17534_v33  ;;  %v14036_v33 = vld [vmem:[#allocation7 + $0x428] ss:$16 sps:$4 sm:$0xff]  }
 0x826   :  { %9779 = vmatpush1.bf16.msra.mxu1 %v13716_v34  ;;  %8593 = vmatprep.subr.bf16.mxu0 %v17537_v43  ;;  %v14037_v43 = vld [vmem:[#allocation7 + $0x44c] ss:$16 sps:$4 sm:$0xff]  }
 0x827   :  { %9801 = vmatprep.subr.bf16.mxu1 %v13721_v3 }
 0x829   :  { %8594 = vmatpush1.bf16.msra.mxu0 %v17542_v56  ;;  %9781 = vmatmul.mubr.bf16.vlgmr.msra.gmra.mrb[104].mxu1 %v17424_v36  ;;  %v13728_v36 = vld [vmem:[#allocation7 + $0xe68] ss:$16 sps:$4 sm:$0xff]  }
 0x82a   :  { %9790 = vmatprep.mubr.bf16.mxu1 %v17427_v35  ;;  %9802 = vmatpush1.bf16.msra.mxu1 %v13719_v40  ;;  %v13733_v35 = vld [vmem:[#allocation7 + $0xe8c] ss:$16 sps:$4 sm:$0xff]   ;;  %v14038_v56 = vld [vmem:[#allocation7 + $0x448] ss:$16 sps:$4 sm:$0xff]  }
 0x82b   :  { %8595 = vmatprep.subr.bf16.mxu0 %v17545_v9  ;;  %9803 = vmatprep.subr.bf16.mxu1 %v13724_v21  ;;  %v14039_v9 = vld [vmem:[#allocation7 + $0x46c] ss:$16 sps:$4 sm:$0xff]  }
 0x82d   :  { %8596 = vmatpush1.bf16.msra.mxu0 %v17552_v58  ;;  %v14040_v58 = vld [vmem:[#allocation7 + $0x468] ss:$16 sps:$4 sm:$0xff]  }
 0x82e   :  { %9804 = vmatpush1.bf16.msra.mxu1 %v13722_v13  ;;  %8597 = vmatprep.subr.bf16.mxu0 %v17555_v51  ;;  %v14041_v51 = vld [vmem:[#allocation7 + $0x48c] ss:$16 sps:$4 sm:$0xff]  }
 0x82f   :  { %9805 = vmatprep.subr.bf16.mxu1 %v13727_v61 }
 0x831   :  { %8598 = vmatpush1.bf16.msra.mxu0 %v17560_v22  ;;  %9791 = vmatmul.mubr.bf16.gmra.mrb[108].mxu1 %v17445_v38  ;;  %v13734_v38 = vld [vmem:[#allocation7 + $0xea8] ss:$16 sps:$4 sm:$0xff]  }
 0x832   :  { %9806 = vmatpush1.bf16.msra.mxu1 %v13725_v60  ;;  %8599 = vmatprep.subr.bf16.mxu0 %v17563_v15  ;;  %v14042_v22 = vld [vmem:[#allocation7 + $0x488] ss:$16 sps:$4 sm:$0xff]   ;;  %v14043_v15 = vld [vmem:[#allocation7 + $0x4ac] ss:$16 sps:$4 sm:$0xff]  }
 0x833   :  { %9807 = vmatprep.subr.bf16.mxu1 %v13730_v32  ;;  %9833 = vmatprep.mubr.bf16.mxu1 %v17832_v5 }
 0x835   :  { %8600 = vmatpush1.bf16.msra.mxu0 %v17568_v41  ;;  %v14044_v41 = vld [vmem:[#allocation7 + $0x4a8] ss:$16 sps:$4 sm:$0xff]  }
 0x836   :  { %9808 = vmatpush1.bf16.msra.mxu1 %v13728_v36  ;;  %8601 = vmatprep.subr.bf16.mxu0 %v17571_v63  ;;  %v14045_v63 = vld [vmem:[#allocation7 + $0x4cc] ss:$16 sps:$4 sm:$0xff]  }
 0x837   :  { %9809 = vmatprep.subr.bf16.mxu1 %v13733_v35 }
 0x839   :  { %8602 = vmatpush1.bf16.msra.mxu0 %v17576_v14  ;;  %v14046_v14 = vld [vmem:[#allocation7 + $0x4c8] ss:$16 sps:$4 sm:$0xff]  }
 0x83a   :  { %9810 = vmatpush1.bf16.msra.mxu1 %v13731_v1  ;;  %8603 = vmatprep.subr.bf16.mxu0 %v17579_v45  ;;  %v14047_v45 = vld [vmem:[#allocation7 + $0x4ec] ss:$16 sps:$4 sm:$0xff]  }
 0x83b   :  { %9811 = vmatprep.subr.bf16.mxu1 %v13736_v7 }
 0x83d   :  { %8604 = vmatpush1.bf16.msra.mxu0 %v17584_v26  ;;  %v14048_v26 = vld [vmem:[#allocation7 + $0x4e8] ss:$16 sps:$4 sm:$0xff]  }
 0x83e   :  { %9812 = vmatpush1.bf16.msra.mxu1 %v13734_v38  ;;  %8605 = vmatprep.subr.bf16.mxu0 %v17587_v44 }
 0x83f   :  { %9813 = vmatprep.subr.bf16.mxu1 %v13739_v31 }
 0x841   :  { %8606 = vmatpush1.bf16.msra.mxu0 %v17592_v52 }
 0x842   :  { %9814 = vmatpush1.bf16.msra.mxu1 %v13737_v4  ;;  %8607 = vmatprep.subr.bf16.mxu0 %v17595_v49 }
 0x843   :  { %9815 = vmatprep.subr.bf16.mxu1 %v13742_v16 }
 0x845   :  { %8608 = vmatpush1.bf16.msra.mxu0 %v17602_v18 }
 0x846   :  { %9816 = vmatpush1.bf16.msra.mxu1 %v13740_v47  ;;  %8609 = vmatprep.subr.bf16.mxu0 %v17605_v6  ;;  %v17667_v6 = vld [vmem:[#allocation8] sm:$0xf] }
 0x849   :  { %8610 = vmatpush1.bf16.msra.mxu0 %v17610_v10  ;;  %9834 = vmatmul.mubr.bf16.vlgmr.msra.gmra.mrb[104].mxu1 %v17498_v12  ;;  %v14024_v12 = vld [vmem:[#allocation7 + $0x368] ss:$16 sps:$4 sm:$0xff]   ;;  %v17833_v10 = vld [vmem:[#allocation50_spill] sm:$0xff] }
 0x84a   :  { %8611 = vmatprep.subr.bf16.mxu0 %v17613_v62  ;;  %9843 = vmatprep.mubr.bf16.mxu1 %v17832_v5  ;;  %v17671_v62 = vrot.slane %v17667_v6, %v17833_v10 }
 0x84d   :  { %8612 = vmatpush1.bf16.msra.mxu0 %v17620_v55  ;;  %v17834_v55 = vld [vmem:[#allocation51_spill] sm:$0xff] }
 0x84e   :  { %8613 = vmatprep.subr.bf16.mxu0 %v17623_v23  ;;  %v17675_v23 = vrot.slane %v17667_v6, %v17834_v55 }
 0x851   :  { %8614 = vmatpush1.bf16.msra.mxu0 %v13716_v34  ;;  %9844 = vmatmul.mubr.bf16.gmra.mrb[108].mxu1 %v17517_v28  ;;  %v14032_v28 = vld [vmem:[#allocation7 + $0x3e8] ss:$16 sps:$4 sm:$0xff]  }
 0x852   :  { %8636 = vmatprep.subr.bf16.mxu0 %v13721_v3 }
 0x854   :  { %8616 = vmatmul.mubr.bf16.vlgmr.msra.gmra.mrb[76].mxu0 %v17210_v11  ;;  %v14017_v11 = vld [vmem:[#allocation7 + $0x30c] ss:$16 sps:$4 sm:$0xff]  }
 0x855   :  { %8625 = vmatprep.mubr.bf16.mxu0 %v14015_v37  ;;  %8637 = vmatpush1.bf16.msra.mxu0 %v13719_v40 }
 0x856   :  { %8638 = vmatprep.subr.bf16.mxu0 %v13724_v21 }
 0x859   :  { %8639 = vmatpush1.bf16.msra.mxu0 %v13722_v13 }
 0x85a   :  { %8640 = vmatprep.subr.bf16.mxu0 %v13727_v61  ;;  %v13743_v61 = vld [vmem:[#allocation10 + $0x100] ss:$8 sps:$4 sm:$0xff]  }
 0x85c   :  { %8626 = vmatmul.mubr.bf16.gmra.mrb[80].mxu0 %v14016_v0 }
 0x85d   :  { %8641 = vmatpush1.bf16.msra.mxu0 %v13725_v60  ;;  %8668 = vmatprep.mubr.bf16.mxu0 %v17832_v5  ;;  %v13745_v60 = vld [vmem:[#allocation10 + $0x104] ss:$8 sps:$4 sm:$0xff]  }
 0x85e   :  { %8642 = vmatprep.subr.bf16.mxu0 %v13730_v32  ;;  %v13748_v32 = vld [vmem:[#allocation10 + $0x114] ss:$8 sps:$4 sm:$0xff]  }
 0x861   :  { %8643 = vmatpush1.bf16.msra.mxu0 %v13728_v36  ;;  %v13746_v36 = vld [vmem:[#allocation10 + $0x110] ss:$8 sps:$4 sm:$0xff]  }
 0x862   :  { %8644 = vmatprep.subr.bf16.mxu0 %v13733_v35  ;;  %v13751_v35 = vld [vmem:[#allocation10 + $0x124] ss:$8 sps:$4 sm:$0xff]  }
 0x865   :  { %8645 = vmatpush1.bf16.msra.mxu0 %v13731_v1  ;;  %v13749_v1 = vld [vmem:[#allocation10 + $0x120] ss:$8 sps:$4 sm:$0xff]  }
 0x866   :  { %8646 = vmatprep.subr.bf16.mxu0 %v13736_v7  ;;  %v13754_v7 = vld [vmem:[#allocation10 + $0x134] ss:$8 sps:$4 sm:$0xff]  }
 0x869   :  { %8647 = vmatpush1.bf16.msra.mxu0 %v13734_v38  ;;  %v13752_v38 = vld [vmem:[#allocation10 + $0x130] ss:$8 sps:$4 sm:$0xff]  }
 0x86a   :  { %8648 = vmatprep.subr.bf16.mxu0 %v13739_v31  ;;  %v13757_v31 = vld [vmem:[#allocation10 + $0x144] ss:$8 sps:$4 sm:$0xff]  }
 0x86d   :  { %8649 = vmatpush1.bf16.msra.mxu0 %v13737_v4  ;;  %v13755_v4 = vld [vmem:[#allocation10 + $0x140] ss:$8 sps:$4 sm:$0xff]  }
 0x86e   :  { %8650 = vmatprep.subr.bf16.mxu0 %v13742_v16  ;;  %v13760_v16 = vld [vmem:[#allocation10 + $0x154] ss:$8 sps:$4 sm:$0xff]  }
 0x871   :  { %8651 = vmatpush1.bf16.msra.mxu0 %v13740_v47 }
 0x872   :  { %8865 = vmatprep.subr.bf16.mxu0 %v14017_v11 }
 0x874   :  { %8669 = vmatmul.mubr.bf16.vlgmr.msra.gmra.mrb[76].mxu0 %v17066_v17  ;;  %v14025_v17 = vld [vmem:[#allocation7 + $0x38c] ss:$16 sps:$4 sm:$0xff]  }
 0x875   :  { %8866 = vmatpush1.bf16.msra.mxu0 %v14018_v30  ;;  %8678 = vmatprep.mubr.bf16.mxu0 %v17832_v5  ;;  %v14027_v5 = vld [vmem:[#allocation7 + $0x3ac] ss:$16 sps:$4 sm:$0xff]  }
 0x876   :  { %8867 = vmatprep.subr.bf16.mxu0 %v14019_v50 }
 0x879   :  { %8868 = vmatpush1.bf16.msra.mxu0 %v14020_v57  ;;  %v13758_v57 = vld [vmem:[#allocation10 + $0x150] ss:$8 sps:$4 sm:$0xff]  }
 0x87a   :  { %8869 = vmatprep.subr.bf16.mxu0 %v14021_v46 }
 0x87c   :  { %8679 = vmatmul.mubr.bf16.gmra.mrb[80].mxu0 %v17085_v48  ;;  %v14031_v48 = vld [vmem:[#allocation7 + $0x3ec] ss:$16 sps:$4 sm:$0xff]  }
 0x87d   :  { %8870 = vmatpush1.bf16.msra.mxu0 %v14022_v20  ;;  %8897 = vmatprep.mubr.bf16.mxu0 %v15885_v27  ;;  %v14033_v27 = vld [vmem:[#allocation7 + $0x40c] ss:$16 sps:$4 sm:$0xff]  }
 0x87e   :  { %8871 = vmatprep.subr.bf16.mxu0 %v14023_v25 }
 0x881   :  { %8872 = vmatpush1.bf16.msra.mxu0 %v14024_v12  ;;  %v13763_v12 = vld [vmem:[#allocation10 + $0x164] ss:$8 sps:$4 sm:$0xff]  }
 0x882   :  { %8873 = vmatprep.subr.bf16.mxu0 %v14025_v17 }
 0x885   :  { %8874 = vmatpush1.bf16.msra.mxu0 %v14026_v2 }
 0x886   :  { %8875 = vmatprep.subr.bf16.mxu0 %v14027_v5 }
 0x889   :  { %8876 = vmatpush1.bf16.msra.mxu0 %v14028_v54 }
 0x88a   :  { %8877 = vmatprep.subr.bf16.mxu0 %v14029_v39 }
 0x88d   :  { %8878 = vmatpush1.bf16.msra.mxu0 %v14030_v42 }
 0x88e   :  { %8879 = vmatprep.subr.bf16.mxu0 %v14031_v48 }
 0x891   :  { %8880 = vmatpush1.bf16.msra.mxu0 %v14032_v28 }
 0x892   :  { %8881 = vmatprep.subr.bf16.mxu0 %v14033_v27 }
 0x895   :  { %8882 = vmatpush1.bf16.msra.mxu0 %v14034_v8 }
 0x896   :  { %8883 = vmatprep.subr.bf16.mxu0 %v14035_v24  ;;  %v13761_v24 = vld [vmem:[#allocation10 + $0x160] ss:$8 sps:$4 sm:$0xff]  }
 0x899   :  { %8884 = vmatpush1.bf16.msra.mxu0 %v14036_v33 }
 0x89a   :  { %8885 = vmatprep.subr.bf16.mxu0 %v14037_v43 }
 0x89d   :  { %8886 = vmatpush1.bf16.msra.mxu0 %v14038_v56 }
 0x89e   :  { %8887 = vmatprep.subr.bf16.mxu0 %v14039_v9  ;;  %v13766_v9 = vld [vmem:[#allocation10 + $0x174] ss:$8 sps:$4 sm:$0xff]  }
 0x8a1   :  { %8888 = vmatpush1.bf16.msra.mxu0 %v14040_v58 }
 0x8a2   :  { %8889 = vmatprep.subr.bf16.mxu0 %v14041_v51 }
 0x8a5   :  { %8890 = vmatpush1.bf16.msra.mxu0 %v14042_v22 }
 0x8a6   :  { %8891 = vmatprep.subr.bf16.mxu0 %v14043_v15 }
 0x8a9   :  { %8892 = vmatpush1.bf16.msra.mxu0 %v14044_v41 }
 0x8aa   :  { %8893 = vmatprep.subr.bf16.mxu0 %v14045_v63  ;;  %v13764_v63 = vld [vmem:[#allocation10 + $0x170] ss:$8 sps:$4 sm:$0xff]  }
 0x8ad   :  { %8894 = vmatpush1.bf16.msra.mxu0 %v14046_v14 }
 0x8ae   :  { %8895 = vmatprep.subr.bf16.mxu0 %v14047_v45 }
 0x8b1   :  { %8896 = vmatpush1.bf16.msra.mxu0 %v14048_v26  ;;  %v13769_v26 = vld [vmem:[#allocation10 + $0x184] ss:$8 sps:$4 sm:$0xff]  }
 0x8b2   :  { %10161 = vmatprep.subr.bf16.mxu0 %v13745_v60 }
 0x8b4   :  { %8898 = vmatmul.mubr.bf16.vlgmr.msra.gmra.mrb[84].mxu0 %v15890_v53 }
 0x8b5   :  { %8907 = vmatprep.mubr.bf16.mxu0 %v15898_v29  ;;  %10162 = vmatpush1.bf16.msra.mxu0 %v13743_v61 }
 0x8b6   :  { %10163 = vmatprep.subr.bf16.mxu0 %v13748_v32  ;;  %v13767_v32 = vld [vmem:[#allocation10 + $0x180] ss:$8 sps:$4 sm:$0xff]  }
 0x8b9   :  { %10164 = vmatpush1.bf16.msra.mxu0 %v13746_v36 }
 0x8ba   :  { %10165 = vmatprep.subr.bf16.mxu0 %v13751_v35 }
 0x8bc   :  { %8908 = vmatmul.mubr.bf16.gmra.mrb[88].mxu0 %v15904_v59  ;;  %v9729_v44 = vpop.f32.mrb[96].mxu1 }
 0x8bd   :  { %v9731_v52 = vpop.f32.mrb[97].mxu1  ;;  %10166 = vmatpush1.bf16.msra.mxu0 %v13749_v1  ;;  %v9870_v47 = vadd.f32 %v9729_v44, %v17671_v62 }
 0x8be   :  { %v9733_v49 = vpop.f32.mrb[98].mxu1  ;;  %10167 = vmatprep.subr.bf16.mxu0 %v13754_v7  ;;  %v9871_v37 = vadd.f32 %v9731_v52, %v17675_v23  ;;  %v13773_v7 = vld [vmem:[#allocation10 + $0x1a0] ss:$8 sps:$4 sm:$0xff]  }
 0x8bf   :  { %v9735_v18 = vpop.f32.mrb[99].mxu1  ;;  %v9874_v11 = vadd.f32 %v9733_v49, %v17671_v62  ;;  %v9886_v17 = vmax.f32 %v9870_v47, 0.0  ;;  %v13782_v47 = vld [vmem:[#allocation10 + $0x1d0] ss:$8 sps:$4 sm:$0xff]  }
 0x8c0   :  { %v9875_v46 = vadd.f32 %v9735_v18, %v17675_v23  ;;  %v9887_v39 = vmax.f32 %v9871_v37, 0.0  ;;  %v13787_v37 = vld [vmem:[#allocation10 + $0x1e4] ss:$8 sps:$4 sm:$0xff]  }
 0x8c1   :  { %10168 = vmatpush1.bf16.msra.mxu0 %v13752_v38  ;;  %v9890_v28 = vmax.f32 %v9874_v11, 0.0  ;;  %v13778_v38 = vld [vmem:[#allocation10 + $0x1b4] ss:$8 sps:$4 sm:$0xff]  }
 0x8c2   :  { %10169 = vmatprep.subr.bf16.mxu0 %v13757_v31  ;;  %v9891_v33 = vmax.f32 %v9875_v46, 0.0  ;;  %v13776_v31 = vld [vmem:[#allocation10 + $0x1b0] ss:$8 sps:$4 sm:$0xff]   ;;  %v13790_v11 = vld [vmem:[#allocation10 + $0x1f4] ss:$8 sps:$4 sm:$0xff]  }
 0x8c4   :  { %v9739_v34 = vpop.f32.mrb[100].mxu1 }
 0x8c5   :  { %v17678_v53 = vadd.f32 %v9739_v34, %v17671_v62  ;;  %v9741_v29 = vpop.f32.mrb[101].mxu1  ;;  %10170 = vmatpush1.bf16.msra.mxu0 %v13755_v4  ;;  %v13779_v4 = vld [vmem:[#allocation10 + $0x1c0] ss:$8 sps:$4 sm:$0xff]  }
 0x8c6   :  { %v17681_v59 = vadd.f32 %v9741_v29, %v17675_v23  ;;  %v9743_v3 = vpop.f32.mrb[102].mxu1  ;;  %10171 = vmatprep.subr.bf16.mxu0 %v13760_v16  ;;  %v13784_v16 = vld [vmem:[#allocation10 + $0x1d4] ss:$8 sps:$4 sm:$0xff]  }
 0x8c7   :  { %v17684_v40 = vadd.f32 %v9743_v3, %v17671_v62  ;;  %v9745_v21 = vpop.f32.mrb[103].mxu1  ;;  %v9894_v44 = vmax.f32 %v17678_v53, 0.0 }
 0x8c8   :  { %v17687_v13 = vadd.f32 %v9745_v21, %v17675_v23  ;;  %v9895_v34 = vmax.f32 %v17681_v59, 0.0 }
 0x8c9   :  { %10172 = vmatpush1.bf16.msra.mxu0 %v13758_v57  ;;  %v9898_v21 = vmax.f32 %v17684_v40, 0.0  ;;  %v13775_v40 = vld [vmem:[#allocation10 + $0x1a4] ss:$8 sps:$4 sm:$0xff]  }
 0x8ca   :  { %10173 = vmatprep.subr.bf16.mxu0 %v13763_v12  ;;  %v9899_v36 = vmax.f32 %v17687_v13, 0.0  ;;  %v13781_v13 = vld [vmem:[#allocation10 + $0x1c4] ss:$8 sps:$4 sm:$0xff]  }
 0x8cd   :  { %10174 = vmatpush1.bf16.msra.mxu0 %v13761_v24 }
 0x8ce   :  { %10175 = vmatprep.subr.bf16.mxu0 %v13766_v9 }
 0x8d1   :  { %10176 = vmatpush1.bf16.msra.mxu0 %v13764_v63 }
 0x8d2   :  { %10177 = vmatprep.subr.bf16.mxu0 %v13769_v26 }
 0x8d5   :  { %10178 = vmatpush1.bf16.msra.mxu0 %v13767_v32 }
 0x8e7   :  { %v8564_v0 = vpop.f32.mrb[68].mxu0 }
 0x8e8   :  { %v8727_v30 = vadd.f32 %v17671_v62, %v8564_v0  ;;  %v8566_v50 = vpop.f32.mrb[69].mxu0  ;;  %v13785_v0 = vld [vmem:[#allocation10 + $0x1e0] ss:$8 sps:$4 sm:$0xff]  }
 0x8e9   :  { %v8728_v20 = vadd.f32 %v17675_v23, %v8566_v50  ;;  %v8568_v25 = vpop.f32.mrb[70].mxu0  ;;  %v13793_v50 = vld [vmem:[#allocation10 + $0x4] ss:$8 sps:$4 sm:$0xff]  }
 0x8ea   :  { %v8743_v2 = vmax.f32 %v8727_v30, 0.0  ;;  %v8731_v5 = vadd.f32 %v17671_v62, %v8568_v25  ;;  %v8570_v54 = vpop.f32.mrb[71].mxu0  ;;  %v13788_v30 = vld [vmem:[#allocation10 + $0x1f0] ss:$8 sps:$4 sm:$0xff]  }
 0x8eb   :  { %v8744_v42 = vmax.f32 %v8728_v20, 0.0  ;;  %v8732_v48 = vadd.f32 %v17675_v23, %v8570_v54 }
 0x8ec   :  { %v17697_v27 = vmax.f32 %v8743_v2, %v9886_v17  ;;  %v8747_v8 = vmax.f32 %v8731_v5, 0.0 }
 0x8ed   :  { %v17699_v43 = vmax.f32 %v8744_v42, %v9887_v39  ;;  %v8748_v56 = vmax.f32 %v8732_v48, 0.0 }
 0x8ee   :  { %v17701_v58 = vmax.f32 %v8747_v8, %v9890_v28 }
 0x8ef   :  { %v17703_v51 = vmax.f32 %v8748_v56, %v9891_v33  ;;  %v8574_v22 = vpop.f32.mrb[72].mxu0  ;;  %v17835_v56 = vsub.s32 2, %v15470_v19 }
 0x8f0   :  { %v8735_v15 = vadd.f32 %v17671_v62, %v8574_v22  ;;  %v8576_v41 = vpop.f32.mrb[73].mxu0  ;;  %v17836_v22 = vsub.s32 3, %v15470_v19 }
 0x8f1   :  { %v8736_v14 = vadd.f32 %v17675_v23, %v8576_v41  ;;  %v8578_v45 = vpop.f32.mrb[74].mxu0  ;;  %v8718_v9 = vrot.slane %v17667_v6, %v17835_v56 }
 0x8f2   :  { %v8751_v52 = vmax.f32 %v8735_v15, 0.0  ;;  %v8739_v49 = vadd.f32 %v17671_v62, %v8578_v45  ;;  %v8580_v18 = vpop.f32.mrb[75].mxu0  ;;  %v13772_v62 = vld [vmem:[#allocation10 + $0x194] ss:$8 sps:$4 sm:$0xff]   ;;  %v8722_v15 = vrot.slane %v17667_v6, %v17836_v22 }
 0x8f3   :  { %v8752_v29 = vmax.f32 %v8736_v14, 0.0  ;;  %v8740_v3 = vadd.f32 %v17675_v23, %v8580_v18  ;;  %v13770_v23 = vld [vmem:[#allocation10 + $0x190] ss:$8 sps:$4 sm:$0xff]   ;;  %10179 = vmatprep.subr.bf16.mxu0 %v13772_v62 }
 0x8f4   :  { %v17712_v61 = vmax.f32 %v8751_v52, %v9894_v44  ;;  %v8755_v60 = vmax.f32 %v8739_v49, 0.0  ;;  %10180 = vmatpush1.bf16.msra.mxu0 %v13770_v23 }
 0x8f5   :  { %v17715_v35 = vmax.f32 %v8752_v29, %v9895_v34  ;;  %v8756_v53 = vmax.f32 %v8740_v3, 0.0  ;;  %10181 = vmatprep.subr.bf16.mxu0 %v13775_v40 }
 0x8f6   :  { %v17717_v1 = vmax.f32 %v8755_v60, %v9898_v21 }
 0x8f7   :  { %v17719_v59 = vmax.f32 %v8756_v53, %v9899_v36 }
 0x8f8   :  { %10182 = vmatpush1.bf16.msra.mxu0 %v13773_v7 }
 0x8f9   :  { %10183 = vmatprep.subr.bf16.mxu0 %v13778_v38 }
 0x8fc   :  { %10184 = vmatpush1.bf16.msra.mxu0 %v13776_v31 }
 0x8fd   :  { %10185 = vmatprep.subr.bf16.mxu0 %v13781_v13 }
 0x900   :  { %10186 = vmatpush1.bf16.msra.mxu0 %v13779_v4 }
 0x901   :  { %10187 = vmatprep.subr.bf16.mxu0 %v13784_v16 }
 0x904   :  { %10188 = vmatpush1.bf16.msra.mxu0 %v13782_v47 }
 0x905   :  { %10189 = vmatprep.subr.bf16.mxu0 %v13787_v37 }
 0x908   :  { %10190 = vmatpush1.bf16.msra.mxu0 %v13785_v0 }
 0x909   :  { %10191 = vmatprep.subr.bf16.mxu0 %v13790_v11 }
 0x90c   :  { %10192 = vmatpush1.bf16.msra.mxu0 %v13788_v30 }
 0x90d   :  { %10362 = vmatprep.subr.bf16.mxu0 %v13793_v50 }
 0x91c   :  { %v9835_v57 = vpop.f32.mrb[104].mxu1 }
 0x91d   :  { %v9837_v46 = vpop.f32.mrb[105].mxu1 }
 0x91e   :  { %v9839_v20 = vpop.f32.mrb[106].mxu1 }
 0x91f   :  { %v9841_v25 = vpop.f32.mrb[107].mxu1 }
 0x924   :  { %v9845_v12 = vpop.f32.mrb[108].mxu1 }
 0x925   :  { %v9847_v17 = vpop.f32.mrb[109].mxu1 }
 0x926   :  { %v9849_v2 = vpop.f32.mrb[110].mxu1 }
 0x927   :  { %v9851_v5 = vpop.f32.mrb[111].mxu1 }
 0x947   :  { %v8670_v54 = vpop.f32.mrb[76].mxu0 }
 0x948   :  { %v8672_v39 = vpop.f32.mrb[77].mxu0  ;;  %v8729_v63 = vadd.f32 %v8718_v9, %v8670_v54 }
 0x949   :  { %v8674_v42 = vpop.f32.mrb[78].mxu0  ;;  %v8730_v26 = vadd.f32 %v8722_v15, %v8672_v39 }
 0x94a   :  { %v8676_v48 = vpop.f32.mrb[79].mxu0  ;;  %v8733_v49 = vadd.f32 %v8718_v9, %v8674_v42  ;;  %v8745_v32 = vmax.f32 %v8729_v63, 0.0 }
 0x94b   :  { %v8734_v3 = vadd.f32 %v8722_v15, %v8676_v48  ;;  %v8746_v19 = vmax.f32 %v8730_v26, 0.0 }
 0x94c   :  { %v8749_v23 = vmax.f32 %v8733_v49, 0.0  ;;  %v13791_v49 = vld [vmem:[#allocation10] ss:$8 sps:$4 sm:$0xff]  }
 0x94d   :  { %v8750_v38 = vmax.f32 %v8734_v3, 0.0  ;;  %v13794_v3 = vld [vmem:[#allocation10 + $0x10] ss:$8 sps:$4 sm:$0xff]  }
 0x94f   :  { %v8680_v28 = vpop.f32.mrb[80].mxu0 }
 0x950   :  { %v8682_v8 = vpop.f32.mrb[81].mxu0  ;;  %v8737_v16 = vadd.f32 %v8718_v9, %v8680_v28 }
 0x951   :  { %v8684_v24 = vpop.f32.mrb[82].mxu0  ;;  %v8738_v30 = vadd.f32 %v8722_v15, %v8682_v8 }
 0x952   :  { %v8686_v33 = vpop.f32.mrb[83].mxu0 }
 0x953   :  { %v8742_v56 = vadd.f32 %v8722_v15, %v8686_v33 }
 0x987   :  { %v8899_v41 = vpop.f32.mrb[84].mxu0 }
 0x988   :  { %v12038_v14 = vadd.f32 %v9835_v57, %v8899_v41  ;;  %v8901_v45 = vpop.f32.mrb[85].mxu0  ;;  %v8753_v41 = vmax.f32 %v8737_v16, 0.0  ;;  %v13823_v16 = vld [vmem:[#allocation10 + $0xa4] ss:$8 sps:$4 sm:$0xff]  }
 0x989   :  { %v12039_v44 = vadd.f32 %v9837_v46, %v8901_v45  ;;  %v8903_v52 = vpop.f32.mrb[86].mxu0 }
 0x98a   :  { %v9872_v18 = vadd.f32 %v12038_v14, %v8718_v9  ;;  %v12040_v34 = vadd.f32 %v9839_v20, %v8903_v52  ;;  %v8905_v29 = vpop.f32.mrb[87].mxu0 }
 0x98b   :  { %v9873_v21 = vadd.f32 %v12039_v44, %v8722_v15  ;;  %v12041_v60 = vadd.f32 %v9841_v25, %v8905_v29  ;;  %v8741_v25 = vadd.f32 %v8718_v9, %v8684_v24  ;;  %v8758_v44 = vmax.f32 %v8742_v56, 0.0  ;;  %v13842_v56 = vld [vmem:[#allocation10 + $0x210] ss:$8 sps:$4 sm:$0xff]  }
 0x98c   :  { %v9888_v36 = vmax.f32 %v9872_v18, 0.0  ;;  %v9876_v53 = vadd.f32 %v12040_v34, %v8718_v9  ;;  %v13796_v34 = vld [vmem:[#allocation10 + $0x14] ss:$8 sps:$4 sm:$0xff]  }
 0x98d   :  { %v9889_v62 = vmax.f32 %v9873_v21, 0.0  ;;  %v9877_v6 = vadd.f32 %v12041_v60, %v8722_v15  ;;  %v8757_v24 = vmax.f32 %v8741_v25, 0.0  ;;  %v13799_v60 = vld [vmem:[#allocation10 + $0x24] ss:$8 sps:$4 sm:$0xff]   ;;  %v13838_v25 = vld [vmem:[#allocation10 + $0xf4] ss:$8 sps:$4 sm:$0xff]  }
 0x98e   :  { %v9904_v40 = vmax.f32 %v8745_v32, %v9888_v36  ;;  %v9892_v7 = vmax.f32 %v9876_v53, 0.0  ;;  %v13802_v53 = vld [vmem:[#allocation10 + $0x34] ss:$8 sps:$4 sm:$0xff]  }
 0x98f   :  { %v9905_v31 = vmax.f32 %v8746_v19, %v9889_v62  ;;  %v9893_v13 = vmax.f32 %v9877_v6, 0.0  ;;  %v8909_v4 = vpop.f32.mrb[88].mxu0  ;;  %v13803_v19 = vld [vmem:[#allocation10 + $0x40] ss:$8 sps:$4 sm:$0xff]   ;;  %v13808_v62 = vld [vmem:[#allocation10 + $0x54] ss:$8 sps:$4 sm:$0xff]  }
 0x990   :  { %v9918_v47 = vmax.f32 %v17697_v27, %v9904_v40  ;;  %v9908_v37 = vmax.f32 %v8749_v23, %v9892_v7  ;;  %v12042_v0 = vadd.f32 %v9845_v12, %v8909_v4  ;;  %v8911_v11 = vpop.f32.mrb[89].mxu0  ;;  %v13811_v6 = vld [vmem:[#allocation10 + $0x64] ss:$8 sps:$4 sm:$0xff]   ;;  %v13809_v23 = vld [vmem:[#allocation10 + $0x60] ss:$8 sps:$4 sm:$0xff]  }
 0x991   :  { %v9919_v50 = vmax.f32 %v17699_v43, %v9905_v31  ;;  %v9909_v57 = vmax.f32 %v8750_v38, %v9893_v13  ;;  %v12043_v46 = vadd.f32 %v9847_v17, %v8911_v11  ;;  %v8913_v20 = vpop.f32.mrb[90].mxu0  ;;  %v8754_v43 = vmax.f32 %v8738_v30, 0.0  ;;  %v13814_v40 = vld [vmem:[#allocation10 + $0x74] ss:$8 sps:$4 sm:$0xff]   ;;  %v13812_v7 = vld [vmem:[#allocation10 + $0x70] ss:$8 sps:$4 sm:$0xff]  }
 0x992   :  { %v9920_v54 = vmax.f32 %v17701_v58, %v9908_v37  ;;  %v9880_v39 = vadd.f32 %v12042_v0, %v8718_v9  ;;  %v12044_v42 = vadd.f32 %v9849_v2, %v8913_v20  ;;  %v8915_v48 = vpop.f32.mrb[91].mxu0  ;;  %v13817_v38 = vld [vmem:[#allocation10 + $0x84] ss:$8 sps:$4 sm:$0xff]   ;;  %v13815_v31 = vld [vmem:[#allocation10 + $0x80] ss:$8 sps:$4 sm:$0xff]  }
 0x993   :  { %v9921_v28 = vmax.f32 %v17703_v51, %v9909_v57  ;;  %v9881_v22 = vadd.f32 %v12043_v46, %v8722_v15  ;;  %v12045_v27 = vadd.f32 %v9851_v5, %v8915_v48  ;;  %v13820_v13 = vld [vmem:[#allocation10 + $0x94] ss:$8 sps:$4 sm:$0xff]   ;;  %v13818_v4 = vld [vmem:[#allocation10 + $0x90] ss:$8 sps:$4 sm:$0xff]   ;;  %v13829_v11 = vld [vmem:[#allocation10 + $0xc4] ss:$8 sps:$4 sm:$0xff]  }
 0x994   :  { %v17731_v12 = vpack.c.bf16 %v9920_v54, %v9918_v47  ;;  %v9896_v8 = vmax.f32 %v9880_v39, 0.0  ;;  %v9884_v63 = vadd.f32 %v12044_v42, %v8718_v9  ;;  %v13821_v47 = vld [vmem:[#allocation10 + $0xa0] ss:$8 sps:$4 sm:$0xff]   ;;  %v13826_v37 = vld [vmem:[#allocation10 + $0xb4] ss:$8 sps:$4 sm:$0xff]  }
 0x995   :  { %v9897_v14 = vmax.f32 %v9881_v22, 0.0  ;;  %v9885_v17 = vadd.f32 %v12045_v27, %v8722_v15  ;;  %v9927_v45 = vpack.c.bf16 %v9921_v28, %v9919_v50  ;;  %v13824_v0 = vld [vmem:[#allocation10 + $0xb0] ss:$8 sps:$4 sm:$0xff]   ;;  %v13827_v30 = vld [vmem:[#allocation10 + $0xc0] ss:$8 sps:$4 sm:$0xff]  }
 0x996   :  { %v9912_v26 = vmax.f32 %v8753_v41, %v9896_v8  ;;  %v9900_v58 = vmax.f32 %v9884_v63, 0.0  ;;  %v9997_v51 = vrot.slane %v17731_v12, 4  ;;  %v13832_v50 = vld [vmem:[#allocation10 + $0xd4] ss:$8 sps:$4 sm:$0xff]   ;;  %v13830_v57 = vld [vmem:[#allocation10 + $0xd0] ss:$8 sps:$4 sm:$0xff]  }
 0x997   :  { %v9913_v2 = vmax.f32 %v8754_v43, %v9897_v14  ;;  %v9901_v52 = vmax.f32 %v9885_v17, 0.0  ;;  %v9998_v33 = vrot.slane %v9927_v45, 4  ;;  %v13835_v46 = vld [vmem:[#allocation10 + $0xe4] ss:$8 sps:$4 sm:$0xff]   ;;  %v13833_v20 = vld [vmem:[#allocation10 + $0xe0] ss:$8 sps:$4 sm:$0xff]  }
 0x998   :  { %v9922_v5 = vmax.f32 %v17712_v61, %v9912_v26  ;;  %v9916_v18 = vmax.f32 %v8757_v24, %v9900_v58  ;;  %v13797_v61 = vld [vmem:[#allocation10 + $0x20] ss:$8 sps:$4 sm:$0xff]   ;;  %v13836_v54 = vld [vmem:[#allocation10 + $0xf0] ss:$8 sps:$4 sm:$0xff]   ;;  %v13841_v39 = vld [vmem:[#allocation10 + $0x204] ss:$8 sps:$4 sm:$0xff]  }
 0x999   :  { %v9917_v29 = vmax.f32 %v8758_v44, %v9901_v52  ;;  %10193 = vmatprep.mubr.bf16.mxu0 %v9998_v33  ;;  %v9923_v9 = vmax.f32 %v17715_v35, %v9913_v2  ;;  %v13800_v35 = vld [vmem:[#allocation10 + $0x30] ss:$8 sps:$4 sm:$0xff]   ;;  %v13839_v42 = vld [vmem:[#allocation10 + $0x200] ss:$8 sps:$4 sm:$0xff]   ;;  %v13844_v48 = vld [vmem:[#allocation10 + $0x214] ss:$8 sps:$4 sm:$0xff]  }
 0x99a   :  { %v9924_v15 = vmax.f32 %v17717_v1, %v9916_v18  ;;  %10194 = vmatmul.mubr.bf16.vlgmr.msra.gmra.mrb[92].mxu0 %v9997_v51  ;;  %v13805_v1 = vld [vmem:[#allocation10 + $0x44] ss:$8 sps:$4 sm:$0xff]   ;;  %v13845_v22 = vld [vmem:[#allocation10 + $0x220] ss:$8 sps:$4 sm:$0xff]   ;;  %v13850_v27 = vld [vmem:[#allocation10 + $0x234] ss:$8 sps:$4 sm:$0xff]  }
 0x99b   :  { %10363 = vmatpush1.bf16.msra.mxu0 %v13791_v49  ;;  %10394 = vmatprep.mubr.bf16.mxu0 %v9927_v45  ;;  %v9925_v21 = vmax.f32 %v17719_v59, %v9917_v29  ;;  %v13806_v59 = vld [vmem:[#allocation10 + $0x50] ss:$8 sps:$4 sm:$0xff]   ;;  %v13847_v28 = vld [vmem:[#allocation10 + $0x224] ss:$8 sps:$4 sm:$0xff]   ;;  %v13851_v63 = vld [vmem:[#allocation10 + $0x240] ss:$8 sps:$4 sm:$0xff]  }
 0x99c   :  { %10364 = vmatprep.subr.bf16.mxu0 %v13796_v34  ;;  %v17738_v32 = vpack.c.bf16 %v9924_v15, %v9922_v5  ;;  %v13848_v41 = vld [vmem:[#allocation10 + $0x230] ss:$8 sps:$4 sm:$0xff]   ;;  %v13853_v8 = vld [vmem:[#allocation10 + $0x244] ss:$8 sps:$4 sm:$0xff]   ;;  %v13856_v43 = vld [vmem:[#allocation10 + $0x254] ss:$8 sps:$4 sm:$0xff]  }
 0x99d   :  { %v17740_v36 = vpack.c.bf16 %v9925_v21, %v9923_v9  ;;  %v13859_v14 = vld [vmem:[#allocation10 + $0x264] ss:$8 sps:$4 sm:$0xff]   ;;  %v13857_v17 = vld [vmem:[#allocation10 + $0x260] ss:$8 sps:$4 sm:$0xff]   ;;  %v13862_v45 = vld [vmem:[#allocation10 + $0x274] ss:$8 sps:$4 sm:$0xff]  }
 0x99e   :  { %v13860_v24 = vld [vmem:[#allocation10 + $0x270] ss:$8 sps:$4 sm:$0xff]   ;;  %v13865_v26 = vld [vmem:[#allocation10 + $0x284] ss:$8 sps:$4 sm:$0xff]   ;;  %v13863_v58 = vld [vmem:[#allocation10 + $0x280] ss:$8 sps:$4 sm:$0xff]  }
 0x99f   :  { %10365 = vmatpush1.bf16.msra.mxu0 %v13794_v3  ;;  %v13868_v44 = vld [vmem:[#allocation10 + $0x294] ss:$8 sps:$4 sm:$0xff]   ;;  %v13866_v2 = vld [vmem:[#allocation10 + $0x290] ss:$8 sps:$4 sm:$0xff]   ;;  %v13871_v52 = vld [vmem:[#allocation10 + $0x2a4] ss:$8 sps:$4 sm:$0xff]  }
 0x9a0   :  { %10366 = vmatprep.subr.bf16.mxu0 %v13799_v60  ;;  %v13869_v33 = vld [vmem:[#allocation10 + $0x2a0] ss:$8 sps:$4 sm:$0xff]   ;;  %v13874_v49 = vld [vmem:[#allocation10 + $0x2b4] ss:$8 sps:$4 sm:$0xff]   ;;  %v13872_v51 = vld [vmem:[#allocation10 + $0x2b0] ss:$8 sps:$4 sm:$0xff]  }
 0x9a1   :  { %v13877_v5 = vld [vmem:[#allocation10 + $0x2c4] ss:$8 sps:$4 sm:$0xff]   ;;  %v13875_v18 = vld [vmem:[#allocation10 + $0x2c0] ss:$8 sps:$4 sm:$0xff]   ;;  %v13880_v34 = vld [vmem:[#allocation10 + $0x2d4] ss:$8 sps:$4 sm:$0xff]  }
 0x9a2   :  { %v13878_v29 = vld [vmem:[#allocation10 + $0x2d0] ss:$8 sps:$4 sm:$0xff]   ;;  %v13883_v9 = vld [vmem:[#allocation10 + $0x2e4] ss:$8 sps:$4 sm:$0xff]   ;;  %v13881_v15 = vld [vmem:[#allocation10 + $0x2e0] ss:$8 sps:$4 sm:$0xff]  }
 0x9a3   :  { %10367 = vmatpush1.bf16.msra.mxu0 %v13797_v61  ;;  %v13886_v3 = vld [vmem:[#allocation10 + $0x2f4] ss:$8 sps:$4 sm:$0xff]   ;;  %v13884_v21 = vld [vmem:[#allocation10 + $0x2f0] ss:$8 sps:$4 sm:$0xff]   ;;  %v13889_v60 = vld [vmem:[#allocation10 + $0x304] ss:$8 sps:$4 sm:$0xff]  }
 0x9a4   :  { %10368 = vmatprep.subr.bf16.mxu0 %v13802_v53  ;;  %v13887_v61 = vld [vmem:[#allocation10 + $0x300] ss:$8 sps:$4 sm:$0xff]   ;;  %v13892_v53 = vld [vmem:[#allocation10 + $0x314] ss:$8 sps:$4 sm:$0xff]  }
 0x9a7   :  { %10369 = vmatpush1.bf16.msra.mxu0 %v13800_v35  ;;  %v10675_v35 = vrot.slane %v17740_v36, 4 }
 0x9a8   :  { %10370 = vmatprep.subr.bf16.mxu0 %v13805_v1  ;;  %v13890_v1 = vld [vmem:[#allocation10 + $0x310] ss:$8 sps:$4 sm:$0xff]  }
 0x9ab   :  { %10371 = vmatpush1.bf16.msra.mxu0 %v13803_v19  ;;  %v13895_v19 = vld [vmem:[#allocation10 + $0x324] ss:$8 sps:$4 sm:$0xff]  }
 0x9ac   :  { %10372 = vmatprep.subr.bf16.mxu0 %v13808_v62  ;;  %v13893_v62 = vld [vmem:[#allocation10 + $0x320] ss:$8 sps:$4 sm:$0xff]  }
 0x9af   :  { %10373 = vmatpush1.bf16.msra.mxu0 %v13806_v59  ;;  %v13898_v59 = vld [vmem:[#allocation10 + $0x334] ss:$8 sps:$4 sm:$0xff]  }
 0x9b0   :  { %10374 = vmatprep.subr.bf16.mxu0 %v13811_v6  ;;  %v13896_v6 = vld [vmem:[#allocation10 + $0x330] ss:$8 sps:$4 sm:$0xff]  }
 0x9b3   :  { %10375 = vmatpush1.bf16.msra.mxu0 %v13809_v23  ;;  %v13901_v23 = vld [vmem:[#allocation10 + $0x344] ss:$8 sps:$4 sm:$0xff]  }
 0x9b4   :  { %10376 = vmatprep.subr.bf16.mxu0 %v13814_v40  ;;  %v13899_v40 = vld [vmem:[#allocation10 + $0x340] ss:$8 sps:$4 sm:$0xff]  }
 0x9b7   :  { %10377 = vmatpush1.bf16.msra.mxu0 %v13812_v7  ;;  %v13904_v7 = vld [vmem:[#allocation10 + $0x354] ss:$8 sps:$4 sm:$0xff]  }
 0x9b8   :  { %10378 = vmatprep.subr.bf16.mxu0 %v13817_v38  ;;  %v13907_v38 = vld [vmem:[#allocation10 + $0x364] ss:$8 sps:$4 sm:$0xff]  }
 0x9bb   :  { %10379 = vmatpush1.bf16.msra.mxu0 %v13815_v31  ;;  %v13905_v31 = vld [vmem:[#allocation10 + $0x360] ss:$8 sps:$4 sm:$0xff]  }
 0x9bc   :  { %10380 = vmatprep.subr.bf16.mxu0 %v13820_v13  ;;  %v13910_v13 = vld [vmem:[#allocation10 + $0x374] ss:$8 sps:$4 sm:$0xff]  }
 0x9bf   :  { %10381 = vmatpush1.bf16.msra.mxu0 %v13818_v4  ;;  %v13908_v4 = vld [vmem:[#allocation10 + $0x370] ss:$8 sps:$4 sm:$0xff]  }
 0x9c0   :  { %10382 = vmatprep.subr.bf16.mxu0 %v13823_v16  ;;  %v13913_v16 = vld [vmem:[#allocation10 + $0x384] ss:$8 sps:$4 sm:$0xff]  }
 0x9c3   :  { %10383 = vmatpush1.bf16.msra.mxu0 %v13821_v47  ;;  %v13911_v47 = vld [vmem:[#allocation10 + $0x380] ss:$8 sps:$4 sm:$0xff]  }
 0x9c4   :  { %10384 = vmatprep.subr.bf16.mxu0 %v13826_v37  ;;  %v13916_v37 = vld [vmem:[#allocation10 + $0x394] ss:$8 sps:$4 sm:$0xff]  }
 0x9c7   :  { %10385 = vmatpush1.bf16.msra.mxu0 %v13824_v0  ;;  %v13914_v0 = vld [vmem:[#allocation10 + $0x390] ss:$8 sps:$4 sm:$0xff]  }
 0x9c8   :  { %10386 = vmatprep.subr.bf16.mxu0 %v13829_v11  ;;  %v13919_v11 = vld [vmem:[#allocation10 + $0x3a4] ss:$8 sps:$4 sm:$0xff]  }
 0x9cb   :  { %10387 = vmatpush1.bf16.msra.mxu0 %v13827_v30  ;;  %v13917_v30 = vld [vmem:[#allocation10 + $0x3a0] ss:$8 sps:$4 sm:$0xff]  }
 0x9cc   :  { %10388 = vmatprep.subr.bf16.mxu0 %v13832_v50  ;;  %v13922_v50 = vld [vmem:[#allocation10 + $0x3b4] ss:$8 sps:$4 sm:$0xff]  }
 0x9cf   :  { %10389 = vmatpush1.bf16.msra.mxu0 %v13830_v57  ;;  %v13920_v57 = vld [vmem:[#allocation10 + $0x3b0] ss:$8 sps:$4 sm:$0xff]  }
 0x9d0   :  { %10390 = vmatprep.subr.bf16.mxu0 %v13835_v46  ;;  %v13925_v46 = vld [vmem:[#allocation10 + $0x3c4] ss:$8 sps:$4 sm:$0xff]  }
 0x9d3   :  { %10391 = vmatpush1.bf16.msra.mxu0 %v13833_v20  ;;  %v13923_v20 = vld [vmem:[#allocation10 + $0x3c0] ss:$8 sps:$4 sm:$0xff]  }
 0x9d4   :  { %10392 = vmatprep.subr.bf16.mxu0 %v13838_v25  ;;  %v13928_v25 = vld [vmem:[#allocation10 + $0x3d4] ss:$8 sps:$4 sm:$0xff]  }
 0x9d7   :  { %10393 = vmatpush1.bf16.msra.mxu0 %v13836_v54  ;;  %v13926_v54 = vld [vmem:[#allocation10 + $0x3d0] ss:$8 sps:$4 sm:$0xff]  }
 0x9d8   :  { %10596 = vmatprep.subr.bf16.mxu0 %v13841_v39  ;;  %v13931_v39 = vld [vmem:[#allocation10 + $0x3e4] ss:$8 sps:$4 sm:$0xff]  }
 0x9da   :  { %10395 = vmatmul.mubr.bf16.vlgmr.msra.gmra.mrb[96].mxu0 %v17731_v12  ;;  %v13854_v12 = vld [vmem:[#allocation10 + $0x250] ss:$8 sps:$4 sm:$0xff]  }
 0x9db   :  { %10597 = vmatpush1.bf16.msra.mxu0 %v13839_v42  ;;  %10628 = vmatprep.mubr.bf16.mxu0 %v17740_v36  ;;  %v13902_v36 = vld [vmem:[#allocation10 + $0x350] ss:$8 sps:$4 sm:$0xff]   ;;  %v13929_v42 = vld [vmem:[#allocation10 + $0x3e0] ss:$8 sps:$4 sm:$0xff]  }
 0x9dc   :  { %10598 = vmatprep.subr.bf16.mxu0 %v13844_v48  ;;  %v13934_v48 = vld [vmem:[#allocation10 + $0x3f4] ss:$8 sps:$4 sm:$0xff]  }
 0x9df   :  { %10599 = vmatpush1.bf16.msra.mxu0 %v13842_v56  ;;  %v13932_v56 = vld [vmem:[#allocation10 + $0x3f0] ss:$8 sps:$4 sm:$0xff]  }
 0x9e0   :  { %10600 = vmatprep.subr.bf16.mxu0 %v13847_v28  ;;  %v10674_v28 = vrot.slane %v17738_v32, 4 }
 0x9e3   :  { %10601 = vmatpush1.bf16.msra.mxu0 %v13845_v22 }
 0x9e4   :  { %10602 = vmatprep.subr.bf16.mxu0 %v13850_v27 }
 0x9e7   :  { %10603 = vmatpush1.bf16.msra.mxu0 %v13848_v41 }
 0x9e8   :  { %10604 = vmatprep.subr.bf16.mxu0 %v13853_v8 }
 0x9eb   :  { %10605 = vmatpush1.bf16.msra.mxu0 %v13851_v63  ;;  %v10913_v63 = vld [vmem:[#allocation13 + $0x80] sm:$0xff] }
 0x9ec   :  { %10606 = vmatprep.subr.bf16.mxu0 %v13856_v43  ;;  %v10914_v43 = vld [vmem:[#allocation13 + $0x88] sm:$0xff] }
 0x9ef   :  { %10607 = vmatpush1.bf16.msra.mxu0 %v13854_v12  ;;  %v10897_v12 = vld [vmem:[#allocation13] sm:$0xff] }
 0x9f0   :  { %10608 = vmatprep.subr.bf16.mxu0 %v13859_v14  ;;  %v11982_v14 = vpack.c.bf16 %v10914_v43, %v10913_v63 }
 0x9f3   :  { %10609 = vmatpush1.bf16.msra.mxu0 %v13857_v17  ;;  %v10898_v17 = vld [vmem:[#allocation13 + $0x8] sm:$0xff] }
 0x9f4   :  { %10610 = vmatprep.subr.bf16.mxu0 %v13862_v45  ;;  %v10915_v45 = vld [vmem:[#allocation13 + $0x90] sm:$0xff] }
 0x9f7   :  { %10611 = vmatpush1.bf16.msra.mxu0 %v13860_v24  ;;  %v10916_v24 = vld [vmem:[#allocation13 + $0x98] sm:$0xff] }
 0x9f8   :  { %10612 = vmatprep.subr.bf16.mxu0 %v13865_v26  ;;  %v11984_v26 = vpack.c.bf16 %v10898_v17, %v10897_v12 }
 0x9fb   :  { %10613 = vmatpush1.bf16.msra.mxu0 %v13863_v58  ;;  %v11986_v58 = vpack.c.bf16 %v10916_v24, %v10915_v45 }
 0x9fc   :  { %10614 = vmatprep.subr.bf16.mxu0 %v13868_v44  ;;  %v10899_v44 = vld [vmem:[#allocation13 + $0x10] sm:$0xff] }
 0x9ff   :  { %10615 = vmatpush1.bf16.msra.mxu0 %v13866_v2  ;;  %v10900_v2 = vld [vmem:[#allocation13 + $0x18] sm:$0xff] }
 0xa00   :  { %10616 = vmatprep.subr.bf16.mxu0 %v13871_v52  ;;  %v10917_v52 = vld [vmem:[#allocation13 + $0xa0] sm:$0xff] }
 0xa03   :  { %10617 = vmatpush1.bf16.msra.mxu0 %v13869_v33  ;;  %v10918_v33 = vld [vmem:[#allocation13 + $0xa8] sm:$0xff] }
 0xa04   :  { %10618 = vmatprep.subr.bf16.mxu0 %v13874_v49  ;;  %v11990_v49 = vpack.c.bf16 %v10918_v33, %v10917_v52 }
 0xa07   :  { %10619 = vmatpush1.bf16.msra.mxu0 %v13872_v51  ;;  %v10901_v51 = vld [vmem:[#allocation13 + $0x20] sm:$0xff] }
 0xa08   :  { %10620 = vmatprep.subr.bf16.mxu0 %v13877_v5  ;;  %v10902_v5 = vld [vmem:[#allocation13 + $0x28] sm:$0xff] }
 0xa0b   :  { %10621 = vmatpush1.bf16.msra.mxu0 %v13875_v18  ;;  %v10919_v18 = vld [vmem:[#allocation13 + $0xb0] sm:$0xff] }
 0xa0c   :  { %10622 = vmatprep.subr.bf16.mxu0 %v13880_v34  ;;  %v10920_v34 = vld [vmem:[#allocation13 + $0xb8] sm:$0xff] }
 0xa0f   :  { %10623 = vmatpush1.bf16.msra.mxu0 %v13878_v29  ;;  %v11992_v29 = vpack.c.bf16 %v10902_v5, %v10901_v51 }
 0xa10   :  { %10624 = vmatprep.subr.bf16.mxu0 %v13883_v9  ;;  %v11994_v9 = vpack.c.bf16 %v10920_v34, %v10919_v18 }
 0xa13   :  { %10625 = vmatpush1.bf16.msra.mxu0 %v13881_v15  ;;  %v10903_v15 = vld [vmem:[#allocation13 + $0x30] sm:$0xff] }
 0xa14   :  { %10626 = vmatprep.subr.bf16.mxu0 %v13886_v3  ;;  %v10904_v3 = vld [vmem:[#allocation13 + $0x38] sm:$0xff] }
 0xa17   :  { %10627 = vmatpush1.bf16.msra.mxu0 %v13884_v21  ;;  %v10921_v21 = vld [vmem:[#allocation13 + $0xc0] sm:$0xff] }
 0xa18   :  { %10838 = vmatprep.subr.bf16.mxu0 %v13889_v60  ;;  %v10922_v60 = vld [vmem:[#allocation13 + $0xc8] sm:$0xff] }
 0xa1a   :  { %10629 = vmatmul.mubr.bf16.vlgmr.msra.gmra.mrb[100].mxu0 %v17738_v32  ;;  %v11988_v32 = vpack.c.bf16 %v10900_v2, %v10899_v44 }
 0xa1b   :  { %10839 = vmatpush1.bf16.msra.mxu0 %v13887_v61  ;;  %10870 = vmatprep.mubr.bf16.mxu0 %v10675_v35  ;;  %v11996_v61 = vpack.c.bf16 %v10904_v3, %v10903_v15  ;;  %v10905_v35 = vld [vmem:[#allocation13 + $0x40] sm:$0xff] }
 0xa1c   :  { %10840 = vmatprep.subr.bf16.mxu0 %v13892_v53  ;;  %v11998_v53 = vpack.c.bf16 %v10922_v60, %v10921_v21 }
 0xa1f   :  { %10841 = vmatpush1.bf16.msra.mxu0 %v13890_v1  ;;  %v10906_v1 = vld [vmem:[#allocation13 + $0x48] sm:$0xff] }
 0xa20   :  { %10842 = vmatprep.subr.bf16.mxu0 %v13895_v19  ;;  %v10923_v19 = vld [vmem:[#allocation13 + $0xd0] sm:$0xff] }
 0xa23   :  { %10843 = vmatpush1.bf16.msra.mxu0 %v13893_v62  ;;  %v10924_v62 = vld [vmem:[#allocation13 + $0xd8] sm:$0xff] }
 0xa24   :  { %10844 = vmatprep.subr.bf16.mxu0 %v13898_v59  ;;  %v12000_v59 = vpack.c.bf16 %v10906_v1, %v10905_v35 }
 0xa27   :  { %10845 = vmatpush1.bf16.msra.mxu0 %v13896_v6  ;;  %v12002_v6 = vpack.c.bf16 %v10924_v62, %v10923_v19 }
 0xa28   :  { %10846 = vmatprep.subr.bf16.mxu0 %v13901_v23  ;;  %v10907_v23 = vld [vmem:[#allocation13 + $0x50] sm:$0xff] }
 0xa2b   :  { %10847 = vmatpush1.bf16.msra.mxu0 %v13899_v40  ;;  %v10908_v40 = vld [vmem:[#allocation13 + $0x58] sm:$0xff] }
 0xa2c   :  { %10848 = vmatprep.subr.bf16.mxu0 %v13904_v7  ;;  %v12004_v7 = vpack.c.bf16 %v10908_v40, %v10907_v23 }
 0xa2f   :  { %10849 = vmatpush1.bf16.msra.mxu0 %v13902_v36  ;;  %v10925_v36 = vld [vmem:[#allocation13 + $0xe0] sm:$0xff] }
 0xa30   :  { %10850 = vmatprep.subr.bf16.mxu0 %v13907_v38  ;;  %v10926_v38 = vld [vmem:[#allocation13 + $0xe8] sm:$0xff] }
 0xa33   :  { %10851 = vmatpush1.bf16.msra.mxu0 %v13905_v31 }
 0xa34   :  { %10852 = vmatprep.subr.bf16.mxu0 %v13910_v13  ;;  %v12006_v13 = vpack.c.bf16 %v10926_v38, %v10925_v36 }
 0xa37   :  { %10853 = vmatpush1.bf16.msra.mxu0 %v13908_v4  ;;  %v10909_v4 = vld [vmem:[#allocation13 + $0x60] sm:$0xff] }
 0xa38   :  { %10854 = vmatprep.subr.bf16.mxu0 %v13913_v16  ;;  %v10910_v16 = vld [vmem:[#allocation13 + $0x68] sm:$0xff] }
 0xa3b   :  { %10855 = vmatpush1.bf16.msra.mxu0 %v13911_v47 }
 0xa3c   :  { %10856 = vmatprep.subr.bf16.mxu0 %v13916_v37 }
 0xa3f   :  { %10857 = vmatpush1.bf16.msra.mxu0 %v13914_v0  ;;  %v12008_v0 = vpack.c.bf16 %v10910_v16, %v10909_v4 }
 0xa40   :  { %10858 = vmatprep.subr.bf16.mxu0 %v13919_v11 }
 0xa43   :  { %10859 = vmatpush1.bf16.msra.mxu0 %v13917_v30 }
 0xa44   :  { %10860 = vmatprep.subr.bf16.mxu0 %v13922_v50 }
 0xa47   :  { %10861 = vmatpush1.bf16.msra.mxu0 %v13920_v57  ;;  %v10927_v57 = vld [vmem:[#allocation13 + $0xf0] sm:$0xff] }
 0xa48   :  { %10862 = vmatprep.subr.bf16.mxu0 %v13925_v46  ;;  %v10928_v46 = vld [vmem:[#allocation13 + $0xf8] sm:$0xff] }
 0xa4b   :  { %10863 = vmatpush1.bf16.msra.mxu0 %v13923_v20  ;;  %v12010_v20 = vpack.c.bf16 %v10928_v46, %v10927_v57 }
 0xa4c   :  { %10864 = vmatprep.subr.bf16.mxu0 %v13928_v25  ;;  %v10911_v25 = vld [vmem:[#allocation13 + $0x70] sm:$0xff] }
 0xa4f   :  { %10865 = vmatpush1.bf16.msra.mxu0 %v13926_v54  ;;  %v10912_v54 = vld [vmem:[#allocation13 + $0x78] sm:$0xff] }
 0xa50   :  { %10866 = vmatprep.subr.bf16.mxu0 %v13931_v39  ;;  %v12012_v39 = vpack.c.bf16 %v10912_v54, %v10911_v25 }
 0xa53   :  { %10867 = vmatpush1.bf16.msra.mxu0 %v13929_v42 }
 0xa54   :  { %10868 = vmatprep.subr.bf16.mxu0 %v13934_v48 }
 0xa57   :  { %10869 = vmatpush1.bf16.msra.mxu0 %v13932_v56 }
 0xa58   :  { %11983 = vmatprep.subr.bf16.mxu0 %v11982_v14 }
 0xa5a   :  { %10871 = vmatmul.mubr.bf16.vlgmr.msra.gmra.mrb[104].mxu0 %v10674_v28 }
 0xa5b   :  { %11985 = vmatpush3.bf16.msra.mxu0 %v11984_v26 }
 0xa5c   :  { %11987 = vmatprep.subr.bf16.mxu0 %v11986_v58 }
 0xa5f   :  { %11989 = vmatpush3.bf16.msra.mxu0 %v11988_v32  ;;  %v11946_v32 = vld [vmem:[#allocation14] ss:$0 sm:$0xff] }
 0xa60   :  { %11991 = vmatprep.subr.bf16.mxu0 %v11990_v49 }
 0xa63   :  { %11993 = vmatpush3.bf16.msra.mxu0 %v11992_v29 }
 0xa64   :  { %11995 = vmatprep.subr.bf16.mxu0 %v11994_v9 }
 0xa67   :  { %11997 = vmatpush3.bf16.msra.mxu0 %v11996_v61 }
 0xa68   :  { %11999 = vmatprep.subr.bf16.mxu0 %v11998_v53 }
 0xa6b   :  { %12001 = vmatpush3.bf16.msra.mxu0 %v12000_v59 }
 0xa6c   :  { %12003 = vmatprep.subr.bf16.mxu0 %v12002_v6 }
 0xa6d   :  { %v10195_v22 = vpop.f32.mrb[92].mxu0 }
 0xa6e   :  { %v10197_v27 = vpop.f32.mrb[93].mxu0 }
 0xa6f   :  { %v10199_v41 = vpop.f32.mrb[94].mxu0  ;;  %12005 = vmatpush3.bf16.msra.mxu0 %v12004_v7 }
 0xa70   :  { %v10200_v8 = vpop.f32.mrb[95].mxu0  ;;  %12007 = vmatprep.subr.bf16.mxu0 %v12006_v13 }
 0xa71   :  { %v10881_v8 = vld [vmem:[#allocation11] sm:$0x3] }
 0xa72   :  { %v10890_v43 = vrot.slane %v10881_v8, %v17834_v55 }
 0xa73   :  { %12009 = vmatpush3.bf16.msra.mxu0 %v12008_v0 }
 0xa74   :  { %12011 = vmatprep.subr.bf16.mxu0 %v12010_v20 }
 0xa77   :  { %12013 = vmatpush3.bf16.msra.mxu0 %v12012_v39 }
 0xaad   :  { %v10396_v31 = vpop.f32.mrb[96].mxu0 }
 0xaae   :  { %v10397_v47 = vadd.f32 %v10396_v31, %v10195_v22  ;;  %v10398_v37 = vpop.f32.mrb[97].mxu0 }
 0xaaf   :  { %v10399_v11 = vadd.f32 %v10398_v37, %v10197_v27  ;;  %v10400_v30 = vpop.f32.mrb[98].mxu0  ;;  %v10886_v27 = vrot.slane %v10881_v8, %v17833_v10 }
 0xab0   :  { %v10401_v50 = vpop.f32.mrb[99].mxu0 }
 0xaed   :  { %v10630_v42 = vpop.f32.mrb[100].mxu0 }
 0xaee   :  { %v10637_v48 = vadd.f32 %v10630_v42, %v10397_v47  ;;  %v10632_v56 = vpop.f32.mrb[101].mxu0 }
 0xaef   :  { %v10638_v28 = vadd.f32 %v10632_v56, %v10399_v11  ;;  %v10634_v22 = vpop.f32.mrb[102].mxu0 }
 0xaf0   :  { %v10635_v41 = vpop.f32.mrb[103].mxu0 }
 0xb2d   :  { %v10872_v63 = vpop.f32.mrb[104].mxu0 }
 0xb2e   :  { %v10879_v12 = vadd.f32 %v10872_v63, %v10637_v48  ;;  %v10874_v14 = vpop.f32.mrb[105].mxu0 }
 0xb2f   :  { %v10880_v17 = vadd.f32 %v10874_v14, %v10638_v28  ;;  %v10876_v45 = vpop.f32.mrb[106].mxu0 }
 0xb30   :  { %v10893_v24 = vadd.f32 %v10886_v27, %v10879_v12  ;;  %v10877_v26 = vpop.f32.mrb[107].mxu0 }
 0xb31   :  { %v10894_v58 = vadd.f32 %v10890_v43, %v10880_v17 }
 0xb32   :  { %v10895_v2 = vmax.f32 %v10893_v24, 0.0 }
 0xb33   :  { %v10896_v44 = vmax.f32 %v10894_v58, 0.0 }
 0xb35   :  { %11000 = vmatprep.mubr.f32.mxu0 %v10896_v44 }
 0xb36   :  { %11001 = vmatmul.mubr.f32.vlgmr.msra.gmra.mrb[108].mxu0 %v10895_v2 }
 0xc09   :  { %v11979_v52 = vpop.f32.mrb[108].mxu0 }
 0xc0a   :  { %v11980_v33 = vpop.f32.mrb[109].mxu0 }
 0xc0b   :  { %v11981_v49 = vadd.f32 %v11980_v33, %v11979_v52 }
 0xc0d   :  { %v11003_v51 = vadd.f32 %v11981_v49, %v11946_v32 }
 0xc0f   :  { %11006 = vmax.xlane.f32.xlu0 %v11003_v51 }
 0xc9c   :  { %v11007_v10 = vpop.xlane.xlu0 %11006 }
 0xc9d   :  { %v11008_v5 = vsub.f32 %v11003_v51, %v11007_v10 }
 0xc9f   :  { %v11009_v55 = vmul.f32 1.442695, %v11008_v5 }
 0xca1   :  { %13935 = vpow2.f32 %v11009_v55 }
 0xcab   :  { %v13936_v18 = vpop.eup %13935 }
 0xcac   :  { %11011 = vadd.xlane.f32.xlu0 %v13936_v18 }
 0xd39   :  { %v11012_v34 = vpop.xlane.xlu0 %11011 }
 0xd3a   :  { %13937 = vlog2.f32 %v11012_v34 }
 0xd44   :  { %v13938_v29 = vpop.eup %13937 }
 0xd45   :  { %v11014_v9 = vmul.f32 0.6931472, %v13938_v29 }
 0xd47   :  { %v11015_v15 = vsub.f32 %v11008_v5, %v11014_v9 }
 0xd49   :  { %11016 = vst [vmem:[%s17761_s9] sm:$0xff] %v11015_v15 }
 0xd4a   :  { %11021 = vsyncpa [#allocation4], 1 }
 0xd4b   :  { %11022 = vsyncpa [#allocation6], 1 }
 0xd4c   :  { %11023 = vsyncpa [#allocation9], 1 }
 0xd4d   :  { %11024 = vsyncpa [#allocation12], 1 }
 0xd4e   :  { %11025 = vsyncpa [#allocation15], 1 }

</bundles_post_ra>
